<compile_context>
chip_gen: v7x
topology: tpu7x:2x2x1
jax: 0.10.0
libtpu: 0.0.40
codegen_flags: <defaults>
</compile_context>

<pallas_src>
import functools

import jax
import jax.numpy as jnp
from jax.experimental import pallas as pl
from jax.experimental.pallas import tpu as pltpu


def _row_tile(m, preferred):
    """Largest power-of-two tile <= preferred that divides m (>=8), else m."""
    t = preferred
    while t >= 8:
        if m % t == 0:
            return t
        t //= 2
    return m


# ----------------------------------------------------------------------------
# Kernel 1: M-tiled fused matmul + bias (+ReLU)  -- used for conv1-as-im2col
# ----------------------------------------------------------------------------
def _mm_bias_kernel(x_ref, w_ref, b_ref, o_ref, *, relu):
    acc = jnp.dot(x_ref[...], w_ref[...], preferred_element_type=jnp.float32)
    acc = acc + b_ref[...]
    if relu:
        acc = jnp.maximum(acc, 0.0)
    o_ref[...] = acc


def matmul_bias(x, w, b, *, relu, tm_pref=256):
    """relu(x @ w + b); bf16 MXU operands, fp32 accumulate/bias. Returns f32."""
    M, K = x.shape
    K2, N = w.shape
    assert K == K2, (K, K2)
    tm = _row_tile(M, tm_pref)
    kernel = functools.partial(_mm_bias_kernel, relu=relu)
    return pl.pallas_call(
        kernel,
        out_shape=jax.ShapeDtypeStruct((M, N), jnp.float32),
        grid=(M // tm,),
        in_specs=[
            pl.BlockSpec((tm, K), lambda i: (i, 0)),
            pl.BlockSpec((K, N), lambda i: (0, 0)),
            pl.BlockSpec((1, N), lambda i: (0, 0)),
        ],
        out_specs=pl.BlockSpec((tm, N), lambda i: (i, 0)),
        compiler_params=pltpu.CompilerParams(
            dimension_semantics=("parallel",)),
    )(x.astype(jnp.bfloat16), w.astype(jnp.bfloat16), b.astype(jnp.float32))


# ----------------------------------------------------------------------------
# Kernel 2: 3x3 / stride-1 / pad-1 conv + bias + ReLU with in-kernel im2col.
#
# The padded sample is passed spatially flattened: rows j = hp*(W+2) + wp.
# Tap (kh,kw) contributes x_flat[j + kh*(W+2) + kw] to output position
# j = h*(W+2) + w, so each tap is one contiguous slab -> one MXU dot.
# Rows with w in {W, W+1} are junk (wrap into the next padded row) and are
# sliced away in the (XLA) un-flatten step.
# ----------------------------------------------------------------------------
def _conv3x3_kernel(x_ref, w_ref, b_ref, o_ref, *, wp):
    # x_ref: (1, (H+2)*(W+2), Cin) f32   w_ref: (3, 3, Cin, Cout) bf16
    # b_ref: (1, Cout) f32               o_ref: (1, L, Cout) f32, L = H*(W+2)-2
    L, cout = o_ref.shape[1], o_ref.shape[2]
    acc = jnp.zeros((L, cout), jnp.float32)
    for kh in range(3):
        for kw in range(3):
            s = kh * wp + kw
            tap = x_ref[0, s:s + L, :].astype(jnp.bfloat16)   # (L, Cin)
            acc = acc + jnp.dot(tap, w_ref[kh, kw],
                                preferred_element_type=jnp.float32)
    acc = acc + b_ref[...]
    o_ref[0] = jnp.maximum(acc, 0.0)


def conv3x3_relu(x_nhwc, w, b):
    """3x3, stride 1, pad 1 conv + bias + ReLU.  w: (3,3,Cin,Cout) bf16."""
    B, H, W, Cin = x_nhwc.shape
    Cout = w.shape[-1]
    Wp = W + 2
    P = (H + 2) * Wp          # flattened padded spatial length
    L = H * Wp - 2            # rows produced per sample (incl. junk columns)

    xp = jnp.pad(x_nhwc, ((0, 0), (1, 1), (1, 1), (0, 0)))
    xflat = xp.reshape(B, P, Cin)                     # free reshape in XLA

    kernel = functools.partial(_conv3x3_kernel, wp=Wp)
    out = pl.pallas_call(
        kernel,
        out_shape=jax.ShapeDtypeStruct((B, L, Cout), jnp.float32),
        grid=(B,),
        in_specs=[
            pl.BlockSpec((1, P, Cin), lambda bb: (bb, 0, 0)),
            pl.BlockSpec((3, 3, Cin, Cout), lambda bb: (0, 0, 0, 0)),
            pl.BlockSpec((1, Cout), lambda bb: (0, 0)),
        ],
        out_specs=pl.BlockSpec((1, L, Cout), lambda bb: (bb, 0, 0)),
        compiler_params=pltpu.CompilerParams(
            dimension_semantics=("parallel",)),
    )(xflat, w, b)

    # Un-flatten: valid outputs live at rows h*(W+2)+w for w < W.
    out = jnp.pad(out, ((0, 0), (0, 2), (0, 0)))      # -> (B, H*(W+2), Cout)
    out = out.reshape(B, H, Wp, Cout)[:, :, :W, :]    # -> (B, H, W, Cout)
    return out


# ----------------------------------------------------------------------------
# Kernel 3: fused FC head  (x@wf1+bf1 -> ReLU -> @wf2+bf2), one pallas_call.
# ----------------------------------------------------------------------------
def _fc_head_kernel(x_ref, w1_ref, b1_ref, w2_ref, b2_ref, o_ref):
    h = jnp.dot(x_ref[...], w1_ref[...], preferred_element_type=jnp.float32)
    h = jnp.maximum(h + b1_ref[...], 0.0)
    o = jnp.dot(h.astype(jnp.bfloat16), w2_ref[...],
                preferred_element_type=jnp.float32)
    o_ref[...] = o + b2_ref[...]


def fc_head(x, w1, b1, w2, b2):
    B, K = x.shape
    N = w2.shape[1]
    tb = _row_tile(B, 256)
    return pl.pallas_call(
        _fc_head_kernel,
        out_shape=jax.ShapeDtypeStruct((B, N), jnp.float32),
        grid=(B // tb,),
        in_specs=[
            pl.BlockSpec((tb, K), lambda i: (i, 0)),
            pl.BlockSpec(w1.shape, lambda i: (0, 0)),
            pl.BlockSpec(b1.shape, lambda i: (0, 0)),
            pl.BlockSpec(w2.shape, lambda i: (0, 0)),
            pl.BlockSpec(b2.shape, lambda i: (0, 0)),
        ],
        out_specs=pl.BlockSpec((tb, N), lambda i: (i, 0)),
        compiler_params=pltpu.CompilerParams(
            dimension_semantics=("parallel",)),
    )(x.astype(jnp.bfloat16), w1, b1, w2, b2)


# ----------------------------------------------------------------------------
# conv1 (3->32, k7, s2, p3): cheap XLA im2col (Cin=3) into the tiled matmul.
# ----------------------------------------------------------------------------
def conv1_7x7_s2(x_nhwc, w2d, b):
    B, H, W, Cin = x_nhwc.shape
    K, pad, stride = 7, 3, 2
    Hout = (H + 2 * pad - K) // stride + 1
    Wout = (W + 2 * pad - K) // stride + 1
    xp = jnp.pad(x_nhwc, ((0, 0), (pad, pad), (pad, pad), (0, 0)))
    cols = []
    for kh in range(K):
        for kw in range(K):
            cols.append(xp[:, kh:kh + stride * Hout:stride,
                           kw:kw + stride * Wout:stride, :])
    patches = jnp.concatenate(cols, axis=-1).reshape(B * Hout * Wout, K * K * Cin)
    out = matmul_bias(patches, w2d, b, relu=True)
    return out.reshape(B, Hout, Wout, -1)


# ----------------------------------------------------------------------------
# MaxPool 2x2: fused XLA elementwise max (no corner-stack materialization).
# TODO(synk): fuse the 2x2 pool into the preceding conv kernel's epilogue.
# ----------------------------------------------------------------------------
def maxpool2x2(x):
    return jnp.maximum(
        jnp.maximum(x[:, 0::2, 0::2, :], x[:, 0::2, 1::2, :]),
        jnp.maximum(x[:, 1::2, 0::2, :], x[:, 1::2, 1::2, :]))


# ----------------------------------------------------------------------------
# Parameters (deterministic synthetic init, PyTorch-default-like uniform)
# ----------------------------------------------------------------------------
def init_params(key):
    ks = jax.random.split(key, 12)

    def u(k, shape, fan_in):
        bound = 1.0 / jnp.sqrt(jnp.float32(fan_in))
        return jax.random.uniform(k, shape, jnp.float32, -bound, bound)

    def conv(kw_, kb_, cout, cin, kk):
        fan_in = cin * kk * kk
        return u(kw_, (cout, cin, kk, kk), fan_in), u(kb_, (cout,), fan_in)

    def linear(kw_, kb_, cin, cout):
        return u(kw_, (cin, cout), cin), u(kb_, (cout,), cin)

    p = {}
    p["w1"], p["b1"] = conv(ks[0], ks[1], 32, 3, 7)
    p["w2"], p["b2"] = conv(ks[2], ks[3], 64, 32, 3)
    p["w3"], p["b3"] = conv(ks[4], ks[5], 128, 64, 3)
    p["w4"], p["b4"] = conv(ks[6], ks[7], 256, 128, 3)
    p["wf1"], p["bf1"] = linear(ks[8], ks[9], 256 * 4 * 4, 128)
    p["wf2"], p["bf2"] = linear(ks[10], ks[11], 128, 10)
    return p


def prepare_params(p):
    """One-time (outside jit) layout prep: bf16 weights, (kh,kw,cin,cout) conv
    layout, biases as (1,N) f32, and wf1 rows permuted from NCHW-flatten order
    to NHWC-flatten order so no runtime transpose is needed."""
    prep = {}
    # conv1 as an im2col matmul weight: (Cout,Cin,7,7) -> (7*7*Cin, Cout)
    prep["w1"] = jnp.transpose(p["w1"], (2, 3, 1, 0)).reshape(7 * 7 * 3, 32)
    prep["w1"] = prep["w1"].astype(jnp.bfloat16)
    prep["b1"] = p["b1"].reshape(1, -1).astype(jnp.float32)
    for i in (2, 3, 4):
        prep[f"w{i}"] = jnp.transpose(p[f"w{i}"], (2, 3, 1, 0)).astype(jnp.bfloat16)
        prep[f"b{i}"] = p[f"b{i}"].reshape(1, -1).astype(jnp.float32)
    # wf1 rows are indexed c*16 + h*4 + w (torch NCHW flatten); re-index them to
    # h*(4*256) + w*256 + c so the NHWC flatten feeds FC1 directly.
    wf1 = p["wf1"].reshape(256, 4, 4, 128)
    wf1 = jnp.transpose(wf1, (1, 2, 0, 3)).reshape(4096, 128)
    prep["wf1"] = wf1.astype(jnp.bfloat16)
    prep["bf1"] = p["bf1"].reshape(1, -1).astype(jnp.float32)
    prep["wf2"] = p["wf2"].astype(jnp.bfloat16)
    prep["bf2"] = p["bf2"].reshape(1, -1).astype(jnp.float32)
    return prep


# ----------------------------------------------------------------------------
# Forward pass
# ----------------------------------------------------------------------------
@jax.jit
def net_forward(x_nchw, prep):
    x = jnp.transpose(x_nchw, (0, 2, 3, 1))                     # NCHW -> NHWC
    x = conv1_7x7_s2(x, prep["w1"], prep["b1"])                 # [B,16,16, 32]
    x = conv3x3_relu(x, prep["w2"], prep["b2"])                 # [B,16,16, 64]
    x = maxpool2x2(x)                                           # [B, 8, 8, 64]
    # TODO(synk): Dropout(p=0.2) is identity at inference; RNG masking not implemented.
    x = conv3x3_relu(x, prep["w3"], prep["b3"])                 # [B, 8, 8,128]
    x = conv3x3_relu(x, prep["w4"], prep["b4"])                 # [B, 8, 8,256]
    x = maxpool2x2(x)                                           # [B, 4, 4,256]
    # Dropout(p=0.2): identity at inference.
    B = x.shape[0]
    x = x.reshape(B, 4 * 4 * 256)   # NHWC flatten; wf1 rows pre-permuted to match
    return fc_head(x, prep["wf1"], prep["bf1"], prep["wf2"], prep["bf2"])


if __name__ == "__main__":
    key = jax.random.PRNGKey(0)
    k_in, k_par = jax.random.split(key)
    # Input shape implied by the module (Flatten expects 256*4*4): [B,3,32,32]
    x = jax.random.normal(k_in, (2, 3, 32, 32), dtype=jnp.float32)
    params = init_params(k_par)
    prep = prepare_params(params)

    logits = net_forward(x, prep)
    jax.block_until_ready(logits)
    assert logits.shape == (2, 10), logits.shape
    assert bool(jnp.all(jnp.isfinite(logits)))
    print("KERNEL_OK")
</pallas_src>

<mosaic_0001>
module attributes {stable_mosaic.version = 11 : i64} {
  func.func @_mm_bias_kernel(%arg0: i32, %arg1: memref<256x147xbf16, #tpu.memory_space<vmem>>, %arg2: memref<147x32xbf16, #tpu.memory_space<vmem>>, %arg3: memref<1x32xf32, #tpu.memory_space<vmem>>, %arg4: memref<256x32xf32, #tpu.memory_space<vmem>>) attributes {dimension_semantics = [#tpu.dimension_semantics<parallel>], iteration_bounds = array<i64: 2>, scalar_prefetch = 0 : i64, scratch_operands = 0 : i64, tpu.core_type = #tpu.core_type<tc>, window_params = [{transform_indices = @transform_0, window_bounds = array<i64: 256, 147>}, {pipeline_mode = #tpu.pipeline_mode<synchronous>, transform_indices = @transform_1, window_bounds = array<i64: 147, 32>}, {pipeline_mode = #tpu.pipeline_mode<synchronous>, transform_indices = @transform_2, window_bounds = array<i64: 1, 32>}, {transform_indices = @transform_3, window_bounds = array<i64: 256, 32>}]} {
    %c0 = arith.constant 0 : index
    %c0_0 = arith.constant 0 : index
    %0 = vector.load %arg1[%c0, %c0_0] : memref<256x147xbf16, #tpu.memory_space<vmem>>, vector<256x147xbf16>
    %c0_1 = arith.constant 0 : index
    %c0_2 = arith.constant 0 : index
    %1 = vector.load %arg2[%c0_1, %c0_2] : memref<147x32xbf16, #tpu.memory_space<vmem>>, vector<147x32xbf16>
    %cst = arith.constant dense<0.000000e+00> : vector<256x32xf32>
    %2 = tpu.matmul %0, %1, %cst {dimension_numbers = #tpu.dot_dimension_numbers<[1], [0], [0], [1], [0, 0, 1, 1], [], []>} : vector<256x147xbf16>, vector<147x32xbf16>, vector<256x32xf32> -> vector<256x32xf32>
    %c0_3 = arith.constant 0 : index
    %c0_4 = arith.constant 0 : index
    %3 = vector.load %arg3[%c0_3, %c0_4] : memref<1x32xf32, #tpu.memory_space<vmem>>, vector<1x32xf32>
    %4 = vector.broadcast %3 : vector<1x32xf32> to vector<256x32xf32>
    %5 = arith.addf %2, %4 : vector<256x32xf32>
    %cst_5 = arith.constant 0.000000e+00 : f32
    %6 = vector.broadcast %cst_5 : f32 to vector<256x32xf32>
    %7 = arith.maximumf %5, %6 : vector<256x32xf32>
    %c0_6 = arith.constant 0 : index
    %c0_7 = arith.constant 0 : index
    %8 = vector.load %arg4[%c0_6, %c0_7] : memref<256x32xf32, #tpu.memory_space<vmem>>, vector<256x32xf32>
    tpu.vector_store %arg4[%c0_6, %c0_7], %7 {strides = array<i32>} : memref<256x32xf32, #tpu.memory_space<vmem>>, vector<256x32xf32>,
    return
  }
  func.func @transform_0(%arg0: i32) -> (i32, i32) {
    %c0_i32 = arith.constant 0 : i32
    %c0_i32_0 = arith.constant 0 : i32
    return %arg0, %c0_i32 : i32, i32
  }
  func.func @transform_1(%arg0: i32) -> (i32, i32) {
    %c0_i32 = arith.constant 0 : i32
    %c0_i32_0 = arith.constant 0 : i32
    %c0_i32_1 = arith.constant 0 : i32
    return %c0_i32, %c0_i32_0 : i32, i32
  }
  func.func @transform_2(%arg0: i32) -> (i32, i32) {
    %c0_i32 = arith.constant 0 : i32
    %c0_i32_0 = arith.constant 0 : i32
    %c0_i32_1 = arith.constant 0 : i32
    return %c0_i32, %c0_i32_0 : i32, i32
  }
  func.func @transform_3(%arg0: i32) -> (i32, i32) {
    %c0_i32 = arith.constant 0 : i32
    %c0_i32_0 = arith.constant 0 : i32
    return %arg0, %c0_i32 : i32, i32
  }
}

module attributes {stable_mosaic.version = 11 : i64} {
  func.func @_conv3x3_kernel(%arg0: i32, %arg1: memref<1x324x32xf32, #tpu.memory_space<vmem>>, %arg2: memref<3x3x32x64xbf16, #tpu.memory_space<vmem>>, %arg3: memref<1x64xf32, #tpu.memory_space<vmem>>, %arg4: memref<1x286x64xf32, #tpu.memory_space<vmem>>) attributes {dimension_semantics = [#tpu.dimension_semantics<parallel>], iteration_bounds = array<i64: 2>, scalar_prefetch = 0 : i64, scratch_operands = 0 : i64, tpu.core_type = #tpu.core_type<tc>, window_params = [{transform_indices = @transform_0, window_bounds = array<i64: 1, 324, 32>}, {pipeline_mode = #tpu.pipeline_mode<synchronous>, transform_indices = @transform_1, window_bounds = array<i64: 3, 3, 32, 64>}, {pipeline_mode = #tpu.pipeline_mode<synchronous>, transform_indices = @transform_2, window_bounds = array<i64: 1, 64>}, {transform_indices = @transform_3, window_bounds = array<i64: 1, 286, 64>}]} {
    %cst = arith.constant 0.000000e+00 : f32
    %0 = vector.broadcast %cst : f32 to vector<286x64xf32>
    %c0 = arith.constant 0 : index
    %c0_0 = arith.constant 0 : index
    %c0_1 = arith.constant 0 : index
    %1 = vector.load %arg1[%c0, %c0_0, %c0_1] : memref<1x324x32xf32, #tpu.memory_space<vmem>>, vector<1x286x32xf32>
    %2 = vector.shape_cast %1 : vector<1x286x32xf32> to vector<286x32xf32>
    %3 = arith.truncf %2 : vector<286x32xf32> to vector<286x32xbf16>
    %c0_2 = arith.constant 0 : index
    %c0_3 = arith.constant 0 : index
    %c0_4 = arith.constant 0 : index
    %c0_5 = arith.constant 0 : index
    %4 = vector.load %arg2[%c0_2, %c0_3, %c0_4, %c0_5] : memref<3x3x32x64xbf16, #tpu.memory_space<vmem>>, vector<1x1x32x64xbf16>
    %5 = vector.shape_cast %4 : vector<1x1x32x64xbf16> to vector<32x64xbf16>
    %cst_6 = arith.constant dense<0.000000e+00> : vector<286x64xf32>
    %6 = tpu.matmul %3, %5, %cst_6 {dimension_numbers = #tpu.dot_dimension_numbers<[1], [0], [0], [1], [0, 0, 1, 1], [], []>} : vector<286x32xbf16>, vector<32x64xbf16>, vector<286x64xf32> -> vector<286x64xf32>
    %7 = arith.addf %0, %6 : vector<286x64xf32>
    %c0_7 = arith.constant 0 : index
    %c1 = arith.constant 1 : index
    %c0_8 = arith.constant 0 : index
    %8 = vector.load %arg1[%c0_7, %c1, %c0_8] : memref<1x324x32xf32, #tpu.memory_space<vmem>>, vector<1x286x32xf32>
    %9 = vector.shape_cast %8 : vector<1x286x32xf32> to vector<286x32xf32>
    %10 = arith.truncf %9 : vector<286x32xf32> to vector<286x32xbf16>
    %c0_9 = arith.constant 0 : index
    %c1_10 = arith.constant 1 : index
    %c0_11 = arith.constant 0 : index
    %c0_12 = arith.constant 0 : index
    %11 = vector.load %arg2[%c0_9, %c1_10, %c0_11, %c0_12] : memref<3x3x32x64xbf16, #tpu.memory_space<vmem>>, vector<1x1x32x64xbf16>
    %12 = vector.shape_cast %11 : vector<1x1x32x64xbf16> to vector<32x64xbf16>
    %cst_13 = arith.constant dense<0.000000e+00> : vector<286x64xf32>
    %13 = tpu.matmul %10, %12, %cst_13 {dimension_numbers = #tpu.dot_dimension_numbers<[1], [0], [0], [1], [0, 0, 1, 1], [], []>} : vector<286x32xbf16>, vector<32x64xbf16>, vector<286x64xf32> -> vector<286x64xf32>
    %14 = arith.addf %7, %13 : vector<286x64xf32>
    %c0_14 = arith.constant 0 : index
    %c2 = arith.constant 2 : index
    %c0_15 = arith.constant 0 : index
    %15 = vector.load %arg1[%c0_14, %c2, %c0_15] : memref<1x324x32xf32, #tpu.memory_space<vmem>>, vector<1x286x32xf32>
    %16 = vector.shape_cast %15 : vector<1x286x32xf32> to vector<286x32xf32>
    %17 = arith.truncf %16 : vector<286x32xf32> to vector<286x32xbf16>
    %c0_16 = arith.constant 0 : index
    %c2_17 = arith.constant 2 : index
    %c0_18 = arith.constant 0 : index
    %c0_19 = arith.constant 0 : index
    %18 = vector.load %arg2[%c0_16, %c2_17, %c0_18, %c0_19] : memref<3x3x32x64xbf16, #tpu.memory_space<vmem>>, vector<1x1x32x64xbf16>
    %19 = vector.shape_cast %18 : vector<1x1x32x64xbf16> to vector<32x64xbf16>
    %cst_20 = arith.constant dense<0.000000e+00> : vector<286x64xf32>
    %20 = tpu.matmul %17, %19, %cst_20 {dimension_numbers = #tpu.dot_dimension_numbers<[1], [0], [0], [1], [0, 0, 1, 1], [], []>} : vector<286x32xbf16>, vector<32x64xbf16>, vector<286x64xf32> -> vector<286x64xf32>
    %21 = arith.addf %14, %20 : vector<286x64xf32>
    %c0_21 = arith.constant 0 : index
    %c18 = arith.constant 18 : index
    %c0_22 = arith.constant 0 : index
    %22 = vector.load %arg1[%c0_21, %c18, %c0_22] : memref<1x324x32xf32, #tpu.memory_space<vmem>>, vector<1x286x32xf32>
    %23 = vector.shape_cast %22 : vector<1x286x32xf32> to vector<286x32xf32>
    %24 = arith.truncf %23 : vector<286x32xf32> to vector<286x32xbf16>
    %c1_23 = arith.constant 1 : index
    %c0_24 = arith.constant 0 : index
    %c0_25 = arith.constant 0 : index
    %c0_26 = arith.constant 0 : index
    %25 = vector.load %arg2[%c1_23, %c0_24, %c0_25, %c0_26] : memref<3x3x32x64xbf16, #tpu.memory_space<vmem>>, vector<1x1x32x64xbf16>
    %26 = vector.shape_cast %25 : vector<1x1x32x64xbf16> to vector<32x64xbf16>
    %cst_27 = arith.constant dense<0.000000e+00> : vector<286x64xf32>
    %27 = tpu.matmul %24, %26, %cst_27 {dimension_numbers = #tpu.dot_dimension_numbers<[1], [0], [0], [1], [0, 0, 1, 1], [], []>} : vector<286x32xbf16>, vector<32x64xbf16>, vector<286x64xf32> -> vector<286x64xf32>
    %28 = arith.addf %21, %27 : vector<286x64xf32>
    %c0_28 = arith.constant 0 : index
    %c19 = arith.constant 19 : index
    %c0_29 = arith.constant 0 : index
    %29 = vector.load %arg1[%c0_28, %c19, %c0_29] : memref<1x324x32xf32, #tpu.memory_space<vmem>>, vector<1x286x32xf32>
    %30 = vector.shape_cast %29 : vector<1x286x32xf32> to vector<286x32xf32>
    %31 = arith.truncf %30 : vector<286x32xf32> to vector<286x32xbf16>
    %c1_30 = arith.constant 1 : index
    %c1_31 = arith.constant 1 : index
    %c0_32 = arith.constant 0 : index
    %c0_33 = arith.constant 0 : index
    %32 = vector.load %arg2[%c1_30, %c1_31, %c0_32, %c0_33] : memref<3x3x32x64xbf16, #tpu.memory_space<vmem>>, vector<1x1x32x64xbf16>
    %33 = vector.shape_cast %32 : vector<1x1x32x64xbf16> to vector<32x64xbf16>
    %cst_34 = arith.constant dense<0.000000e+00> : vector<286x64xf32>
    %34 = tpu.matmul %31, %33, %cst_34 {dimension_numbers = #tpu.dot_dimension_numbers<[1], [0], [0], [1], [0, 0, 1, 1], [], []>} : vector<286x32xbf16>, vector<32x64xbf16>, vector<286x64xf32> -> vector<286x64xf32>
    %35 = arith.addf %28, %34 : vector<286x64xf32>
    %c0_35 = arith.constant 0 : index
    %c20 = arith.constant 20 : index
    %c0_36 = arith.constant 0 : index
    %36 = vector.load %arg1[%c0_35, %c20, %c0_36] : memref<1x324x32xf32, #tpu.memory_space<vmem>>, vector<1x286x32xf32>
    %37 = vector.shape_cast %36 : vector<1x286x32xf32> to vector<286x32xf32>
    %38 = arith.truncf %37 : vector<286x32xf32> to vector<286x32xbf16>
    %c1_37 = arith.constant 1 : index
    %c2_38 = arith.constant 2 : index
    %c0_39 = arith.constant 0 : index
    %c0_40 = arith.constant 0 : index
    %39 = vector.load %arg2[%c1_37, %c2_38, %c0_39, %c0_40] : memref<3x3x32x64xbf16, #tpu.memory_space<vmem>>, vector<1x1x32x64xbf16>
    %40 = vector.shape_cast %39 : vector<1x1x32x64xbf16> to vector<32x64xbf16>
    %cst_41 = arith.constant dense<0.000000e+00> : vector<286x64xf32>
    %41 = tpu.matmul %38, %40, %cst_41 {dimension_numbers = #tpu.dot_dimension_numbers<[1], [0], [0], [1], [0, 0, 1, 1], [], []>} : vector<286x32xbf16>, vector<32x64xbf16>, vector<286x64xf32> -> vector<286x64xf32>
    %42 = arith.addf %35, %41 : vector<286x64xf32>
    %c0_42 = arith.constant 0 : index
    %c36 = arith.constant 36 : index
    %c0_43 = arith.constant 0 : index
    %43 = vector.load %arg1[%c0_42, %c36, %c0_43] : memref<1x324x32xf32, #tpu.memory_space<vmem>>, vector<1x286x32xf32>
    %44 = vector.shape_cast %43 : vector<1x286x32xf32> to vector<286x32xf32>
    %45 = arith.truncf %44 : vector<286x32xf32> to vector<286x32xbf16>
    %c2_44 = arith.constant 2 : index
    %c0_45 = arith.constant 0 : index
    %c0_46 = arith.constant 0 : index
    %c0_47 = arith.constant 0 : index
    %46 = vector.load %arg2[%c2_44, %c0_45, %c0_46, %c0_47] : memref<3x3x32x64xbf16, #tpu.memory_space<vmem>>, vector<1x1x32x64xbf16>
    %47 = vector.shape_cast %46 : vector<1x1x32x64xbf16> to vector<32x64xbf16>
    %cst_48 = arith.constant dense<0.000000e+00> : vector<286x64xf32>
    %48 = tpu.matmul %45, %47, %cst_48 {dimension_numbers = #tpu.dot_dimension_numbers<[1], [0], [0], [1], [0, 0, 1, 1], [], []>} : vector<286x32xbf16>, vector<32x64xbf16>, vector<286x64xf32> -> vector<286x64xf32>
    %49 = arith.addf %42, %48 : vector<286x64xf32>
    %c0_49 = arith.constant 0 : index
    %c37 = arith.constant 37 : index
    %c0_50 = arith.constant 0 : index
    %50 = vector.load %arg1[%c0_49, %c37, %c0_50] : memref<1x324x32xf32, #tpu.memory_space<vmem>>, vector<1x286x32xf32>
    %51 = vector.shape_cast %50 : vector<1x286x32xf32> to vector<286x32xf32>
    %52 = arith.truncf %51 : vector<286x32xf32> to vector<286x32xbf16>
    %c2_51 = arith.constant 2 : index
    %c1_52 = arith.constant 1 : index
    %c0_53 = arith.constant 0 : index
    %c0_54 = arith.constant 0 : index
    %53 = vector.load %arg2[%c2_51, %c1_52, %c0_53, %c0_54] : memref<3x3x32x64xbf16, #tpu.memory_space<vmem>>, vector<1x1x32x64xbf16>
    %54 = vector.shape_cast %53 : vector<1x1x32x64xbf16> to vector<32x64xbf16>
    %cst_55 = arith.constant dense<0.000000e+00> : vector<286x64xf32>
    %55 = tpu.matmul %52, %54, %cst_55 {dimension_numbers = #tpu.dot_dimension_numbers<[1], [0], [0], [1], [0, 0, 1, 1], [], []>} : vector<286x32xbf16>, vector<32x64xbf16>, vector<286x64xf32> -> vector<286x64xf32>
    %56 = arith.addf %49, %55 : vector<286x64xf32>
    %c0_56 = arith.constant 0 : index
    %c38 = arith.constant 38 : index
    %c0_57 = arith.constant 0 : index
    %57 = vector.load %arg1[%c0_56, %c38, %c0_57] : memref<1x324x32xf32, #tpu.memory_space<vmem>>, vector<1x286x32xf32>
    %58 = vector.shape_cast %57 : vector<1x286x32xf32> to vector<286x32xf32>
    %59 = arith.truncf %58 : vector<286x32xf32> to vector<286x32xbf16>
    %c2_58 = arith.constant 2 : index
    %c2_59 = arith.constant 2 : index
    %c0_60 = arith.constant 0 : index
    %c0_61 = arith.constant 0 : index
    %60 = vector.load %arg2[%c2_58, %c2_59, %c0_60, %c0_61] : memref<3x3x32x64xbf16, #tpu.memory_space<vmem>>, vector<1x1x32x64xbf16>
    %61 = vector.shape_cast %60 : vector<1x1x32x64xbf16> to vector<32x64xbf16>
    %cst_62 = arith.constant dense<0.000000e+00> : vector<286x64xf32>
    %62 = tpu.matmul %59, %61, %cst_62 {dimension_numbers = #tpu.dot_dimension_numbers<[1], [0], [0], [1], [0, 0, 1, 1], [], []>} : vector<286x32xbf16>, vector<32x64xbf16>, vector<286x64xf32> -> vector<286x64xf32>
    %63 = arith.addf %56, %62 : vector<286x64xf32>
    %c0_63 = arith.constant 0 : index
    %c0_64 = arith.constant 0 : index
    %64 = vector.load %arg3[%c0_63, %c0_64] : memref<1x64xf32, #tpu.memory_space<vmem>>, vector<1x64xf32>
    %65 = vector.broadcast %64 : vector<1x64xf32> to vector<286x64xf32>
    %66 = arith.addf %63, %65 : vector<286x64xf32>
    %cst_65 = arith.constant 0.000000e+00 : f32
    %67 = vector.broadcast %cst_65 : f32 to vector<286x64xf32>
    %68 = arith.maximumf %66, %67 : vector<286x64xf32>
    %c0_66 = arith.constant 0 : index
    %c0_67 = arith.constant 0 : index
    %c0_68 = arith.constant 0 : index
    %69 = vector.load %arg4[%c0_66, %c0_67, %c0_68] : memref<1x286x64xf32, #tpu.memory_space<vmem>>, vector<1x286x64xf32>
    %70 = vector.shape_cast %69 : vector<1x286x64xf32> to vector<286x64xf32>
    %71 = vector.shape_cast %68 : vector<286x64xf32> to vector<1x286x64xf32>
    tpu.vector_store %arg4[%c0_66, %c0_67, %c0_68], %71 {strides = array<i32>} : memref<1x286x64xf32, #tpu.memory_space<vmem>>, vector<1x286x64xf32>,
    return
  }
  func.func @transform_0(%arg0: i32) -> (i32, i32, i32) {
    %c0_i32 = arith.constant 0 : i32
    %c0_i32_0 = arith.constant 0 : i32
    %c0_i32_1 = arith.constant 0 : i32
    return %arg0, %c0_i32, %c0_i32_0 : i32, i32, i32
  }
  func.func @transform_1(%arg0: i32) -> (i32, i32, i32, i32) {
    %c0_i32 = arith.constant 0 : i32
    %c0_i32_0 = arith.constant 0 : i32
    %c0_i32_1 = arith.constant 0 : i32
    %c0_i32_2 = arith.constant 0 : i32
    %c0_i32_3 = arith.constant 0 : i32
    return %c0_i32, %c0_i32_0, %c0_i32_1, %c0_i32_2 : i32, i32, i32, i32
  }
  func.func @transform_2(%arg0: i32) -> (i32, i32) {
    %c0_i32 = arith.constant 0 : i32
    %c0_i32_0 = arith.constant 0 : i32
    %c0_i32_1 = arith.constant 0 : i32
    return %c0_i32, %c0_i32_0 : i32, i32
  }
  func.func @transform_3(%arg0: i32) -> (i32, i32, i32) {
    %c0_i32 = arith.constant 0 : i32
    %c0_i32_0 = arith.constant 0 : i32
    %c0_i32_1 = arith.constant 0 : i32
    return %arg0, %c0_i32, %c0_i32_0 : i32, i32, i32
  }
}

module attributes {stable_mosaic.version = 11 : i64} {
  func.func @_conv3x3_kernel(%arg0: i32, %arg1: memref<1x100x64xf32, #tpu.memory_space<vmem>>, %arg2: memref<3x3x64x128xbf16, #tpu.memory_space<vmem>>, %arg3: memref<1x128xf32, #tpu.memory_space<vmem>>, %arg4: memref<1x78x128xf32, #tpu.memory_space<vmem>>) attributes {dimension_semantics = [#tpu.dimension_semantics<parallel>], iteration_bounds = array<i64: 2>, scalar_prefetch = 0 : i64, scratch_operands = 0 : i64, tpu.core_type = #tpu.core_type<tc>, window_params = [{transform_indices = @transform_0, window_bounds = array<i64: 1, 100, 64>}, {pipeline_mode = #tpu.pipeline_mode<synchronous>, transform_indices = @transform_1, window_bounds = array<i64: 3, 3, 64, 128>}, {pipeline_mode = #tpu.pipeline_mode<synchronous>, transform_indices = @transform_2, window_bounds = array<i64: 1, 128>}, {transform_indices = @transform_3, window_bounds = array<i64: 1, 78, 128>}]} {
    %cst = arith.constant 0.000000e+00 : f32
    %0 = vector.broadcast %cst : f32 to vector<78x128xf32>
    %c0 = arith.constant 0 : index
    %c0_0 = arith.constant 0 : index
    %c0_1 = arith.constant 0 : index
    %1 = vector.load %arg1[%c0, %c0_0, %c0_1] : memref<1x100x64xf32, #tpu.memory_space<vmem>>, vector<1x78x64xf32>
    %2 = vector.shape_cast %1 : vector<1x78x64xf32> to vector<78x64xf32>
    %3 = arith.truncf %2 : vector<78x64xf32> to vector<78x64xbf16>
    %c0_2 = arith.constant 0 : index
    %c0_3 = arith.constant 0 : index
    %c0_4 = arith.constant 0 : index
    %c0_5 = arith.constant 0 : index
    %4 = vector.load %arg2[%c0_2, %c0_3, %c0_4, %c0_5] : memref<3x3x64x128xbf16, #tpu.memory_space<vmem>>, vector<1x1x64x128xbf16>
    %5 = vector.shape_cast %4 : vector<1x1x64x128xbf16> to vector<64x128xbf16>
    %cst_6 = arith.constant dense<0.000000e+00> : vector<78x128xf32>
    %6 = tpu.matmul %3, %5, %cst_6 {dimension_numbers = #tpu.dot_dimension_numbers<[1], [0], [0], [1], [0, 0, 1, 1], [], []>} : vector<78x64xbf16>, vector<64x128xbf16>, vector<78x128xf32> -> vector<78x128xf32>
    %7 = arith.addf %0, %6 : vector<78x128xf32>
    %c0_7 = arith.constant 0 : index
    %c1 = arith.constant 1 : index
    %c0_8 = arith.constant 0 : index
    %8 = vector.load %arg1[%c0_7, %c1, %c0_8] : memref<1x100x64xf32, #tpu.memory_space<vmem>>, vector<1x78x64xf32>
    %9 = vector.shape_cast %8 : vector<1x78x64xf32> to vector<78x64xf32>
    %10 = arith.truncf %9 : vector<78x64xf32> to vector<78x64xbf16>
    %c0_9 = arith.constant 0 : index
    %c1_10 = arith.constant 1 : index
    %c0_11 = arith.constant 0 : index
    %c0_12 = arith.constant 0 : index
    %11 = vector.load %arg2[%c0_9, %c1_10, %c0_11, %c0_12] : memref<3x3x64x128xbf16, #tpu.memory_space<vmem>>, vector<1x1x64x128xbf16>
    %12 = vector.shape_cast %11 : vector<1x1x64x128xbf16> to vector<64x128xbf16>
    %cst_13 = arith.constant dense<0.000000e+00> : vector<78x128xf32>
    %13 = tpu.matmul %10, %12, %cst_13 {dimension_numbers = #tpu.dot_dimension_numbers<[1], [0], [0], [1], [0, 0, 1, 1], [], []>} : vector<78x64xbf16>, vector<64x128xbf16>, vector<78x128xf32> -> vector<78x128xf32>
    %14 = arith.addf %7, %13 : vector<78x128xf32>
    %c0_14 = arith.constant 0 : index
    %c2 = arith.constant 2 : index
    %c0_15 = arith.constant 0 : index
    %15 = vector.load %arg1[%c0_14, %c2, %c0_15] : memref<1x100x64xf32, #tpu.memory_space<vmem>>, vector<1x78x64xf32>
    %16 = vector.shape_cast %15 : vector<1x78x64xf32> to vector<78x64xf32>
    %17 = arith.truncf %16 : vector<78x64xf32> to vector<78x64xbf16>
    %c0_16 = arith.constant 0 : index
    %c2_17 = arith.constant 2 : index
    %c0_18 = arith.constant 0 : index
    %c0_19 = arith.constant 0 : index
    %18 = vector.load %arg2[%c0_16, %c2_17, %c0_18, %c0_19] : memref<3x3x64x128xbf16, #tpu.memory_space<vmem>>, vector<1x1x64x128xbf16>
    %19 = vector.shape_cast %18 : vector<1x1x64x128xbf16> to vector<64x128xbf16>
    %cst_20 = arith.constant dense<0.000000e+00> : vector<78x128xf32>
    %20 = tpu.matmul %17, %19, %cst_20 {dimension_numbers = #tpu.dot_dimension_numbers<[1], [0], [0], [1], [0, 0, 1, 1], [], []>} : vector<78x64xbf16>, vector<64x128xbf16>, vector<78x128xf32> -> vector<78x128xf32>
    %21 = arith.addf %14, %20 : vector<78x128xf32>
    %c0_21 = arith.constant 0 : index
    %c10 = arith.constant 10 : index
    %c0_22 = arith.constant 0 : index
    %22 = vector.load %arg1[%c0_21, %c10, %c0_22] : memref<1x100x64xf32, #tpu.memory_space<vmem>>, vector<1x78x64xf32>
    %23 = vector.shape_cast %22 : vector<1x78x64xf32> to vector<78x64xf32>
    %24 = arith.truncf %23 : vector<78x64xf32> to vector<78x64xbf16>
    %c1_23 = arith.constant 1 : index
    %c0_24 = arith.constant 0 : index
    %c0_25 = arith.constant 0 : index
    %c0_26 = arith.constant 0 : index
    %25 = vector.load %arg2[%c1_23, %c0_24, %c0_25, %c0_26] : memref<3x3x64x128xbf16, #tpu.memory_space<vmem>>, vector<1x1x64x128xbf16>
    %26 = vector.shape_cast %25 : vector<1x1x64x128xbf16> to vector<64x128xbf16>
    %cst_27 = arith.constant dense<0.000000e+00> : vector<78x128xf32>
    %27 = tpu.matmul %24, %26, %cst_27 {dimension_numbers = #tpu.dot_dimension_numbers<[1], [0], [0], [1], [0, 0, 1, 1], [], []>} : vector<78x64xbf16>, vector<64x128xbf16>, vector<78x128xf32> -> vector<78x128xf32>
    %28 = arith.addf %21, %27 : vector<78x128xf32>
    %c0_28 = arith.constant 0 : index
    %c11 = arith.constant 11 : index
    %c0_29 = arith.constant 0 : index
    %29 = vector.load %arg1[%c0_28, %c11, %c0_29] : memref<1x100x64xf32, #tpu.memory_space<vmem>>, vector<1x78x64xf32>
    %30 = vector.shape_cast %29 : vector<1x78x64xf32> to vector<78x64xf32>
    %31 = arith.truncf %30 : vector<78x64xf32> to vector<78x64xbf16>
    %c1_30 = arith.constant 1 : index
    %c1_31 = arith.constant 1 : index
    %c0_32 = arith.constant 0 : index
    %c0_33 = arith.constant 0 : index
    %32 = vector.load %arg2[%c1_30, %c1_31, %c0_32, %c0_33] : memref<3x3x64x128xbf16, #tpu.memory_space<vmem>>, vector<1x1x64x128xbf16>
    %33 = vector.shape_cast %32 : vector<1x1x64x128xbf16> to vector<64x128xbf16>
    %cst_34 = arith.constant dense<0.000000e+00> : vector<78x128xf32>
    %34 = tpu.matmul %31, %33, %cst_34 {dimension_numbers = #tpu.dot_dimension_numbers<[1], [0], [0], [1], [0, 0, 1, 1], [], []>} : vector<78x64xbf16>, vector<64x128xbf16>, vector<78x128xf32> -> vector<78x128xf32>
    %35 = arith.addf %28, %34 : vector<78x128xf32>
    %c0_35 = arith.constant 0 : index
    %c12 = arith.constant 12 : index
    %c0_36 = arith.constant 0 : index
    %36 = vector.load %arg1[%c0_35, %c12, %c0_36] : memref<1x100x64xf32, #tpu.memory_space<vmem>>, vector<1x78x64xf32>
    %37 = vector.shape_cast %36 : vector<1x78x64xf32> to vector<78x64xf32>
    %38 = arith.truncf %37 : vector<78x64xf32> to vector<78x64xbf16>
    %c1_37 = arith.constant 1 : index
    %c2_38 = arith.constant 2 : index
    %c0_39 = arith.constant 0 : index
    %c0_40 = arith.constant 0 : index
    %39 = vector.load %arg2[%c1_37, %c2_38, %c0_39, %c0_40] : memref<3x3x64x128xbf16, #tpu.memory_space<vmem>>, vector<1x1x64x128xbf16>
    %40 = vector.shape_cast %39 : vector<1x1x64x128xbf16> to vector<64x128xbf16>
    %cst_41 = arith.constant dense<0.000000e+00> : vector<78x128xf32>
    %41 = tpu.matmul %38, %40, %cst_41 {dimension_numbers = #tpu.dot_dimension_numbers<[1], [0], [0], [1], [0, 0, 1, 1], [], []>} : vector<78x64xbf16>, vector<64x128xbf16>, vector<78x128xf32> -> vector<78x128xf32>
    %42 = arith.addf %35, %41 : vector<78x128xf32>
    %c0_42 = arith.constant 0 : index
    %c20 = arith.constant 20 : index
    %c0_43 = arith.constant 0 : index
    %43 = vector.load %arg1[%c0_42, %c20, %c0_43] : memref<1x100x64xf32, #tpu.memory_space<vmem>>, vector<1x78x64xf32>
    %44 = vector.shape_cast %43 : vector<1x78x64xf32> to vector<78x64xf32>
    %45 = arith.truncf %44 : vector<78x64xf32> to vector<78x64xbf16>
    %c2_44 = arith.constant 2 : index
    %c0_45 = arith.constant 0 : index
    %c0_46 = arith.constant 0 : index
    %c0_47 = arith.constant 0 : index
    %46 = vector.load %arg2[%c2_44, %c0_45, %c0_46, %c0_47] : memref<3x3x64x128xbf16, #tpu.memory_space<vmem>>, vector<1x1x64x128xbf16>
    %47 = vector.shape_cast %46 : vector<1x1x64x128xbf16> to vector<64x128xbf16>
    %cst_48 = arith.constant dense<0.000000e+00> : vector<78x128xf32>
    %48 = tpu.matmul %45, %47, %cst_48 {dimension_numbers = #tpu.dot_dimension_numbers<[1], [0], [0], [1], [0, 0, 1, 1], [], []>} : vector<78x64xbf16>, vector<64x128xbf16>, vector<78x128xf32> -> vector<78x128xf32>
    %49 = arith.addf %42, %48 : vector<78x128xf32>
    %c0_49 = arith.constant 0 : index
    %c21 = arith.constant 21 : index
    %c0_50 = arith.constant 0 : index
    %50 = vector.load %arg1[%c0_49, %c21, %c0_50] : memref<1x100x64xf32, #tpu.memory_space<vmem>>, vector<1x78x64xf32>
    %51 = vector.shape_cast %50 : vector<1x78x64xf32> to vector<78x64xf32>
    %52 = arith.truncf %51 : vector<78x64xf32> to vector<78x64xbf16>
    %c2_51 = arith.constant 2 : index
    %c1_52 = arith.constant 1 : index
    %c0_53 = arith.constant 0 : index
    %c0_54 = arith.constant 0 : index
    %53 = vector.load %arg2[%c2_51, %c1_52, %c0_53, %c0_54] : memref<3x3x64x128xbf16, #tpu.memory_space<vmem>>, vector<1x1x64x128xbf16>
    %54 = vector.shape_cast %53 : vector<1x1x64x128xbf16> to vector<64x128xbf16>
    %cst_55 = arith.constant dense<0.000000e+00> : vector<78x128xf32>
    %55 = tpu.matmul %52, %54, %cst_55 {dimension_numbers = #tpu.dot_dimension_numbers<[1], [0], [0], [1], [0, 0, 1, 1], [], []>} : vector<78x64xbf16>, vector<64x128xbf16>, vector<78x128xf32> -> vector<78x128xf32>
    %56 = arith.addf %49, %55 : vector<78x128xf32>
    %c0_56 = arith.constant 0 : index
    %c22 = arith.constant 22 : index
    %c0_57 = arith.constant 0 : index
    %57 = vector.load %arg1[%c0_56, %c22, %c0_57] : memref<1x100x64xf32, #tpu.memory_space<vmem>>, vector<1x78x64xf32>
    %58 = vector.shape_cast %57 : vector<1x78x64xf32> to vector<78x64xf32>
    %59 = arith.truncf %58 : vector<78x64xf32> to vector<78x64xbf16>
    %c2_58 = arith.constant 2 : index
    %c2_59 = arith.constant 2 : index
    %c0_60 = arith.constant 0 : index
    %c0_61 = arith.constant 0 : index
    %60 = vector.load %arg2[%c2_58, %c2_59, %c0_60, %c0_61] : memref<3x3x64x128xbf16, #tpu.memory_space<vmem>>, vector<1x1x64x128xbf16>
    %61 = vector.shape_cast %60 : vector<1x1x64x128xbf16> to vector<64x128xbf16>
    %cst_62 = arith.constant dense<0.000000e+00> : vector<78x128xf32>
    %62 = tpu.matmul %59, %61, %cst_62 {dimension_numbers = #tpu.dot_dimension_numbers<[1], [0], [0], [1], [0, 0, 1, 1], [], []>} : vector<78x64xbf16>, vector<64x128xbf16>, vector<78x128xf32> -> vector<78x128xf32>
    %63 = arith.addf %56, %62 : vector<78x128xf32>
    %c0_63 = arith.constant 0 : index
    %c0_64 = arith.constant 0 : index
    %64 = vector.load %arg3[%c0_63, %c0_64] : memref<1x128xf32, #tpu.memory_space<vmem>>, vector<1x128xf32>
    %65 = vector.broadcast %64 : vector<1x128xf32> to vector<78x128xf32>
    %66 = arith.addf %63, %65 : vector<78x128xf32>
    %cst_65 = arith.constant 0.000000e+00 : f32
    %67 = vector.broadcast %cst_65 : f32 to vector<78x128xf32>
    %68 = arith.maximumf %66, %67 : vector<78x128xf32>
    %c0_66 = arith.constant 0 : index
    %c0_67 = arith.constant 0 : index
    %c0_68 = arith.constant 0 : index
    %69 = vector.load %arg4[%c0_66, %c0_67, %c0_68] : memref<1x78x128xf32, #tpu.memory_space<vmem>>, vector<1x78x128xf32>
    %70 = vector.shape_cast %69 : vector<1x78x128xf32> to vector<78x128xf32>
    %71 = vector.shape_cast %68 : vector<78x128xf32> to vector<1x78x128xf32>
    tpu.vector_store %arg4[%c0_66, %c0_67, %c0_68], %71 {strides = array<i32>} : memref<1x78x128xf32, #tpu.memory_space<vmem>>, vector<1x78x128xf32>,
    return
  }
  func.func @transform_0(%arg0: i32) -> (i32, i32, i32) {
    %c0_i32 = arith.constant 0 : i32
    %c0_i32_0 = arith.constant 0 : i32
    %c0_i32_1 = arith.constant 0 : i32
    return %arg0, %c0_i32, %c0_i32_0 : i32, i32, i32
  }
  func.func @transform_1(%arg0: i32) -> (i32, i32, i32, i32) {
    %c0_i32 = arith.constant 0 : i32
    %c0_i32_0 = arith.constant 0 : i32
    %c0_i32_1 = arith.constant 0 : i32
    %c0_i32_2 = arith.constant 0 : i32
    %c0_i32_3 = arith.constant 0 : i32
    return %c0_i32, %c0_i32_0, %c0_i32_1, %c0_i32_2 : i32, i32, i32, i32
  }
  func.func @transform_2(%arg0: i32) -> (i32, i32) {
    %c0_i32 = arith.constant 0 : i32
    %c0_i32_0 = arith.constant 0 : i32
    %c0_i32_1 = arith.constant 0 : i32
    return %c0_i32, %c0_i32_0 : i32, i32
  }
  func.func @transform_3(%arg0: i32) -> (i32, i32, i32) {
    %c0_i32 = arith.constant 0 : i32
    %c0_i32_0 = arith.constant 0 : i32
    %c0_i32_1 = arith.constant 0 : i32
    return %arg0, %c0_i32, %c0_i32_0 : i32, i32, i32
  }
}

module attributes {stable_mosaic.version = 11 : i64} {
  func.func @_conv3x3_kernel(%arg0: i32, %arg1: memref<1x100x128xf32, #tpu.memory_space<vmem>>, %arg2: memref<3x3x128x256xbf16, #tpu.memory_space<vmem>>, %arg3: memref<1x256xf32, #tpu.memory_space<vmem>>, %arg4: memref<1x78x256xf32, #tpu.memory_space<vmem>>) attributes {dimension_semantics = [#tpu.dimension_semantics<parallel>], iteration_bounds = array<i64: 2>, scalar_prefetch = 0 : i64, scratch_operands = 0 : i64, tpu.core_type = #tpu.core_type<tc>, window_params = [{transform_indices = @transform_0, window_bounds = array<i64: 1, 100, 128>}, {pipeline_mode = #tpu.pipeline_mode<synchronous>, transform_indices = @transform_1, window_bounds = array<i64: 3, 3, 128, 256>}, {pipeline_mode = #tpu.pipeline_mode<synchronous>, transform_indices = @transform_2, window_bounds = array<i64: 1, 256>}, {transform_indices = @transform_3, window_bounds = array<i64: 1, 78, 256>}]} {
    %cst = arith.constant 0.000000e+00 : f32
    %0 = vector.broadcast %cst : f32 to vector<78x256xf32>
    %c0 = arith.constant 0 : index
    %c0_0 = arith.constant 0 : index
    %c0_1 = arith.constant 0 : index
    %1 = vector.load %arg1[%c0, %c0_0, %c0_1] : memref<1x100x128xf32, #tpu.memory_space<vmem>>, vector<1x78x128xf32>
    %2 = vector.shape_cast %1 : vector<1x78x128xf32> to vector<78x128xf32>
    %3 = arith.truncf %2 : vector<78x128xf32> to vector<78x128xbf16>
    %c0_2 = arith.constant 0 : index
    %c0_3 = arith.constant 0 : index
    %c0_4 = arith.constant 0 : index
    %c0_5 = arith.constant 0 : index
    %4 = vector.load %arg2[%c0_2, %c0_3, %c0_4, %c0_5] : memref<3x3x128x256xbf16, #tpu.memory_space<vmem>>, vector<1x1x128x256xbf16>
    %5 = vector.shape_cast %4 : vector<1x1x128x256xbf16> to vector<128x256xbf16>
    %cst_6 = arith.constant dense<0.000000e+00> : vector<78x256xf32>
    %6 = tpu.matmul %3, %5, %cst_6 {dimension_numbers = #tpu.dot_dimension_numbers<[1], [0], [0], [1], [0, 0, 1, 1], [], []>} : vector<78x128xbf16>, vector<128x256xbf16>, vector<78x256xf32> -> vector<78x256xf32>
    %7 = arith.addf %0, %6 : vector<78x256xf32>
    %c0_7 = arith.constant 0 : index
    %c1 = arith.constant 1 : index
    %c0_8 = arith.constant 0 : index
    %8 = vector.load %arg1[%c0_7, %c1, %c0_8] : memref<1x100x128xf32, #tpu.memory_space<vmem>>, vector<1x78x128xf32>
    %9 = vector.shape_cast %8 : vector<1x78x128xf32> to vector<78x128xf32>
    %10 = arith.truncf %9 : vector<78x128xf32> to vector<78x128xbf16>
    %c0_9 = arith.constant 0 : index
    %c1_10 = arith.constant 1 : index
    %c0_11 = arith.constant 0 : index
    %c0_12 = arith.constant 0 : index
    %11 = vector.load %arg2[%c0_9, %c1_10, %c0_11, %c0_12] : memref<3x3x128x256xbf16, #tpu.memory_space<vmem>>, vector<1x1x128x256xbf16>
    %12 = vector.shape_cast %11 : vector<1x1x128x256xbf16> to vector<128x256xbf16>
    %cst_13 = arith.constant dense<0.000000e+00> : vector<78x256xf32>
    %13 = tpu.matmul %10, %12, %cst_13 {dimension_numbers = #tpu.dot_dimension_numbers<[1], [0], [0], [1], [0, 0, 1, 1], [], []>} : vector<78x128xbf16>, vector<128x256xbf16>, vector<78x256xf32> -> vector<78x256xf32>
    %14 = arith.addf %7, %13 : vector<78x256xf32>
    %c0_14 = arith.constant 0 : index
    %c2 = arith.constant 2 : index
    %c0_15 = arith.constant 0 : index
    %15 = vector.load %arg1[%c0_14, %c2, %c0_15] : memref<1x100x128xf32, #tpu.memory_space<vmem>>, vector<1x78x128xf32>
    %16 = vector.shape_cast %15 : vector<1x78x128xf32> to vector<78x128xf32>
    %17 = arith.truncf %16 : vector<78x128xf32> to vector<78x128xbf16>
    %c0_16 = arith.constant 0 : index
    %c2_17 = arith.constant 2 : index
    %c0_18 = arith.constant 0 : index
    %c0_19 = arith.constant 0 : index
    %18 = vector.load %arg2[%c0_16, %c2_17, %c0_18, %c0_19] : memref<3x3x128x256xbf16, #tpu.memory_space<vmem>>, vector<1x1x128x256xbf16>
    %19 = vector.shape_cast %18 : vector<1x1x128x256xbf16> to vector<128x256xbf16>
    %cst_20 = arith.constant dense<0.000000e+00> : vector<78x256xf32>
    %20 = tpu.matmul %17, %19, %cst_20 {dimension_numbers = #tpu.dot_dimension_numbers<[1], [0], [0], [1], [0, 0, 1, 1], [], []>} : vector<78x128xbf16>, vector<128x256xbf16>, vector<78x256xf32> -> vector<78x256xf32>
    %21 = arith.addf %14, %20 : vector<78x256xf32>
    %c0_21 = arith.constant 0 : index
    %c10 = arith.constant 10 : index
    %c0_22 = arith.constant 0 : index
    %22 = vector.load %arg1[%c0_21, %c10, %c0_22] : memref<1x100x128xf32, #tpu.memory_space<vmem>>, vector<1x78x128xf32>
    %23 = vector.shape_cast %22 : vector<1x78x128xf32> to vector<78x128xf32>
    %24 = arith.truncf %23 : vector<78x128xf32> to vector<78x128xbf16>
    %c1_23 = arith.constant 1 : index
    %c0_24 = arith.constant 0 : index
    %c0_25 = arith.constant 0 : index
    %c0_26 = arith.constant 0 : index
    %25 = vector.load %arg2[%c1_23, %c0_24, %c0_25, %c0_26] : memref<3x3x128x256xbf16, #tpu.memory_space<vmem>>, vector<1x1x128x256xbf16>
    %26 = vector.shape_cast %25 : vector<1x1x128x256xbf16> to vector<128x256xbf16>
    %cst_27 = arith.constant dense<0.000000e+00> : vector<78x256xf32>
    %27 = tpu.matmul %24, %26, %cst_27 {dimension_numbers = #tpu.dot_dimension_numbers<[1], [0], [0], [1], [0, 0, 1, 1], [], []>} : vector<78x128xbf16>, vector<128x256xbf16>, vector<78x256xf32> -> vector<78x256xf32>
    %28 = arith.addf %21, %27 : vector<78x256xf32>
    %c0_28 = arith.constant 0 : index
    %c11 = arith.constant 11 : index
    %c0_29 = arith.constant 0 : index
    %29 = vector.load %arg1[%c0_28, %c11, %c0_29] : memref<1x100x128xf32, #tpu.memory_space<vmem>>, vector<1x78x128xf32>
    %30 = vector.shape_cast %29 : vector<1x78x128xf32> to vector<78x128xf32>
    %31 = arith.truncf %30 : vector<78x128xf32> to vector<78x128xbf16>
    %c1_30 = arith.constant 1 : index
    %c1_31 = arith.constant 1 : index
    %c0_32 = arith.constant 0 : index
    %c0_33 = arith.constant 0 : index
    %32 = vector.load %arg2[%c1_30, %c1_31, %c0_32, %c0_33] : memref<3x3x128x256xbf16, #tpu.memory_space<vmem>>, vector<1x1x128x256xbf16>
    %33 = vector.shape_cast %32 : vector<1x1x128x256xbf16> to vector<128x256xbf16>
    %cst_34 = arith.constant dense<0.000000e+00> : vector<78x256xf32>
    %34 = tpu.matmul %31, %33, %cst_34 {dimension_numbers = #tpu.dot_dimension_numbers<[1], [0], [0], [1], [0, 0, 1, 1], [], []>} : vector<78x128xbf16>, vector<128x256xbf16>, vector<78x256xf32> -> vector<78x256xf32>
    %35 = arith.addf %28, %34 : vector<78x256xf32>
    %c0_35 = arith.constant 0 : index
    %c12 = arith.constant 12 : index
    %c0_36 = arith.constant 0 : index
    %36 = vector.load %arg1[%c0_35, %c12, %c0_36] : memref<1x100x128xf32, #tpu.memory_space<vmem>>, vector<1x78x128xf32>
    %37 = vector.shape_cast %36 : vector<1x78x128xf32> to vector<78x128xf32>
    %38 = arith.truncf %37 : vector<78x128xf32> to vector<78x128xbf16>
    %c1_37 = arith.constant 1 : index
    %c2_38 = arith.constant 2 : index
    %c0_39 = arith.constant 0 : index
    %c0_40 = arith.constant 0 : index
    %39 = vector.load %arg2[%c1_37, %c2_38, %c0_39, %c0_40] : memref<3x3x128x256xbf16, #tpu.memory_space<vmem>>, vector<1x1x128x256xbf16>
    %40 = vector.shape_cast %39 : vector<1x1x128x256xbf16> to vector<128x256xbf16>
    %cst_41 = arith.constant dense<0.000000e+00> : vector<78x256xf32>
    %41 = tpu.matmul %38, %40, %cst_41 {dimension_numbers = #tpu.dot_dimension_numbers<[1], [0], [0], [1], [0, 0, 1, 1], [], []>} : vector<78x128xbf16>, vector<128x256xbf16>, vector<78x256xf32> -> vector<78x256xf32>
    %42 = arith.addf %35, %41 : vector<78x256xf32>
    %c0_42 = arith.constant 0 : index
    %c20 = arith.constant 20 : index
    %c0_43 = arith.constant 0 : index
    %43 = vector.load %arg1[%c0_42, %c20, %c0_43] : memref<1x100x128xf32, #tpu.memory_space<vmem>>, vector<1x78x128xf32>
    %44 = vector.shape_cast %43 : vector<1x78x128xf32> to vector<78x128xf32>
    %45 = arith.truncf %44 : vector<78x128xf32> to vector<78x128xbf16>
    %c2_44 = arith.constant 2 : index
    %c0_45 = arith.constant 0 : index
    %c0_46 = arith.constant 0 : index
    %c0_47 = arith.constant 0 : index
    %46 = vector.load %arg2[%c2_44, %c0_45, %c0_46, %c0_47] : memref<3x3x128x256xbf16, #tpu.memory_space<vmem>>, vector<1x1x128x256xbf16>
    %47 = vector.shape_cast %46 : vector<1x1x128x256xbf16> to vector<128x256xbf16>
    %cst_48 = arith.constant dense<0.000000e+00> : vector<78x256xf32>
    %48 = tpu.matmul %45, %47, %cst_48 {dimension_numbers = #tpu.dot_dimension_numbers<[1], [0], [0], [1], [0, 0, 1, 1], [], []>} : vector<78x128xbf16>, vector<128x256xbf16>, vector<78x256xf32> -> vector<78x256xf32>
    %49 = arith.addf %42, %48 : vector<78x256xf32>
    %c0_49 = arith.constant 0 : index
    %c21 = arith.constant 21 : index
    %c0_50 = arith.constant 0 : index
    %50 = vector.load %arg1[%c0_49, %c21, %c0_50] : memref<1x100x128xf32, #tpu.memory_space<vmem>>, vector<1x78x128xf32>
    %51 = vector.shape_cast %50 : vector<1x78x128xf32> to vector<78x128xf32>
    %52 = arith.truncf %51 : vector<78x128xf32> to vector<78x128xbf16>
    %c2_51 = arith.constant 2 : index
    %c1_52 = arith.constant 1 : index
    %c0_53 = arith.constant 0 : index
    %c0_54 = arith.constant 0 : index
    %53 = vector.load %arg2[%c2_51, %c1_52, %c0_53, %c0_54] : memref<3x3x128x256xbf16, #tpu.memory_space<vmem>>, vector<1x1x128x256xbf16>
    %54 = vector.shape_cast %53 : vector<1x1x128x256xbf16> to vector<128x256xbf16>
    %cst_55 = arith.constant dense<0.000000e+00> : vector<78x256xf32>
    %55 = tpu.matmul %52, %54, %cst_55 {dimension_numbers = #tpu.dot_dimension_numbers<[1], [0], [0], [1], [0, 0, 1, 1], [], []>} : vector<78x128xbf16>, vector<128x256xbf16>, vector<78x256xf32> -> vector<78x256xf32>
    %56 = arith.addf %49, %55 : vector<78x256xf32>
    %c0_56 = arith.constant 0 : index
    %c22 = arith.constant 22 : index
    %c0_57 = arith.constant 0 : index
    %57 = vector.load %arg1[%c0_56, %c22, %c0_57] : memref<1x100x128xf32, #tpu.memory_space<vmem>>, vector<1x78x128xf32>
    %58 = vector.shape_cast %57 : vector<1x78x128xf32> to vector<78x128xf32>
    %59 = arith.truncf %58 : vector<78x128xf32> to vector<78x128xbf16>
    %c2_58 = arith.constant 2 : index
    %c2_59 = arith.constant 2 : index
    %c0_60 = arith.constant 0 : index
    %c0_61 = arith.constant 0 : index
    %60 = vector.load %arg2[%c2_58, %c2_59, %c0_60, %c0_61] : memref<3x3x128x256xbf16, #tpu.memory_space<vmem>>, vector<1x1x128x256xbf16>
    %61 = vector.shape_cast %60 : vector<1x1x128x256xbf16> to vector<128x256xbf16>
    %cst_62 = arith.constant dense<0.000000e+00> : vector<78x256xf32>
    %62 = tpu.matmul %59, %61, %cst_62 {dimension_numbers = #tpu.dot_dimension_numbers<[1], [0], [0], [1], [0, 0, 1, 1], [], []>} : vector<78x128xbf16>, vector<128x256xbf16>, vector<78x256xf32> -> vector<78x256xf32>
    %63 = arith.addf %56, %62 : vector<78x256xf32>
    %c0_63 = arith.constant 0 : index
    %c0_64 = arith.constant 0 : index
    %64 = vector.load %arg3[%c0_63, %c0_64] : memref<1x256xf32, #tpu.memory_space<vmem>>, vector<1x256xf32>
    %65 = vector.broadcast %64 : vector<1x256xf32> to vector<78x256xf32>
    %66 = arith.addf %63, %65 : vector<78x256xf32>
    %cst_65 = arith.constant 0.000000e+00 : f32
    %67 = vector.broadcast %cst_65 : f32 to vector<78x256xf32>
    %68 = arith.maximumf %66, %67 : vector<78x256xf32>
    %c0_66 = arith.constant 0 : index
    %c0_67 = arith.constant 0 : index
    %c0_68 = arith.constant 0 : index
    %69 = vector.load %arg4[%c0_66, %c0_67, %c0_68] : memref<1x78x256xf32, #tpu.memory_space<vmem>>, vector<1x78x256xf32>
    %70 = vector.shape_cast %69 : vector<1x78x256xf32> to vector<78x256xf32>
    %71 = vector.shape_cast %68 : vector<78x256xf32> to vector<1x78x256xf32>
    tpu.vector_store %arg4[%c0_66, %c0_67, %c0_68], %71 {strides = array<i32>} : memref<1x78x256xf32, #tpu.memory_space<vmem>>, vector<1x78x256xf32>,
    return
  }
  func.func @transform_0(%arg0: i32) -> (i32, i32, i32) {
    %c0_i32 = arith.constant 0 : i32
    %c0_i32_0 = arith.constant 0 : i32
    %c0_i32_1 = arith.constant 0 : i32
    return %arg0, %c0_i32, %c0_i32_0 : i32, i32, i32
  }
  func.func @transform_1(%arg0: i32) -> (i32, i32, i32, i32) {
    %c0_i32 = arith.constant 0 : i32
    %c0_i32_0 = arith.constant 0 : i32
    %c0_i32_1 = arith.constant 0 : i32
    %c0_i32_2 = arith.constant 0 : i32
    %c0_i32_3 = arith.constant 0 : i32
    return %c0_i32, %c0_i32_0, %c0_i32_1, %c0_i32_2 : i32, i32, i32, i32
  }
  func.func @transform_2(%arg0: i32) -> (i32, i32) {
    %c0_i32 = arith.constant 0 : i32
    %c0_i32_0 = arith.constant 0 : i32
    %c0_i32_1 = arith.constant 0 : i32
    return %c0_i32, %c0_i32_0 : i32, i32
  }
  func.func @transform_3(%arg0: i32) -> (i32, i32, i32) {
    %c0_i32 = arith.constant 0 : i32
    %c0_i32_0 = arith.constant 0 : i32
    %c0_i32_1 = arith.constant 0 : i32
    return %arg0, %c0_i32, %c0_i32_0 : i32, i32, i32
  }
}

module attributes {stable_mosaic.version = 11 : i64} {
  func.func @_fc_head_kernel(%arg0: i32, %arg1: memref<2x4096xbf16, #tpu.memory_space<vmem>>, %arg2: memref<4096x128xbf16, #tpu.memory_space<vmem>>, %arg3: memref<1x128xf32, #tpu.memory_space<vmem>>, %arg4: memref<128x10xbf16, #tpu.memory_space<vmem>>, %arg5: memref<1x10xf32, #tpu.memory_space<vmem>>, %arg6: memref<2x10xf32, #tpu.memory_space<vmem>>) attributes {dimension_semantics = [#tpu.dimension_semantics<parallel>], iteration_bounds = array<i64: 1>, scalar_prefetch = 0 : i64, scratch_operands = 0 : i64, tpu.core_type = #tpu.core_type<tc>, window_params = [{transform_indices = @transform_0, window_bounds = array<i64: 2, 4096>}, {pipeline_mode = #tpu.pipeline_mode<synchronous>, transform_indices = @transform_1, window_bounds = array<i64: 4096, 128>}, {pipeline_mode = #tpu.pipeline_mode<synchronous>, transform_indices = @transform_2, window_bounds = array<i64: 1, 128>}, {pipeline_mode = #tpu.pipeline_mode<synchronous>, transform_indices = @transform_3, window_bounds = array<i64: 128, 10>}, {pipeline_mode = #tpu.pipeline_mode<synchronous>, transform_indices = @transform_4, window_bounds = array<i64: 1, 10>}, {transform_indices = @transform_5, window_bounds = array<i64: 2, 10>}]} {
    %c0 = arith.constant 0 : index
    %c0_0 = arith.constant 0 : index
    %0 = vector.load %arg1[%c0, %c0_0] : memref<2x4096xbf16, #tpu.memory_space<vmem>>, vector<2x4096xbf16>
    %c0_1 = arith.constant 0 : index
    %c0_2 = arith.constant 0 : index
    %1 = vector.load %arg2[%c0_1, %c0_2] : memref<4096x128xbf16, #tpu.memory_space<vmem>>, vector<4096x128xbf16>
    %cst = arith.constant dense<0.000000e+00> : vector<2x128xf32>
    %2 = tpu.matmul %0, %1, %cst {dimension_numbers = #tpu.dot_dimension_numbers<[1], [0], [0], [1], [0, 0, 1, 1], [], []>} : vector<2x4096xbf16>, vector<4096x128xbf16>, vector<2x128xf32> -> vector<2x128xf32>
    %c0_3 = arith.constant 0 : index
    %c0_4 = arith.constant 0 : index
    %3 = vector.load %arg3[%c0_3, %c0_4] : memref<1x128xf32, #tpu.memory_space<vmem>>, vector<1x128xf32>
    %4 = vector.broadcast %3 : vector<1x128xf32> to vector<2x128xf32>
    %5 = arith.addf %2, %4 : vector<2x128xf32>
    %cst_5 = arith.constant 0.000000e+00 : f32
    %6 = vector.broadcast %cst_5 : f32 to vector<2x128xf32>
    %7 = arith.maximumf %5, %6 : vector<2x128xf32>
    %8 = arith.truncf %7 : vector<2x128xf32> to vector<2x128xbf16>
    %c0_6 = arith.constant 0 : index
    %c0_7 = arith.constant 0 : index
    %9 = vector.load %arg4[%c0_6, %c0_7] : memref<128x10xbf16, #tpu.memory_space<vmem>>, vector<128x10xbf16>
    %cst_8 = arith.constant dense<0.000000e+00> : vector<2x10xf32>
    %10 = tpu.matmul %8, %9, %cst_8 {dimension_numbers = #tpu.dot_dimension_numbers<[1], [0], [0], [1], [0, 0, 1, 1], [], []>} : vector<2x128xbf16>, vector<128x10xbf16>, vector<2x10xf32> -> vector<2x10xf32>
    %c0_9 = arith.constant 0 : index
    %c0_10 = arith.constant 0 : index
    %11 = vector.load %arg5[%c0_9, %c0_10] : memref<1x10xf32, #tpu.memory_space<vmem>>, vector<1x10xf32>
    %12 = vector.broadcast %11 : vector<1x10xf32> to vector<2x10xf32>
    %13 = arith.addf %10, %12 : vector<2x10xf32>
    %c0_11 = arith.constant 0 : index
    %c0_12 = arith.constant 0 : index
    %14 = vector.load %arg6[%c0_11, %c0_12] : memref<2x10xf32, #tpu.memory_space<vmem>>, vector<2x10xf32>
    tpu.vector_store %arg6[%c0_11, %c0_12], %13 {strides = array<i32>} : memref<2x10xf32, #tpu.memory_space<vmem>>, vector<2x10xf32>,
    return
  }
  func.func @transform_0(%arg0: i32) -> (i32, i32) {
    %c0_i32 = arith.constant 0 : i32
    %c0_i32_0 = arith.constant 0 : i32
    return %arg0, %c0_i32 : i32, i32
  }
  func.func @transform_1(%arg0: i32) -> (i32, i32) {
    %c0_i32 = arith.constant 0 : i32
    %c0_i32_0 = arith.constant 0 : i32
    %c0_i32_1 = arith.constant 0 : i32
    return %c0_i32, %c0_i32_0 : i32, i32
  }
  func.func @transform_2(%arg0: i32) -> (i32, i32) {
    %c0_i32 = arith.constant 0 : i32
    %c0_i32_0 = arith.constant 0 : i32
    %c0_i32_1 = arith.constant 0 : i32
    return %c0_i32, %c0_i32_0 : i32, i32
  }
  func.func @transform_3(%arg0: i32) -> (i32, i32) {
    %c0_i32 = arith.constant 0 : i32
    %c0_i32_0 = arith.constant 0 : i32
    %c0_i32_1 = arith.constant 0 : i32
    return %c0_i32, %c0_i32_0 : i32, i32
  }
  func.func @transform_4(%arg0: i32) -> (i32, i32) {
    %c0_i32 = arith.constant 0 : i32
    %c0_i32_0 = arith.constant 0 : i32
    %c0_i32_1 = arith.constant 0 : i32
    return %c0_i32, %c0_i32_0 : i32, i32
  }
  func.func @transform_5(%arg0: i32) -> (i32, i32) {
    %c0_i32 = arith.constant 0 : i32
    %c0_i32_0 = arith.constant 0 : i32
    return %arg0, %c0_i32 : i32, i32
  }
}

</mosaic_0001>

<bundles_post_ra>
// kernel: net_forward.5
= control target key start
LH: loop header
LB: loop body
LE: loop exit
PB: predicated region body
PF: predicated region fallthrough
CT: control target
= control target key end

     0   :  { %s965_s12 = smov 0   ;;  %s1172_s0 = inlined_call_operand.vmem [shape: bf16[512,147], index: 0, kind: input, shape index: {}]   ;;  %s1173_s1 = inlined_call_operand.vmem [shape: bf16[147,32], index: 1, kind: input, shape index: {}]   ;;  %s1174_s2 = inlined_call_operand.vmem [shape: f32[1,32], index: 2, kind: input, shape index: {}]   ;;  %s1175_s3 = inlined_call_operand.vmem [shape: f32[512,32], index: 3, kind: output, shape index: {}]  }
   0x1 LB: > { %s775_s13 = sadd.s32 4294967295, %s941_s12   ;;  %p779_p0 = scmp.ge.s32.totalorder %s941_s12, 1  ;;  %s941_s12 = sphi %s965_s12, %s13_s12  }
   0x2   : > { %p139_p1 = scmp.lt.s32.totalorder %s941_s12, 3 }
   0x4   : > { %p140_p2 = pnand %p779_p0, %p139_p1 }
   0x5   : > { %v877_v0 = vld [vmem:[%s1173_s1] sm:$0xff] (!%p140_p2)   ;;  %v943_v1 = vmov (!%p140_p2), 0   ;;  %v878_v2 = vld [vmem:[%s1173_s1 + $0x8] sm:$0xff] (!%p140_p2)   ;;  %v879_v3 = vld [vmem:[%s1173_s1 + $0x10] sm:$0xff] (!%p140_p2)   ;;  %s780_s20 = sshll.u32 (!%p140_p2), %s775_s13, 5  ;;  %vm437_vm0 = vcmask (!%p140_p2), 154624  }
   0x6   : > { %143 = sbr.rel (%p140_p2) target bundleno = 321 (0x141), region = 32  ;;  %493 = vmatprep.subr.bf16.mxu0 (!%p140_p2), %v943_v1  ;;  %847 = vmatprep.subr.bf16.mxu1 (!%p140_p2), %v943_v1  ;;  %p165_p3 = scmp.lt.s32.totalorder (!%p140_p2), %s780_s20, 63  ;;  %v880_v4 = vld [vmem:[%s1173_s1 + $0x18] sm:$0xff] (!%p140_p2)   ;;  %v881_v5 = vld [vmem:[%s1173_s1 + $0x20] sm:$0xff] (!%p140_p2)   ;;  %v882_v8 = vld [vmem:[%s1173_s1 + $0x28] sm:$0xff] (!%p140_p2)   ;;  %vm486_vm1 = vcmask (!%p140_p2), 1040384  }
   0x7   : > { %494 = vmatpush1.bf16.msra.mxu0 (!%p140_p2), %v877_v0  ;;  %857 = vmatpush1.bf16.msra.mxu1 (!%p140_p2), %v877_v0  ;;  %v883_v9 = vld [vmem:[%s1173_s1 + $0x30] sm:$0xff] (!%p140_p2)   ;;  %v884_v10 = vld [vmem:[%s1173_s1 + $0x38] sm:$0xff] (!%p140_p2)   ;;  %vm487_vm2 = vcmask (!%p140_p2), 1041408   ;;  %v944_v11 = vmov (!%p140_p2), 65535   ;;  %v885_v13 = vld [vmem:[%s1173_s1 + $0x40] sm:$0xff] (!%p140_p2)   ;;  %vm686_vm3 = vcmask (!%p140_p2), 261120  }
   0x8   : > { %495 = vmatprep.subr.bf16.mxu0 (!%p140_p2), %v943_v1  ;;  %848 = vmatprep.subr.bf16.mxu1 (!%p140_p2), %v943_v1  ;;  %v488_v12 = vsel (!%p140_p2), %vm486_vm1, 4294967295, %v944_v11  ;;  %v886_v14 = vld [vmem:[%s1173_s1 + $0x48] ss:$0 sps:$4 sm:$0x33] (!%p140_p2)   ;;  %v1064_v47 = vld [vmem:[%s1174_s2] ss:$0 sm:$0xff] (!%p140_p2) }
   0x9   : > { %v489_v15 = vsel (!%p140_p2), %vm487_vm2, %v488_v12, 0 }
   0xa   : > { %v491_v16 = vand.u32 (!%p140_p2), %v886_v14, %v489_v15 }
   0xb   : > { %496 = vmatpush1.bf16.msra.mxu0 (!%p140_p2), %v878_v2  ;;  %858 = vmatpush1.bf16.msra.mxu1 (!%p140_p2), %v878_v2 }
   0xc   : > { %497 = vmatprep.subr.bf16.mxu0 (!%p140_p2), %v943_v1  ;;  %849 = vmatprep.subr.bf16.mxu1 (!%p140_p2), %v943_v1 }
   0xd   : > { %s1177_s20 = smov (!%p165_p3, %s780_s20), 63 }
   0xe   : > { %s846_s23 = sshll.u32 %s1177_s20, 3 }
   0xf   : > { %498 = vmatpush1.bf16.msra.mxu0 %v879_v3  ;;  %859 = vmatpush1.bf16.msra.mxu1 %v879_v3  ;;  %s993_s26 = scalar_lea.vmem %s1172_s0, %s846_s23  ;;  %s1073_s17 = scalar_lea.vmem %s1175_s3, %s846_s23 }
  0x10   : > { %499 = vmatprep.subr.bf16.mxu0 %v943_v1  ;;  %850 = vmatprep.subr.bf16.mxu1 %v943_v1  ;;  %v889_v6 = vld [vmem:[%s993_s26 + $0x4] ss:$8 sps:$4 sm:$0xff]   ;;  %v887_v17 = vld [vmem:[%s993_s26] ss:$8 sps:$4 sm:$0xff]   ;;  %v893_v19 = vld [vmem:[%s993_s26 + $0x14] ss:$8 sps:$4 sm:$0xff]  }
  0x11   : > { %v892_v7 = vld [vmem:[%s993_s26 + $0x84] ss:$8 sps:$4 sm:$0xff]   ;;  %828 = vmatprep.mubr.msk.bf16.mxu0 %vm437_vm0, %v889_v6  ;;  %v890_v18 = vld [vmem:[%s993_s26 + $0x80] ss:$8 sps:$4 sm:$0xff]   ;;  %v895_v20 = vld [vmem:[%s993_s26 + $0x94] ss:$8 sps:$4 sm:$0xff]  }
  0x12   : > { %836 = vmatprep.mubr.msk.bf16.mxu1 %vm437_vm0, %v892_v7  ;;  %v897_v21 = vld [vmem:[%s993_s26 + $0x10] ss:$8 sps:$4 sm:$0xff]   ;;  %v899_v23 = vld [vmem:[%s993_s26 + $0x24] ss:$8 sps:$4 sm:$0xff]   ;;  %v903_v25 = vld [vmem:[%s993_s26 + $0x20] ss:$8 sps:$4 sm:$0xff]  }
  0x13   : > { %500 = vmatpush1.bf16.msra.mxu0 %v880_v4  ;;  %860 = vmatpush1.bf16.msra.mxu1 %v880_v4  ;;  %v898_v22 = vld [vmem:[%s993_s26 + $0x90] ss:$8 sps:$4 sm:$0xff]   ;;  %v901_v24 = vld [vmem:[%s993_s26 + $0xa4] ss:$8 sps:$4 sm:$0xff]   ;;  %v904_v26 = vld [vmem:[%s993_s26 + $0xa0] ss:$8 sps:$4 sm:$0xff]  }
  0x14   : > { %501 = vmatprep.subr.bf16.mxu0 %v943_v1  ;;  %851 = vmatprep.subr.bf16.mxu1 %v943_v1  ;;  %v905_v27 = vld [vmem:[%s993_s26 + $0x34] ss:$8 sps:$4 sm:$0xff]   ;;  %v909_v29 = vld [vmem:[%s993_s26 + $0x30] ss:$8 sps:$4 sm:$0xff]   ;;  %v911_v31 = vld [vmem:[%s993_s26 + $0x44] ss:$8 sps:$4 sm:$0xff]  }
  0x15   : > { %v907_v28 = vld [vmem:[%s993_s26 + $0xb4] ss:$8 sps:$4 sm:$0xff]   ;;  %v910_v30 = vld [vmem:[%s993_s26 + $0xb0] ss:$8 sps:$4 sm:$0xff]   ;;  %v913_v32 = vld [vmem:[%s993_s26 + $0xc4] ss:$8 sps:$4 sm:$0xff]  }
  0x16   : > { %v915_v33 = vld [vmem:[%s993_s26 + $0x40] ss:$8 sps:$4 sm:$0xff]   ;;  %v917_v35 = vld [vmem:[%s993_s26 + $0x54] ss:$8 sps:$4 sm:$0xff]   ;;  %v921_v37 = vld [vmem:[%s993_s26 + $0x50] ss:$8 sps:$4 sm:$0xff]  }
  0x17   : > { %502 = vmatpush1.bf16.msra.mxu0 %v881_v5  ;;  %861 = vmatpush1.bf16.msra.mxu1 %v881_v5  ;;  %v916_v34 = vld [vmem:[%s993_s26 + $0xc0] ss:$8 sps:$4 sm:$0xff]   ;;  %v919_v36 = vld [vmem:[%s993_s26 + $0xd4] ss:$8 sps:$4 sm:$0xff]   ;;  %v922_v38 = vld [vmem:[%s993_s26 + $0xd0] ss:$8 sps:$4 sm:$0xff]  }
  0x18   : > { %503 = vmatprep.subr.bf16.mxu0 %v943_v1  ;;  %852 = vmatprep.subr.bf16.mxu1 %v943_v1  ;;  %v923_v39 = vld [vmem:[%s993_s26 + $0x64] ss:$8 sps:$4 sm:$0xff]   ;;  %v927_v41 = vld [vmem:[%s993_s26 + $0x60] ss:$8 sps:$4 sm:$0xff]   ;;  %v929_v43 = vld [vmem:[%s993_s26 + $0x74] ss:$8 sps:$4 sm:$0xff]  }
  0x19   : > { %v925_v40 = vld [vmem:[%s993_s26 + $0xe4] ss:$8 sps:$4 sm:$0xff]   ;;  %v928_v42 = vld [vmem:[%s993_s26 + $0xe0] ss:$8 sps:$4 sm:$0xff]   ;;  %v931_v44 = vld [vmem:[%s993_s26 + $0xf4] ss:$8 sps:$4 sm:$0xff]  }
  0x1a   : > { %v933_v45 = vld [vmem:[%s993_s26 + $0x70] ss:$8 sps:$4 sm:$0xff]  }
  0x1b   : > { %504 = vmatpush1.bf16.msra.mxu0 %v882_v8  ;;  %862 = vmatpush1.bf16.msra.mxu1 %v882_v8  ;;  %v934_v46 = vld [vmem:[%s993_s26 + $0xf0] ss:$8 sps:$4 sm:$0xff]  }
  0x1c   : > { %505 = vmatprep.subr.bf16.mxu0 %v943_v1  ;;  %853 = vmatprep.subr.bf16.mxu1 %v943_v1 }
  0x1f   : > { %506 = vmatpush1.bf16.msra.mxu0 %v883_v9  ;;  %863 = vmatpush1.bf16.msra.mxu1 %v883_v9 }
  0x20   : > { %507 = vmatprep.subr.bf16.mxu0 %v943_v1  ;;  %854 = vmatprep.subr.bf16.mxu1 %v943_v1 }
  0x23   : > { %508 = vmatpush1.bf16.msra.mxu0 %v884_v10  ;;  %864 = vmatpush1.bf16.msra.mxu1 %v884_v10 }
  0x24   : > { %509 = vmatprep.subr.bf16.mxu0 %v943_v1  ;;  %855 = vmatprep.subr.bf16.mxu1 %v943_v1 }
  0x27   : > { %510 = vmatpush1.bf16.msra.mxu0 %v885_v13  ;;  %865 = vmatpush1.bf16.msra.mxu1 %v885_v13 }
  0x28   : > { %511 = vmatprep.subr.bf16.mxu0 %v943_v1  ;;  %856 = vmatprep.subr.bf16.mxu1 %v943_v1 }
  0x2b   : > { %512 = vmatpush1.bf16.msra.mxu0 %v491_v16  ;;  %866 = vmatpush1.bf16.msra.mxu1 %v491_v16 }
  0x2e   : > { %526 = vmatmul.mubr.bf16.vlgmr.msra.gmra.mrb[0].mxu0 %v887_v17  ;;  %590 = vmatmul.mubr.bf16.vlgmr.msra.gmra.mrb[0].mxu1 %v890_v18 }
  0x2f   : > { %829 = vmatprep.mubr.msk.bf16.mxu0 %vm437_vm0, %v893_v19  ;;  %837 = vmatprep.mubr.msk.bf16.mxu1 %vm437_vm0, %v895_v20 }
  0x36   : > { %534 = vmatmul.mubr.bf16.gmra.mrb[4].mxu0 %v897_v21  ;;  %598 = vmatmul.mubr.bf16.gmra.mrb[4].mxu1 %v898_v22 }
  0x37   : > { %830 = vmatprep.mubr.msk.bf16.mxu0 %vm437_vm0, %v899_v23  ;;  %838 = vmatprep.mubr.msk.bf16.mxu1 %vm437_vm0, %v901_v24 }
  0x3e   : > { %542 = vmatmul.mubr.bf16.gmra.mrb[8].mxu0 %v903_v25  ;;  %606 = vmatmul.mubr.bf16.gmra.mrb[8].mxu1 %v904_v26 }
  0x3f   : > { %831 = vmatprep.mubr.msk.bf16.mxu0 %vm437_vm0, %v905_v27  ;;  %839 = vmatprep.mubr.msk.bf16.mxu1 %vm437_vm0, %v907_v28 }
  0x46   : > { %550 = vmatmul.mubr.bf16.gmra.mrb[12].mxu0 %v909_v29  ;;  %614 = vmatmul.mubr.bf16.gmra.mrb[12].mxu1 %v910_v30 }
  0x47   : > { %832 = vmatprep.mubr.msk.bf16.mxu0 %vm437_vm0, %v911_v31  ;;  %840 = vmatprep.mubr.msk.bf16.mxu1 %vm437_vm0, %v913_v32 }
  0x4e   : > { %558 = vmatmul.mubr.bf16.gmra.mrb[16].mxu0 %v915_v33  ;;  %622 = vmatmul.mubr.bf16.gmra.mrb[16].mxu1 %v916_v34 }
  0x4f   : > { %833 = vmatprep.mubr.msk.bf16.mxu0 %vm437_vm0, %v917_v35  ;;  %841 = vmatprep.mubr.msk.bf16.mxu1 %vm437_vm0, %v919_v36 }
  0x56   : > { %566 = vmatmul.mubr.bf16.gmra.mrb[20].mxu0 %v921_v37  ;;  %630 = vmatmul.mubr.bf16.gmra.mrb[20].mxu1 %v922_v38 }
  0x57   : > { %834 = vmatprep.mubr.msk.bf16.mxu0 %vm437_vm0, %v923_v39  ;;  %842 = vmatprep.mubr.msk.bf16.mxu1 %vm437_vm0, %v925_v40 }
  0x5e   : > { %574 = vmatmul.mubr.bf16.gmra.mrb[24].mxu0 %v927_v41  ;;  %638 = vmatmul.mubr.bf16.gmra.mrb[24].mxu1 %v928_v42 }
  0x5f   : > { %835 = vmatprep.mubr.msk.bf16.mxu0 %vm437_vm0, %v929_v43  ;;  %843 = vmatprep.mubr.msk.bf16.mxu1 %vm437_vm0, %v931_v44 }
  0x66   : > { %582 = vmatmul.mubr.bf16.gmra.mrb[28].mxu0 %v933_v45  ;;  %646 = vmatmul.mubr.bf16.gmra.mrb[28].mxu1 %v934_v46 }
 0x101   : > { %v527_v48 = vpop.f32.mrb[0].mxu0  ;;  %v591_v49 = vpop.f32.mrb[0].mxu1 }
 0x102   : > { %v528_v50 = vadd.f32 %v1064_v47, %v527_v48  ;;  %v592_v51 = vadd.f32 %v1064_v47, %v591_v49  ;;  %v529_v52 = vpop.f32.mrb[1].mxu0  ;;  %v593_v53 = vpop.f32.mrb[1].mxu1 }
 0x103   : > { %v530_v54 = vpop.f32.mrb[2].mxu0  ;;  %v594_v55 = vpop.f32.mrb[2].mxu1 }
 0x104   : > { %v654_v56 = vmax.f32 %v528_v50, 0.0  ;;  %v670_v57 = vmax.f32 %v592_v51, 0.0  ;;  %v531_v58 = vadd.f32 %v1064_v47, %v530_v54  ;;  %v595_v59 = vadd.f32 %v1064_v47, %v594_v55  ;;  %v532_v60 = vpop.f32.mrb[3].mxu0  ;;  %v596_v61 = vpop.f32.mrb[3].mxu1 }
 0x106   : > { %687 = vst.msk [vmem:[%s1073_s17] sm:$0xff] %vm686_vm3, %v654_v56  ;;  %703 = vst.msk [vmem:[%s1073_s17 + $0x80] sm:$0xff] %vm686_vm3, %v670_v57  ;;  %v655_v62 = vmax.f32 %v531_v58, 0.0  ;;  %v671_v63 = vmax.f32 %v595_v59, 0.0 }
 0x108   : > { %688 = vst.msk [vmem:[%s1073_s17 + $0x8] sm:$0xff] %vm686_vm3, %v655_v62  ;;  %704 = vst.msk [vmem:[%s1073_s17 + $0x88] sm:$0xff] %vm686_vm3, %v671_v63 }
 0x109   : > { %v535_v0 = vpop.f32.mrb[4].mxu0  ;;  %v599_v1 = vpop.f32.mrb[4].mxu1 }
 0x10a   : > { %v536_v2 = vadd.f32 %v1064_v47, %v535_v0  ;;  %v600_v3 = vadd.f32 %v1064_v47, %v599_v1  ;;  %v537_v4 = vpop.f32.mrb[5].mxu0  ;;  %v601_v5 = vpop.f32.mrb[5].mxu1 }
 0x10b   : > { %v538_v6 = vpop.f32.mrb[6].mxu0  ;;  %v602_v7 = vpop.f32.mrb[6].mxu1 }
 0x10c   : > { %v656_v8 = vmax.f32 %v536_v2, 0.0  ;;  %v672_v9 = vmax.f32 %v600_v3, 0.0  ;;  %v539_v10 = vadd.f32 %v1064_v47, %v538_v6  ;;  %v603_v11 = vadd.f32 %v1064_v47, %v602_v7  ;;  %v540_v12 = vpop.f32.mrb[7].mxu0  ;;  %v604_v13 = vpop.f32.mrb[7].mxu1 }
 0x10e   : > { %689 = vst.msk [vmem:[%s1073_s17 + $0x10] sm:$0xff] %vm686_vm3, %v656_v8  ;;  %705 = vst.msk [vmem:[%s1073_s17 + $0x90] sm:$0xff] %vm686_vm3, %v672_v9  ;;  %v657_v14 = vmax.f32 %v539_v10, 0.0  ;;  %v673_v15 = vmax.f32 %v603_v11, 0.0 }
 0x110   : > { %690 = vst.msk [vmem:[%s1073_s17 + $0x18] sm:$0xff] %vm686_vm3, %v657_v14  ;;  %706 = vst.msk [vmem:[%s1073_s17 + $0x98] sm:$0xff] %vm686_vm3, %v673_v15 }
 0x111   : > { %v543_v16 = vpop.f32.mrb[8].mxu0  ;;  %v607_v17 = vpop.f32.mrb[8].mxu1 }
 0x112   : > { %v544_v18 = vadd.f32 %v1064_v47, %v543_v16  ;;  %v608_v19 = vadd.f32 %v1064_v47, %v607_v17  ;;  %v545_v20 = vpop.f32.mrb[9].mxu0  ;;  %v609_v21 = vpop.f32.mrb[9].mxu1 }
 0x113   : > { %v546_v22 = vpop.f32.mrb[10].mxu0  ;;  %v610_v23 = vpop.f32.mrb[10].mxu1 }
 0x114   : > { %v658_v24 = vmax.f32 %v544_v18, 0.0  ;;  %v674_v25 = vmax.f32 %v608_v19, 0.0  ;;  %v547_v26 = vadd.f32 %v1064_v47, %v546_v22  ;;  %v611_v27 = vadd.f32 %v1064_v47, %v610_v23  ;;  %v548_v28 = vpop.f32.mrb[11].mxu0  ;;  %v612_v29 = vpop.f32.mrb[11].mxu1 }
 0x116   : > { %691 = vst.msk [vmem:[%s1073_s17 + $0x20] sm:$0xff] %vm686_vm3, %v658_v24  ;;  %707 = vst.msk [vmem:[%s1073_s17 + $0xa0] sm:$0xff] %vm686_vm3, %v674_v25  ;;  %v659_v30 = vmax.f32 %v547_v26, 0.0  ;;  %v675_v31 = vmax.f32 %v611_v27, 0.0 }
 0x118   : > { %692 = vst.msk [vmem:[%s1073_s17 + $0x28] sm:$0xff] %vm686_vm3, %v659_v30  ;;  %708 = vst.msk [vmem:[%s1073_s17 + $0xa8] sm:$0xff] %vm686_vm3, %v675_v31 }
 0x119   : > { %v551_v32 = vpop.f32.mrb[12].mxu0  ;;  %v615_v33 = vpop.f32.mrb[12].mxu1 }
 0x11a   : > { %v552_v34 = vadd.f32 %v1064_v47, %v551_v32  ;;  %v616_v35 = vadd.f32 %v1064_v47, %v615_v33  ;;  %v553_v36 = vpop.f32.mrb[13].mxu0  ;;  %v617_v37 = vpop.f32.mrb[13].mxu1 }
 0x11b   : > { %v554_v38 = vpop.f32.mrb[14].mxu0  ;;  %v618_v39 = vpop.f32.mrb[14].mxu1 }
 0x11c   : > { %v660_v40 = vmax.f32 %v552_v34, 0.0  ;;  %v676_v41 = vmax.f32 %v616_v35, 0.0  ;;  %v555_v42 = vadd.f32 %v1064_v47, %v554_v38  ;;  %v619_v43 = vadd.f32 %v1064_v47, %v618_v39  ;;  %v556_v44 = vpop.f32.mrb[15].mxu0  ;;  %v620_v45 = vpop.f32.mrb[15].mxu1 }
 0x11e   : > { %693 = vst.msk [vmem:[%s1073_s17 + $0x30] sm:$0xff] %vm686_vm3, %v660_v40  ;;  %709 = vst.msk [vmem:[%s1073_s17 + $0xb0] sm:$0xff] %vm686_vm3, %v676_v41  ;;  %v661_v46 = vmax.f32 %v555_v42, 0.0  ;;  %v677_v48 = vmax.f32 %v619_v43, 0.0 }
 0x120   : > { %694 = vst.msk [vmem:[%s1073_s17 + $0x38] sm:$0xff] %vm686_vm3, %v661_v46  ;;  %710 = vst.msk [vmem:[%s1073_s17 + $0xb8] sm:$0xff] %vm686_vm3, %v677_v48 }
 0x121   : > { %v559_v49 = vpop.f32.mrb[16].mxu0  ;;  %v623_v50 = vpop.f32.mrb[16].mxu1 }
 0x122   : > { %v560_v51 = vadd.f32 %v1064_v47, %v559_v49  ;;  %v624_v52 = vadd.f32 %v1064_v47, %v623_v50  ;;  %v561_v53 = vpop.f32.mrb[17].mxu0  ;;  %v625_v54 = vpop.f32.mrb[17].mxu1 }
 0x123   : > { %v562_v55 = vpop.f32.mrb[18].mxu0  ;;  %v626_v56 = vpop.f32.mrb[18].mxu1 }
 0x124   : > { %v662_v57 = vmax.f32 %v560_v51, 0.0  ;;  %v678_v58 = vmax.f32 %v624_v52, 0.0  ;;  %v563_v59 = vadd.f32 %v1064_v47, %v562_v55  ;;  %v627_v60 = vadd.f32 %v1064_v47, %v626_v56  ;;  %v564_v61 = vpop.f32.mrb[19].mxu0  ;;  %v628_v62 = vpop.f32.mrb[19].mxu1 }
 0x126   : > { %695 = vst.msk [vmem:[%s1073_s17 + $0x40] sm:$0xff] %vm686_vm3, %v662_v57  ;;  %711 = vst.msk [vmem:[%s1073_s17 + $0xc0] sm:$0xff] %vm686_vm3, %v678_v58  ;;  %v663_v63 = vmax.f32 %v563_v59, 0.0  ;;  %v679_v0 = vmax.f32 %v627_v60, 0.0 }
 0x128   : > { %696 = vst.msk [vmem:[%s1073_s17 + $0x48] sm:$0xff] %vm686_vm3, %v663_v63  ;;  %712 = vst.msk [vmem:[%s1073_s17 + $0xc8] sm:$0xff] %vm686_vm3, %v679_v0 }
 0x129   : > { %v567_v1 = vpop.f32.mrb[20].mxu0  ;;  %v631_v2 = vpop.f32.mrb[20].mxu1 }
 0x12a   : > { %v568_v3 = vadd.f32 %v1064_v47, %v567_v1  ;;  %v632_v4 = vadd.f32 %v1064_v47, %v631_v2  ;;  %v569_v5 = vpop.f32.mrb[21].mxu0  ;;  %v633_v6 = vpop.f32.mrb[21].mxu1 }
 0x12b   : > { %v570_v7 = vpop.f32.mrb[22].mxu0  ;;  %v634_v8 = vpop.f32.mrb[22].mxu1 }
 0x12c   : > { %v664_v9 = vmax.f32 %v568_v3, 0.0  ;;  %v680_v10 = vmax.f32 %v632_v4, 0.0  ;;  %v571_v11 = vadd.f32 %v1064_v47, %v570_v7  ;;  %v635_v12 = vadd.f32 %v1064_v47, %v634_v8  ;;  %v572_v13 = vpop.f32.mrb[23].mxu0  ;;  %v636_v14 = vpop.f32.mrb[23].mxu1 }
 0x12e   : > { %697 = vst.msk [vmem:[%s1073_s17 + $0x50] sm:$0xff] %vm686_vm3, %v664_v9  ;;  %713 = vst.msk [vmem:[%s1073_s17 + $0xd0] sm:$0xff] %vm686_vm3, %v680_v10  ;;  %v665_v15 = vmax.f32 %v571_v11, 0.0  ;;  %v681_v16 = vmax.f32 %v635_v12, 0.0 }
 0x130   : > { %698 = vst.msk [vmem:[%s1073_s17 + $0x58] sm:$0xff] %vm686_vm3, %v665_v15  ;;  %714 = vst.msk [vmem:[%s1073_s17 + $0xd8] sm:$0xff] %vm686_vm3, %v681_v16 }
 0x131   : > { %v575_v17 = vpop.f32.mrb[24].mxu0  ;;  %v639_v18 = vpop.f32.mrb[24].mxu1 }
 0x132   : > { %v576_v19 = vadd.f32 %v1064_v47, %v575_v17  ;;  %v640_v20 = vadd.f32 %v1064_v47, %v639_v18  ;;  %v577_v21 = vpop.f32.mrb[25].mxu0  ;;  %v641_v22 = vpop.f32.mrb[25].mxu1 }
 0x133   : > { %v578_v23 = vpop.f32.mrb[26].mxu0  ;;  %v642_v24 = vpop.f32.mrb[26].mxu1 }
 0x134   : > { %v666_v25 = vmax.f32 %v576_v19, 0.0  ;;  %v682_v26 = vmax.f32 %v640_v20, 0.0  ;;  %v579_v27 = vadd.f32 %v1064_v47, %v578_v23  ;;  %v643_v28 = vadd.f32 %v1064_v47, %v642_v24  ;;  %v580_v29 = vpop.f32.mrb[27].mxu0  ;;  %v644_v30 = vpop.f32.mrb[27].mxu1 }
 0x136   : > { %699 = vst.msk [vmem:[%s1073_s17 + $0x60] sm:$0xff] %vm686_vm3, %v666_v25  ;;  %715 = vst.msk [vmem:[%s1073_s17 + $0xe0] sm:$0xff] %vm686_vm3, %v682_v26  ;;  %v667_v31 = vmax.f32 %v579_v27, 0.0  ;;  %v683_v32 = vmax.f32 %v643_v28, 0.0 }
 0x138   : > { %700 = vst.msk [vmem:[%s1073_s17 + $0x68] sm:$0xff] %vm686_vm3, %v667_v31  ;;  %716 = vst.msk [vmem:[%s1073_s17 + $0xe8] sm:$0xff] %vm686_vm3, %v683_v32 }
 0x139   : > { %v583_v33 = vpop.f32.mrb[28].mxu0  ;;  %v647_v34 = vpop.f32.mrb[28].mxu1 }
 0x13a   : > { %v584_v35 = vadd.f32 %v1064_v47, %v583_v33  ;;  %v648_v36 = vadd.f32 %v1064_v47, %v647_v34  ;;  %v585_v37 = vpop.f32.mrb[29].mxu0  ;;  %v649_v38 = vpop.f32.mrb[29].mxu1 }
 0x13b   : > { %v586_v39 = vpop.f32.mrb[30].mxu0  ;;  %v650_v40 = vpop.f32.mrb[30].mxu1 }
 0x13c   : > { %v668_v41 = vmax.f32 %v584_v35, 0.0  ;;  %v684_v42 = vmax.f32 %v648_v36, 0.0  ;;  %v587_v43 = vadd.f32 %v1064_v47, %v586_v39  ;;  %v651_v44 = vadd.f32 %v1064_v47, %v650_v40  ;;  %v588_v45 = vpop.f32.mrb[31].mxu0  ;;  %v652_v46 = vpop.f32.mrb[31].mxu1 }
 0x13e   : > { %701 = vst.msk [vmem:[%s1073_s17 + $0x70] sm:$0xff] %vm686_vm3, %v668_v41  ;;  %717 = vst.msk [vmem:[%s1073_s17 + $0xf0] sm:$0xff] %vm686_vm3, %v684_v42  ;;  %v669_v48 = vmax.f32 %v587_v43, 0.0  ;;  %v685_v49 = vmax.f32 %v651_v44, 0.0 }
 0x140   : > { %702 = vst.msk [vmem:[%s1073_s17 + $0x78] sm:$0xff] %vm686_vm3, %v669_v48  ;;  %718 = vst.msk [vmem:[%s1073_s17 + $0xf8] sm:$0xff] %vm686_vm3, %v685_v49 }
 0x141 PF: > { %s13_s12 = sadd.s32 1, %s941_s12  }
 0x142   : > { %p10_p4 = scmp.ge.s32.totalorder %s13_s12, 4  }
 0x144   :  { %12 = sbr.rel (!%p10_p4) target bundleno = 1 (0x1), region = 62 }

// kernel: net_forward.6
= control target key start
LH: loop header
LB: loop body
LE: loop exit
PB: predicated region body
PF: predicated region fallthrough
CT: control target
= control target key end

     0   :  { %s4424_s12 = smov 0   ;;  %s5227_s0 = inlined_call_operand.vmem [shape: f32[2,324,32], index: 0, kind: input, shape index: {}]   ;;  %s5228_s1 = inlined_call_operand.vmem [shape: bf16[3,3,32,64], index: 1, kind: input, shape index: {}]   ;;  %s5229_s2 = inlined_call_operand.vmem [shape: f32[1,64], index: 2, kind: input, shape index: {}]   ;;  %s5230_s3 = inlined_call_operand.vmem [shape: f32[2,286,64], index: 3, kind: output, shape index: {}]  }
   0x1 LB: > { %s3314_s13 = sadd.s32 4294967295, %s4402_s12   ;;  %p3318_p0 = scmp.ge.s32.totalorder %s4402_s12, 1  ;;  %s4402_s12 = sphi %s4424_s12, %s13_s12  }
   0x2   : > { %p137_p1 = scmp.lt.s32.totalorder %s4402_s12, 3 }
   0x4   : > { %p138_p2 = pnand %p3318_p0, %p137_p1 }
   0x5   : > { %v4378_v0 = vld [vmem:[%s5228_s1 + $0x10] sm:$0xff] (!%p138_p2)   ;;  %p161_p3 = scmp.lt.s32.totalorder (!%p138_p2), %s3314_s13, 1  ;;  %v4438_v1 = vld [vmem:[%s5228_s1 + $0x40] sm:$0xff] (!%p138_p2)   ;;  %v4380_v2 = vld [vmem:[%s5228_s1 + $0x18] sm:$0xff] (!%p138_p2)   ;;  %vm301_vm0 = vcmask (!%p138_p2), 261120   ;;  %vm3221_vm1 = vcmask (!%p138_p2), 523264  }
   0x6   : > { %141 = sbr.rel (%p138_p2) target bundleno = 564 (0x234), region = 32  ;;  %3716 = vmatprep.subr.bf16.mxu1 (!%p138_p2), %v4378_v0  ;;  %3876 = vmatprep.subr.bf16.mxu0 (!%p138_p2), %v4438_v1  ;;  %v4449_v3 = vld [vmem:[%s5228_s1 + $0x48] sm:$0xff] (!%p138_p2)   ;;  %v4382_v4 = vld [vmem:[%s5228_s1 + $0x50] sm:$0xff] (!%p138_p2)   ;;  %v4383_v5 = vld [vmem:[%s5228_s1] sm:$0xff] (!%p138_p2)   ;;  %vm3257_vm2 = vcmask (!%p138_p2), 521216  }
   0x7   : > { %3717 = vmatpush3.bf16.msra.mxu1 (!%p138_p2), %v4378_v0  ;;  %3877 = vmatpush3.bf16.msra.mxu0 (!%p138_p2), %v4438_v1  ;;  %v4384_v13 = vld [vmem:[%s5228_s1 + $0x58] sm:$0xff] (!%p138_p2)   ;;  %v4510_v46 = vld [vmem:[%s5228_s1 + $0x60] sm:$0xff] (!%p138_p2)   ;;  %v4386_v49 = vld [vmem:[%s5228_s1 + $0x8] sm:$0xff] (!%p138_p2)  }
   0x8   : > { %3718 = vmatprep.subr.bf16.mxu1 (!%p138_p2), %v4380_v2  ;;  %3878 = vmatprep.subr.bf16.mxu0 (!%p138_p2), %v4449_v3 }
   0xb   : > { %3719 = vmatpush3.bf16.msra.mxu1 (!%p138_p2), %v4380_v2  ;;  %3879 = vmatpush3.bf16.msra.mxu0 (!%p138_p2), %v4449_v3 }
   0xc   : > { %3756 = vmatprep.subr.bf16.mxu1 (!%p138_p2), %v4383_v5  ;;  %3916 = vmatprep.subr.bf16.mxu0 (!%p138_p2), %v4382_v4 }
   0xd   : > { %s5232_s13 = smov (!%p161_p3, %s3314_s13), 1 }
   0xe   : > { %s4368_s22 = smul.u32 328, %s5232_s13 }
  0x10   : > { %s4463_s29 = scalar_lea.vmem %s5227_s0, %s4368_s22 }
  0x11   : > { %v230_v6 = vld [vmem:[%s4463_s29 + $0x1] sm:$0xff]  ;;  %v231_v7 = vld [vmem:[%s4463_s29 + $0x9] sm:$0xff]  ;;  %v1452_v8 = vld [vmem:[%s4463_s29 + $0x13] sm:$0xff] }
  0x12   : > { %v266_v9 = vpack.c.bf16 %v231_v7, %v230_v6  ;;  %v1453_v10 = vld [vmem:[%s4463_s29 + $0x1b] sm:$0xff]  ;;  %v232_v11 = vld [vmem:[%s4463_s29 + $0x11] sm:$0xff]  ;;  %v1454_v16 = vld [vmem:[%s4463_s29 + $0x23] sm:$0xff] }
  0x13   : > { %v233_v12 = vld [vmem:[%s4463_s29 + $0x19] sm:$0xff]  ;;  %v1488_v14 = vpack.c.bf16 %v1453_v10, %v1452_v8  ;;  %v1455_v17 = vld [vmem:[%s4463_s29 + $0x2b] sm:$0xff]  ;;  %v234_v18 = vld [vmem:[%s4463_s29 + $0x21] sm:$0xff] }
  0x14   : > { %v267_v15 = vpack.c.bf16 %v233_v12, %v232_v11  ;;  %3720 = vmatprep.mubr.msk.bf16.mxu1 %vm301_vm0, %v266_v9  ;;  %v1489_v19 = vpack.c.bf16 %v1455_v17, %v1454_v16  ;;  %v235_v20 = vld [vmem:[%s4463_s29 + $0x29] sm:$0xff]  ;;  %v1456_v21 = vld [vmem:[%s4463_s29 + $0x33] sm:$0xff]  ;;  %v1457_v22 = vld [vmem:[%s4463_s29 + $0x3b] sm:$0xff] }
  0x15   : > { %3880 = vmatprep.mubr.msk.bf16.mxu0 %vm301_vm0, %v1488_v14  ;;  %v268_v23 = vpack.c.bf16 %v235_v20, %v234_v18  ;;  %v1490_v24 = vpack.c.bf16 %v1457_v22, %v1456_v21  ;;  %v236_v25 = vld [vmem:[%s4463_s29 + $0x31] sm:$0xff]  ;;  %v237_v26 = vld [vmem:[%s4463_s29 + $0x39] sm:$0xff]  ;;  %v1458_v27 = vld [vmem:[%s4463_s29 + $0x43] sm:$0xff] }
  0x16   : > { %3721 = vmatmul.mubr.msk.bf16.vlgmr.msra.gmra.mrb[0].mxu1 %vm301_vm0, %v267_v15  ;;  %3881 = vmatmul.mubr.msk.bf16.vlgmr.msra.gmra.mrb[0].mxu0 %vm301_vm0, %v1489_v19  ;;  %v1459_v28 = vld [vmem:[%s4463_s29 + $0x4b] sm:$0xff]  ;;  %v238_v29 = vld [vmem:[%s4463_s29 + $0x41] sm:$0xff]  ;;  %v1460_v31 = vld [vmem:[%s4463_s29 + $0x53] sm:$0xff]  ;;  %v269_v33 = vpack.c.bf16 %v237_v26, %v236_v25 }
  0x17   : > { %3757 = vmatpush3.bf16.msra.mxu1 %v4383_v5  ;;  %3917 = vmatpush3.bf16.msra.mxu0 %v4382_v4  ;;  %v239_v30 = vld [vmem:[%s4463_s29 + $0x49] sm:$0xff]  ;;  %v1461_v32 = vld [vmem:[%s4463_s29 + $0x5b] sm:$0xff]  ;;  %v1491_v34 = vpack.c.bf16 %v1459_v28, %v1458_v27  ;;  %v240_v37 = vld [vmem:[%s4463_s29 + $0x51] sm:$0xff] }
  0x18   : > { %3724 = vmatprep.mubr.msk.bf16.mxu1 %vm301_vm0, %v268_v23  ;;  %3884 = vmatprep.mubr.msk.bf16.mxu0 %vm301_vm0, %v1490_v24  ;;  %v270_v35 = vpack.c.bf16 %v239_v30, %v238_v29  ;;  %v1492_v36 = vpack.c.bf16 %v1461_v32, %v1460_v31  ;;  %v241_v38 = vld [vmem:[%s4463_s29 + $0x59] sm:$0xff]  ;;  %v1462_v39 = vld [vmem:[%s4463_s29 + $0x63] sm:$0xff]  ;;  %v1463_v40 = vld [vmem:[%s4463_s29 + $0x6b] sm:$0xff] }
  0x19   : > { %3918 = vmatprep.subr.bf16.mxu0 %v4384_v13  ;;  %v242_v41 = vld [vmem:[%s4463_s29 + $0x61] sm:$0xff]  ;;  %v243_v42 = vld [vmem:[%s4463_s29 + $0x69] sm:$0xff]  ;;  %v1464_v43 = vld [vmem:[%s4463_s29 + $0x73] sm:$0xff]  ;;  %v271_v45 = vpack.c.bf16 %v241_v38, %v240_v37  ;;  %v1493_v47 = vpack.c.bf16 %v1463_v40, %v1462_v39  ;;  %3758 = vmatprep.subr.bf16.mxu1 %v4386_v49 }
  0x1a   : > { %v1465_v44 = vld [vmem:[%s4463_s29 + $0x7b] sm:$0xff]  ;;  %v272_v48 = vpack.c.bf16 %v243_v42, %v242_v41  ;;  %v244_v51 = vld [vmem:[%s4463_s29 + $0x71] sm:$0xff]  ;;  %v1466_v53 = vld [vmem:[%s4463_s29 + $0x83] sm:$0xff] }
  0x1b   : > { %3919 = vmatpush3.bf16.msra.mxu0 %v4384_v13  ;;  %v1494_v50 = vpack.c.bf16 %v1465_v44, %v1464_v43  ;;  %v245_v52 = vld [vmem:[%s4463_s29 + $0x79] sm:$0xff]  ;;  %v1467_v54 = vld [vmem:[%s4463_s29 + $0x8b] sm:$0xff]  ;;  %v246_v55 = vld [vmem:[%s4463_s29 + $0x81] sm:$0xff]  ;;  %3759 = vmatpush3.bf16.msra.mxu1 %v4386_v49 }
  0x1c   : > { %3956 = vmatprep.subr.bf16.mxu0 %v4510_v46  ;;  %v247_v56 = vld [vmem:[%s4463_s29 + $0x89] sm:$0xff]  ;;  %v1468_v57 = vld [vmem:[%s4463_s29 + $0x93] sm:$0xff]  ;;  %v1469_v58 = vld [vmem:[%s4463_s29 + $0x9b] sm:$0xff]  ;;  %v273_v59 = vpack.c.bf16 %v245_v52, %v244_v51  ;;  %v1495_v60 = vpack.c.bf16 %v1467_v54, %v1466_v53 }
  0x1d   : > { %v274_v61 = vpack.c.bf16 %v247_v56, %v246_v55  ;;  %v1496_v62 = vpack.c.bf16 %v1469_v58, %v1468_v57  ;;  %v248_v63 = vld [vmem:[%s4463_s29 + $0x91] sm:$0xff]  ;;  %v249_v0 = vld [vmem:[%s4463_s29 + $0x99] sm:$0xff]  ;;  %v1470_v2 = vld [vmem:[%s4463_s29 + $0xa3] sm:$0xff] }
  0x1e   : > { %3725 = vmatmul.mubr.msk.bf16.gmra.mrb[4].mxu1 %vm301_vm0, %v269_v33  ;;  %3885 = vmatmul.mubr.msk.bf16.gmra.mrb[4].mxu0 %vm301_vm0, %v1491_v34  ;;  %v1471_v4 = vld [vmem:[%s4463_s29 + $0xab] sm:$0xff]  ;;  %v250_v5 = vld [vmem:[%s4463_s29 + $0xa1] sm:$0xff]  ;;  %v1790_v7 = vld [vmem:[%s4463_s29 + $0x14] sm:$0xff]  ;;  %v275_v9 = vpack.c.bf16 %v249_v0, %v248_v63 }
  0x1f   : > { %3728 = vmatprep.mubr.msk.bf16.mxu1 %vm301_vm0, %v270_v35  ;;  %3888 = vmatprep.mubr.msk.bf16.mxu0 %vm301_vm0, %v1492_v36  ;;  %v251_v6 = vld [vmem:[%s4463_s29 + $0xa9] sm:$0xff]  ;;  %v1791_v8 = vld [vmem:[%s4463_s29 + $0x1c] sm:$0xff]  ;;  %v1497_v11 = vpack.c.bf16 %v1471_v4, %v1470_v2  ;;  %v252_v14 = vld [vmem:[%s4463_s29 + $0xb1] sm:$0xff] }
  0x20   : > { %v4543_v10 = vld [vmem:[%s5228_s1 + $0x20] sm:$0xff]   ;;  %v276_v12 = vpack.c.bf16 %v251_v6, %v250_v5  ;;  %v1826_v13 = vpack.c.bf16 %v1791_v8, %v1790_v7  ;;  %v1793_v17 = vld [vmem:[%s4463_s29 + $0x2c] sm:$0xff]  ;;  %v1794_v20 = vld [vmem:[%s4463_s29 + $0x34] sm:$0xff] }
  0x21   : > { %3796 = vmatprep.subr.bf16.mxu1 %v4543_v10  ;;  %v253_v15 = vld [vmem:[%s4463_s29 + $0xb9] sm:$0xff]  ;;  %v1792_v16 = vld [vmem:[%s4463_s29 + $0x24] sm:$0xff]  ;;  %v256_v27 = vld [vmem:[%s4463_s29 + $0xd1] sm:$0xff] }
  0x22   : > { %v254_v18 = vld [vmem:[%s4463_s29 + $0xc1] sm:$0xff]  ;;  %v255_v19 = vld [vmem:[%s4463_s29 + $0xc9] sm:$0xff]  ;;  %v277_v22 = vpack.c.bf16 %v253_v15, %v252_v14  ;;  %v4558_v23 = vpack.c.bf16 %v1793_v17, %v1792_v16  ;;  %v257_v28 = vld [vmem:[%s4463_s29 + $0xd9] sm:$0xff] }
  0x23   : > { %v1795_v21 = vld [vmem:[%s4463_s29 + $0x3c] sm:$0xff]  ;;  %v278_v24 = vpack.c.bf16 %v255_v19, %v254_v18  ;;  %v4387_v26 = vld [vmem:[%s5228_s1 + $0x68] sm:$0xff]   ;;  %v1798_v33 = vld [vmem:[%s4463_s29 + $0x54] sm:$0xff]  ;;  %v279_v36 = vpack.c.bf16 %v257_v28, %v256_v27 }
  0x24   : > { %v4560_v25 = vpack.c.bf16 %v1795_v21, %v1794_v20  ;;  %v1796_v29 = vld [vmem:[%s4463_s29 + $0x44] sm:$0xff]  ;;  %v1797_v30 = vld [vmem:[%s4463_s29 + $0x4c] sm:$0xff]  ;;  %v1799_v34 = vld [vmem:[%s4463_s29 + $0x5c] sm:$0xff] }
  0x25   : > { %v258_v31 = vld [vmem:[%s4463_s29 + $0xe1] sm:$0xff]  ;;  %v259_v32 = vld [vmem:[%s4463_s29 + $0xe9] sm:$0xff]  ;;  %v4585_v37 = vpack.c.bf16 %v1797_v30, %v1796_v29  ;;  %v4587_v39 = vpack.c.bf16 %v1799_v34, %v1798_v33  ;;  %v260_v40 = vld [vmem:[%s4463_s29 + $0xf1] sm:$0xff] }
  0x26   : > { %3729 = vmatmul.mubr.msk.bf16.gmra.mrb[8].mxu1 %vm301_vm0, %v271_v45  ;;  %3889 = vmatmul.mubr.msk.bf16.gmra.mrb[8].mxu0 %vm301_vm0, %v1493_v47  ;;  %v4583_v35 = vld [vmem:[%s5228_s1 + $0x70] sm:$0xff]   ;;  %v280_v38 = vpack.c.bf16 %v259_v32, %v258_v31  ;;  %v261_v41 = vld [vmem:[%s4463_s29 + $0xf9] sm:$0xff]  ;;  %v1800_v42 = vld [vmem:[%s4463_s29 + $0x64] sm:$0xff] }
  0x27   : > { %3732 = vmatprep.mubr.msk.bf16.mxu1 %vm301_vm0, %v272_v48  ;;  %3892 = vmatprep.mubr.msk.bf16.mxu0 %vm301_vm0, %v1494_v50  ;;  %v1801_v43 = vld [vmem:[%s4463_s29 + $0x6c] sm:$0xff]  ;;  %v262_v44 = vld [vmem:[%s4463_s29 + $0x101] sm:$0xff]  ;;  %v281_v48 = vpack.c.bf16 %v261_v41, %v260_v40  ;;  %v265_v53 = vld [vmem:[%s4463_s29 + $0x119] sm:$0x3f] }
  0x28   : > { %v263_v45 = vld [vmem:[%s4463_s29 + $0x109] sm:$0xff]  ;;  %v1803_v47 = vld [vmem:[%s4463_s29 + $0x7c] sm:$0xff]  ;;  %v4604_v49 = vpack.c.bf16 %v1801_v43, %v1800_v42  ;;  %v264_v52 = vld [vmem:[%s4463_s29 + $0x111] sm:$0xff] }
  0x29   : > { %v282_v50 = vpack.c.bf16 %v263_v45, %v262_v44  ;;  %v1804_v54 = vld [vmem:[%s4463_s29 + $0x84] sm:$0xff]  ;;  %v1805_v55 = vld [vmem:[%s4463_s29 + $0x8c] sm:$0xff]  ;;  %v1806_v58 = vld [vmem:[%s4463_s29 + $0x94] sm:$0xff] }
  0x2a   : > { %v172_v56 = vld [vmem:[%s4463_s29] sm:$0xff]  ;;  %v173_v57 = vld [vmem:[%s4463_s29 + $0x8] sm:$0xff]  ;;  %v174_v0 = vld [vmem:[%s4463_s29 + $0x10] sm:$0xff] }
  0x2b   : > { %v175_v2 = vld [vmem:[%s4463_s29 + $0x18] sm:$0xff]  ;;  %v1808_v4 = vld [vmem:[%s4463_s29 + $0xa4] sm:$0xff]  ;;  %v1809_v5 = vld [vmem:[%s4463_s29 + $0xac] sm:$0xff] }
  0x2c   : > { %v176_v6 = vld [vmem:[%s4463_s29 + $0x20] sm:$0xff]  ;;  %v177_v7 = vld [vmem:[%s4463_s29 + $0x28] sm:$0xff]  ;;  %v1810_v8 = vld [vmem:[%s4463_s29 + $0xb4] sm:$0xff] }
  0x2d   : > { %v4390_v15 = vld [vmem:[%s5228_s1 + $0x28] sm:$0xff]   ;;  %v178_v16 = vld [vmem:[%s4463_s29 + $0x30] sm:$0xff]  ;;  %v179_v17 = vld [vmem:[%s4463_s29 + $0x38] sm:$0xff] }
  0x2e   : > { %3733 = vmatmul.mubr.msk.bf16.gmra.mrb[12].mxu1 %vm301_vm0, %v273_v59  ;;  %3893 = vmatmul.mubr.msk.bf16.gmra.mrb[12].mxu0 %vm301_vm0, %v1495_v60  ;;  %v1807_v59 = vld [vmem:[%s4463_s29 + $0x9c] sm:$0xff]  ;;  %v283_v60 = vpack.c.bf16 %v265_v53, %v264_v52  ;;  %v1812_v18 = vld [vmem:[%s4463_s29 + $0xc4] sm:$0xff]  ;;  %v1813_v19 = vld [vmem:[%s4463_s29 + $0xcc] sm:$0xff]  ;;  %v211_v27 = vpack.c.bf16 %v179_v17, %v178_v16 }
  0x2f   : > { %3736 = vmatprep.mubr.msk.bf16.mxu1 %vm301_vm0, %v274_v61  ;;  %3896 = vmatprep.mubr.msk.bf16.mxu0 %vm301_vm0, %v1496_v62  ;;  %v4622_v61 = vpack.c.bf16 %v1805_v55, %v1804_v54  ;;  %v208_v62 = vpack.c.bf16 %v173_v57, %v172_v56  ;;  %v4624_v63 = vpack.c.bf16 %v1807_v59, %v1806_v58  ;;  %v180_v20 = vld [vmem:[%s4463_s29 + $0x40] sm:$0xff]  ;;  %v181_v21 = vld [vmem:[%s4463_s29 + $0x48] sm:$0xff]  ;;  %v182_v30 = vld [vmem:[%s4463_s29 + $0x50] sm:$0xff] }
  0x30   : > { %v4667_v28 = vpack.c.bf16 %v1813_v19, %v1812_v18  ;;  %v183_v31 = vld [vmem:[%s4463_s29 + $0x58] sm:$0xff]  ;;  %v1816_v32 = vld [vmem:[%s4463_s29 + $0xe4] sm:$0xff]  ;;  %v1817_v33 = vld [vmem:[%s4463_s29 + $0xec] sm:$0xff] }
  0x31   : > { %v184_v34 = vld [vmem:[%s4463_s29 + $0x60] sm:$0xff]  ;;  %v213_v41 = vpack.c.bf16 %v183_v31, %v182_v30  ;;  %v4686_v42 = vpack.c.bf16 %v1817_v33, %v1816_v32  ;;  %v186_v45 = vld [vmem:[%s4463_s29 + $0x70] sm:$0xff]  ;;  %v189_v52 = vld [vmem:[%s4463_s29 + $0x88] sm:$0xff] }
  0x32   : > { %v1819_v40 = vld [vmem:[%s4463_s29 + $0xfc] sm:$0xff]  ;;  %v1822_v53 = vld [vmem:[%s4463_s29 + $0x114] sm:$0xff]  ;;  %v777_v32 = vld [vmem:[%s4463_s29 + $0xa] sm:$0xff] }
  0x33   : > { %v1823_v54 = vld [vmem:[%s4463_s29 + $0x11c] sm:$0xff]  ;;  %v190_v59 = vld [vmem:[%s4463_s29 + $0x90] sm:$0xff] }
  0x34   : > { %v4706_v58 = vpack.c.bf16 %v1823_v54, %v1822_v53  ;;  %v4391_v17 = vld [vmem:[%s5228_s1 + $0x78] sm:$0xff]   ;;  %v198_v18 = vld [vmem:[%s4463_s29 + $0xd0] sm:$0xff]  ;;  %v792_v54 = vld [vmem:[%s4463_s29 + $0x82] sm:$0xff] }
  0x35   : > { %v199_v19 = vld [vmem:[%s4463_s29 + $0xd8] sm:$0xff] }
  0x36   : > { %3737 = vmatmul.mubr.msk.bf16.gmra.mrb[16].mxu1 %vm301_vm0, %v275_v9  ;;  %3897 = vmatmul.mubr.msk.bf16.gmra.mrb[16].mxu0 %vm301_vm0, %v1497_v11  ;;  %v1811_v9 = vld [vmem:[%s4463_s29 + $0xbc] sm:$0xff]  ;;  %v209_v11 = vpack.c.bf16 %v175_v2, %v174_v0  ;;  %v1825_v0 = vld [vmem:[%s4463_s29 + $0x12c] sm:$0x3f] }
  0x37   : > { %3740 = vmatprep.mubr.msk.bf16.mxu1 %vm301_vm0, %v276_v12  ;;  %3920 = vmatprep.mubr.msk.bf16.mxu0 %vm301_vm0, %v1826_v13  ;;  %v4640_v12 = vpack.c.bf16 %v1809_v5, %v1808_v4  ;;  %v210_v13 = vpack.c.bf16 %v177_v7, %v176_v6  ;;  %v4642_v14 = vpack.c.bf16 %v1811_v9, %v1810_v8  ;;  %v192_v2 = vld [vmem:[%s4463_s29 + $0xa0] sm:$0xff]  ;;  %v193_v4 = vld [vmem:[%s4463_s29 + $0xa8] sm:$0xff]  ;;  %v194_v8 = vld [vmem:[%s4463_s29 + $0xb0] sm:$0xff] }
  0x38   : > { %v218_v7 = vpack.c.bf16 %v193_v4, %v192_v2  ;;  %v195_v9 = vld [vmem:[%s4463_s29 + $0xb8] sm:$0xff] }
  0x39   : > { %v207_v31 = vld [vmem:[%s4463_s29 + $0x118] sm:$0x3f] }
  0x3a   : > { %v2162_v2 = vld [vmem:[%s4463_s29 + $0x134] sm:$0xff]  ;;  %v2163_v4 = vld [vmem:[%s4463_s29 + $0x13c] sm:$0x3f] }
  0x3e   : > { %3741 = vmatmul.mubr.msk.bf16.gmra.mrb[20].mxu1 %vm301_vm0, %v277_v22  ;;  %3921 = vmatmul.mubr.msk.bf16.vlgmr.msra.gmra.mrb[0].mxu0 %vm301_vm0, %v4558_v23  ;;  %v1814_v22 = vld [vmem:[%s4463_s29 + $0xd4] sm:$0xff] }
  0x3f   : > { %3744 = vmatprep.mubr.msk.bf16.mxu1 %vm301_vm0, %v278_v24  ;;  %3957 = vmatpush3.bf16.msra.mxu0 %v4510_v46  ;;  %v1802_v46 = vld [vmem:[%s4463_s29 + $0x74] sm:$0xff]  ;;  %v1815_v24 = vld [vmem:[%s4463_s29 + $0xdc] sm:$0xff] }
  0x40   : > { %3924 = vmatprep.mubr.msk.bf16.mxu0 %vm301_vm0, %v4560_v25  ;;  %3958 = vmatprep.subr.bf16.mxu0 %v4387_v26  ;;  %v4606_v51 = vpack.c.bf16 %v1803_v47, %v1802_v46  ;;  %v4669_v29 = vpack.c.bf16 %v1815_v24, %v1814_v22  ;;  %v187_v46 = vld [vmem:[%s4463_s29 + $0x78] sm:$0xff]  ;;  %v1820_v47 = vld [vmem:[%s4463_s29 + $0x104] sm:$0xff] }
  0x41   : > { %v215_v55 = vpack.c.bf16 %v187_v46, %v186_v45  ;;  %v204_v24 = vld [vmem:[%s4463_s29 + $0x100] sm:$0xff]  ;;  %v785_v46 = vld [vmem:[%s4463_s29 + $0x4a] sm:$0xff] }
  0x42   : > { %v784_v45 = vld [vmem:[%s4463_s29 + $0x42] sm:$0xff] }
  0x43   : > { %3959 = vmatpush3.bf16.msra.mxu0 %v4387_v26  ;;  %v4665_v26 = vld [vmem:[%s5228_s1 + $0x30] sm:$0xff]  }
  0x44   : > { %3996 = vmatprep.subr.bf16.mxu0 %v4583_v35 }
  0x46   : > { %3745 = vmatmul.mubr.msk.bf16.gmra.mrb[24].mxu1 %vm301_vm0, %v279_v36  ;;  %3925 = vmatmul.mubr.msk.bf16.gmra.mrb[4].mxu0 %vm301_vm0, %v4585_v37  ;;  %v185_v36 = vld [vmem:[%s4463_s29 + $0x68] sm:$0xff] }
  0x47   : > { %3748 = vmatprep.mubr.msk.bf16.mxu1 %vm301_vm0, %v280_v38  ;;  %3928 = vmatprep.mubr.msk.bf16.mxu0 %vm301_vm0, %v4587_v39  ;;  %v1818_v38 = vld [vmem:[%s4463_s29 + $0xf4] sm:$0xff]  ;;  %v214_v43 = vpack.c.bf16 %v185_v36, %v184_v34 }
  0x48   : > { %v4688_v44 = vpack.c.bf16 %v1819_v40, %v1818_v38  ;;  %v779_v36 = vld [vmem:[%s4463_s29 + $0x1a] sm:$0xff]  ;;  %v781_v38 = vld [vmem:[%s4463_s29 + $0x2a] sm:$0xff] }
  0x4e   : > { %3749 = vmatmul.mubr.msk.bf16.gmra.mrb[28].mxu1 %vm301_vm0, %v281_v48  ;;  %3929 = vmatmul.mubr.msk.bf16.gmra.mrb[8].mxu0 %vm301_vm0, %v4604_v49  ;;  %v1821_v48 = vld [vmem:[%s4463_s29 + $0x10c] sm:$0xff] }
  0x4f   : > { %3752 = vmatprep.mubr.msk.bf16.mxu1 %vm301_vm0, %v282_v50  ;;  %3932 = vmatprep.mubr.msk.bf16.mxu0 %vm301_vm0, %v4606_v51  ;;  %v188_v50 = vld [vmem:[%s4463_s29 + $0x80] sm:$0xff]  ;;  %v4704_v56 = vpack.c.bf16 %v1821_v48, %v1820_v47 }
  0x50   : > { %v216_v57 = vpack.c.bf16 %v189_v52, %v188_v50  ;;  %v788_v48 = vld [vmem:[%s4463_s29 + $0x62] sm:$0xff]  ;;  %v789_v50 = vld [vmem:[%s4463_s29 + $0x6a] sm:$0xff] }
  0x51   : > { %v4821_v53 = vpack.c.bf16 %v789_v50, %v788_v48 }
  0x56   : > { %3753 = vmatmul.mubr.msk.bf16.gmra.mrb[32].mxu1 %vm301_vm0, %v283_v60  ;;  %3933 = vmatmul.mubr.msk.bf16.gmra.mrb[12].mxu0 %vm301_vm0, %v4622_v61  ;;  %v191_v60 = vld [vmem:[%s4463_s29 + $0x98] sm:$0xff] }
  0x57   : > { %3760 = vmatprep.mubr.msk.bf16.mxu1 %vm301_vm0, %v208_v62  ;;  %3936 = vmatprep.mubr.msk.bf16.mxu0 %vm301_vm0, %v4624_v63  ;;  %v4715_v62 = vld [vmem:[%s4463_s29 + $0x124] sm:$0xff]  ;;  %v217_v5 = vpack.c.bf16 %v191_v60, %v190_v59 }
  0x58   : > { %v1843_v6 = vpack.c.bf16 %v1825_v0, %v4715_v62  ;;  %v795_v0 = vld [vmem:[%s4463_s29 + $0x9a] sm:$0xff] }
  0x5e   : > { %3761 = vmatmul.mubr.msk.bf16.vlgmr.msra.gmra.mrb[0].mxu1 %vm301_vm0, %v209_v11  ;;  %3937 = vmatmul.mubr.msk.bf16.gmra.mrb[16].mxu0 %vm301_vm0, %v4640_v12  ;;  %v196_v11 = vld [vmem:[%s4463_s29 + $0xc0] sm:$0xff] }
  0x5f   : > { %3764 = vmatprep.mubr.msk.bf16.mxu1 %vm301_vm0, %v210_v13  ;;  %3940 = vmatprep.mubr.msk.bf16.mxu0 %vm301_vm0, %v4642_v14  ;;  %v197_v13 = vld [vmem:[%s4463_s29 + $0xc8] sm:$0xff] }
  0x60   : > { %3797 = vmatpush3.bf16.msra.mxu1 %v4543_v10  ;;  %v212_v10 = vpack.c.bf16 %v181_v21, %v180_v20  ;;  %v220_v16 = vpack.c.bf16 %v197_v13, %v196_v11  ;;  %v201_v20 = vld [vmem:[%s4463_s29 + $0xe8] sm:$0xff]  ;;  %v221_v21 = vpack.c.bf16 %v199_v19, %v198_v18  ;;  %v798_v13 = vld [vmem:[%s4463_s29 + $0xb2] sm:$0xff] }
  0x61   : > { %3798 = vmatprep.subr.bf16.mxu1 %v4390_v15  ;;  %v800_v18 = vld [vmem:[%s4463_s29 + $0xc2] sm:$0xff]  ;;  %v801_v19 = vld [vmem:[%s4463_s29 + $0xca] sm:$0xff] }
  0x64   : > { %3799 = vmatpush3.bf16.msra.mxu1 %v4390_v15  ;;  %v219_v15 = vpack.c.bf16 %v195_v9, %v194_v8  ;;  %v2181_v8 = vpack.c.bf16 %v2163_v4, %v2162_v2 }
  0x65   : > { %3836 = vmatprep.subr.bf16.mxu1 %v4665_v26 }
  0x66   : > { %3765 = vmatmul.mubr.msk.bf16.gmra.mrb[4].mxu1 %vm301_vm0, %v211_v27  ;;  %3941 = vmatmul.mubr.msk.bf16.gmra.mrb[20].mxu0 %vm301_vm0, %v4667_v28  ;;  %v205_v27 = vld [vmem:[%s4463_s29 + $0x108] sm:$0xff] }
  0x67   : > { %3768 = vmatprep.mubr.msk.bf16.mxu1 %vm301_vm0, %v212_v10  ;;  %3944 = vmatprep.mubr.msk.bf16.mxu0 %vm301_vm0, %v4669_v29  ;;  %v224_v30 = vpack.c.bf16 %v205_v27, %v204_v24  ;;  %v4395_v24 = vld [vmem:[%s5228_s1 + $0x88] sm:$0xff]   ;;  %v802_v27 = vld [vmem:[%s4463_s29 + $0xd2] sm:$0xff] }
  0x6e   : > { %3769 = vmatmul.mubr.msk.bf16.gmra.mrb[8].mxu1 %vm301_vm0, %v213_v41  ;;  %3945 = vmatmul.mubr.msk.bf16.gmra.mrb[24].mxu0 %vm301_vm0, %v4686_v42 }
  0x6f   : > { %3772 = vmatprep.mubr.msk.bf16.mxu1 %vm301_vm0, %v214_v43  ;;  %3948 = vmatprep.mubr.msk.bf16.mxu0 %vm301_vm0, %v4688_v44  ;;  %v4394_v43 = vld [vmem:[%s5228_s1 + $0x38] sm:$0xff]  }
  0x76   : > { %3773 = vmatmul.mubr.msk.bf16.gmra.mrb[12].mxu1 %vm301_vm0, %v215_v55  ;;  %3949 = vmatmul.mubr.msk.bf16.gmra.mrb[28].mxu0 %vm301_vm0, %v4704_v56  ;;  %v793_v55 = vld [vmem:[%s4463_s29 + $0x8a] sm:$0xff] }
  0x77   : > { %3776 = vmatprep.mubr.msk.bf16.mxu1 %vm301_vm0, %v216_v57  ;;  %3952 = vmatprep.mubr.msk.bf16.mxu0 %vm301_vm0, %v4706_v58  ;;  %v2161_v57 = vld [vmem:[%s4463_s29 + $0x12c] sm:$0xff] }
  0x78   : > { %v2180_v60 = vpack.c.bf16 %v2161_v57, %v4715_v62  ;;  %v796_v62 = vld [vmem:[%s4463_s29 + $0xa2] sm:$0xff] }
  0x79   : > { %v2481_v57 = vld [vmem:[%s4463_s29 + $0x9d] sm:$0xff] }
  0x7e   : > { %3777 = vmatmul.mubr.msk.bf16.gmra.mrb[16].mxu1 %vm301_vm0, %v217_v5  ;;  %3953 = vmatmul.mubr.msk.bf16.gmra.mrb[32].mxu0 %vm301_vm0, %v1843_v6  ;;  %v797_v5 = vld [vmem:[%s4463_s29 + $0xaa] sm:$0xff] }
  0x7f   : > { %3780 = vmatprep.mubr.msk.bf16.mxu1 %vm301_vm0, %v218_v7  ;;  %3960 = vmatprep.mubr.msk.bf16.mxu0 %vm301_vm0, %v4558_v23  ;;  %v200_v23 = vld [vmem:[%s4463_s29 + $0xe0] sm:$0xff]  ;;  %v4858_v9 = vpack.c.bf16 %v797_v5, %v796_v62  ;;  %v2484_v62 = vld [vmem:[%s4463_s29 + $0xb5] sm:$0xff] }
  0x80   : > { %v222_v22 = vpack.c.bf16 %v201_v20, %v200_v23  ;;  %v2466_v6 = vld [vmem:[%s4463_s29 + $0x25] sm:$0xff]  ;;  %v2471_v20 = vld [vmem:[%s4463_s29 + $0x4d] sm:$0xff]  ;;  %v2485_v5 = vld [vmem:[%s4463_s29 + $0xbd] sm:$0xff] }
  0x81   : > { %v2470_v23 = vld [vmem:[%s4463_s29 + $0x45] sm:$0xff] }
  0x86   : > { %3781 = vmatmul.mubr.msk.bf16.gmra.mrb[20].mxu1 %vm301_vm0, %v219_v15  ;;  %3961 = vmatmul.mubr.msk.bf16.vlgmr.msra.gmra.mrb[0].mxu0 %vm301_vm0, %v4560_v25  ;;  %v4749_v25 = vld [vmem:[%s5228_s1 + $0x80] sm:$0xff]  }
  0x87   : > { %3784 = vmatprep.mubr.msk.bf16.mxu1 %vm301_vm0, %v220_v16  ;;  %3997 = vmatpush3.bf16.msra.mxu0 %v4583_v35  ;;  %v202_v35 = vld [vmem:[%s4463_s29 + $0xf0] sm:$0xff]  ;;  %v799_v15 = vld [vmem:[%s4463_s29 + $0xba] sm:$0xff] }
  0x88   : > { %3964 = vmatprep.mubr.msk.bf16.mxu0 %vm301_vm0, %v4585_v37  ;;  %3998 = vmatprep.subr.bf16.mxu0 %v4391_v17  ;;  %v203_v37 = vld [vmem:[%s4463_s29 + $0xf8] sm:$0xff] }
  0x89   : > { %v223_v10 = vpack.c.bf16 %v203_v37, %v202_v35  ;;  %v2468_v16 = vld [vmem:[%s4463_s29 + $0x35] sm:$0xff]  ;;  %v4876_v35 = vpack.c.bf16 %v801_v19, %v800_v18  ;;  %v2504_v37 = vpack.c.bf16 %v2471_v20, %v2470_v23  ;;  %v2494_v18 = vld [vmem:[%s4463_s29 + $0x105] sm:$0xff]  ;;  %v2495_v19 = vld [vmem:[%s4463_s29 + $0x10d] sm:$0xff] }
  0x8a   : > { %v2498_v20 = vld [vmem:[%s4463_s29 + $0x125] sm:$0xff] }
  0x8b   : > { %3999 = vmatpush3.bf16.msra.mxu0 %v4391_v17  ;;  %v2469_v17 = vld [vmem:[%s4463_s29 + $0x3d] sm:$0xff] }
  0x8c   : > { %4036 = vmatprep.subr.bf16.mxu0 %v4749_v25 }
  0x8e   : > { %3785 = vmatmul.mubr.msk.bf16.gmra.mrb[24].mxu1 %vm301_vm0, %v221_v21  ;;  %3965 = vmatmul.mubr.msk.bf16.gmra.mrb[4].mxu0 %vm301_vm0, %v4587_v39  ;;  %v206_v39 = vld [vmem:[%s4463_s29 + $0x110] sm:$0xff]  ;;  %v4874_v21 = vpack.c.bf16 %v799_v15, %v798_v13  ;;  %v2489_v13 = vld [vmem:[%s4463_s29 + $0xdd] sm:$0xff]  ;;  %v2490_v15 = vld [vmem:[%s4463_s29 + $0xe5] sm:$0xff] }
  0x8f   : > { %3788 = vmatprep.mubr.msk.bf16.mxu1 %vm301_vm0, %v222_v22  ;;  %3968 = vmatprep.mubr.msk.bf16.mxu0 %vm301_vm0, %v4604_v49  ;;  %v776_v49 = vld [vmem:[%s4463_s29 + $0x2] sm:$0xff]  ;;  %v225_v33 = vpack.c.bf16 %v207_v31, %v206_v39  ;;  %v2503_v22 = vpack.c.bf16 %v2469_v17, %v2468_v16  ;;  %v2491_v16 = vld [vmem:[%s4463_s29 + $0xed] sm:$0xff] }
  0x90   : > { %v812_v34 = vpack.c.bf16 %v777_v32, %v776_v49  ;;  %v2473_v39 = vld [vmem:[%s4463_s29 + $0x5d] sm:$0xff]  ;;  %v805_v49 = vld [vmem:[%s4463_s29 + $0xea] sm:$0xff]  ;;  %v2514_v17 = vpack.c.bf16 %v2491_v16, %v2490_v15 }
  0x91   : > { %v804_v31 = vld [vmem:[%s4463_s29 + $0xe2] sm:$0xff] }
  0x92   : > { %v2474_v32 = vld [vmem:[%s4463_s29 + $0x65] sm:$0xff] }
  0x96   : > { %3789 = vmatmul.mubr.msk.bf16.gmra.mrb[28].mxu1 %vm301_vm0, %v223_v10  ;;  %3969 = vmatmul.mubr.msk.bf16.gmra.mrb[8].mxu0 %vm301_vm0, %v4606_v51  ;;  %v778_v51 = vld [vmem:[%s4463_s29 + $0x12] sm:$0xff]  ;;  %v803_v10 = vld [vmem:[%s4463_s29 + $0xda] sm:$0xff] }
  0x97   : > { %3792 = vmatprep.mubr.msk.bf16.mxu1 %vm301_vm0, %v224_v30  ;;  %3972 = vmatprep.mubr.msk.bf16.mxu0 %vm301_vm0, %v4622_v61  ;;  %v780_v61 = vld [vmem:[%s4463_s29 + $0x22] sm:$0xff]  ;;  %v4782_v40 = vpack.c.bf16 %v779_v36, %v778_v51  ;;  %v2472_v30 = vld [vmem:[%s4463_s29 + $0x55] sm:$0xff] }
  0x98   : > { %v4784_v41 = vpack.c.bf16 %v781_v38, %v780_v61  ;;  %v2505_v51 = vpack.c.bf16 %v2473_v39, %v2472_v30  ;;  %v806_v61 = vld [vmem:[%s4463_s29 + $0xf2] sm:$0xff]  ;;  %v807_v38 = vld [vmem:[%s4463_s29 + $0xfa] sm:$0xff] }
  0x9e   : > { %3793 = vmatmul.mubr.msk.bf16.gmra.mrb[32].mxu1 %vm301_vm0, %v225_v33  ;;  %3973 = vmatmul.mubr.msk.bf16.gmra.mrb[12].mxu0 %vm301_vm0, %v4624_v63  ;;  %v782_v63 = vld [vmem:[%s4463_s29 + $0x32] sm:$0xff] }
  0x9f   : > { %3800 = vmatprep.mubr.msk.bf16.mxu1 %vm301_vm0, %v812_v34  ;;  %3976 = vmatprep.mubr.msk.bf16.mxu0 %vm301_vm0, %v4640_v12  ;;  %v783_v12 = vld [vmem:[%s4463_s29 + $0x3a] sm:$0xff]  ;;  %v2475_v33 = vld [vmem:[%s4463_s29 + $0x6d] sm:$0xff]  ;;  %v4896_v34 = vpack.c.bf16 %v803_v10, %v802_v27 }
  0xa0   : > { %v4802_v47 = vpack.c.bf16 %v783_v12, %v782_v63  ;;  %v2506_v36 = vpack.c.bf16 %v2475_v33, %v2474_v32  ;;  %v2477_v63 = vld [vmem:[%s4463_s29 + $0x7d] sm:$0xff]  ;;  %v2804_v27 = vld [vmem:[%s4463_s29 + $0x26] sm:$0xff]  ;;  %v2805_v10 = vld [vmem:[%s4463_s29 + $0x2e] sm:$0xff] }
  0xa1   : > { %v808_v12 = vld [vmem:[%s4463_s29 + $0x102] sm:$0xff]  ;;  %v2840_v39 = vpack.c.bf16 %v2805_v10, %v2804_v27  ;;  %v1484_v27 = vld [vmem:[%s4463_s29 + $0x113] sm:$0xff] }
  0xa2   : > { %v1485_v10 = vld [vmem:[%s4463_s29 + $0x11b] sm:$0xff] }
  0xa6   : > { %3801 = vmatmul.mubr.msk.bf16.vlgmr.msra.gmra.mrb[0].mxu1 %vm301_vm0, %v4782_v40  ;;  %3977 = vmatmul.mubr.msk.bf16.gmra.mrb[16].mxu0 %vm301_vm0, %v4642_v14  ;;  %v4804_v14 = vpack.c.bf16 %v785_v46, %v784_v45  ;;  %v809_v45 = vld [vmem:[%s4463_s29 + $0x10a] sm:$0xff] }
  0xa7   : > { %3804 = vmatprep.mubr.msk.bf16.mxu1 %vm301_vm0, %v4784_v41  ;;  %3980 = vmatprep.mubr.msk.bf16.mxu0 %vm301_vm0, %v4667_v28  ;;  %v787_v28 = vld [vmem:[%s4463_s29 + $0x5a] sm:$0xff]  ;;  %v2478_v46 = vld [vmem:[%s4463_s29 + $0x85] sm:$0xff]  ;;  %v4916_v50 = vpack.c.bf16 %v809_v45, %v808_v12  ;;  %v2817_v12 = vld [vmem:[%s4463_s29 + $0x8e] sm:$0xff] }
  0xa8   : > { %3837 = vmatpush3.bf16.msra.mxu1 %v4665_v26  ;;  %v786_v26 = vld [vmem:[%s4463_s29 + $0x52] sm:$0xff] }
  0xa9   : > { %3838 = vmatprep.subr.bf16.mxu1 %v4394_v43  ;;  %v4819_v52 = vpack.c.bf16 %v787_v28, %v786_v26  ;;  %v2479_v26 = vld [vmem:[%s4463_s29 + $0x8d] sm:$0xff]  ;;  %v4914_v28 = vpack.c.bf16 %v807_v38, %v806_v61 }
  0xac   : > { %3839 = vmatpush3.bf16.msra.mxu1 %v4394_v43  ;;  %v2476_v43 = vld [vmem:[%s4463_s29 + $0x75] sm:$0xff] }
  0xad   : > { %4076 = vmatprep.subr.bf16.mxu1 %v4438_v1  ;;  %v2507_v48 = vpack.c.bf16 %v2477_v63, %v2476_v43  ;;  %v1147_v43 = vld [vmem:[%s4463_s29 + $0x11a] sm:$0xff]  ;;  %v2816_v63 = vld [vmem:[%s4463_s29 + $0x86] sm:$0xff] }
  0xae   : > { %3805 = vmatmul.mubr.msk.bf16.gmra.mrb[4].mxu1 %vm301_vm0, %v4802_v47  ;;  %3981 = vmatmul.mubr.msk.bf16.gmra.mrb[20].mxu0 %vm301_vm0, %v4669_v29  ;;  %v790_v29 = vld [vmem:[%s4463_s29 + $0x72] sm:$0xff] }
  0xaf   : > { %3808 = vmatprep.mubr.msk.bf16.mxu1 %vm301_vm0, %v4804_v14  ;;  %3984 = vmatprep.mubr.msk.bf16.mxu0 %vm301_vm0, %v4686_v42  ;;  %v791_v42 = vld [vmem:[%s4463_s29 + $0x7a] sm:$0xff] }
  0xb0   : > { %v4836_v59 = vpack.c.bf16 %v791_v42, %v790_v29  ;;  %v2508_v29 = vpack.c.bf16 %v2479_v26, %v2478_v46  ;;  %v4924_v42 = vld [vmem:[%s4463_s29 + $0x112] sm:$0xff]  ;;  %v2846_v46 = vpack.c.bf16 %v2817_v12, %v2816_v63  ;;  %v1148_v26 = vld [vmem:[%s4463_s29 + $0x122] sm:$0xff] }
  0xb1   : > { %v1166_v45 = vpack.c.bf16 %v1147_v43, %v4924_v42  ;;  %v2839_v43 = vld [vmem:[%s4463_s29 + $0x13e] sm:$0x3f] }
  0xb6   : > { %3809 = vmatmul.mubr.msk.bf16.gmra.mrb[8].mxu1 %vm301_vm0, %v4819_v52  ;;  %3985 = vmatmul.mubr.msk.bf16.gmra.mrb[24].mxu0 %vm301_vm0, %v4688_v44  ;;  %v4838_v44 = vpack.c.bf16 %v793_v55, %v792_v54  ;;  %v811_v54 = vld [vmem:[%s4463_s29 + $0x11a] sm:$0x3f] }
  0xb7   : > { %3812 = vmatprep.mubr.msk.bf16.mxu1 %vm301_vm0, %v4821_v53  ;;  %3988 = vmatprep.mubr.msk.bf16.mxu0 %vm301_vm0, %v4704_v56  ;;  %v794_v56 = vld [vmem:[%s4463_s29 + $0x92] sm:$0xff] }
  0xb8   : > { %v4856_v7 = vpack.c.bf16 %v795_v0, %v794_v56  ;;  %v2480_v55 = vld [vmem:[%s4463_s29 + $0x95] sm:$0xff]  ;;  %v2483_v56 = vld [vmem:[%s4463_s29 + $0xad] sm:$0xff]  ;;  %v829_v0 = vpack.c.bf16 %v811_v54, %v4924_v42 }
  0xb9   : > { %v2509_v2 = vpack.c.bf16 %v2481_v57, %v2480_v55  ;;  %v1472_v54 = vld [vmem:[%s4463_s29 + $0xb3] sm:$0xff]  ;;  %v1473_v42 = vld [vmem:[%s4463_s29 + $0xbb] sm:$0xff]  ;;  %v2820_v55 = vld [vmem:[%s4463_s29 + $0xa6] sm:$0xff] }
  0xbe   : > { %3813 = vmatmul.mubr.msk.bf16.gmra.mrb[12].mxu1 %vm301_vm0, %v4836_v59  ;;  %3989 = vmatmul.mubr.msk.bf16.gmra.mrb[28].mxu0 %vm301_vm0, %v4706_v58  ;;  %v2467_v58 = vld [vmem:[%s4463_s29 + $0x2d] sm:$0xff] }
  0xbf   : > { %3816 = vmatprep.mubr.msk.bf16.mxu1 %vm301_vm0, %v4838_v44  ;;  %3992 = vmatprep.mubr.msk.bf16.mxu0 %vm301_vm0, %v2180_v60  ;;  %v2502_v11 = vpack.c.bf16 %v2467_v58, %v2466_v6  ;;  %v2482_v60 = vld [vmem:[%s4463_s29 + $0xa5] sm:$0xff]  ;;  %v2487_v58 = vld [vmem:[%s4463_s29 + $0xcd] sm:$0xff] }
  0xc0   : > { %v2510_v4 = vpack.c.bf16 %v2483_v56, %v2482_v60  ;;  %v2486_v6 = vld [vmem:[%s4463_s29 + $0xc5] sm:$0xff]  ;;  %v1498_v56 = vpack.c.bf16 %v1473_v42, %v1472_v54 }
  0xc6   : > { %3817 = vmatmul.mubr.msk.bf16.gmra.mrb[16].mxu1 %vm301_vm0, %v4856_v7  ;;  %3993 = vmatmul.mubr.msk.bf16.gmra.mrb[32].mxu0 %vm301_vm0, %v2181_v8  ;;  %v2511_v8 = vpack.c.bf16 %v2485_v5, %v2484_v62  ;;  %v2822_v62 = vld [vmem:[%s4463_s29 + $0xb6] sm:$0xff]  ;;  %v2823_v5 = vld [vmem:[%s4463_s29 + $0xbe] sm:$0xff] }
  0xc7   : > { %3820 = vmatprep.mubr.msk.bf16.mxu1 %vm301_vm0, %v4858_v9  ;;  %4000 = vmatprep.mubr.msk.bf16.mxu0 %vm301_vm0, %v2502_v11  ;;  %v2512_v11 = vpack.c.bf16 %v2487_v58, %v2486_v6  ;;  %v1476_v6 = vld [vmem:[%s4463_s29 + $0xd3] sm:$0xff]  ;;  %v1477_v58 = vld [vmem:[%s4463_s29 + $0xdb] sm:$0xff] }
  0xc8   : > { %v1500_v15 = vpack.c.bf16 %v1477_v58, %v1476_v6  ;;  %v5102_v58 = vld [vmem:[%s5229_s2] ss:$0 sm:$0xff] }
  0xce   : > { %3821 = vmatmul.mubr.msk.bf16.gmra.mrb[20].mxu1 %vm301_vm0, %v4874_v21  ;;  %4001 = vmatmul.mubr.msk.bf16.vlgmr.msra.gmra.mrb[0].mxu0 %vm301_vm0, %v2503_v22  ;;  %v2499_v22 = vld [vmem:[%s4463_s29 + $0x12d] sm:$0xff] }
  0xcf   : > { %3824 = vmatprep.mubr.msk.bf16.mxu1 %vm301_vm0, %v4876_v35  ;;  %4037 = vmatpush3.bf16.msra.mxu0 %v4749_v25  ;;  %v4898_v25 = vpack.c.bf16 %v805_v49, %v804_v31  ;;  %v2808_v31 = vld [vmem:[%s4463_s29 + $0x46] sm:$0xff]  ;;  %v2809_v49 = vld [vmem:[%s4463_s29 + $0x4e] sm:$0xff] }
  0xd0   : > { %4004 = vmatprep.mubr.msk.bf16.mxu0 %vm301_vm0, %v2504_v37  ;;  %4038 = vmatprep.subr.bf16.mxu0 %v4395_v24  ;;  %v2842_v33 = vpack.c.bf16 %v2809_v49, %v2808_v31  ;;  %v1504_v31 = vpack.c.bf16 %v1485_v10, %v1484_v27 }
  0xd3   : > { %4039 = vmatpush3.bf16.msra.mxu0 %v4395_v24  ;;  %v2518_v24 = vpack.c.bf16 %v2499_v22, %v2498_v20 }
  0xd6   : > { %3825 = vmatmul.mubr.msk.bf16.gmra.mrb[24].mxu1 %vm301_vm0, %v4896_v34  ;;  %4005 = vmatmul.mubr.msk.bf16.gmra.mrb[4].mxu0 %vm301_vm0, %v2505_v51  ;;  %v2812_v51 = vld [vmem:[%s4463_s29 + $0x66] sm:$0xff] }
  0xd7   : > { %3828 = vmatprep.mubr.msk.bf16.mxu1 %vm301_vm0, %v4898_v25  ;;  %4008 = vmatprep.mubr.msk.bf16.mxu0 %vm301_vm0, %v2506_v36  ;;  %v2813_v36 = vld [vmem:[%s4463_s29 + $0x6e] sm:$0xff] }
  0xd8   : > { %v2844_v38 = vpack.c.bf16 %v2813_v36, %v2812_v51  ;;  %v2836_v51 = vld [vmem:[%s4463_s29 + $0x126] sm:$0xff]  ;;  %v2837_v36 = vld [vmem:[%s4463_s29 + $0x12e] sm:$0xff] }
  0xde   : > { %3829 = vmatmul.mubr.msk.bf16.gmra.mrb[28].mxu1 %vm301_vm0, %v4914_v28  ;;  %4009 = vmatmul.mubr.msk.bf16.gmra.mrb[8].mxu0 %vm301_vm0, %v2507_v48  ;;  %v2818_v48 = vld [vmem:[%s4463_s29 + $0x96] sm:$0xff] }
  0xdf   : > { %3832 = vmatprep.mubr.msk.bf16.mxu1 %vm301_vm0, %v4916_v50  ;;  %4012 = vmatprep.mubr.msk.bf16.mxu0 %vm301_vm0, %v2508_v29  ;;  %v2819_v29 = vld [vmem:[%s4463_s29 + $0x9e] sm:$0xff] }
  0xe0   : > { %v2847_v60 = vpack.c.bf16 %v2819_v29, %v2818_v48 }
  0xe6   : > { %3833 = vmatmul.mubr.msk.bf16.gmra.mrb[32].mxu1 %vm301_vm0, %v829_v0  ;;  %4013 = vmatmul.mubr.msk.bf16.gmra.mrb[12].mxu0 %vm301_vm0, %v2509_v2  ;;  %v1474_v2 = vld [vmem:[%s4463_s29 + $0xc3] sm:$0xff] }
  0xe7   : > { %3840 = vmatprep.mubr.msk.bf16.mxu1 %vm301_vm0, %v4782_v40  ;;  %4016 = vmatprep.mubr.msk.bf16.mxu0 %vm301_vm0, %v2510_v4  ;;  %v2488_v40 = vld [vmem:[%s4463_s29 + $0xd5] sm:$0xff]  ;;  %v1475_v4 = vld [vmem:[%s4463_s29 + $0xcb] sm:$0xff] }
  0xee   : > { %3841 = vmatmul.mubr.msk.bf16.vlgmr.msra.gmra.mrb[0].mxu1 %vm301_vm0, %v4784_v41  ;;  %4017 = vmatmul.mubr.msk.bf16.gmra.mrb[16].mxu0 %vm301_vm0, %v2511_v8  ;;  %v2513_v41 = vpack.c.bf16 %v2489_v13, %v2488_v40  ;;  %v2824_v8 = vld [vmem:[%s4463_s29 + $0xc6] sm:$0xff]  ;;  %v1499_v40 = vpack.c.bf16 %v1475_v4, %v1474_v2  ;;  %v2849_v13 = vpack.c.bf16 %v2823_v5, %v2822_v62 }
  0xef   : > { %3844 = vmatprep.mubr.msk.bf16.mxu1 %vm301_vm0, %v4802_v47  ;;  %4020 = vmatprep.mubr.msk.bf16.mxu0 %vm301_vm0, %v2512_v11  ;;  %v2493_v47 = vld [vmem:[%s4463_s29 + $0xfd] sm:$0xff]  ;;  %v2825_v11 = vld [vmem:[%s4463_s29 + $0xce] sm:$0xff] }
  0xf0   : > { %4078 = vmatpush3.bf16.msra.mxu1 %v4438_v1  ;;  %v2492_v1 = vld [vmem:[%s4463_s29 + $0xf5] sm:$0xff]  ;;  %v2850_v16 = vpack.c.bf16 %v2825_v11, %v2824_v8 }
  0xf1   : > { %4077 = vmatprep.subr.bf16.mxu1 %v4449_v3  ;;  %v2515_v23 = vpack.c.bf16 %v2493_v47, %v2492_v1  ;;  %v2826_v1 = vld [vmem:[%s4463_s29 + $0xd6] sm:$0xff]  ;;  %v2827_v47 = vld [vmem:[%s4463_s29 + $0xde] sm:$0xff] }
  0xf4   : > { %4079 = vmatpush3.bf16.msra.mxu1 %v4449_v3  ;;  %v2516_v3 = vpack.c.bf16 %v2495_v19, %v2494_v18  ;;  %v1480_v18 = vld [vmem:[%s4463_s29 + $0xf3] sm:$0xff]  ;;  %v1481_v19 = vld [vmem:[%s4463_s29 + $0xfb] sm:$0xff] }
  0xf5   : > { %v1502_v20 = vpack.c.bf16 %v1481_v19, %v1480_v18 }
  0xf6   : > { %3845 = vmatmul.mubr.msk.bf16.gmra.mrb[4].mxu1 %vm301_vm0, %v4804_v14  ;;  %4021 = vmatmul.mubr.msk.bf16.gmra.mrb[20].mxu0 %vm301_vm0, %v2513_v41  ;;  %v2496_v14 = vld [vmem:[%s4463_s29 + $0x115] sm:$0xff]  ;;  %v1478_v41 = vld [vmem:[%s4463_s29 + $0xe3] sm:$0xff] }
  0xf7   : > { %3848 = vmatprep.mubr.msk.bf16.mxu1 %vm301_vm0, %v4819_v52  ;;  %4024 = vmatprep.mubr.msk.bf16.mxu0 %vm301_vm0, %v2514_v17  ;;  %v2497_v52 = vld [vmem:[%s4463_s29 + $0x11d] sm:$0xff]  ;;  %v1479_v17 = vld [vmem:[%s4463_s29 + $0xeb] sm:$0xff] }
  0xf8   : > { %v2517_v37 = vpack.c.bf16 %v2497_v52, %v2496_v14  ;;  %v1501_v14 = vpack.c.bf16 %v1479_v17, %v1478_v41  ;;  %v2851_v52 = vpack.c.bf16 %v2827_v47, %v2826_v1 }
  0xfe   : > { %3849 = vmatmul.mubr.msk.bf16.gmra.mrb[8].mxu1 %vm301_vm0, %v4821_v53  ;;  %4025 = vmatmul.mubr.msk.bf16.gmra.mrb[24].mxu0 %vm301_vm0, %v2515_v23  ;;  %v2500_v53 = vld [vmem:[%s4463_s29 + $0x135] sm:$0xff]  ;;  %v2828_v23 = vld [vmem:[%s4463_s29 + $0xe6] sm:$0xff] }
  0xff   : > { %3852 = vmatprep.mubr.msk.bf16.mxu1 %vm301_vm0, %v4836_v59  ;;  %4028 = vmatprep.mubr.msk.bf16.mxu0 %vm301_vm0, %v2516_v3  ;;  %v2501_v59 = vld [vmem:[%s4463_s29 + $0x13d] sm:$0x3f]  ;;  %v2829_v3 = vld [vmem:[%s4463_s29 + $0xee] sm:$0xff] }
 0x100   : > { %v2519_v30 = vpack.c.bf16 %v2501_v59, %v2500_v53  ;;  %v2852_v22 = vpack.c.bf16 %v2829_v3, %v2828_v23  ;;  %v2830_v53 = vld [vmem:[%s4463_s29 + $0xf6] sm:$0xff]  ;;  %v2831_v59 = vld [vmem:[%s4463_s29 + $0xfe] sm:$0xff] }
 0x106   : > { %3853 = vmatmul.mubr.msk.bf16.gmra.mrb[12].mxu1 %vm301_vm0, %v4838_v44  ;;  %4029 = vmatmul.mubr.msk.bf16.gmra.mrb[28].mxu0 %vm301_vm0, %v2517_v37  ;;  %v2806_v44 = vld [vmem:[%s4463_s29 + $0x36] sm:$0xff]  ;;  %v1482_v37 = vld [vmem:[%s4463_s29 + $0x103] sm:$0xff] }
 0x107   : > { %3856 = vmatprep.mubr.msk.bf16.mxu1 %vm301_vm0, %v4856_v7  ;;  %4032 = vmatprep.mubr.msk.bf16.mxu0 %vm301_vm0, %v2518_v24  ;;  %v2807_v7 = vld [vmem:[%s4463_s29 + $0x3e] sm:$0xff]  ;;  %v1483_v24 = vld [vmem:[%s4463_s29 + $0x10b] sm:$0xff] }
 0x108   : > { %v2841_v32 = vpack.c.bf16 %v2807_v7, %v2806_v44  ;;  %v1503_v44 = vpack.c.bf16 %v1483_v24, %v1482_v37  ;;  %v2853_v7 = vpack.c.bf16 %v2831_v59, %v2830_v53 }
 0x10e   : > { %3857 = vmatmul.mubr.msk.bf16.gmra.mrb[16].mxu1 %vm301_vm0, %v4858_v9  ;;  %4033 = vmatmul.mubr.msk.bf16.gmra.mrb[32].mxu0 %vm301_vm0, %v2519_v30  ;;  %v2810_v9 = vld [vmem:[%s4463_s29 + $0x56] sm:$0xff]  ;;  %v2832_v30 = vld [vmem:[%s4463_s29 + $0x106] sm:$0xff] }
 0x10f   : > { %3860 = vmatprep.mubr.msk.bf16.mxu1 %vm301_vm0, %v4874_v21  ;;  %4040 = vmatprep.mubr.msk.bf16.mxu0 %vm301_vm0, %v2840_v39  ;;  %v2811_v21 = vld [vmem:[%s4463_s29 + $0x5e] sm:$0xff]  ;;  %v2833_v39 = vld [vmem:[%s4463_s29 + $0x10e] sm:$0xff] }
 0x110   : > { %v2843_v61 = vpack.c.bf16 %v2811_v21, %v2810_v9  ;;  %v2854_v49 = vpack.c.bf16 %v2833_v39, %v2832_v30  ;;  %v2834_v9 = vld [vmem:[%s4463_s29 + $0x116] sm:$0xff]  ;;  %v2835_v21 = vld [vmem:[%s4463_s29 + $0x11e] sm:$0xff] }
 0x116   : > { %3861 = vmatmul.mubr.msk.bf16.gmra.mrb[20].mxu1 %vm301_vm0, %v4876_v35  ;;  %4041 = vmatmul.mubr.msk.bf16.vlgmr.msra.gmra.mrb[0].mxu0 %vm301_vm0, %v2841_v32  ;;  %v2814_v35 = vld [vmem:[%s4463_s29 + $0x76] sm:$0xff]  ;;  %v1486_v32 = vld [vmem:[%s4463_s29 + $0x123] sm:$0xff] }
 0x117   : > { %3864 = vmatprep.mubr.msk.bf16.mxu1 %vm301_vm0, %v4896_v34  ;;  %4044 = vmatprep.mubr.msk.bf16.mxu0 %vm301_vm0, %v2842_v33  ;;  %v2815_v34 = vld [vmem:[%s4463_s29 + $0x7e] sm:$0xff]  ;;  %v1487_v33 = vld [vmem:[%s4463_s29 + $0x12b] sm:$0x3f] }
 0x11e   : > { %3865 = vmatmul.mubr.msk.bf16.gmra.mrb[24].mxu1 %vm301_vm0, %v4898_v25  ;;  %4045 = vmatmul.mubr.msk.bf16.gmra.mrb[4].mxu0 %vm301_vm0, %v2843_v61  ;;  %v2845_v25 = vpack.c.bf16 %v2815_v34, %v2814_v35  ;;  %v1505_v61 = vpack.c.bf16 %v1487_v33, %v1486_v32  ;;  %v2856_v35 = vpack.c.bf16 %v2837_v36, %v2836_v51  ;;  %v2838_v34 = vld [vmem:[%s4463_s29 + $0x136] sm:$0xff] }
 0x11f   : > { %3868 = vmatprep.mubr.msk.bf16.mxu1 %vm301_vm0, %v4914_v28  ;;  %4048 = vmatprep.mubr.msk.bf16.mxu0 %vm301_vm0, %v2844_v38  ;;  %v1149_v28 = vld [vmem:[%s4463_s29 + $0x12a] sm:$0x3f]  ;;  %v2855_v38 = vpack.c.bf16 %v2835_v21, %v2834_v9  ;;  %v2857_v63 = vpack.c.bf16 %v2839_v43, %v2838_v34 }
 0x120   : > { %v1167_v57 = vpack.c.bf16 %v1149_v28, %v1148_v26 }
 0x126   : > { %3869 = vmatmul.mubr.msk.bf16.gmra.mrb[28].mxu1 %vm301_vm0, %v4916_v50  ;;  %4049 = vmatmul.mubr.msk.bf16.gmra.mrb[8].mxu0 %vm301_vm0, %v2845_v25  ;;  %v2821_v50 = vld [vmem:[%s4463_s29 + $0xae] sm:$0xff]  ;;  %s4369_s29 = smul.u32 288, %s5232_s13 }
 0x127   : > { %3872 = vmatprep.mubr.msk.bf16.mxu1 %vm301_vm0, %v1166_v45  ;;  %4052 = vmatprep.mubr.msk.bf16.mxu0 %vm301_vm0, %v2846_v46  ;;  %v2848_v0 = vpack.c.bf16 %v2821_v50, %v2820_v55 }
 0x128   : > { %s5108_s7 = scalar_lea.vmem %s5230_s3, %s4369_s29 }
 0x12e   : > { %3873 = vmatmul.mubr.msk.bf16.gmra.mrb[32].mxu1 %vm301_vm0, %v1167_v57  ;;  %4053 = vmatmul.mubr.msk.bf16.gmra.mrb[12].mxu0 %vm301_vm0, %v2847_v60 }
 0x12f   : > { %3900 = vmatprep.mubr.msk.bf16.mxu1 %vm301_vm0, %v1498_v56  ;;  %4056 = vmatprep.mubr.msk.bf16.mxu0 %vm301_vm0, %v2848_v0 }
 0x136   : > { %3901 = vmatmul.mubr.msk.bf16.vlgmr.msra.gmra.mrb[20].mxu1 %vm301_vm0, %v1499_v40  ;;  %4057 = vmatmul.mubr.msk.bf16.gmra.mrb[16].mxu0 %vm301_vm0, %v2849_v13 }
 0x137   : > { %3904 = vmatprep.mubr.msk.bf16.mxu1 %vm301_vm0, %v1500_v15  ;;  %4060 = vmatprep.mubr.msk.bf16.mxu0 %vm301_vm0, %v2850_v16 }
 0x13e   : > { %3905 = vmatmul.mubr.msk.bf16.gmra.mrb[24].mxu1 %vm301_vm0, %v1501_v14  ;;  %4061 = vmatmul.mubr.msk.bf16.gmra.mrb[20].mxu0 %vm301_vm0, %v2851_v52 }
 0x13f   : > { %3908 = vmatprep.mubr.msk.bf16.mxu1 %vm301_vm0, %v1502_v20  ;;  %4064 = vmatprep.mubr.msk.bf16.mxu0 %vm301_vm0, %v2852_v22 }
 0x146   : > { %3909 = vmatmul.mubr.msk.bf16.gmra.mrb[28].mxu1 %vm301_vm0, %v1503_v44  ;;  %4065 = vmatmul.mubr.msk.bf16.gmra.mrb[24].mxu0 %vm301_vm0, %v2853_v7 }
 0x147   : > { %3912 = vmatprep.mubr.msk.bf16.mxu1 %vm301_vm0, %v1504_v31  ;;  %4068 = vmatprep.mubr.msk.bf16.mxu0 %vm301_vm0, %v2854_v49 }
 0x14e   : > { %3913 = vmatmul.mubr.msk.bf16.gmra.mrb[32].mxu1 %vm301_vm0, %v1505_v61  ;;  %4069 = vmatmul.mubr.msk.bf16.gmra.mrb[28].mxu0 %vm301_vm0, %v2855_v38 }
 0x14f   : > { %4072 = vmatprep.mubr.msk.bf16.mxu0 %vm301_vm0, %v2856_v35 }
 0x156   : > { %4073 = vmatmul.mubr.msk.bf16.gmra.mrb[32].mxu0 %vm301_vm0, %v2857_v63 }
 0x1c1   : > { %v3842_v12 = vpop.f32.mrb[0].mxu1 }
 0x1c2   : > { %v1273_v25 = vpop.f32.mrb[1].mxu1 }
 0x1c3   : > { %v3843_v45 = vpop.f32.mrb[2].mxu1 }
 0x1c4   : > { %v1276_v46 = vpop.f32.mrb[3].mxu1 }
 0x1c9   : > { %v3846_v26 = vpop.f32.mrb[4].mxu1 }
 0x1ca   : > { %v1289_v28 = vpop.f32.mrb[5].mxu1 }
 0x1cb   : > { %v3847_v48 = vpop.f32.mrb[6].mxu1 }
 0x1cc   : > { %v1292_v29 = vpop.f32.mrb[7].mxu1 }
 0x1d1   : > { %v3850_v54 = vpop.f32.mrb[8].mxu1 }
 0x1d2   : > { %v1305_v42 = vpop.f32.mrb[9].mxu1 }
 0x1d3   : > { %v3851_v55 = vpop.f32.mrb[10].mxu1 }
 0x1d4   : > { %v1308_v50 = vpop.f32.mrb[11].mxu1 }
 0x1d9   : > { %v5082_v57 = vpop.f32.mrb[12].mxu1 }
 0x1da   : > { %v5084_v60 = vpop.f32.mrb[13].mxu1 }
 0x1db   : > { %v5086_v56 = vpop.f32.mrb[14].mxu1 }
 0x1dc   : > { %v5088_v0 = vpop.f32.mrb[15].mxu1 }
 0x1e1   : > { %v5090_v2 = vpop.f32.mrb[16].mxu1 }
 0x1e2   : > { %v5092_v4 = vpop.f32.mrb[17].mxu1 }
 0x1e3   : > { %v5094_v62 = vpop.f32.mrb[18].mxu1 }
 0x1e4   : > { %v5096_v5 = vpop.f32.mrb[19].mxu1 }
 0x1e9   : > { %v4042_v6 = vpop.f32.mrb[0].mxu0 }
 0x1ea   : > { %v4080_v8 = vadd.f32 %v4042_v6, %v3842_v12  ;;  %v2963_v11 = vpop.f32.mrb[1].mxu0 }
 0x1eb   : > { %v4081_v40 = vadd.f32 %v2963_v11, %v1273_v25  ;;  %v4043_v13 = vpop.f32.mrb[2].mxu0 }
 0x1ec   : > { %v3151_v15 = vadd.f32 %v4080_v8, %v5102_v58  ;;  %v4082_v16 = vadd.f32 %v4043_v13, %v3843_v45  ;;  %v2966_v41 = vpop.f32.mrb[3].mxu0 }
 0x1ed   : > { %v3149_v17 = vadd.f32 %v4081_v40, %v5102_v58  ;;  %v4083_v1 = vadd.f32 %v2966_v41, %v1276_v46 }
 0x1ee   : > { %v3187_v47 = vmax.f32 %v3151_v15, 0.0  ;;  %v3152_v18 = vadd.f32 %v4082_v16, %v5102_v58 }
 0x1ef   : > { %v3185_v19 = vmax.f32 %v3149_v17, 0.0  ;;  %v3150_v23 = vadd.f32 %v4083_v1, %v5102_v58 }
 0x1f0   : > { %3224 = vst.msk [vmem:[%s5108_s7 + $0x10] sm:$0xff] %vm3221_vm1, %v3187_v47  ;;  %v3188_v3 = vmax.f32 %v3152_v18, 0.0 }
 0x1f1   : > { %3222 = vst.msk [vmem:[%s5108_s7] sm:$0xff] %vm3221_vm1, %v3185_v19  ;;  %v3186_v14 = vmax.f32 %v3150_v23, 0.0  ;;  %v4046_v52 = vpop.f32.mrb[4].mxu0 }
 0x1f2   : > { %3225 = vst.msk [vmem:[%s5108_s7 + $0x18] sm:$0xff] %vm3221_vm1, %v3188_v3  ;;  %v4084_v20 = vadd.f32 %v4046_v52, %v3846_v26  ;;  %v2979_v22 = vpop.f32.mrb[5].mxu0 }
 0x1f3   : > { %3223 = vst.msk [vmem:[%s5108_s7 + $0x8] sm:$0xff] %vm3221_vm1, %v3186_v14  ;;  %v4085_v37 = vadd.f32 %v2979_v22, %v1289_v28  ;;  %v4047_v24 = vpop.f32.mrb[6].mxu0 }
 0x1f4   : > { %v3155_v53 = vadd.f32 %v4084_v20, %v5102_v58  ;;  %v4086_v59 = vadd.f32 %v4047_v24, %v3847_v48  ;;  %v2982_v27 = vpop.f32.mrb[7].mxu0 }
 0x1f5   : > { %v3153_v10 = vadd.f32 %v4085_v37, %v5102_v58  ;;  %v4087_v30 = vadd.f32 %v2982_v27, %v1292_v29 }
 0x1f6   : > { %v3191_v39 = vmax.f32 %v3155_v53, 0.0  ;;  %v3156_v44 = vadd.f32 %v4086_v59, %v5102_v58 }
 0x1f7   : > { %v3189_v7 = vmax.f32 %v3153_v10, 0.0  ;;  %v3154_v31 = vadd.f32 %v4087_v30, %v5102_v58 }
 0x1f8   : > { %3228 = vst.msk [vmem:[%s5108_s7 + $0x30] sm:$0xff] %vm3221_vm1, %v3191_v39  ;;  %v3192_v49 = vmax.f32 %v3156_v44, 0.0 }
 0x1f9   : > { %3226 = vst.msk [vmem:[%s5108_s7 + $0x20] sm:$0xff] %vm3221_vm1, %v3189_v7  ;;  %v3190_v32 = vmax.f32 %v3154_v31, 0.0  ;;  %v4050_v33 = vpop.f32.mrb[8].mxu0 }
 0x1fa   : > { %3229 = vst.msk [vmem:[%s5108_s7 + $0x38] sm:$0xff] %vm3221_vm1, %v3192_v49  ;;  %v4088_v9 = vadd.f32 %v4050_v33, %v3850_v54  ;;  %v2995_v21 = vpop.f32.mrb[9].mxu0 }
 0x1fb   : > { %3227 = vst.msk [vmem:[%s5108_s7 + $0x28] sm:$0xff] %vm3221_vm1, %v3190_v32  ;;  %v4089_v51 = vadd.f32 %v2995_v21, %v1305_v42  ;;  %v4051_v36 = vpop.f32.mrb[10].mxu0 }
 0x1fc   : > { %v3159_v61 = vadd.f32 %v4088_v9, %v5102_v58  ;;  %v4090_v38 = vadd.f32 %v4051_v36, %v3851_v55  ;;  %v2998_v35 = vpop.f32.mrb[11].mxu0 }
 0x1fd   : > { %v3157_v34 = vadd.f32 %v4089_v51, %v5102_v58  ;;  %v4091_v43 = vadd.f32 %v2998_v35, %v1308_v50 }
 0x1fe   : > { %v3195_v63 = vmax.f32 %v3159_v61, 0.0  ;;  %v3160_v12 = vadd.f32 %v4090_v38, %v5102_v58 }
 0x1ff   : > { %v3193_v25 = vmax.f32 %v3157_v34, 0.0  ;;  %v3158_v45 = vadd.f32 %v4091_v43, %v5102_v58 }
 0x200   : > { %3232 = vst.msk [vmem:[%s5108_s7 + $0x50] sm:$0xff] %vm3221_vm1, %v3195_v63  ;;  %v3196_v46 = vmax.f32 %v3160_v12, 0.0 }
 0x201   : > { %3230 = vst.msk [vmem:[%s5108_s7 + $0x40] sm:$0xff] %vm3221_vm1, %v3193_v25  ;;  %v3194_v26 = vmax.f32 %v3158_v45, 0.0  ;;  %v4054_v28 = vpop.f32.mrb[12].mxu0 }
 0x202   : > { %3233 = vst.msk [vmem:[%s5108_s7 + $0x58] sm:$0xff] %vm3221_vm1, %v3196_v46  ;;  %v4092_v48 = vadd.f32 %v4054_v28, %v5082_v57  ;;  %v3011_v29 = vpop.f32.mrb[13].mxu0 }
 0x203   : > { %3231 = vst.msk [vmem:[%s5108_s7 + $0x48] sm:$0xff] %vm3221_vm1, %v3194_v26  ;;  %v4093_v54 = vadd.f32 %v3011_v29, %v5084_v60  ;;  %v4055_v42 = vpop.f32.mrb[14].mxu0 }
 0x204   : > { %v3163_v55 = vadd.f32 %v4092_v48, %v5102_v58  ;;  %v4094_v50 = vadd.f32 %v4055_v42, %v5086_v56  ;;  %v3014_v6 = vpop.f32.mrb[15].mxu0 }
 0x205   : > { %v3161_v8 = vadd.f32 %v4093_v54, %v5102_v58  ;;  %v4095_v11 = vadd.f32 %v3014_v6, %v5088_v0 }
 0x206   : > { %v3199_v40 = vmax.f32 %v3163_v55, 0.0  ;;  %v3164_v57 = vadd.f32 %v4094_v50, %v5102_v58 }
 0x207   : > { %v3197_v13 = vmax.f32 %v3161_v8, 0.0  ;;  %v3162_v15 = vadd.f32 %v4095_v11, %v5102_v58 }
 0x208   : > { %3236 = vst.msk [vmem:[%s5108_s7 + $0x70] sm:$0xff] %vm3221_vm1, %v3199_v40  ;;  %v3200_v60 = vmax.f32 %v3164_v57, 0.0 }
 0x209   : > { %v3902_v16 = vpop.f32.mrb[20].mxu1  ;;  %3234 = vst.msk [vmem:[%s5108_s7 + $0x60] sm:$0xff] %vm3221_vm1, %v3197_v13  ;;  %v3198_v41 = vmax.f32 %v3162_v15, 0.0  ;;  %v4058_v56 = vpop.f32.mrb[16].mxu0 }
 0x20a   : > { %v1691_v17 = vpop.f32.mrb[21].mxu1  ;;  %3237 = vst.msk [vmem:[%s5108_s7 + $0x78] sm:$0xff] %vm3221_vm1, %v3200_v60  ;;  %v4096_v0 = vadd.f32 %v4058_v56, %v5090_v2  ;;  %v3027_v1 = vpop.f32.mrb[17].mxu0 }
 0x20b   : > { %v3903_v47 = vpop.f32.mrb[22].mxu1  ;;  %3235 = vst.msk [vmem:[%s5108_s7 + $0x68] sm:$0xff] %vm3221_vm1, %v3198_v41  ;;  %v4097_v18 = vadd.f32 %v3027_v1, %v5092_v4  ;;  %v4059_v19 = vpop.f32.mrb[18].mxu0 }
 0x20c   : > { %v1694_v23 = vpop.f32.mrb[23].mxu1  ;;  %v3167_v3 = vadd.f32 %v4096_v0, %v5102_v58  ;;  %v4098_v14 = vadd.f32 %v4059_v19, %v5094_v62  ;;  %v3030_v52 = vpop.f32.mrb[19].mxu0 }
 0x20d   : > { %v3165_v20 = vadd.f32 %v4097_v18, %v5102_v58  ;;  %v4099_v2 = vadd.f32 %v3030_v52, %v5096_v5 }
 0x20e   : > { %v3203_v22 = vmax.f32 %v3167_v3, 0.0  ;;  %v3168_v37 = vadd.f32 %v4098_v14, %v5102_v58 }
 0x20f   : > { %v3201_v24 = vmax.f32 %v3165_v20, 0.0  ;;  %v3166_v53 = vadd.f32 %v4099_v2, %v5102_v58 }
 0x210   : > { %3240 = vst.msk [vmem:[%s5108_s7 + $0x90] sm:$0xff] %vm3221_vm1, %v3203_v22  ;;  %v3204_v4 = vmax.f32 %v3168_v37, 0.0 }
 0x211   : > { %v3906_v59 = vpop.f32.mrb[24].mxu1  ;;  %3238 = vst.msk [vmem:[%s5108_s7 + $0x80] sm:$0xff] %vm3221_vm1, %v3201_v24  ;;  %v3202_v27 = vmax.f32 %v3166_v53, 0.0  ;;  %v4062_v62 = vpop.f32.mrb[20].mxu0 }
 0x212   : > { %v1707_v10 = vpop.f32.mrb[25].mxu1  ;;  %3241 = vst.msk [vmem:[%s5108_s7 + $0x98] sm:$0xff] %vm3221_vm1, %v3204_v4  ;;  %v4100_v30 = vadd.f32 %v4062_v62, %v3902_v16  ;;  %v3043_v5 = vpop.f32.mrb[21].mxu0 }
 0x213   : > { %v3907_v39 = vpop.f32.mrb[26].mxu1  ;;  %3239 = vst.msk [vmem:[%s5108_s7 + $0x88] sm:$0xff] %vm3221_vm1, %v3202_v27  ;;  %v4101_v44 = vadd.f32 %v3043_v5, %v1691_v17  ;;  %v4063_v7 = vpop.f32.mrb[22].mxu0 }
 0x214   : > { %v1710_v31 = vpop.f32.mrb[27].mxu1  ;;  %v3171_v49 = vadd.f32 %v4100_v30, %v5102_v58  ;;  %v4102_v32 = vadd.f32 %v4063_v7, %v3903_v47  ;;  %v3046_v33 = vpop.f32.mrb[23].mxu0 }
 0x215   : > { %v3169_v9 = vadd.f32 %v4101_v44, %v5102_v58  ;;  %v4103_v21 = vadd.f32 %v3046_v33, %v1694_v23 }
 0x216   : > { %v3207_v51 = vmax.f32 %v3171_v49, 0.0  ;;  %v3172_v36 = vadd.f32 %v4102_v32, %v5102_v58 }
 0x217   : > { %v3205_v61 = vmax.f32 %v3169_v9, 0.0  ;;  %v3170_v38 = vadd.f32 %v4103_v21, %v5102_v58 }
 0x218   : > { %3244 = vst.msk [vmem:[%s5108_s7 + $0xb0] sm:$0xff] %vm3221_vm1, %v3207_v51  ;;  %v3208_v35 = vmax.f32 %v3172_v36, 0.0 }
 0x219   : > { %v3910_v34 = vpop.f32.mrb[28].mxu1  ;;  %3242 = vst.msk [vmem:[%s5108_s7 + $0xa0] sm:$0xff] %vm3221_vm1, %v3205_v61  ;;  %v3206_v43 = vmax.f32 %v3170_v38, 0.0  ;;  %v4066_v63 = vpop.f32.mrb[24].mxu0 }
 0x21a   : > { %v1723_v12 = vpop.f32.mrb[29].mxu1  ;;  %3245 = vst.msk [vmem:[%s5108_s7 + $0xb8] sm:$0xff] %vm3221_vm1, %v3208_v35  ;;  %v4104_v25 = vadd.f32 %v4066_v63, %v3906_v59  ;;  %v3059_v45 = vpop.f32.mrb[25].mxu0 }
 0x21b   : > { %v3911_v46 = vpop.f32.mrb[30].mxu1  ;;  %3243 = vst.msk [vmem:[%s5108_s7 + $0xa8] sm:$0xff] %vm3221_vm1, %v3206_v43  ;;  %v4105_v26 = vadd.f32 %v3059_v45, %v1707_v10  ;;  %v4067_v28 = vpop.f32.mrb[26].mxu0 }
 0x21c   : > { %v1726_v48 = vpop.f32.mrb[31].mxu1  ;;  %v3175_v29 = vadd.f32 %v4104_v25, %v5102_v58  ;;  %v4106_v54 = vadd.f32 %v4067_v28, %v3907_v39  ;;  %v3062_v42 = vpop.f32.mrb[27].mxu0 }
 0x21d   : > { %v3173_v55 = vadd.f32 %v4105_v26, %v5102_v58  ;;  %v4107_v50 = vadd.f32 %v3062_v42, %v1710_v31 }
 0x21e   : > { %v3211_v6 = vmax.f32 %v3175_v29, 0.0  ;;  %v3176_v8 = vadd.f32 %v4106_v54, %v5102_v58 }
 0x21f   : > { %v3209_v11 = vmax.f32 %v3173_v55, 0.0  ;;  %v3174_v40 = vadd.f32 %v4107_v50, %v5102_v58 }
 0x220   : > { %3248 = vst.msk [vmem:[%s5108_s7 + $0xd0] sm:$0xff] %vm3221_vm1, %v3211_v6  ;;  %v3212_v57 = vmax.f32 %v3176_v8, 0.0 }
 0x221   : > { %v3914_v13 = vpop.f32.mrb[32].mxu1  ;;  %3246 = vst.msk [vmem:[%s5108_s7 + $0xc0] sm:$0xff] %vm3221_vm1, %v3209_v11  ;;  %v3210_v15 = vmax.f32 %v3174_v40, 0.0  ;;  %v4070_v60 = vpop.f32.mrb[28].mxu0 }
 0x222   : > { %v1739_v16 = vpop.f32.mrb[33].mxu1  ;;  %3249 = vst.msk [vmem:[%s5108_s7 + $0xd8] sm:$0xff] %vm3221_vm1, %v3212_v57  ;;  %v4108_v41 = vadd.f32 %v4070_v60, %v3910_v34  ;;  %v3075_v56 = vpop.f32.mrb[29].mxu0 }
 0x223   : > { %v3915_v17 = vpop.f32.mrb[34].mxu1  ;;  %3247 = vst.msk [vmem:[%s5108_s7 + $0xc8] sm:$0xff] %vm3221_vm1, %v3210_v15  ;;  %v4109_v0 = vadd.f32 %v3075_v56, %v1723_v12  ;;  %v4071_v1 = vpop.f32.mrb[30].mxu0 }
 0x224   : > { %v1742_v47 = vpop.f32.mrb[35].mxu1  ;;  %v3179_v18 = vadd.f32 %v4108_v41, %v5102_v58  ;;  %v4110_v19 = vadd.f32 %v4071_v1, %v3911_v46  ;;  %v3078_v23 = vpop.f32.mrb[31].mxu0 }
 0x225   : > { %v3177_v3 = vadd.f32 %v4109_v0, %v5102_v58  ;;  %v4111_v14 = vadd.f32 %v3078_v23, %v1726_v48 }
 0x226   : > { %v3215_v52 = vmax.f32 %v3179_v18, 0.0  ;;  %v3180_v20 = vadd.f32 %v4110_v19, %v5102_v58 }
 0x227   : > { %v3213_v2 = vmax.f32 %v3177_v3, 0.0  ;;  %v3178_v22 = vadd.f32 %v4111_v14, %v5102_v58 }
 0x228   : > { %3252 = vst.msk [vmem:[%s5108_s7 + $0xf0] sm:$0xff] %vm3221_vm1, %v3215_v52  ;;  %v3216_v37 = vmax.f32 %v3180_v20, 0.0 }
 0x229   : > { %3250 = vst.msk [vmem:[%s5108_s7 + $0xe0] sm:$0xff] %vm3221_vm1, %v3213_v2  ;;  %v3214_v24 = vmax.f32 %v3178_v22, 0.0  ;;  %v4074_v53 = vpop.f32.mrb[32].mxu0 }
 0x22a   : > { %3253 = vst.msk [vmem:[%s5108_s7 + $0xf8] sm:$0xff] %vm3221_vm1, %v3216_v37  ;;  %v4112_v4 = vadd.f32 %v4074_v53, %v3914_v13  ;;  %v3091_v59 = vpop.f32.mrb[33].mxu0 }
 0x22b   : > { %3251 = vst.msk [vmem:[%s5108_s7 + $0xe8] sm:$0xff] %vm3221_vm1, %v3214_v24  ;;  %v4113_v27 = vadd.f32 %v3091_v59, %v1739_v16  ;;  %v4075_v62 = vpop.f32.mrb[34].mxu0 }
 0x22c   : > { %v3183_v10 = vadd.f32 %v4112_v4, %v5102_v58  ;;  %v4114_v30 = vadd.f32 %v4075_v62, %v3915_v17  ;;  %v3094_v5 = vpop.f32.mrb[35].mxu0 }
 0x22d   : > { %v3181_v39 = vadd.f32 %v4113_v27, %v5102_v58  ;;  %v4115_v44 = vadd.f32 %v3094_v5, %v1742_v47 }
 0x22e   : > { %v3219_v7 = vmax.f32 %v3183_v10, 0.0  ;;  %v3184_v31 = vadd.f32 %v4114_v30, %v5102_v58 }
 0x22f   : > { %v3217_v49 = vmax.f32 %v3181_v39, 0.0  ;;  %v3182_v32 = vadd.f32 %v4115_v44, %v5102_v58 }
 0x230   : > { %3256 = vst.msk [vmem:[%s5108_s7 + $0x110] sm:$0xff] %vm3221_vm1, %v3219_v7  ;;  %v3220_v33 = vmax.f32 %v3184_v31, 0.0 }
 0x231   : > { %3254 = vst.msk [vmem:[%s5108_s7 + $0x100] sm:$0xff] %vm3221_vm1, %v3217_v49  ;;  %v3218_v9 = vmax.f32 %v3182_v32, 0.0 }
 0x232   : > { %3258 = vst.msk [vmem:[%s5108_s7 + $0x118] sm:$0x3f] %vm3257_vm2, %v3220_v33 }
 0x233   : > { %3255 = vst.msk [vmem:[%s5108_s7 + $0x108] sm:$0xff] %vm3221_vm1, %v3218_v9 }
 0x234 PF: > { %s13_s12 = sadd.s32 1, %s4402_s12  }
 0x235   : > { %p10_p4 = scmp.ge.s32.totalorder %s13_s12, 4  }
 0x237   :  { %12 = sbr.rel (!%p10_p4) target bundleno = 1 (0x1), region = 70 }

// kernel: net_forward.7
= control target key start
LH: loop header
LB: loop body
LE: loop exit
PB: predicated region body
PF: predicated region fallthrough
CT: control target
= control target key end

     0   :  { %s2132_s12 = smov 0   ;;  %s2595_s0 = inlined_call_operand.vmem [shape: f32[2,100,64], index: 0, kind: input, shape index: {}]   ;;  %s2596_s1 = inlined_call_operand.vmem [shape: bf16[3,3,64,128], index: 1, kind: input, shape index: {}]   ;;  %s2597_s2 = inlined_call_operand.vmem [shape: f32[1,128], index: 2, kind: input, shape index: {}]   ;;  %s2598_s3 = inlined_call_operand.vmem [shape: f32[2,78,128], index: 3, kind: output, shape index: {}]  }
   0x1 LB: > { %s1558_s13 = sadd.s32 4294967295, %s2108_s12   ;;  %p1562_p0 = scmp.ge.s32.totalorder %s2108_s12, 1  ;;  %s2108_s12 = sphi %s2132_s12, %s13_s12  }
   0x2   : > { %p137_p1 = scmp.lt.s32.totalorder %s2108_s12, 3 }
   0x4   : > { %p138_p2 = pnand %p1562_p0, %p137_p1 }
   0x5   : > { %v2066_v0 = vld [vmem:[%s2596_s1 + $0x20] sm:$0xff] (!%p138_p2)   ;;  %v2110_v1 = vmov (!%p138_p2), 0.0   ;;  %v2067_v2 = vld [vmem:[%s2596_s1 + $0x28] sm:$0xff] (!%p138_p2)   ;;  %p161_p3 = scmp.lt.s32.totalorder (!%p138_p2), %s1558_s13, 1  ;;  %vm2111_vm0 = vmmov (!%p138_p2), 0   ;;  %v2068_v3 = vld [vmem:[%s2596_s1 + $0x30] sm:$0xff] (!%p138_p2)  }
   0x6   : > { %141 = sbr.rel (%p138_p2) target bundleno = 421 (0x1a5), region = 32  ;;  %2046 = vmatprep.subr.bf16.mxu1 (!%p138_p2), %v2110_v1  ;;  %1794 = vmatprep.subr.bf16.mxu0 (!%p138_p2), %v2110_v1  ;;  %v2069_v4 = vld [vmem:[%s2596_s1 + $0x38] sm:$0xff] (!%p138_p2)   ;;  %vm243_vm1 = vcmask (!%p138_p2), 523264   ;;  %v2070_v11 = vld [vmem:[%s2596_s1] sm:$0xff] (!%p138_p2)   ;;  %v2071_v13 = vld [vmem:[%s2596_s1 + $0x8] sm:$0xff] (!%p138_p2)  }
   0x7   : > { %2050 = vmatpush3.bf16.msra.mxu1 (!%p138_p2), %v2066_v0  ;;  %1795 = vmatpush3.bf16.msra.mxu0 (!%p138_p2), %v2066_v0  ;;  %v2072_v12 = vld [vmem:[%s2596_s1 + $0x40] sm:$0xff] (!%p138_p2)   ;;  %v2074_v18 = vld [vmem:[%s2596_s1 + $0x48] sm:$0xff] (!%p138_p2)   ;;  %v2073_v21 = vld [vmem:[%s2596_s1 + $0x10] sm:$0xff] (!%p138_p2)  }
   0x8   : > { %2047 = vmatprep.subr.bf16.mxu1 (!%p138_p2), %v2110_v1  ;;  %1796 = vmatprep.subr.bf16.mxu0 (!%p138_p2), %v2110_v1  ;;  %v2075_v22 = vld [vmem:[%s2596_s1 + $0x50] sm:$0xff] (!%p138_p2)   ;;  %v2076_v25 = vld [vmem:[%s2596_s1 + $0x18] sm:$0xff] (!%p138_p2)   ;;  %v2079_v31 = vld [vmem:[%s2596_s1 + $0x80] sm:$0xff] (!%p138_p2)  }
   0x9   : > { %1810 = vmatprep.mubr.msk.bf16.mxu1 (!%p138_p2), %vm2111_vm0, %v2110_v1  ;;  %1802 = vmatprep.mubr.msk.bf16.mxu0 (!%p138_p2), %vm2111_vm0, %v2110_v1  ;;  %v2077_v26 = vld [vmem:[%s2596_s1 + $0x58] sm:$0xff] (!%p138_p2)   ;;  %v2081_v35 = vld [vmem:[%s2596_s1 + $0x88] sm:$0xff] (!%p138_p2)   ;;  %v2078_v38 = vld [vmem:[%s2596_s1 + $0x60] sm:$0xff] (!%p138_p2)  }
   0xa   : > { %v2083_v40 = vld [vmem:[%s2596_s1 + $0x90] sm:$0xff] (!%p138_p2)   ;;  %v2080_v43 = vld [vmem:[%s2596_s1 + $0x68] sm:$0xff] (!%p138_p2)   ;;  %v2085_v46 = vld [vmem:[%s2596_s1 + $0x98] sm:$0xff] (!%p138_p2)  }
   0xb   : > { %2051 = vmatpush3.bf16.msra.mxu1 (!%p138_p2), %v2067_v2  ;;  %1797 = vmatpush3.bf16.msra.mxu0 (!%p138_p2), %v2067_v2  ;;  %v2082_v48 = vld [vmem:[%s2596_s1 + $0x70] sm:$0xff] (!%p138_p2)   ;;  %v2084_v52 = vld [vmem:[%s2596_s1 + $0x78] sm:$0xff] (!%p138_p2)  }
   0xc   : > { %2048 = vmatprep.subr.bf16.mxu1 (!%p138_p2), %v2110_v1  ;;  %1798 = vmatprep.subr.bf16.mxu0 (!%p138_p2), %v2110_v1 }
   0xd   : > { %s2600_s13 = smov (!%p161_p3, %s1558_s13), 1 }
   0xe   : > { %s2054_s20 = smul.u32 104, %s2600_s13 }
   0xf   : > { %2052 = vmatpush3.bf16.msra.mxu1 %v2068_v3  ;;  %1799 = vmatpush3.bf16.msra.mxu0 %v2068_v3 }
  0x10   : > { %s2165_s23 = scalar_lea.vmem %s2595_s0, %s2054_s20  ;;  %2049 = vmatprep.subr.bf16.mxu1 %v2110_v1  ;;  %1800 = vmatprep.subr.bf16.mxu0 %v2110_v1 }
  0x11   : > { %v199_v5 = vld [vmem:[%s2165_s23 + $0x21] sm:$0xff]  ;;  %v200_v6 = vld [vmem:[%s2165_s23 + $0x29] sm:$0xff]  ;;  %v201_v14 = vld [vmem:[%s2165_s23 + $0x31] sm:$0xff] }
  0x12   : > { %v195_v7 = vld [vmem:[%s2165_s23 + $0x1] sm:$0xff]  ;;  %v196_v8 = vld [vmem:[%s2165_s23 + $0x9] sm:$0xff]  ;;  %v207_v9 = vpack.c.bf16 %v200_v6, %v199_v5  ;;  %v202_v15 = vld [vmem:[%s2165_s23 + $0x39] sm:$0xff] }
  0x13   : > { %v205_v10 = vpack.c.bf16 %v196_v8, %v195_v7  ;;  %2053 = vmatpush3.bf16.msra.mxu1 %v2069_v4  ;;  %1801 = vmatpush3.bf16.msra.mxu0 %v2069_v4  ;;  %v197_v16 = vld [vmem:[%s2165_s23 + $0x11] sm:$0xff]  ;;  %v198_v17 = vld [vmem:[%s2165_s23 + $0x19] sm:$0xff]  ;;  %v208_v19 = vpack.c.bf16 %v202_v15, %v201_v14  ;;  %v203_v23 = vld [vmem:[%s2165_s23 + $0x41] sm:$0xff] }
  0x14   : > { %1822 = vmatprep.subr.bf16.mxu1 %v2110_v1  ;;  %1850 = vmatprep.subr.bf16.mxu0 %v2110_v1  ;;  %v206_v20 = vpack.c.bf16 %v198_v17, %v197_v16  ;;  %v204_v24 = vld [vmem:[%s2165_s23 + $0x49] sm:$0x3f]  ;;  %v172_v32 = vld [vmem:[%s2165_s23] sm:$0xff]  ;;  %v2245_v34 = vld [vmem:[%s2165_s23 + $0x12] sm:$0xff] }
  0x15   : > { %v444_v27 = vld [vmem:[%s2165_s23 + $0x2] sm:$0xff]  ;;  %v2225_v28 = vld [vmem:[%s2165_s23 + $0xa] sm:$0xff]  ;;  %v209_v29 = vpack.c.bf16 %v204_v24, %v203_v23  ;;  %v2251_v36 = vld [vmem:[%s2165_s23 + $0x1a] sm:$0xff] }
  0x16   : > { %1811 = vmatmul.mubr.msk.bf16.vlgmr.msra.gmra.mrb[0].mxu1 %vm243_vm1, %v207_v9  ;;  %1803 = vmatmul.mubr.msk.bf16.vlgmr.msra.gmra.mrb[0].mxu0 %vm243_vm1, %v205_v10  ;;  %v454_v30 = vpack.c.bf16 %v2225_v28, %v444_v27  ;;  %v173_v33 = vld [vmem:[%s2165_s23 + $0x8] sm:$0xff]  ;;  %v455_v39 = vpack.c.bf16 %v2251_v36, %v2245_v34  ;;  %v174_v41 = vld [vmem:[%s2165_s23 + $0x10] sm:$0xff]  ;;  %v175_v42 = vld [vmem:[%s2165_s23 + $0x18] sm:$0xff]  ;;  %v600_v10 = vpack.c.bf16 %v2245_v34, %v2225_v28 }
  0x17   : > { %1823 = vmatpush3.bf16.msra.mxu1 %v2070_v11  ;;  %1814 = vmatprep.mubr.msk.bf16.mxu1 %vm2111_vm0, %v2110_v1  ;;  %v182_v37 = vpack.c.bf16 %v173_v33, %v172_v32  ;;  %v2272_v44 = vld [vmem:[%s2165_s23 + $0x22] sm:$0xff]  ;;  %v2277_v45 = vld [vmem:[%s2165_s23 + $0x2a] sm:$0xff]  ;;  %v183_v47 = vpack.c.bf16 %v175_v42, %v174_v41  ;;  %v2305_v53 = vld [vmem:[%s2165_s23 + $0x32] sm:$0xff] }
  0x18   : > { %1824 = vmatprep.subr.bf16.mxu1 %v2110_v1  ;;  %1851 = vmatpush3.bf16.msra.mxu0 %v2072_v12  ;;  %v456_v49 = vpack.c.bf16 %v2277_v45, %v2272_v44  ;;  %v176_v50 = vld [vmem:[%s2165_s23 + $0x20] sm:$0xff]  ;;  %v177_v51 = vld [vmem:[%s2165_s23 + $0x28] sm:$0xff]  ;;  %v178_v57 = vld [vmem:[%s2165_s23 + $0x30] sm:$0xff]  ;;  %v602_v24 = vpack.c.bf16 %v2305_v53, %v2277_v45 }
  0x19   : > { %1852 = vmatprep.subr.bf16.mxu0 %v2110_v1  ;;  %1806 = vmatprep.mubr.msk.bf16.mxu0 %vm2111_vm0, %v2110_v1  ;;  %v2308_v54 = vld [vmem:[%s2165_s23 + $0x3a] sm:$0xff]  ;;  %v184_v55 = vpack.c.bf16 %v177_v51, %v176_v50  ;;  %v2322_v59 = vld [vmem:[%s2165_s23 + $0x42] sm:$0xff]  ;;  %v453_v60 = vld [vmem:[%s2165_s23 + $0x4a] sm:$0x3f] }
  0x1a   : > { %v457_v56 = vpack.c.bf16 %v2308_v54, %v2305_v53  ;;  %v179_v58 = vld [vmem:[%s2165_s23 + $0x38] sm:$0xff]  ;;  %v458_v62 = vpack.c.bf16 %v453_v60, %v2322_v59  ;;  %v180_v63 = vld [vmem:[%s2165_s23 + $0x40] sm:$0xff]  ;;  %v181_v0 = vld [vmem:[%s2165_s23 + $0x48] sm:$0x3f]  ;;  %v603_v28 = vpack.c.bf16 %v2322_v59, %v2308_v54 }
  0x1b   : > { %1825 = vmatpush3.bf16.msra.mxu1 %v2071_v13  ;;  %v185_v61 = vpack.c.bf16 %v179_v58, %v178_v57  ;;  %v736_v2 = vld [vmem:[%s2165_s23 + $0xb] sm:$0xff]  ;;  %v737_v3 = vld [vmem:[%s2165_s23 + $0x13] sm:$0xff]  ;;  %v186_v4 = vpack.c.bf16 %v181_v0, %v180_v63  ;;  %v2087_v6 = vld [vmem:[%s2596_s1 + $0xc0] sm:$0xff]  }
  0x1c   : > { %1826 = vmatprep.subr.bf16.mxu1 %v2110_v1  ;;  %1853 = vmatpush3.bf16.msra.mxu0 %v2074_v18  ;;  %v746_v5 = vpack.c.bf16 %v737_v3, %v736_v2  ;;  %v738_v7 = vld [vmem:[%s2165_s23 + $0x1b] sm:$0xff]  ;;  %v739_v8 = vld [vmem:[%s2165_s23 + $0x23] sm:$0xff]  ;;  %v2091_v13 = vld [vmem:[%s2596_s1 + $0xd0] sm:$0xff]   ;;  %v601_v18 = vpack.c.bf16 %v2272_v44, %v2251_v36 }
  0x1d   : > { %1854 = vmatprep.subr.bf16.mxu0 %v2110_v1  ;;  %v2089_v9 = vld [vmem:[%s2596_s1 + $0xc8] sm:$0xff]   ;;  %v2086_v11 = vld [vmem:[%s2596_s1 + $0xa0] sm:$0xff]   ;;  %v747_v12 = vpack.c.bf16 %v739_v8, %v738_v7  ;;  %v741_v16 = vld [vmem:[%s2165_s23 + $0x33] sm:$0xff] }
  0x1e   : > { %1815 = vmatmul.mubr.msk.bf16.gmra.mrb[4].mxu1 %vm243_vm1, %v208_v19  ;;  %1807 = vmatmul.mubr.msk.bf16.gmra.mrb[4].mxu0 %vm243_vm1, %v206_v20  ;;  %v2088_v14 = vld [vmem:[%s2596_s1 + $0xa8] sm:$0xff]   ;;  %v2093_v17 = vld [vmem:[%s2596_s1 + $0xd8] sm:$0xff]   ;;  %v2090_v19 = vld [vmem:[%s2596_s1 + $0xb0] sm:$0xff]  }
  0x1f   : > { %1827 = vmatpush3.bf16.msra.mxu1 %v2073_v21  ;;  %1818 = vmatprep.mubr.msk.bf16.mxu1 %vm2111_vm0, %v2110_v1  ;;  %v740_v15 = vld [vmem:[%s2165_s23 + $0x2b] sm:$0xff]  ;;  %v2092_v21 = vld [vmem:[%s2596_s1 + $0xb8] sm:$0xff]   ;;  %v743_v23 = vld [vmem:[%s2165_s23 + $0x43] sm:$0xff] }
  0x20   : > { %1855 = vmatpush3.bf16.msra.mxu0 %v2075_v22  ;;  %1828 = vmatprep.subr.bf16.mxu1 %v2110_v1  ;;  %v748_v20 = vpack.c.bf16 %v741_v16, %v740_v15  ;;  %v742_v22 = vld [vmem:[%s2165_s23 + $0x3b] sm:$0xff]  ;;  %v745_v27 = vld [vmem:[%s2165_s23 + $0x53] sm:$0x3f]  ;;  %v2096_v45 = vld [vmem:[%s2596_s1 + $0xe8] sm:$0xff]  }
  0x21   : > { %1856 = vmatprep.subr.bf16.mxu0 %v2110_v1  ;;  %1858 = vmatprep.mubr.msk.bf16.mxu0 %vm2111_vm0, %v2110_v1  ;;  %v883_v32 = vld [vmem:[%s2165_s23 + $0x14] sm:$0xff]  ;;  %v1029_v33 = vld [vmem:[%s2165_s23 + $0x1c] sm:$0xff]  ;;  %v889_v53 = vld [vmem:[%s2165_s23 + $0x44] sm:$0xff] }
  0x22   : > { %v2095_v36 = vld [vmem:[%s2596_s1 + $0x100] sm:$0xff]   ;;  %v2099_v44 = vld [vmem:[%s2596_s1 + $0x110] sm:$0xff]  }
  0x23   : > { %1829 = vmatpush3.bf16.msra.mxu1 %v2076_v25  ;;  %v749_v25 = vpack.c.bf16 %v743_v23, %v742_v22  ;;  %v2094_v42 = vld [vmem:[%s2596_s1 + $0xe0] sm:$0xff]   ;;  %v2098_v50 = vld [vmem:[%s2596_s1 + $0xf0] sm:$0xff]  }
  0x24   : > { %1857 = vmatpush3.bf16.msra.mxu0 %v2077_v26  ;;  %1878 = vmatprep.subr.bf16.mxu1 %v2110_v1  ;;  %v744_v26 = vld [vmem:[%s2165_s23 + $0x4b] sm:$0xff]  ;;  %v1036_v57 = vld [vmem:[%s2165_s23 + $0x54] sm:$0xff]  ;;  %v1037_v58 = vld [vmem:[%s2165_s23 + $0x5c] sm:$0x3f] }
  0x25   : > { %1906 = vmatprep.subr.bf16.mxu0 %v2110_v1  ;;  %v1035_v54 = vld [vmem:[%s2165_s23 + $0x4c] sm:$0xff]  ;;  %v1042_v60 = vpack.c.bf16 %v1037_v58, %v1036_v57  ;;  %v1321_v63 = vld [vmem:[%s2165_s23 + $0x1e] sm:$0xff]  ;;  %v1174_v3 = vld [vmem:[%s2165_s23 + $0x15] sm:$0xff] }
  0x26   : > { %1819 = vmatmul.mubr.msk.bf16.gmra.mrb[8].mxu1 %vm243_vm1, %v209_v29  ;;  %v750_v29 = vpack.c.bf16 %v745_v27, %v744_v26  ;;  %v1178_v15 = vld [vmem:[%s2165_s23 + $0x35] sm:$0xff]  ;;  %v1179_v16 = vld [vmem:[%s2165_s23 + $0x3d] sm:$0xff]  ;;  %v1181_v22 = vld [vmem:[%s2165_s23 + $0x4d] sm:$0xff] }
  0x27   : > { %1830 = vmatprep.mubr.msk.bf16.mxu1 %vm2111_vm0, %v2110_v1  ;;  %1859 = vmatmul.mubr.msk.bf16.vlgmr.msra.gmra.mrb[8].mxu0 %vm243_vm1, %v454_v30  ;;  %v598_v30 = vld [vmem:[%s2165_s23 + $0x4a] sm:$0xff]  ;;  %v1328_v23 = vld [vmem:[%s2165_s23 + $0x56] sm:$0xff] }
  0x28   : > { %1907 = vmatpush3.bf16.msra.mxu0 %v2079_v31  ;;  %1862 = vmatprep.mubr.msk.bf16.mxu0 %vm2111_vm0, %v2110_v1  ;;  %v599_v31 = vld [vmem:[%s2165_s23 + $0x52] sm:$0x3f] }
  0x29   : > { %1908 = vmatprep.subr.bf16.mxu0 %v2110_v1  ;;  %v604_v34 = vpack.c.bf16 %v599_v31, %v598_v30  ;;  %v1182_v27 = vld [vmem:[%s2165_s23 + $0x55] sm:$0xff] }
  0x2c   : > { %1909 = vmatpush3.bf16.msra.mxu0 %v2081_v35  ;;  %v1038_v35 = vpack.c.bf16 %v1029_v33, %v883_v32 }
  0x2d   : > { %1910 = vmatprep.subr.bf16.mxu0 %v2110_v1 }
  0x2e   : > { %1831 = vmatmul.mubr.msk.bf16.vlgmr.msra.gmra.mrb[12].mxu1 %vm243_vm1, %v182_v37  ;;  %v882_v37 = vld [vmem:[%s2165_s23 + $0xc] sm:$0xff] }
  0x2f   : > { %1879 = vmatpush3.bf16.msra.mxu1 %v2078_v38  ;;  %1834 = vmatprep.mubr.msk.bf16.mxu1 %vm2111_vm0, %v2110_v1  ;;  %v885_v38 = vld [vmem:[%s2165_s23 + $0x24] sm:$0xff]  ;;  %v892_v41 = vpack.c.bf16 %v883_v32, %v882_v37 }
  0x30   : > { %1863 = vmatmul.mubr.msk.bf16.gmra.mrb[12].mxu0 %vm243_vm1, %v455_v39  ;;  %1880 = vmatprep.subr.bf16.mxu1 %v2110_v1  ;;  %v1031_v39 = vld [vmem:[%s2165_s23 + $0x2c] sm:$0xff] }
  0x31   : > { %1866 = vmatprep.mubr.msk.bf16.mxu0 %vm2111_vm0, %v2110_v1  ;;  %1911 = vmatpush3.bf16.msra.mxu0 %v2083_v40  ;;  %v2097_v40 = vld [vmem:[%s2596_s1 + $0x108] sm:$0xff]  }
  0x32   : > { %1912 = vmatprep.subr.bf16.mxu0 %v2110_v1 }
  0x33   : > { %1881 = vmatpush3.bf16.msra.mxu1 %v2080_v43  ;;  %v1039_v43 = vpack.c.bf16 %v1031_v39, %v885_v38 }
  0x34   : > { %1882 = vmatprep.subr.bf16.mxu1 %v2110_v1 }
  0x35   : > { %1913 = vmatpush3.bf16.msra.mxu0 %v2085_v46  ;;  %v887_v46 = vld [vmem:[%s2165_s23 + $0x34] sm:$0xff] }
  0x36   : > { %1835 = vmatmul.mubr.msk.bf16.gmra.mrb[16].mxu1 %vm243_vm1, %v183_v47  ;;  %1962 = vmatprep.subr.bf16.mxu0 %v2110_v1  ;;  %v1033_v47 = vld [vmem:[%s2165_s23 + $0x3c] sm:$0xff] }
  0x37   : > { %1838 = vmatprep.mubr.msk.bf16.mxu1 %vm2111_vm0, %v2110_v1  ;;  %1883 = vmatpush3.bf16.msra.mxu1 %v2082_v48  ;;  %v2101_v48 = vld [vmem:[%s2596_s1 + $0x118] sm:$0xff]   ;;  %v1040_v51 = vpack.c.bf16 %v1033_v47, %v887_v46  ;;  %v895_v59 = vpack.c.bf16 %v889_v53, %v1033_v47 }
  0x38   : > { %1867 = vmatmul.mubr.msk.bf16.gmra.mrb[16].mxu0 %vm243_vm1, %v456_v49  ;;  %1884 = vmatprep.subr.bf16.mxu1 %v2110_v1  ;;  %v893_v49 = vpack.c.bf16 %v885_v38, %v1029_v33 }
  0x39   : > { %1870 = vmatprep.mubr.msk.bf16.mxu0 %vm2111_vm0, %v2110_v1 }
  0x3b   : > { %1885 = vmatpush3.bf16.msra.mxu1 %v2084_v52  ;;  %v2100_v52 = vld [vmem:[%s2596_s1 + $0xf8] sm:$0xff]  }
  0x3c   : > { %1934 = vmatprep.subr.bf16.mxu1 %v2110_v1 }
  0x3e   : > { %1839 = vmatmul.mubr.msk.bf16.gmra.mrb[20].mxu1 %vm243_vm1, %v184_v55  ;;  %v894_v55 = vpack.c.bf16 %v887_v46, %v1031_v39 }
  0x3f   : > { %1842 = vmatprep.mubr.msk.bf16.mxu1 %vm2111_vm0, %v2110_v1 }
  0x40   : > { %1871 = vmatmul.mubr.msk.bf16.gmra.mrb[20].mxu0 %vm243_vm1, %v457_v56  ;;  %v1041_v56 = vpack.c.bf16 %v1035_v54, %v889_v53 }
  0x41   : > { %1874 = vmatprep.mubr.msk.bf16.mxu0 %vm2111_vm0, %v2110_v1 }
  0x46   : > { %1843 = vmatmul.mubr.msk.bf16.gmra.mrb[24].mxu1 %vm243_vm1, %v185_v61  ;;  %v891_v61 = vld [vmem:[%s2165_s23 + $0x54] sm:$0x3f] }
  0x47   : > { %1846 = vmatprep.mubr.msk.bf16.mxu1 %vm2111_vm0, %v2110_v1  ;;  %v896_v0 = vpack.c.bf16 %v891_v61, %v1035_v54 }
  0x48   : > { %1875 = vmatmul.mubr.msk.bf16.gmra.mrb[24].mxu0 %vm243_vm1, %v458_v62  ;;  %v1320_v62 = vld [vmem:[%s2165_s23 + $0x16] sm:$0xff] }
  0x49   : > { %1914 = vmatprep.mubr.msk.bf16.mxu0 %vm2111_vm0, %v2110_v1  ;;  %v1330_v2 = vpack.c.bf16 %v1321_v63, %v1320_v62 }
  0x4e   : > { %1847 = vmatmul.mubr.msk.bf16.gmra.mrb[28].mxu1 %vm243_vm1, %v186_v4  ;;  %v1175_v4 = vld [vmem:[%s2165_s23 + $0x1d] sm:$0xff] }
  0x4f   : > { %1886 = vmatprep.mubr.msk.bf16.mxu1 %vm2111_vm0, %v2110_v1  ;;  %v1184_v7 = vpack.c.bf16 %v1175_v4, %v1174_v3 }
  0x50   : > { %1915 = vmatmul.mubr.msk.bf16.vlgmr.msra.gmra.mrb[28].mxu0 %vm243_vm1, %v746_v5  ;;  %v1322_v5 = vld [vmem:[%s2165_s23 + $0x26] sm:$0xff] }
  0x51   : > { %1963 = vmatpush3.bf16.msra.mxu0 %v2087_v6  ;;  %1918 = vmatprep.mubr.msk.bf16.mxu0 %vm2111_vm0, %v2110_v1  ;;  %v1323_v6 = vld [vmem:[%s2165_s23 + $0x2e] sm:$0xff] }
  0x52   : > { %1964 = vmatprep.subr.bf16.mxu0 %v2110_v1  ;;  %v1331_v8 = vpack.c.bf16 %v1323_v6, %v1322_v5 }
  0x55   : > { %1965 = vmatpush3.bf16.msra.mxu0 %v2089_v9  ;;  %v1176_v9 = vld [vmem:[%s2165_s23 + $0x25] sm:$0xff] }
  0x56   : > { %1887 = vmatmul.mubr.msk.bf16.vlgmr.msra.gmra.mrb[32].mxu1 %vm243_vm1, %v600_v10  ;;  %1966 = vmatprep.subr.bf16.mxu0 %v2110_v1  ;;  %v1177_v10 = vld [vmem:[%s2165_s23 + $0x2d] sm:$0xff] }
  0x57   : > { %1935 = vmatpush3.bf16.msra.mxu1 %v2086_v11  ;;  %1890 = vmatprep.mubr.msk.bf16.mxu1 %vm2111_vm0, %v2110_v1  ;;  %v1324_v11 = vld [vmem:[%s2165_s23 + $0x36] sm:$0xff] }
  0x58   : > { %1919 = vmatmul.mubr.msk.bf16.gmra.mrb[32].mxu0 %vm243_vm1, %v747_v12  ;;  %1936 = vmatprep.subr.bf16.mxu1 %v2110_v1  ;;  %v1325_v12 = vld [vmem:[%s2165_s23 + $0x3e] sm:$0xff] }
  0x59   : > { %1922 = vmatprep.mubr.msk.bf16.mxu0 %vm2111_vm0, %v2110_v1  ;;  %1967 = vmatpush3.bf16.msra.mxu0 %v2091_v13  ;;  %v1185_v13 = vpack.c.bf16 %v1177_v10, %v1176_v9 }
  0x5a   : > { %1968 = vmatprep.subr.bf16.mxu0 %v2110_v1 }
  0x5b   : > { %1937 = vmatpush3.bf16.msra.mxu1 %v2088_v14  ;;  %v1332_v14 = vpack.c.bf16 %v1325_v12, %v1324_v11 }
  0x5c   : > { %1938 = vmatprep.subr.bf16.mxu1 %v2110_v1 }
  0x5d   : > { %1969 = vmatpush3.bf16.msra.mxu0 %v2093_v17  ;;  %v1326_v17 = vld [vmem:[%s2165_s23 + $0x46] sm:$0xff] }
  0x5e   : > { %1891 = vmatmul.mubr.msk.bf16.gmra.mrb[36].mxu1 %vm243_vm1, %v601_v18  ;;  %2018 = vmatprep.subr.bf16.mxu0 %v2110_v1  ;;  %v1327_v18 = vld [vmem:[%s2165_s23 + $0x4e] sm:$0xff] }
  0x5f   : > { %1894 = vmatprep.mubr.msk.bf16.mxu1 %vm2111_vm0, %v2110_v1  ;;  %1939 = vmatpush3.bf16.msra.mxu1 %v2090_v19  ;;  %v1186_v19 = vpack.c.bf16 %v1179_v16, %v1178_v15 }
  0x60   : > { %1923 = vmatmul.mubr.msk.bf16.gmra.mrb[36].mxu0 %vm243_vm1, %v748_v20  ;;  %1940 = vmatprep.subr.bf16.mxu1 %v2110_v1  ;;  %v1333_v20 = vpack.c.bf16 %v1327_v18, %v1326_v17 }
  0x61   : > { %1926 = vmatprep.mubr.msk.bf16.mxu0 %vm2111_vm0, %v2110_v1 }
  0x63   : > { %1941 = vmatpush3.bf16.msra.mxu1 %v2092_v21  ;;  %v1180_v21 = vld [vmem:[%s2165_s23 + $0x45] sm:$0xff] }
  0x64   : > { %1990 = vmatprep.subr.bf16.mxu1 %v2110_v1 }
  0x66   : > { %1895 = vmatmul.mubr.msk.bf16.gmra.mrb[40].mxu1 %vm243_vm1, %v602_v24  ;;  %v1329_v24 = vld [vmem:[%s2165_s23 + $0x5e] sm:$0x3f] }
  0x67   : > { %1898 = vmatprep.mubr.msk.bf16.mxu1 %vm2111_vm0, %v2110_v1  ;;  %v1334_v26 = vpack.c.bf16 %v1329_v24, %v1328_v23 }
  0x68   : > { %1927 = vmatmul.mubr.msk.bf16.gmra.mrb[40].mxu0 %vm243_vm1, %v749_v25  ;;  %v1187_v25 = vpack.c.bf16 %v1181_v22, %v1180_v21 }
  0x69   : > { %1930 = vmatprep.mubr.msk.bf16.mxu0 %vm2111_vm0, %v2110_v1 }
  0x6e   : > { %1899 = vmatmul.mubr.msk.bf16.gmra.mrb[44].mxu1 %vm243_vm1, %v603_v28  ;;  %v1183_v28 = vld [vmem:[%s2165_s23 + $0x5d] sm:$0x3f]  ;;  %s2055_s23 = smul.u32 80, %s2600_s13 }
  0x6f   : > { %1902 = vmatprep.mubr.msk.bf16.mxu1 %vm2111_vm0, %v2110_v1 }
  0x70   : > { %1931 = vmatmul.mubr.msk.bf16.gmra.mrb[44].mxu0 %vm243_vm1, %v750_v29  ;;  %v1188_v29 = vpack.c.bf16 %v1183_v28, %v1182_v27  ;;  %s2563_s13 = scalar_lea.vmem %s2598_s3, %s2055_s23 }
  0x71   : > { %1970 = vmatprep.mubr.msk.bf16.mxu0 %vm2111_vm0, %v2110_v1 }
  0x76   : > { %1903 = vmatmul.mubr.msk.bf16.gmra.mrb[48].mxu1 %vm243_vm1, %v604_v34 }
  0x77   : > { %1942 = vmatprep.mubr.msk.bf16.mxu1 %vm2111_vm0, %v2110_v1 }
  0x78   : > { %1971 = vmatmul.mubr.msk.bf16.vlgmr.msra.gmra.mrb[48].mxu0 %vm243_vm1, %v1038_v35 }
  0x79   : > { %2019 = vmatpush3.bf16.msra.mxu0 %v2095_v36  ;;  %1974 = vmatprep.mubr.msk.bf16.mxu0 %vm2111_vm0, %v2110_v1 }
  0x7a   : > { %2020 = vmatprep.subr.bf16.mxu0 %v2110_v1 }
  0x7d   : > { %2021 = vmatpush3.bf16.msra.mxu0 %v2097_v40 }
  0x7e   : > { %1943 = vmatmul.mubr.msk.bf16.vlgmr.msra.gmra.mrb[52].mxu1 %vm243_vm1, %v892_v41  ;;  %2022 = vmatprep.subr.bf16.mxu0 %v2110_v1 }
  0x7f   : > { %1991 = vmatpush3.bf16.msra.mxu1 %v2094_v42  ;;  %1946 = vmatprep.mubr.msk.bf16.mxu1 %vm2111_vm0, %v2110_v1 }
  0x80   : > { %1975 = vmatmul.mubr.msk.bf16.gmra.mrb[52].mxu0 %vm243_vm1, %v1039_v43  ;;  %1992 = vmatprep.subr.bf16.mxu1 %v2110_v1 }
  0x81   : > { %1978 = vmatprep.mubr.msk.bf16.mxu0 %vm2111_vm0, %v2110_v1  ;;  %2023 = vmatpush3.bf16.msra.mxu0 %v2099_v44 }
  0x82   : > { %2024 = vmatprep.subr.bf16.mxu0 %v2110_v1 }
  0x83   : > { %1993 = vmatpush3.bf16.msra.mxu1 %v2096_v45 }
  0x84   : > { %1994 = vmatprep.subr.bf16.mxu1 %v2110_v1 }
  0x85   : > { %2025 = vmatpush3.bf16.msra.mxu0 %v2101_v48 }
  0x86   : > { %1947 = vmatmul.mubr.msk.bf16.gmra.mrb[56].mxu1 %vm243_vm1, %v893_v49 }
  0x87   : > { %1950 = vmatprep.mubr.msk.bf16.mxu1 %vm2111_vm0, %v2110_v1  ;;  %1995 = vmatpush3.bf16.msra.mxu1 %v2098_v50 }
  0x88   : > { %1979 = vmatmul.mubr.msk.bf16.gmra.mrb[56].mxu0 %vm243_vm1, %v1040_v51  ;;  %1996 = vmatprep.subr.bf16.mxu1 %v2110_v1 }
  0x89   : > { %1982 = vmatprep.mubr.msk.bf16.mxu0 %vm2111_vm0, %v2110_v1 }
  0x8b   : > { %1997 = vmatpush3.bf16.msra.mxu1 %v2100_v52 }
  0x8e   : > { %1951 = vmatmul.mubr.msk.bf16.gmra.mrb[60].mxu1 %vm243_vm1, %v894_v55 }
  0x8f   : > { %1954 = vmatprep.mubr.msk.bf16.mxu1 %vm2111_vm0, %v2110_v1 }
  0x90   : > { %1983 = vmatmul.mubr.msk.bf16.gmra.mrb[60].mxu0 %vm243_vm1, %v1041_v56 }
  0x91   : > { %1986 = vmatprep.mubr.msk.bf16.mxu0 %vm2111_vm0, %v2110_v1 }
  0x96   : > { %1955 = vmatmul.mubr.msk.bf16.gmra.mrb[64].mxu1 %vm243_vm1, %v895_v59 }
  0x97   : > { %1958 = vmatprep.mubr.msk.bf16.mxu1 %vm2111_vm0, %v2110_v1 }
  0x98   : > { %1987 = vmatmul.mubr.msk.bf16.gmra.mrb[64].mxu0 %vm243_vm1, %v1042_v60 }
  0x99   : > { %2026 = vmatprep.mubr.msk.bf16.mxu0 %vm2111_vm0, %v2110_v1 }
  0x9e   : > { %1959 = vmatmul.mubr.msk.bf16.gmra.mrb[68].mxu1 %vm243_vm1, %v896_v0 }
  0x9f   : > { %1998 = vmatprep.mubr.msk.bf16.mxu1 %vm2111_vm0, %v2110_v1 }
  0xa0   : > { %2027 = vmatmul.mubr.msk.bf16.vlgmr.msra.gmra.mrb[68].mxu0 %vm243_vm1, %v1330_v2 }
  0xa1   : > { %2030 = vmatprep.mubr.msk.bf16.mxu0 %vm2111_vm0, %v2110_v1 }
  0xa6   : > { %1999 = vmatmul.mubr.msk.bf16.vlgmr.msra.gmra.mrb[72].mxu1 %vm243_vm1, %v1184_v7 }
  0xa7   : > { %2002 = vmatprep.mubr.msk.bf16.mxu1 %vm2111_vm0, %v2110_v1 }
  0xa8   : > { %2031 = vmatmul.mubr.msk.bf16.gmra.mrb[72].mxu0 %vm243_vm1, %v1331_v8 }
  0xa9   : > { %2034 = vmatprep.mubr.msk.bf16.mxu0 %vm2111_vm0, %v2110_v1 }
  0xae   : > { %2003 = vmatmul.mubr.msk.bf16.gmra.mrb[76].mxu1 %vm243_vm1, %v1185_v13 }
  0xaf   : > { %2006 = vmatprep.mubr.msk.bf16.mxu1 %vm2111_vm0, %v2110_v1 }
  0xb0   : > { %2035 = vmatmul.mubr.msk.bf16.gmra.mrb[76].mxu0 %vm243_vm1, %v1332_v14 }
  0xb1   : > { %2038 = vmatprep.mubr.msk.bf16.mxu0 %vm2111_vm0, %v2110_v1 }
  0xb6   : > { %2007 = vmatmul.mubr.msk.bf16.gmra.mrb[80].mxu1 %vm243_vm1, %v1186_v19 }
  0xb7   : > { %2010 = vmatprep.mubr.msk.bf16.mxu1 %vm2111_vm0, %v2110_v1 }
  0xb8   : > { %2039 = vmatmul.mubr.msk.bf16.gmra.mrb[80].mxu0 %vm243_vm1, %v1333_v20 }
  0xb9   : > { %2042 = vmatprep.mubr.msk.bf16.mxu0 %vm2111_vm0, %v2110_v1 }
  0xbe   : > { %2011 = vmatmul.mubr.msk.bf16.gmra.mrb[84].mxu1 %vm243_vm1, %v1187_v25 }
  0xbf   : > { %2014 = vmatprep.mubr.msk.bf16.mxu1 %vm2111_vm0, %v2110_v1 }
  0xc0   : > { %2043 = vmatmul.mubr.msk.bf16.gmra.mrb[84].mxu0 %vm243_vm1, %v1334_v26 }
  0xc6   : > { %2015 = vmatmul.mubr.msk.bf16.gmra.mrb[88].mxu1 %vm243_vm1, %v1188_v29 }
  0xe9   : > { %v309_v30 = vpop.f32.mrb[0].mxu1  ;;  %v293_v31 = vpop.f32.mrb[0].mxu0 }
  0xea   : > { %v1812_v32 = vpop.f32.mrb[1].mxu1  ;;  %v1804_v33 = vpop.f32.mrb[1].mxu0 }
  0xeb   : > { %v312_v34 = vpop.f32.mrb[2].mxu1  ;;  %v296_v35 = vpop.f32.mrb[2].mxu0 }
  0xec   : > { %v1813_v36 = vpop.f32.mrb[3].mxu1  ;;  %v1805_v37 = vpop.f32.mrb[3].mxu0 }
  0xf1   : > { %v317_v38 = vpop.f32.mrb[4].mxu1  ;;  %v301_v39 = vpop.f32.mrb[4].mxu0 }
  0xf2   : > { %v1816_v40 = vpop.f32.mrb[5].mxu1  ;;  %v1808_v41 = vpop.f32.mrb[5].mxu0 }
  0xf3   : > { %v320_v1 = vpop.f32.mrb[6].mxu1  ;;  %v304_v42 = vpop.f32.mrb[6].mxu0 }
  0xf4   : > { %v1817_v43 = vpop.f32.mrb[7].mxu1  ;;  %v1809_v44 = vpop.f32.mrb[7].mxu0 }
  0xf9   : > { %v325_v45 = vpop.f32.mrb[8].mxu1 }
  0xfa   : > { %v1820_v46 = vpop.f32.mrb[9].mxu1  ;;  %v541_v47 = vpop.f32.mrb[8].mxu0 }
  0xfb   : > { %v328_v48 = vpop.f32.mrb[10].mxu1  ;;  %v1860_v49 = vpop.f32.mrb[9].mxu0 }
  0xfc   : > { %v1821_v50 = vpop.f32.mrb[11].mxu1  ;;  %v544_v51 = vpop.f32.mrb[10].mxu0 }
  0xfd   : > { %v1861_v52 = vpop.f32.mrb[11].mxu0 }
 0x101   : > { %v405_v53 = vpop.f32.mrb[12].mxu1 }
 0x102   : > { %v406_v54 = vadd.f32 %v405_v53, %v293_v31  ;;  %v1832_v55 = vpop.f32.mrb[13].mxu1 }
 0x103   : > { %v408_v56 = vpop.f32.mrb[14].mxu1  ;;  %v549_v57 = vpop.f32.mrb[12].mxu0 }
 0x104   : > { %v580_v58 = vadd.f32 %v541_v47, %v406_v54  ;;  %v409_v59 = vadd.f32 %v408_v56, %v296_v35  ;;  %v1833_v60 = vpop.f32.mrb[15].mxu1  ;;  %v1864_v61 = vpop.f32.mrb[13].mxu0 }
 0x105   : > { %v552_v62 = vpop.f32.mrb[14].mxu0 }
 0x106   : > { %v581_v63 = vadd.f32 %v544_v51, %v409_v59  ;;  %v1865_v0 = vpop.f32.mrb[15].mxu0 }
 0x109   : > { %v413_v2 = vpop.f32.mrb[16].mxu1 }
 0x10a   : > { %v414_v3 = vadd.f32 %v413_v2, %v301_v39  ;;  %v1836_v4 = vpop.f32.mrb[17].mxu1 }
 0x10b   : > { %v416_v5 = vpop.f32.mrb[18].mxu1  ;;  %v557_v6 = vpop.f32.mrb[16].mxu0 }
 0x10c   : > { %v582_v7 = vadd.f32 %v549_v57, %v414_v3  ;;  %v417_v8 = vadd.f32 %v416_v5, %v304_v42  ;;  %v1837_v9 = vpop.f32.mrb[19].mxu1  ;;  %v1868_v10 = vpop.f32.mrb[17].mxu0 }
 0x10d   : > { %v560_v11 = vpop.f32.mrb[18].mxu0 }
 0x10e   : > { %v583_v12 = vadd.f32 %v552_v62, %v417_v8  ;;  %v1869_v13 = vpop.f32.mrb[19].mxu0 }
 0x111   : > { %v421_v14 = vpop.f32.mrb[20].mxu1 }
 0x112   : > { %v422_v15 = vadd.f32 %v421_v14, %v309_v30  ;;  %v1840_v16 = vpop.f32.mrb[21].mxu1 }
 0x113   : > { %v424_v17 = vpop.f32.mrb[22].mxu1  ;;  %v565_v18 = vpop.f32.mrb[20].mxu0 }
 0x114   : > { %v584_v19 = vadd.f32 %v557_v6, %v422_v15  ;;  %v425_v20 = vadd.f32 %v424_v17, %v312_v34  ;;  %v1841_v21 = vpop.f32.mrb[23].mxu1  ;;  %v1872_v22 = vpop.f32.mrb[21].mxu0 }
 0x115   : > { %v568_v23 = vpop.f32.mrb[22].mxu0 }
 0x116   : > { %v585_v24 = vadd.f32 %v560_v11, %v425_v20  ;;  %v1873_v25 = vpop.f32.mrb[23].mxu0 }
 0x119   : > { %v429_v26 = vpop.f32.mrb[24].mxu1 }
 0x11a   : > { %v430_v27 = vadd.f32 %v429_v26, %v317_v38  ;;  %v1844_v28 = vpop.f32.mrb[25].mxu1 }
 0x11b   : > { %v432_v29 = vpop.f32.mrb[26].mxu1  ;;  %v573_v31 = vpop.f32.mrb[24].mxu0 }
 0x11c   : > { %v586_v32 = vadd.f32 %v565_v18, %v430_v27  ;;  %v433_v33 = vadd.f32 %v432_v29, %v320_v1  ;;  %v1845_v35 = vpop.f32.mrb[27].mxu1  ;;  %v1876_v36 = vpop.f32.mrb[25].mxu0 }
 0x11d   : > { %v576_v30 = vpop.f32.mrb[26].mxu0 }
 0x11e   : > { %v587_v37 = vadd.f32 %v568_v23, %v433_v33  ;;  %v1877_v39 = vpop.f32.mrb[27].mxu0 }
 0x121   : > { %v437_v40 = vpop.f32.mrb[28].mxu1 }
 0x122   : > { %v438_v41 = vadd.f32 %v437_v40, %v325_v45  ;;  %v1848_v34 = vpop.f32.mrb[29].mxu1 }
 0x123   : > { %v440_v42 = vpop.f32.mrb[30].mxu1  ;;  %v833_v43 = vpop.f32.mrb[28].mxu0 }
 0x124   : > { %v588_v44 = vadd.f32 %v573_v31, %v438_v41  ;;  %v441_v46 = vadd.f32 %v440_v42, %v328_v48  ;;  %v1849_v47 = vpop.f32.mrb[31].mxu1  ;;  %v1916_v49 = vpop.f32.mrb[29].mxu0 }
 0x125   : > { %v836_v38 = vpop.f32.mrb[30].mxu0 }
 0x126   : > { %v589_v50 = vadd.f32 %v576_v30, %v441_v46  ;;  %v1917_v51 = vpop.f32.mrb[31].mxu0 }
 0x129   : > { %v687_v52 = vpop.f32.mrb[32].mxu1 }
 0x12a   : > { %v726_v53 = vadd.f32 %v687_v52, %v580_v58  ;;  %v1888_v1 = vpop.f32.mrb[33].mxu1 }
 0x12b   : > { %v690_v54 = vpop.f32.mrb[34].mxu1  ;;  %v841_v55 = vpop.f32.mrb[32].mxu0 }
 0x12c   : > { %v872_v56 = vadd.f32 %v833_v43, %v726_v53  ;;  %v727_v57 = vadd.f32 %v690_v54, %v581_v63  ;;  %v1889_v59 = vpop.f32.mrb[35].mxu1  ;;  %v1920_v60 = vpop.f32.mrb[33].mxu0 }
 0x12d   : > { %v844_v45 = vpop.f32.mrb[34].mxu0 }
 0x12e   : > { %v873_v61 = vadd.f32 %v836_v38, %v727_v57  ;;  %v1921_v62 = vpop.f32.mrb[35].mxu0 }
 0x131   : > { %v695_v0 = vpop.f32.mrb[36].mxu1 }
 0x132   : > { %v728_v2 = vadd.f32 %v695_v0, %v582_v7  ;;  %v1892_v48 = vpop.f32.mrb[37].mxu1 }
 0x133   : > { %v698_v3 = vpop.f32.mrb[38].mxu1  ;;  %v849_v4 = vpop.f32.mrb[36].mxu0 }
 0x134   : > { %v874_v5 = vadd.f32 %v841_v55, %v728_v2  ;;  %v729_v6 = vadd.f32 %v698_v3, %v583_v12  ;;  %v1893_v8 = vpop.f32.mrb[39].mxu1  ;;  %v1924_v9 = vpop.f32.mrb[37].mxu0 }
 0x135   : > { %v852_v58 = vpop.f32.mrb[38].mxu0 }
 0x136   : > { %v875_v10 = vadd.f32 %v844_v45, %v729_v6  ;;  %v1925_v11 = vpop.f32.mrb[39].mxu0 }
 0x139   : > { %v703_v13 = vpop.f32.mrb[40].mxu1 }
 0x13a   : > { %v730_v14 = vadd.f32 %v703_v13, %v584_v19  ;;  %v1896_v63 = vpop.f32.mrb[41].mxu1 }
 0x13b   : > { %v706_v15 = vpop.f32.mrb[42].mxu1  ;;  %v857_v16 = vpop.f32.mrb[40].mxu0 }
 0x13c   : > { %v876_v17 = vadd.f32 %v849_v4, %v730_v14  ;;  %v731_v18 = vadd.f32 %v706_v15, %v585_v24  ;;  %v1897_v20 = vpop.f32.mrb[43].mxu1  ;;  %v1928_v21 = vpop.f32.mrb[41].mxu0 }
 0x13d   : > { %v860_v7 = vpop.f32.mrb[42].mxu0 }
 0x13e   : > { %v877_v22 = vadd.f32 %v852_v58, %v731_v18  ;;  %v1929_v23 = vpop.f32.mrb[43].mxu0 }
 0x141   : > { %v711_v25 = vpop.f32.mrb[44].mxu1 }
 0x142   : > { %v732_v26 = vadd.f32 %v711_v25, %v586_v32  ;;  %v1900_v12 = vpop.f32.mrb[45].mxu1 }
 0x143   : > { %v714_v27 = vpop.f32.mrb[46].mxu1  ;;  %v865_v28 = vpop.f32.mrb[44].mxu0 }
 0x144   : > { %v878_v29 = vadd.f32 %v857_v16, %v732_v26  ;;  %v733_v31 = vadd.f32 %v714_v27, %v587_v37  ;;  %v1901_v33 = vpop.f32.mrb[47].mxu1  ;;  %v1932_v35 = vpop.f32.mrb[45].mxu0 }
 0x145   : > { %v868_v19 = vpop.f32.mrb[46].mxu0 }
 0x146   : > { %v879_v36 = vadd.f32 %v860_v7, %v733_v31  ;;  %v1933_v30 = vpop.f32.mrb[47].mxu0 }
 0x149   : > { %v719_v39 = vpop.f32.mrb[48].mxu1 }
 0x14a   : > { %v734_v40 = vadd.f32 %v719_v39, %v588_v44  ;;  %v1904_v24 = vpop.f32.mrb[49].mxu1 }
 0x14b   : > { %v722_v41 = vpop.f32.mrb[50].mxu1  ;;  %v1125_v34 = vpop.f32.mrb[48].mxu0 }
 0x14c   : > { %v880_v42 = vadd.f32 %v865_v28, %v734_v40  ;;  %v735_v43 = vadd.f32 %v722_v41, %v589_v50  ;;  %v1905_v46 = vpop.f32.mrb[51].mxu1  ;;  %v1972_v47 = vpop.f32.mrb[49].mxu0 }
 0x14d   : > { %v1128_v32 = vpop.f32.mrb[50].mxu0 }
 0x14e   : > { %v881_v49 = vadd.f32 %v868_v19, %v735_v43  ;;  %v1973_v38 = vpop.f32.mrb[51].mxu0 }
 0x151   : > { %v979_v51 = vpop.f32.mrb[52].mxu1 }
 0x152   : > { %v1018_v52 = vadd.f32 %v979_v51, %v872_v56  ;;  %v1944_v37 = vpop.f32.mrb[53].mxu1 }
 0x153   : > { %v982_v53 = vpop.f32.mrb[54].mxu1  ;;  %v1133_v1 = vpop.f32.mrb[52].mxu0 }
 0x154   : > { %v1164_v54 = vadd.f32 %v1125_v34, %v1018_v52  ;;  %v1019_v55 = vadd.f32 %v982_v53, %v873_v61  ;;  %v1945_v57 = vpop.f32.mrb[55].mxu1  ;;  %v1976_v59 = vpop.f32.mrb[53].mxu0 }
 0x155   : > { %v1136_v44 = vpop.f32.mrb[54].mxu0 }
 0x156   : > { %v1165_v60 = vadd.f32 %v1128_v32, %v1019_v55  ;;  %v1977_v45 = vpop.f32.mrb[55].mxu0 }
 0x159   : > { %v987_v62 = vpop.f32.mrb[56].mxu1 }
 0x15a   : > { %v1020_v0 = vadd.f32 %v987_v62, %v874_v5  ;;  %v1948_v50 = vpop.f32.mrb[57].mxu1 }
 0x15b   : > { %v990_v2 = vpop.f32.mrb[58].mxu1  ;;  %v1141_v48 = vpop.f32.mrb[56].mxu0 }
 0x15c   : > { %v2537_v3 = vadd.f32 %v1133_v1, %v1020_v0  ;;  %v1021_v4 = vadd.f32 %v990_v2, %v875_v10  ;;  %v1949_v6 = vpop.f32.mrb[59].mxu1  ;;  %v1980_v56 = vpop.f32.mrb[57].mxu0 }
 0x15d   : > { %v1144_v8 = vpop.f32.mrb[58].mxu0 }
 0x15e   : > { %v2539_v9 = vadd.f32 %v1136_v44, %v1021_v4  ;;  %v1981_v58 = vpop.f32.mrb[59].mxu0 }
 0x161   : > { %v995_v61 = vpop.f32.mrb[60].mxu1 }
 0x162   : > { %v1022_v11 = vadd.f32 %v995_v61, %v876_v17  ;;  %v1952_v13 = vpop.f32.mrb[61].mxu1 }
 0x163   : > { %v998_v14 = vpop.f32.mrb[62].mxu1  ;;  %v1149_v63 = vpop.f32.mrb[60].mxu0 }
 0x164   : > { %v2541_v15 = vadd.f32 %v1141_v48, %v1022_v11  ;;  %v1023_v5 = vadd.f32 %v998_v14, %v877_v22  ;;  %v1953_v16 = vpop.f32.mrb[63].mxu1  ;;  %v1984_v18 = vpop.f32.mrb[61].mxu0 }
 0x165   : > { %v1152_v20 = vpop.f32.mrb[62].mxu0 }
 0x166   : > { %v2543_v21 = vadd.f32 %v1144_v8, %v1023_v5  ;;  %v1985_v10 = vpop.f32.mrb[63].mxu0 }
 0x169   : > { %v1003_v7 = vpop.f32.mrb[64].mxu1 }
 0x16a   : > { %v1024_v23 = vadd.f32 %v1003_v7, %v878_v29  ;;  %v1956_v25 = vpop.f32.mrb[65].mxu1 }
 0x16b   : > { %v1006_v26 = vpop.f32.mrb[66].mxu1  ;;  %v1157_v12 = vpop.f32.mrb[64].mxu0 }
 0x16c   : > { %v2545_v27 = vadd.f32 %v1149_v63, %v1024_v23  ;;  %v1025_v17 = vadd.f32 %v1006_v26, %v879_v36  ;;  %v1957_v28 = vpop.f32.mrb[67].mxu1  ;;  %v1988_v31 = vpop.f32.mrb[65].mxu0 }
 0x16d   : > { %v1160_v33 = vpop.f32.mrb[66].mxu0 }
 0x16e   : > { %v2547_v35 = vadd.f32 %v1152_v20, %v1025_v17  ;;  %v1989_v22 = vpop.f32.mrb[67].mxu0 }
 0x171   : > { %v1011_v19 = vpop.f32.mrb[68].mxu1 }
 0x172   : > { %v1026_v30 = vadd.f32 %v1011_v19, %v880_v42  ;;  %v1960_v39 = vpop.f32.mrb[69].mxu1  ;;  %v2557_v42 = vld [vmem:[%s2597_s2] ss:$0 sm:$0xff] }
 0x173   : > { %v1014_v40 = vpop.f32.mrb[70].mxu1  ;;  %v1417_v24 = vpop.f32.mrb[68].mxu0 }
 0x174   : > { %v2549_v41 = vadd.f32 %v1157_v12, %v1026_v30  ;;  %v1027_v29 = vadd.f32 %v1014_v40, %v881_v49  ;;  %v1961_v34 = vpop.f32.mrb[71].mxu1  ;;  %v2028_v43 = vpop.f32.mrb[69].mxu0 }
 0x175   : > { %v1420_v46 = vpop.f32.mrb[70].mxu0 }
 0x176   : > { %v2551_v47 = vadd.f32 %v1160_v33, %v1027_v29  ;;  %v2029_v36 = vpop.f32.mrb[71].mxu0 }
 0x179   : > { %v1271_v32 = vpop.f32.mrb[72].mxu1 }
 0x17a   : > { %v1310_v38 = vadd.f32 %v1271_v32, %v1164_v54  ;;  %v2000_v51 = vpop.f32.mrb[73].mxu1 }
 0x17b   : > { %v1274_v52 = vpop.f32.mrb[74].mxu1  ;;  %v1425_v37 = vpop.f32.mrb[72].mxu0 }
 0x17c   : > { %v1456_v53 = vadd.f32 %v1417_v24, %v1310_v38  ;;  %v1311_v1 = vadd.f32 %v1274_v52, %v1165_v60  ;;  %v2001_v49 = vpop.f32.mrb[75].mxu1  ;;  %v2032_v55 = vpop.f32.mrb[73].mxu0 }
 0x17d   : > { %v1428_v57 = vpop.f32.mrb[74].mxu0 }
 0x17e   : > { %v1473_v59 = vadd.f32 %v2557_v42, %v1456_v53  ;;  %v1457_v44 = vadd.f32 %v1420_v46, %v1311_v1  ;;  %v2033_v45 = vpop.f32.mrb[75].mxu0 }
 0x180   : > { %v1483_v54 = vmax.f32 %v1473_v59, 0.0  ;;  %v1474_v62 = vadd.f32 %v2557_v42, %v1457_v44 }
 0x181   : > { %v1279_v0 = vpop.f32.mrb[76].mxu1 }
 0x182   : > { %1493 = vst [vmem:[%s2563_s13] sm:$0xff] %v1483_v54  ;;  %v1484_v60 = vmax.f32 %v1474_v62, 0.0  ;;  %v1312_v50 = vadd.f32 %v1279_v0, %v2537_v3  ;;  %v2004_v2 = vpop.f32.mrb[77].mxu1 }
 0x183   : > { %v1282_v48 = vpop.f32.mrb[78].mxu1  ;;  %v1433_v4 = vpop.f32.mrb[76].mxu0 }
 0x184   : > { %1494 = vst [vmem:[%s2563_s13 + $0x8] sm:$0xff] %v1484_v60  ;;  %v1458_v6 = vadd.f32 %v1425_v37, %v1312_v50  ;;  %v1313_v56 = vadd.f32 %v1282_v48, %v2539_v9  ;;  %v2005_v8 = vpop.f32.mrb[79].mxu1  ;;  %v2036_v58 = vpop.f32.mrb[77].mxu0 }
 0x185   : > { %v1436_v61 = vpop.f32.mrb[78].mxu0 }
 0x186   : > { %v1475_v11 = vadd.f32 %v2557_v42, %v1458_v6  ;;  %v1459_v13 = vadd.f32 %v1428_v57, %v1313_v56  ;;  %v2037_v14 = vpop.f32.mrb[79].mxu0 }
 0x188   : > { %v1485_v63 = vmax.f32 %v1475_v11, 0.0  ;;  %v1476_v5 = vadd.f32 %v2557_v42, %v1459_v13 }
 0x189   : > { %v1287_v3 = vpop.f32.mrb[80].mxu1 }
 0x18a   : > { %1495 = vst [vmem:[%s2563_s13 + $0x10] sm:$0xff] %v1485_v63  ;;  %v1486_v16 = vmax.f32 %v1476_v5, 0.0  ;;  %v1314_v18 = vadd.f32 %v1287_v3, %v2541_v15  ;;  %v2008_v20 = vpop.f32.mrb[81].mxu1 }
 0x18b   : > { %v1290_v10 = vpop.f32.mrb[82].mxu1  ;;  %v1441_v9 = vpop.f32.mrb[80].mxu0 }
 0x18c   : > { %1496 = vst [vmem:[%s2563_s13 + $0x18] sm:$0xff] %v1486_v16  ;;  %v1460_v7 = vadd.f32 %v1433_v4, %v1314_v18  ;;  %v1315_v23 = vadd.f32 %v1290_v10, %v2543_v21  ;;  %v2009_v25 = vpop.f32.mrb[83].mxu1  ;;  %v2040_v26 = vpop.f32.mrb[81].mxu0 }
 0x18d   : > { %v1444_v12 = vpop.f32.mrb[82].mxu0 }
 0x18e   : > { %v1477_v17 = vadd.f32 %v2557_v42, %v1460_v7  ;;  %v1461_v28 = vadd.f32 %v1436_v61, %v1315_v23  ;;  %v2041_v31 = vpop.f32.mrb[83].mxu0 }
 0x190   : > { %v1487_v33 = vmax.f32 %v1477_v17, 0.0  ;;  %v1478_v22 = vadd.f32 %v2557_v42, %v1461_v28 }
 0x191   : > { %v1295_v15 = vpop.f32.mrb[84].mxu1 }
 0x192   : > { %1497 = vst [vmem:[%s2563_s13 + $0x20] sm:$0xff] %v1487_v33  ;;  %v1488_v19 = vmax.f32 %v1478_v22, 0.0  ;;  %v1316_v30 = vadd.f32 %v1295_v15, %v2545_v27  ;;  %v2012_v39 = vpop.f32.mrb[85].mxu1 }
 0x193   : > { %v1298_v40 = vpop.f32.mrb[86].mxu1  ;;  %v1449_v21 = vpop.f32.mrb[84].mxu0 }
 0x194   : > { %1498 = vst [vmem:[%s2563_s13 + $0x28] sm:$0xff] %v1488_v19  ;;  %v1462_v24 = vadd.f32 %v1441_v9, %v1316_v30  ;;  %v1317_v29 = vadd.f32 %v1298_v40, %v2547_v35  ;;  %v2013_v34 = vpop.f32.mrb[87].mxu1  ;;  %v2044_v43 = vpop.f32.mrb[85].mxu0 }
 0x195   : > { %v1452_v46 = vpop.f32.mrb[86].mxu0 }
 0x196   : > { %v1479_v36 = vadd.f32 %v2557_v42, %v1462_v24  ;;  %v1463_v32 = vadd.f32 %v1444_v12, %v1317_v29  ;;  %v2045_v38 = vpop.f32.mrb[87].mxu0 }
 0x198   : > { %v1489_v51 = vmax.f32 %v1479_v36, 0.0  ;;  %v1480_v27 = vadd.f32 %v2557_v42, %v1463_v32 }
 0x199   : > { %v1303_v52 = vpop.f32.mrb[88].mxu1 }
 0x19a   : > { %1499 = vst [vmem:[%s2563_s13 + $0x30] sm:$0xff] %v1489_v51  ;;  %v1490_v37 = vmax.f32 %v1480_v27, 0.0  ;;  %v1318_v53 = vadd.f32 %v1303_v52, %v2549_v41  ;;  %v2016_v1 = vpop.f32.mrb[89].mxu1 }
 0x19b   : > { %v1306_v49 = vpop.f32.mrb[90].mxu1 }
 0x19c   : > { %1500 = vst [vmem:[%s2563_s13 + $0x38] sm:$0xff] %v1490_v37  ;;  %v1464_v35 = vadd.f32 %v1449_v21, %v1318_v53  ;;  %v1319_v55 = vadd.f32 %v1306_v49, %v2551_v47  ;;  %v2017_v57 = vpop.f32.mrb[91].mxu1 }
 0x19e   : > { %v1481_v59 = vadd.f32 %v2557_v42, %v1464_v35  ;;  %v1465_v44 = vadd.f32 %v1452_v46, %v1319_v55 }
 0x1a0   : > { %v1491_v45 = vmax.f32 %v1481_v59, 0.0  ;;  %v1482_v54 = vadd.f32 %v2557_v42, %v1465_v44 }
 0x1a2   : > { %1501 = vst [vmem:[%s2563_s13 + $0x40] sm:$0xff] %v1491_v45  ;;  %v1492_v62 = vmax.f32 %v1482_v54, 0.0 }
 0x1a4   : > { %1502 = vst [vmem:[%s2563_s13 + $0x48] sm:$0x3f] %v1492_v62 }
 0x1a5 PF: > { %s13_s12 = sadd.s32 1, %s2108_s12  }
 0x1a6   : > { %p10_p4 = scmp.ge.s32.totalorder %s13_s12, 4  }
 0x1a8   :  { %12 = sbr.rel (!%p10_p4) target bundleno = 1 (0x1), region = 70 }

// kernel: net_forward.8
= control target key start
LH: loop header
LB: loop body
LE: loop exit
PB: predicated region body
PF: predicated region fallthrough
CT: control target
= control target key end

     0   :  { %s2906_s12 = smov 0   ;;  %s3627_s0 = inlined_call_operand.vmem [shape: f32[2,100,128], index: 0, kind: input, shape index: {}]   ;;  %s3628_s1 = inlined_call_operand.vmem [shape: bf16[3,3,128,256], index: 1, kind: input, shape index: {}]   ;;  %s3629_s2 = inlined_call_operand.vmem [shape: f32[1,256], index: 2, kind: input, shape index: {}]   ;;  %s3630_s3 = inlined_call_operand.vmem [shape: f32[2,78,256], index: 3, kind: output, shape index: {}]  }
   0x1 LB: > { %s2193_s13 = sadd.s32 4294967295, %s2883_s12   ;;  %p2197_p0 = scmp.ge.s32.totalorder %s2883_s12, 1  ;;  %s2883_s12 = sphi %s2906_s12, %s13_s12  }
   0x2   : > { %p137_p1 = scmp.lt.s32.totalorder %s2883_s12, 3 }
   0x4   : > { %p138_p2 = pnand %p2197_p0, %p137_p1 }
   0x5   : > { %v2661_v0 = vld [vmem:[%s3628_s1 + $0x84] ss:$8 sps:$4 sm:$0xff] (!%p138_p2)   ;;  %v2885_v2 = vmov (!%p138_p2), 0   ;;  %v2665_v3 = vld [vmem:[%s3628_s1 + $0x80] ss:$8 sps:$4 sm:$0xff] (!%p138_p2)   ;;  %p161_p3 = scmp.lt.s32.totalorder (!%p138_p2), %s2193_s13, 1 }
   0x6   : > { %141 = sbr.rel (%p138_p2) target bundleno = 437 (0x1b5), region = 32  ;;  %v2663_v1 = vld [vmem:[%s3628_s1 + $0x204] ss:$8 sps:$4 sm:$0xff] (!%p138_p2)   ;;  %347 = vmatprep.mubr.bf16.mxu1 (!%p138_p2), %v2885_v2  ;;  %1135 = vmatprep.mubr.bf16.mxu0 (!%p138_p2), %v2885_v2  ;;  %v2666_v4 = vld [vmem:[%s3628_s1 + $0x200] ss:$8 sps:$4 sm:$0xff] (!%p138_p2)  }
   0x7   : > { %315 = vmatprep.subr.bf16.mxu1 (!%p138_p2), %v2661_v0  ;;  %1103 = vmatprep.subr.bf16.mxu0 (!%p138_p2), %v2663_v1  ;;  %v2667_v5 = vld [vmem:[%s3628_s1 + $0x94] ss:$8 sps:$4 sm:$0xff] (!%p138_p2)   ;;  %v2671_v7 = vld [vmem:[%s3628_s1 + $0x90] ss:$8 sps:$4 sm:$0xff] (!%p138_p2)   ;;  %v2673_v9 = vld [vmem:[%s3628_s1 + $0xa4] ss:$8 sps:$4 sm:$0xff] (!%p138_p2)  }
   0x8   : > { %316 = vmatpush1.bf16.msra.mxu1 (!%p138_p2), %v2665_v3  ;;  %1104 = vmatpush1.bf16.msra.mxu0 (!%p138_p2), %v2666_v4  ;;  %v2669_v6 = vld [vmem:[%s3628_s1 + $0x214] ss:$8 sps:$4 sm:$0xff] (!%p138_p2)   ;;  %v2672_v8 = vld [vmem:[%s3628_s1 + $0x210] ss:$8 sps:$4 sm:$0xff] (!%p138_p2)   ;;  %v2675_v10 = vld [vmem:[%s3628_s1 + $0x224] ss:$8 sps:$4 sm:$0xff] (!%p138_p2)  }
   0x9   : > { %317 = vmatprep.subr.bf16.mxu1 (!%p138_p2), %v2667_v5  ;;  %1105 = vmatprep.subr.bf16.mxu0 (!%p138_p2), %v2669_v6  ;;  %v2677_v11 = vld [vmem:[%s3628_s1 + $0xa0] ss:$8 sps:$4 sm:$0xff] (!%p138_p2)   ;;  %v2679_v13 = vld [vmem:[%s3628_s1 + $0xb4] ss:$8 sps:$4 sm:$0xff] (!%p138_p2)   ;;  %v2683_v15 = vld [vmem:[%s3628_s1 + $0xb0] ss:$8 sps:$4 sm:$0xff] (!%p138_p2)  }
   0xa   : > { %v2678_v12 = vld [vmem:[%s3628_s1 + $0x220] ss:$8 sps:$4 sm:$0xff] (!%p138_p2)   ;;  %v2681_v14 = vld [vmem:[%s3628_s1 + $0x234] ss:$8 sps:$4 sm:$0xff] (!%p138_p2)   ;;  %v2684_v16 = vld [vmem:[%s3628_s1 + $0x230] ss:$8 sps:$4 sm:$0xff] (!%p138_p2)  }
   0xb   : > { %v2685_v17 = vld [vmem:[%s3628_s1 + $0xc4] ss:$8 sps:$4 sm:$0xff] (!%p138_p2)   ;;  %v2689_v19 = vld [vmem:[%s3628_s1 + $0xc0] ss:$8 sps:$4 sm:$0xff] (!%p138_p2)   ;;  %v2691_v21 = vld [vmem:[%s3628_s1 + $0xd4] ss:$8 sps:$4 sm:$0xff] (!%p138_p2)  }
   0xc   : > { %318 = vmatpush1.bf16.msra.mxu1 (!%p138_p2), %v2671_v7  ;;  %1106 = vmatpush1.bf16.msra.mxu0 (!%p138_p2), %v2672_v8  ;;  %v2687_v18 = vld [vmem:[%s3628_s1 + $0x244] ss:$8 sps:$4 sm:$0xff] (!%p138_p2)   ;;  %v2690_v20 = vld [vmem:[%s3628_s1 + $0x240] ss:$8 sps:$4 sm:$0xff] (!%p138_p2)   ;;  %v2693_v22 = vld [vmem:[%s3628_s1 + $0x254] ss:$8 sps:$4 sm:$0xff] (!%p138_p2)  }
   0xd   : > { %319 = vmatprep.subr.bf16.mxu1 %v2673_v9  ;;  %1107 = vmatprep.subr.bf16.mxu0 %v2675_v10  ;;  %s3632_s13 = smov (!%p161_p3, %s2193_s13), 1  ;;  %v2695_v23 = vld [vmem:[%s3628_s1 + $0xd0] ss:$8 sps:$4 sm:$0xff]   ;;  %v2697_v25 = vld [vmem:[%s3628_s1 + $0xe4] ss:$8 sps:$4 sm:$0xff]  }
   0xe   : > { %s2650_s6 = smul.u32 104, %s3632_s13  ;;  %v2696_v24 = vld [vmem:[%s3628_s1 + $0x250] ss:$8 sps:$4 sm:$0xff]   ;;  %v2699_v26 = vld [vmem:[%s3628_s1 + $0x264] ss:$8 sps:$4 sm:$0xff]  }
   0xf   : > { %v2701_v27 = vld [vmem:[%s3628_s1 + $0xe0] ss:$8 sps:$4 sm:$0xff]   ;;  %v2703_v29 = vld [vmem:[%s3628_s1 + $0xf4] ss:$8 sps:$4 sm:$0xff]   ;;  %v2707_v31 = vld [vmem:[%s3628_s1 + $0xf0] ss:$8 sps:$4 sm:$0xff]  }
  0x10   : > { %320 = vmatpush1.bf16.msra.mxu1 %v2677_v11  ;;  %1108 = vmatpush1.bf16.msra.mxu0 %v2678_v12  ;;  %s3007_s21 = scalar_lea.vmem %s3627_s0, %s2650_s6  ;;  %v2702_v28 = vld [vmem:[%s3628_s1 + $0x260] ss:$8 sps:$4 sm:$0xff]   ;;  %v2705_v30 = vld [vmem:[%s3628_s1 + $0x274] ss:$8 sps:$4 sm:$0xff]   ;;  %v2708_v32 = vld [vmem:[%s3628_s1 + $0x270] ss:$8 sps:$4 sm:$0xff]  }
  0x11   : > { %321 = vmatprep.subr.bf16.mxu1 %v2679_v13  ;;  %1109 = vmatprep.subr.bf16.mxu0 %v2681_v14  ;;  %v203_v33 = vld [vmem:[%s3007_s21 + $0x1] sm:$0xff]  ;;  %v204_v34 = vld [vmem:[%s3007_s21 + $0x9] sm:$0xff]  ;;  %v992_v36 = vld [vmem:[%s3007_s21 + $0x13] sm:$0xff]  ;;  %s2651_s16 = smul.u32 160, %s3632_s13 }
  0x12   : > { %v991_v35 = vld [vmem:[%s3007_s21 + $0xb] sm:$0xff]  ;;  %v213_v39 = vpack.c.bf16 %v204_v34, %v203_v33  ;;  %v2714_v42 = vld [vmem:[%s3628_s1 + $0x294] ss:$8 sps:$4 sm:$0xff]   ;;  %v994_v49 = vld [vmem:[%s3007_s21 + $0x23] sm:$0xff] }
  0x13   : > { %v2711_v37 = vld [vmem:[%s3628_s1 + $0x284] ss:$8 sps:$4 sm:$0xff]   ;;  %v1001_v40 = vpack.c.bf16 %v992_v36, %v991_v35  ;;  %v2709_v41 = vld [vmem:[%s3628_s1 + $0x280] ss:$8 sps:$4 sm:$0xff]   ;;  %v2712_v43 = vld [vmem:[%s3628_s1 + $0x290] ss:$8 sps:$4 sm:$0xff]   ;;  %s3574_s18 = scalar_lea.vmem %s3630_s3, %s2651_s16 }
  0x14   : > { %322 = vmatpush1.bf16.msra.mxu1 %v2683_v15  ;;  %1110 = vmatpush1.bf16.msra.mxu0 %v2684_v16  ;;  %v2717_v38 = vld [vmem:[%s3628_s1 + $0x4] ss:$8 sps:$4 sm:$0xff]   ;;  %v205_v44 = vld [vmem:[%s3007_s21 + $0x11] sm:$0xff]  ;;  %v206_v45 = vld [vmem:[%s3007_s21 + $0x19] sm:$0xff] }
  0x15   : > { %323 = vmatprep.subr.bf16.mxu1 %v2685_v17  ;;  %1111 = vmatprep.subr.bf16.mxu0 %v2687_v18  ;;  %v2715_v46 = vld [vmem:[%s3628_s1] ss:$8 sps:$4 sm:$0xff]   ;;  %v2723_v48 = vld [vmem:[%s3628_s1 + $0x14] ss:$8 sps:$4 sm:$0xff]   ;;  %v2720_v50 = vld [vmem:[%s3628_s1 + $0x2a4] ss:$8 sps:$4 sm:$0xff]   ;;  %v214_v52 = vpack.c.bf16 %v206_v45, %v205_v44 }
  0x16   : > { %v993_v47 = vld [vmem:[%s3007_s21 + $0x1b] sm:$0xff]  ;;  %v208_v58 = vld [vmem:[%s3007_s21 + $0x29] sm:$0xff]  ;;  %v996_v62 = vld [vmem:[%s3007_s21 + $0x33] sm:$0xff] }
  0x17   : > { %v2721_v51 = vld [vmem:[%s3628_s1 + $0x10] ss:$8 sps:$4 sm:$0xff]   ;;  %v1002_v53 = vpack.c.bf16 %v994_v49, %v993_v47  ;;  %v2718_v54 = vld [vmem:[%s3628_s1 + $0x2a0] ss:$8 sps:$4 sm:$0xff]   ;;  %v2726_v55 = vld [vmem:[%s3628_s1 + $0x2b4] ss:$8 sps:$4 sm:$0xff]  }
  0x18   : > { %324 = vmatpush1.bf16.msra.mxu1 %v2689_v19  ;;  %1112 = vmatpush1.bf16.msra.mxu0 %v2690_v20  ;;  %v2724_v56 = vld [vmem:[%s3628_s1 + $0x2b0] ss:$8 sps:$4 sm:$0xff]   ;;  %v207_v57 = vld [vmem:[%s3007_s21 + $0x21] sm:$0xff]  ;;  %v2732_v63 = vld [vmem:[%s3628_s1 + $0x34] ss:$8 sps:$4 sm:$0xff]  }
  0x19   : > { %325 = vmatprep.subr.bf16.mxu1 %v2691_v21  ;;  %1113 = vmatprep.subr.bf16.mxu0 %v2693_v22  ;;  %v2729_v59 = vld [vmem:[%s3628_s1 + $0x24] ss:$8 sps:$4 sm:$0xff]   ;;  %v2727_v60 = vld [vmem:[%s3628_s1 + $0x20] ss:$8 sps:$4 sm:$0xff]   ;;  %v215_v1 = vpack.c.bf16 %v208_v58, %v207_v57  ;;  %v2730_v4 = vld [vmem:[%s3628_s1 + $0x30] ss:$8 sps:$4 sm:$0xff]  }
  0x1a   : > { %v995_v61 = vld [vmem:[%s3007_s21 + $0x2b] sm:$0xff]  ;;  %v210_v7 = vld [vmem:[%s3007_s21 + $0x39] sm:$0xff]  ;;  %v998_v12 = vld [vmem:[%s3007_s21 + $0x43] sm:$0xff] }
  0x1b   : > { %v2735_v0 = vld [vmem:[%s3628_s1 + $0x2c4] ss:$8 sps:$4 sm:$0xff]   ;;  %v1003_v3 = vpack.c.bf16 %v996_v62, %v995_v61  ;;  %v2733_v5 = vld [vmem:[%s3628_s1 + $0x2c0] ss:$8 sps:$4 sm:$0xff]   ;;  %v209_v6 = vld [vmem:[%s3007_s21 + $0x31] sm:$0xff] }
  0x1c   : > { %326 = vmatpush1.bf16.msra.mxu1 %v2695_v23  ;;  %1114 = vmatpush1.bf16.msra.mxu0 %v2696_v24  ;;  %v2736_v8 = vld [vmem:[%s3628_s1 + $0x40] ss:$8 sps:$4 sm:$0xff]   ;;  %v2738_v9 = vld [vmem:[%s3628_s1 + $0x44] ss:$8 sps:$4 sm:$0xff]   ;;  %v2741_v10 = vld [vmem:[%s3628_s1 + $0x2d4] ss:$8 sps:$4 sm:$0xff]   ;;  %v216_v16 = vpack.c.bf16 %v210_v7, %v209_v6 }
  0x1d   : > { %327 = vmatprep.subr.bf16.mxu1 %v2697_v25  ;;  %1115 = vmatprep.subr.bf16.mxu0 %v2699_v26  ;;  %v997_v11 = vld [vmem:[%s3007_s21 + $0x3b] sm:$0xff]  ;;  %v2747_v15 = vld [vmem:[%s3628_s1 + $0x2e4] ss:$8 sps:$4 sm:$0xff]   ;;  %v1000_v26 = vld [vmem:[%s3007_s21 + $0x53] sm:$0x3f] }
  0x1e   : > { %v2739_v13 = vld [vmem:[%s3628_s1 + $0x2d0] ss:$8 sps:$4 sm:$0xff]   ;;  %v2744_v14 = vld [vmem:[%s3628_s1 + $0x54] ss:$8 sps:$4 sm:$0xff]   ;;  %v1004_v17 = vpack.c.bf16 %v998_v12, %v997_v11  ;;  %v2745_v19 = vld [vmem:[%s3628_s1 + $0x2e0] ss:$8 sps:$4 sm:$0xff]  }
  0x1f   : > { %v2742_v18 = vld [vmem:[%s3628_s1 + $0x50] ss:$8 sps:$4 sm:$0xff]   ;;  %v211_v20 = vld [vmem:[%s3007_s21 + $0x41] sm:$0xff]  ;;  %v2753_v22 = vld [vmem:[%s3628_s1 + $0x2f4] ss:$8 sps:$4 sm:$0xff]  }
  0x20   : > { %328 = vmatpush1.bf16.msra.mxu1 %v2701_v27  ;;  %1116 = vmatpush1.bf16.msra.mxu0 %v2702_v28  ;;  %v2750_v21 = vld [vmem:[%s3628_s1 + $0x64] ss:$8 sps:$4 sm:$0xff]   ;;  %v2748_v24 = vld [vmem:[%s3628_s1 + $0x60] ss:$8 sps:$4 sm:$0xff]   ;;  %v2751_v27 = vld [vmem:[%s3628_s1 + $0x2f0] ss:$8 sps:$4 sm:$0xff]  }
  0x21   : > { %329 = vmatprep.subr.bf16.mxu1 %v2703_v29  ;;  %1117 = vmatprep.subr.bf16.mxu0 %v2705_v30  ;;  %v212_v23 = vld [vmem:[%s3007_s21 + $0x49] sm:$0x3f]  ;;  %v2756_v28 = vld [vmem:[%s3628_s1 + $0x74] ss:$8 sps:$4 sm:$0xff]   ;;  %v172_v34 = vld [vmem:[%s3007_s21] sm:$0xff] }
  0x22   : > { %v999_v25 = vld [vmem:[%s3007_s21 + $0x4b] sm:$0xff]  ;;  %v217_v30 = vpack.c.bf16 %v212_v23, %v211_v20  ;;  %v175_v44 = vld [vmem:[%s3007_s21 + $0x18] sm:$0xff]  ;;  %v180_v20 = vld [vmem:[%s3007_s21 + $0x40] sm:$0xff] }
  0x23   : > { %v2759_v29 = vld [vmem:[%s3628_s1 + $0x304] ss:$8 sps:$4 sm:$0xff]   ;;  %v2763_v45 = vld [vmem:[%s3628_s1 + $0x100] ss:$8 sps:$4 sm:$0xff]   ;;  %v2771_v47 = vld [vmem:[%s3628_s1 + $0x114] ss:$8 sps:$4 sm:$0xff]  }
  0x24   : > { %330 = vmatpush1.bf16.msra.mxu1 %v2707_v31  ;;  %1118 = vmatpush1.bf16.msra.mxu0 %v2708_v32  ;;  %v1005_v31 = vpack.c.bf16 %v1000_v26, %v999_v25  ;;  %v2754_v32 = vld [vmem:[%s3628_s1 + $0x70] ss:$8 sps:$4 sm:$0xff]   ;;  %v2765_v33 = vld [vmem:[%s3628_s1 + $0x104] ss:$8 sps:$4 sm:$0xff]   ;;  %v2775_v58 = vld [vmem:[%s3628_s1 + $0x120] ss:$8 sps:$4 sm:$0xff]  }
  0x25   : > { %1318 = vmatprep.subr.bf16.mxu0 %v2711_v37  ;;  %478 = vmatprep.subr.bf16.mxu1 %v2717_v38  ;;  %v173_v35 = vld [vmem:[%s3007_s21 + $0x8] sm:$0xff]  ;;  %v3159_v37 = vld [vmem:[%s3007_s21 + $0x14] sm:$0xff] }
  0x26   : > { %v1206_v36 = vld [vmem:[%s3007_s21 + $0xc] sm:$0xff]  ;;  %v182_v38 = vpack.c.bf16 %v173_v35, %v172_v34  ;;  %v3217_v61 = vld [vmem:[%s3007_s21 + $0x34] sm:$0xff]  ;;  %v3250_v11 = vld [vmem:[%s3007_s21 + $0x44] sm:$0xff] }
  0x27   : > { %348 = vmatmul.mubr.bf16.vlgmr.msra.gmra.mrb[0].mxu1 %v213_v39  ;;  %1136 = vmatmul.mubr.bf16.vlgmr.msra.gmra.mrb[0].mxu0 %v1001_v40  ;;  %v1216_v39 = vpack.c.bf16 %v3159_v37, %v1206_v36  ;;  %v2757_v40 = vld [vmem:[%s3628_s1 + $0x300] ss:$8 sps:$4 sm:$0xff]   ;;  %v2768_v49 = vld [vmem:[%s3628_s1 + $0x324] ss:$8 sps:$4 sm:$0xff]   ;;  %v2780_v62 = vld [vmem:[%s3628_s1 + $0x134] ss:$8 sps:$4 sm:$0xff]  }
  0x28   : > { %1319 = vmatpush1.bf16.msra.mxu0 %v2709_v41  ;;  %357 = vmatprep.mubr.bf16.mxu1 %v2885_v2  ;;  %v2762_v41 = vld [vmem:[%s3628_s1 + $0x314] ss:$8 sps:$4 sm:$0xff]   ;;  %v177_v57 = vld [vmem:[%s3007_s21 + $0x28] sm:$0xff]  ;;  %v2787_v12 = vld [vmem:[%s3628_s1 + $0x350] ss:$8 sps:$4 sm:$0xff]  }
  0x29   : > { %1320 = vmatprep.subr.bf16.mxu0 %v2714_v42  ;;  %1145 = vmatprep.mubr.bf16.mxu0 %v2885_v2  ;;  %v2760_v42 = vld [vmem:[%s3628_s1 + $0x310] ss:$8 sps:$4 sm:$0xff]   ;;  %v2796_v23 = vld [vmem:[%s3628_s1 + $0x160] ss:$8 sps:$4 sm:$0xff]  }
  0x2a   : > { %479 = vmatpush1.bf16.msra.mxu1 %v2715_v46  ;;  %v3178_v46 = vld [vmem:[%s3007_s21 + $0x1c] sm:$0xff]  ;;  %v178_v6 = vld [vmem:[%s3007_s21 + $0x30] sm:$0xff] }
  0x2b   : > { %480 = vmatprep.subr.bf16.mxu1 %v2723_v48  ;;  %v3185_v48 = vld [vmem:[%s3007_s21 + $0x24] sm:$0xff]  ;;  %v179_v7 = vld [vmem:[%s3007_s21 + $0x38] sm:$0xff]  ;;  %v1431_v36 = vpack.c.bf16 %v3178_v46, %v3159_v37 }
  0x2c   : > { %1321 = vmatpush1.bf16.msra.mxu0 %v2712_v43  ;;  %v174_v43 = vld [vmem:[%s3007_s21 + $0x10] sm:$0xff] }
  0x2d   : > { %1322 = vmatprep.subr.bf16.mxu0 %v2720_v50  ;;  %v2769_v50 = vld [vmem:[%s3628_s1 + $0x110] ss:$8 sps:$4 sm:$0xff]   ;;  %v2819_v37 = vld [vmem:[%s3628_s1 + $0x194] ss:$8 sps:$4 sm:$0xff]  }
  0x2e   : > { %481 = vmatpush1.bf16.msra.mxu1 %v2721_v51  ;;  %v183_v51 = vpack.c.bf16 %v175_v44, %v174_v43  ;;  %v1215_v25 = vld [vmem:[%s3007_s21 + $0x54] sm:$0x3f]  ;;  %v3307_v34 = vld [vmem:[%s3007_s21 + $0xa] sm:$0xff]  ;;  %v3333_v43 = vld [vmem:[%s3007_s21 + $0x1a] sm:$0xff] }
  0x2f   : > { %358 = vmatmul.mubr.bf16.gmra.mrb[4].mxu1 %v214_v52  ;;  %1146 = vmatmul.mubr.bf16.gmra.mrb[4].mxu0 %v1002_v53  ;;  %v1217_v52 = vpack.c.bf16 %v3185_v48, %v3178_v46  ;;  %v2766_v53 = vld [vmem:[%s3628_s1 + $0x320] ss:$8 sps:$4 sm:$0xff]   ;;  %v2799_v26 = vld [vmem:[%s3628_s1 + $0x370] ss:$8 sps:$4 sm:$0xff]   ;;  %v2816_v44 = vld [vmem:[%s3628_s1 + $0x3a4] ss:$8 sps:$4 sm:$0xff]  }
  0x30   : > { %1323 = vmatpush1.bf16.msra.mxu0 %v2718_v54  ;;  %367 = vmatprep.mubr.bf16.mxu1 %v2885_v2  ;;  %v2774_v54 = vld [vmem:[%s3628_s1 + $0x334] ss:$8 sps:$4 sm:$0xff]  }
  0x31   : > { %1155 = vmatprep.mubr.bf16.mxu0 %v2885_v2  ;;  %1324 = vmatprep.subr.bf16.mxu0 %v2726_v55  ;;  %v2772_v55 = vld [vmem:[%s3628_s1 + $0x330] ss:$8 sps:$4 sm:$0xff]  }
  0x32   : > { %482 = vmatprep.subr.bf16.mxu1 %v2729_v59  ;;  %v2777_v59 = vld [vmem:[%s3628_s1 + $0x124] ss:$8 sps:$4 sm:$0xff]  }
  0x33   : > { %483 = vmatpush1.bf16.msra.mxu1 %v2727_v60  ;;  %v3214_v60 = vld [vmem:[%s3007_s21 + $0x2c] sm:$0xff] }
  0x34   : > { %1325 = vmatpush1.bf16.msra.mxu0 %v2724_v56  ;;  %484 = vmatprep.subr.bf16.mxu1 %v2732_v63  ;;  %v176_v56 = vld [vmem:[%s3007_s21 + $0x20] sm:$0xff] }
  0x35   : > { %1326 = vmatprep.subr.bf16.mxu0 %v2735_v0  ;;  %v2783_v63 = vld [vmem:[%s3628_s1 + $0x344] ss:$8 sps:$4 sm:$0xff]   ;;  %v184_v0 = vpack.c.bf16 %v177_v57, %v176_v56 }
  0x36   : > { %v2831_v56 = vld [vmem:[%s3628_s1 + $0x3c4] ss:$8 sps:$4 sm:$0xff]  }
  0x37   : > { %368 = vmatmul.mubr.bf16.gmra.mrb[8].mxu1 %v215_v1  ;;  %1156 = vmatmul.mubr.bf16.gmra.mrb[8].mxu0 %v1003_v3  ;;  %v1218_v1 = vpack.c.bf16 %v3217_v61, %v3214_v60  ;;  %v2778_v3 = vld [vmem:[%s3628_s1 + $0x130] ss:$8 sps:$4 sm:$0xff]  }
  0x38   : > { %485 = vmatpush1.bf16.msra.mxu1 %v2730_v4  ;;  %1327 = vmatpush1.bf16.msra.mxu0 %v2733_v5  ;;  %v2781_v4 = vld [vmem:[%s3628_s1 + $0x340] ss:$8 sps:$4 sm:$0xff]   ;;  %v2786_v5 = vld [vmem:[%s3628_s1 + $0x144] ss:$8 sps:$4 sm:$0xff]  }
  0x39   : > { %377 = vmatprep.mubr.bf16.mxu1 %v2885_v2  ;;  %1165 = vmatprep.mubr.bf16.mxu0 %v2885_v2 }
  0x3a   : > { %486 = vmatprep.subr.bf16.mxu1 %v2738_v9  ;;  %1328 = vmatprep.subr.bf16.mxu0 %v2741_v10  ;;  %v2789_v9 = vld [vmem:[%s3628_s1 + $0x354] ss:$8 sps:$4 sm:$0xff]  }
  0x3b   : > { %v3247_v10 = vld [vmem:[%s3007_s21 + $0x3c] sm:$0xff] }
  0x3c   : > { %487 = vmatpush1.bf16.msra.mxu1 %v2736_v8  ;;  %1329 = vmatpush1.bf16.msra.mxu0 %v2739_v13  ;;  %v2784_v8 = vld [vmem:[%s3628_s1 + $0x140] ss:$8 sps:$4 sm:$0xff]   ;;  %v2792_v13 = vld [vmem:[%s3628_s1 + $0x154] ss:$8 sps:$4 sm:$0xff]  }
  0x3d   : > { %488 = vmatprep.subr.bf16.mxu1 %v2744_v14  ;;  %1330 = vmatprep.subr.bf16.mxu0 %v2747_v15  ;;  %v2795_v14 = vld [vmem:[%s3628_s1 + $0x364] ss:$8 sps:$4 sm:$0xff]   ;;  %v185_v15 = vpack.c.bf16 %v179_v7, %v178_v6 }
  0x3f   : > { %378 = vmatmul.mubr.bf16.gmra.mrb[12].mxu1 %v216_v16  ;;  %1166 = vmatmul.mubr.bf16.gmra.mrb[12].mxu0 %v1004_v17  ;;  %v1219_v16 = vpack.c.bf16 %v3250_v11, %v3247_v10  ;;  %v2790_v17 = vld [vmem:[%s3628_s1 + $0x150] ss:$8 sps:$4 sm:$0xff]  }
  0x40   : > { %489 = vmatpush1.bf16.msra.mxu1 %v2742_v18  ;;  %387 = vmatprep.mubr.bf16.mxu1 %v2885_v2  ;;  %v2793_v18 = vld [vmem:[%s3628_s1 + $0x360] ss:$8 sps:$4 sm:$0xff]  }
  0x41   : > { %1175 = vmatprep.mubr.bf16.mxu0 %v2885_v2  ;;  %1331 = vmatpush1.bf16.msra.mxu0 %v2745_v19  ;;  %v2798_v19 = vld [vmem:[%s3628_s1 + $0x164] ss:$8 sps:$4 sm:$0xff]  }
  0x42   : > { %490 = vmatprep.subr.bf16.mxu1 %v2750_v21  ;;  %1332 = vmatprep.subr.bf16.mxu0 %v2753_v22  ;;  %v181_v21 = vld [vmem:[%s3007_s21 + $0x48] sm:$0x3f]  ;;  %v2801_v22 = vld [vmem:[%s3628_s1 + $0x374] ss:$8 sps:$4 sm:$0xff]  }
  0x44   : > { %491 = vmatpush1.bf16.msra.mxu1 %v2748_v24  ;;  %v3283_v24 = vld [vmem:[%s3007_s21 + $0x4c] sm:$0xff] }
  0x45   : > { %492 = vmatprep.subr.bf16.mxu1 %v2756_v28  ;;  %1333 = vmatpush1.bf16.msra.mxu0 %v2751_v27  ;;  %v2804_v27 = vld [vmem:[%s3628_s1 + $0x174] ss:$8 sps:$4 sm:$0xff]   ;;  %v2807_v28 = vld [vmem:[%s3628_s1 + $0x384] ss:$8 sps:$4 sm:$0xff]   ;;  %v1434_v7 = vpack.c.bf16 %v3283_v24, %v3250_v11 }
  0x46   : > { %1533 = vmatprep.subr.bf16.mxu0 %v2759_v29  ;;  %v186_v29 = vpack.c.bf16 %v181_v21, %v180_v20  ;;  %v2849_v11 = vld [vmem:[%s3628_s1 + $0x3f4] ss:$8 sps:$4 sm:$0xff]  }
  0x47   : > { %388 = vmatmul.mubr.bf16.gmra.mrb[16].mxu1 %v217_v30  ;;  %1176 = vmatmul.mubr.bf16.gmra.mrb[16].mxu0 %v1005_v31  ;;  %v1220_v30 = vpack.c.bf16 %v1215_v25, %v3283_v24  ;;  %v2802_v31 = vld [vmem:[%s3628_s1 + $0x170] ss:$8 sps:$4 sm:$0xff]   ;;  %v1637_v24 = vld [vmem:[%s3007_s21 + $0x1d] sm:$0xff] }
  0x48   : > { %493 = vmatpush1.bf16.msra.mxu1 %v2754_v32  ;;  %510 = vmatprep.mubr.bf16.mxu1 %v2885_v2  ;;  %v2813_v32 = vld [vmem:[%s3628_s1 + $0x184] ss:$8 sps:$4 sm:$0xff]  }
  0x49   : > { %1350 = vmatprep.mubr.bf16.mxu0 %v2885_v2  ;;  %673 = vmatprep.subr.bf16.mxu1 %v2765_v33  ;;  %v561_v33 = vld [vmem:[%s3007_s21 + $0x2] sm:$0xff] }
  0x4a   : > { %v571_v35 = vpack.c.bf16 %v3307_v34, %v561_v33 }
  0x4f   : > { %511 = vmatmul.mubr.bf16.vlgmr.msra.gmra.mrb[0].mxu1 %v182_v38  ;;  %1351 = vmatmul.mubr.bf16.vlgmr.msra.gmra.mrb[0].mxu0 %v1216_v39  ;;  %v2805_v38 = vld [vmem:[%s3628_s1 + $0x380] ss:$8 sps:$4 sm:$0xff]   ;;  %v2810_v39 = vld [vmem:[%s3628_s1 + $0x394] ss:$8 sps:$4 sm:$0xff]  }
  0x50   : > { %1534 = vmatpush1.bf16.msra.mxu0 %v2757_v40  ;;  %520 = vmatprep.mubr.bf16.mxu1 %v2885_v2  ;;  %v2811_v40 = vld [vmem:[%s3628_s1 + $0x180] ss:$8 sps:$4 sm:$0xff]  }
  0x51   : > { %1535 = vmatprep.subr.bf16.mxu0 %v2762_v41  ;;  %1360 = vmatprep.mubr.bf16.mxu0 %v2885_v2  ;;  %v2808_v41 = vld [vmem:[%s3628_s1 + $0x390] ss:$8 sps:$4 sm:$0xff]  }
  0x52   : > { %674 = vmatpush1.bf16.msra.mxu1 %v2763_v45  ;;  %v2817_v45 = vld [vmem:[%s3628_s1 + $0x190] ss:$8 sps:$4 sm:$0xff]  }
  0x53   : > { %675 = vmatprep.subr.bf16.mxu1 %v2771_v47  ;;  %v1432_v47 = vpack.c.bf16 %v3214_v60, %v3185_v48  ;;  %v2820_v48 = vld [vmem:[%s3628_s1 + $0x3b0] ss:$8 sps:$4 sm:$0xff]   ;;  %v2829_v60 = vld [vmem:[%s3628_s1 + $0x3c0] ss:$8 sps:$4 sm:$0xff]  }
  0x54   : > { %1536 = vmatpush1.bf16.msra.mxu0 %v2760_v42  ;;  %v3326_v42 = vld [vmem:[%s3007_s21 + $0x12] sm:$0xff] }
  0x55   : > { %1537 = vmatprep.subr.bf16.mxu0 %v2768_v49  ;;  %v572_v46 = vpack.c.bf16 %v3333_v43, %v3326_v42  ;;  %v2814_v49 = vld [vmem:[%s3628_s1 + $0x3a0] ss:$8 sps:$4 sm:$0xff]   ;;  %v786_v25 = vpack.c.bf16 %v3326_v42, %v3307_v34 }
  0x56   : > { %676 = vmatpush1.bf16.msra.mxu1 %v2769_v50  ;;  %v2822_v50 = vld [vmem:[%s3628_s1 + $0x3b4] ss:$8 sps:$4 sm:$0xff]  }
  0x57   : > { %521 = vmatmul.mubr.bf16.gmra.mrb[4].mxu1 %v183_v51  ;;  %1361 = vmatmul.mubr.bf16.gmra.mrb[4].mxu0 %v1217_v52  ;;  %v2825_v51 = vld [vmem:[%s3628_s1 + $0x1a4] ss:$8 sps:$4 sm:$0xff]   ;;  %v2823_v52 = vld [vmem:[%s3628_s1 + $0x1a0] ss:$8 sps:$4 sm:$0xff]  }
  0x58   : > { %1538 = vmatpush1.bf16.msra.mxu0 %v2766_v53  ;;  %530 = vmatprep.mubr.bf16.mxu1 %v2885_v2  ;;  %v3363_v53 = vld [vmem:[%s3007_s21 + $0x22] sm:$0xff] }
  0x59   : > { %1370 = vmatprep.mubr.bf16.mxu0 %v2885_v2  ;;  %1539 = vmatprep.subr.bf16.mxu0 %v2774_v54  ;;  %v3366_v54 = vld [vmem:[%s3007_s21 + $0x2a] sm:$0xff]  ;;  %v787_v33 = vpack.c.bf16 %v3363_v53, %v3333_v43 }
  0x5a   : > { %677 = vmatprep.subr.bf16.mxu1 %v2777_v59  ;;  %v573_v57 = vpack.c.bf16 %v3366_v54, %v3363_v53  ;;  %v2826_v59 = vld [vmem:[%s3628_s1 + $0x1b0] ss:$8 sps:$4 sm:$0xff]   ;;  %v2865_v43 = vld [vmem:[%s3628_s1 + $0x440] ss:$8 sps:$4 sm:$0xff]  }
  0x5b   : > { %678 = vmatpush1.bf16.msra.mxu1 %v2775_v58  ;;  %v1433_v58 = vpack.c.bf16 %v3247_v10, %v3217_v61  ;;  %v2837_v61 = vld [vmem:[%s3628_s1 + $0x3d4] ss:$8 sps:$4 sm:$0xff]   ;;  %v2846_v10 = vld [vmem:[%s3628_s1 + $0x1e4] ss:$8 sps:$4 sm:$0xff]  }
  0x5c   : > { %1540 = vmatpush1.bf16.msra.mxu0 %v2772_v55  ;;  %679 = vmatprep.subr.bf16.mxu1 %v2780_v62  ;;  %v2828_v55 = vld [vmem:[%s3628_s1 + $0x1b4] ss:$8 sps:$4 sm:$0xff]   ;;  %v2834_v62 = vld [vmem:[%s3628_s1 + $0x1c4] ss:$8 sps:$4 sm:$0xff]  }
  0x5d   : > { %1541 = vmatprep.subr.bf16.mxu0 %v2783_v63  ;;  %v3392_v63 = vld [vmem:[%s3007_s21 + $0x32] sm:$0xff]  ;;  %v784_v53 = vld [vmem:[%s3007_s21 + $0x4a] sm:$0xff] }
  0x5e   : > { %v788_v42 = vpack.c.bf16 %v3392_v63, %v3366_v54  ;;  %v785_v54 = vld [vmem:[%s3007_s21 + $0x52] sm:$0x3f] }
  0x5f   : > { %531 = vmatmul.mubr.bf16.gmra.mrb[8].mxu1 %v184_v0  ;;  %1371 = vmatmul.mubr.bf16.gmra.mrb[8].mxu0 %v1218_v1  ;;  %v3395_v0 = vld [vmem:[%s3007_s21 + $0x3a] sm:$0xff] }
  0x60   : > { %680 = vmatpush1.bf16.msra.mxu1 %v2778_v3  ;;  %1542 = vmatpush1.bf16.msra.mxu0 %v2781_v4  ;;  %v2832_v1 = vld [vmem:[%s3628_s1 + $0x1c0] ss:$8 sps:$4 sm:$0xff]   ;;  %v2835_v3 = vld [vmem:[%s3628_s1 + $0x3d0] ss:$8 sps:$4 sm:$0xff]   ;;  %v2840_v4 = vld [vmem:[%s3628_s1 + $0x1d4] ss:$8 sps:$4 sm:$0xff]   ;;  %v574_v6 = vpack.c.bf16 %v3395_v0, %v3392_v63 }
  0x61   : > { %540 = vmatprep.mubr.bf16.mxu1 %v2885_v2  ;;  %1380 = vmatprep.mubr.bf16.mxu0 %v2885_v2  ;;  %v1858_v63 = vld [vmem:[%s3007_s21 + $0x4e] sm:$0xff] }
  0x62   : > { %681 = vmatprep.subr.bf16.mxu1 %v2786_v5  ;;  %1543 = vmatprep.subr.bf16.mxu0 %v2789_v9  ;;  %v2843_v5 = vld [vmem:[%s3628_s1 + $0x3e4] ss:$8 sps:$4 sm:$0xff]   ;;  %v2841_v9 = vld [vmem:[%s3628_s1 + $0x3e0] ss:$8 sps:$4 sm:$0xff]  }
  0x64   : > { %682 = vmatpush1.bf16.msra.mxu1 %v2784_v8  ;;  %1544 = vmatpush1.bf16.msra.mxu0 %v2787_v12  ;;  %v2838_v8 = vld [vmem:[%s3628_s1 + $0x1d0] ss:$8 sps:$4 sm:$0xff]   ;;  %v3428_v12 = vld [vmem:[%s3007_s21 + $0x42] sm:$0xff] }
  0x65   : > { %683 = vmatprep.subr.bf16.mxu1 %v2792_v13  ;;  %1545 = vmatprep.subr.bf16.mxu0 %v2795_v14  ;;  %v570_v13 = vld [vmem:[%s3007_s21 + $0x4a] sm:$0x3f] }
  0x66   : > { %v2844_v14 = vld [vmem:[%s3628_s1 + $0x1e0] ss:$8 sps:$4 sm:$0xff]   ;;  %v575_v20 = vpack.c.bf16 %v570_v13, %v3428_v12 }
  0x67   : > { %541 = vmatmul.mubr.bf16.gmra.mrb[12].mxu1 %v185_v15  ;;  %1381 = vmatmul.mubr.bf16.gmra.mrb[12].mxu0 %v1219_v16  ;;  %v1429_v15 = vld [vmem:[%s3007_s21 + $0x54] sm:$0xff]  ;;  %v1430_v16 = vld [vmem:[%s3007_s21 + $0x5c] sm:$0x3f] }
  0x68   : > { %684 = vmatpush1.bf16.msra.mxu1 %v2790_v17  ;;  %550 = vmatprep.mubr.bf16.mxu1 %v2885_v2  ;;  %v2847_v17 = vld [vmem:[%s3628_s1 + $0x3f0] ss:$8 sps:$4 sm:$0xff]   ;;  %v1435_v21 = vpack.c.bf16 %v1430_v16, %v1429_v15 }
  0x69   : > { %1390 = vmatprep.mubr.bf16.mxu0 %v2885_v2  ;;  %1546 = vmatpush1.bf16.msra.mxu0 %v2793_v18  ;;  %v2852_v18 = vld [vmem:[%s3628_s1 + $0x1f4] ss:$8 sps:$4 sm:$0xff]  }
  0x6a   : > { %685 = vmatprep.subr.bf16.mxu1 %v2798_v19  ;;  %1547 = vmatprep.subr.bf16.mxu0 %v2801_v22  ;;  %v2855_v19 = vld [vmem:[%s3628_s1 + $0x404] ss:$8 sps:$4 sm:$0xff]   ;;  %v2850_v22 = vld [vmem:[%s3628_s1 + $0x1f0] ss:$8 sps:$4 sm:$0xff]  }
  0x6c   : > { %686 = vmatpush1.bf16.msra.mxu1 %v2796_v23  ;;  %v1636_v23 = vld [vmem:[%s3007_s21 + $0x15] sm:$0xff] }
  0x6d   : > { %687 = vmatprep.subr.bf16.mxu1 %v2804_v27  ;;  %1548 = vmatpush1.bf16.msra.mxu0 %v2799_v26  ;;  %v1646_v26 = vpack.c.bf16 %v1637_v24, %v1636_v23  ;;  %v2853_v27 = vld [vmem:[%s3628_s1 + $0x400] ss:$8 sps:$4 sm:$0xff]  }
  0x6e   : > { %1748 = vmatprep.subr.bf16.mxu0 %v2807_v28  ;;  %v2858_v28 = vld [vmem:[%s3628_s1 + $0x414] ss:$8 sps:$4 sm:$0xff]  }
  0x6f   : > { %551 = vmatmul.mubr.bf16.gmra.mrb[16].mxu1 %v186_v29  ;;  %1391 = vmatmul.mubr.bf16.gmra.mrb[16].mxu0 %v1220_v30  ;;  %v2856_v29 = vld [vmem:[%s3628_s1 + $0x410] ss:$8 sps:$4 sm:$0xff]   ;;  %v1638_v30 = vld [vmem:[%s3007_s21 + $0x25] sm:$0xff] }
  0x70   : > { %688 = vmatpush1.bf16.msra.mxu1 %v2802_v31  ;;  %705 = vmatprep.mubr.bf16.mxu1 %v2885_v2  ;;  %v1639_v31 = vld [vmem:[%s3007_s21 + $0x2d] sm:$0xff] }
  0x71   : > { %1565 = vmatprep.mubr.bf16.mxu0 %v2885_v2  ;;  %888 = vmatprep.subr.bf16.mxu1 %v2813_v32  ;;  %v2861_v32 = vld [vmem:[%s3628_s1 + $0x424] ss:$8 sps:$4 sm:$0xff]   ;;  %v1647_v34 = vpack.c.bf16 %v1639_v31, %v1638_v30 }
  0x77   : > { %706 = vmatmul.mubr.bf16.vlgmr.msra.gmra.mrb[0].mxu1 %v571_v35  ;;  %1566 = vmatmul.mubr.bf16.vlgmr.msra.gmra.mrb[0].mxu0 %v1431_v36  ;;  %v2859_v35 = vld [vmem:[%s3628_s1 + $0x420] ss:$8 sps:$4 sm:$0xff]   ;;  %v2864_v36 = vld [vmem:[%s3628_s1 + $0x434] ss:$8 sps:$4 sm:$0xff]  }
  0x78   : > { %1749 = vmatpush1.bf16.msra.mxu0 %v2805_v38  ;;  %715 = vmatprep.mubr.bf16.mxu1 %v2885_v2  ;;  %v2862_v38 = vld [vmem:[%s3628_s1 + $0x430] ss:$8 sps:$4 sm:$0xff]  }
  0x79   : > { %1750 = vmatprep.subr.bf16.mxu0 %v2810_v39  ;;  %1575 = vmatprep.mubr.bf16.mxu0 %v2885_v2  ;;  %v1640_v39 = vld [vmem:[%s3007_s21 + $0x35] sm:$0xff] }
  0x7a   : > { %889 = vmatpush1.bf16.msra.mxu1 %v2811_v40  ;;  %v1641_v40 = vld [vmem:[%s3007_s21 + $0x3d] sm:$0xff] }
  0x7b   : > { %890 = vmatprep.subr.bf16.mxu1 %v2819_v37  ;;  %v1648_v37 = vpack.c.bf16 %v1641_v40, %v1640_v39 }
  0x7c   : > { %1751 = vmatpush1.bf16.msra.mxu0 %v2808_v41  ;;  %v2867_v41 = vld [vmem:[%s3628_s1 + $0x444] ss:$8 sps:$4 sm:$0xff]  }
  0x7d   : > { %1752 = vmatprep.subr.bf16.mxu0 %v2816_v44  ;;  %v2870_v44 = vld [vmem:[%s3628_s1 + $0x454] ss:$8 sps:$4 sm:$0xff]  }
  0x7e   : > { %891 = vmatpush1.bf16.msra.mxu1 %v2817_v45  ;;  %v1642_v45 = vld [vmem:[%s3007_s21 + $0x45] sm:$0xff] }
  0x7f   : > { %716 = vmatmul.mubr.bf16.gmra.mrb[4].mxu1 %v572_v46  ;;  %1576 = vmatmul.mubr.bf16.gmra.mrb[4].mxu0 %v1432_v47  ;;  %v1643_v46 = vld [vmem:[%s3007_s21 + $0x4d] sm:$0xff] }
  0x80   : > { %1753 = vmatpush1.bf16.msra.mxu0 %v2814_v49  ;;  %725 = vmatprep.mubr.bf16.mxu1 %v2885_v2  ;;  %v2868_v47 = vld [vmem:[%s3628_s1 + $0x450] ss:$8 sps:$4 sm:$0xff]   ;;  %v2873_v49 = vld [vmem:[%s3628_s1 + $0x464] ss:$8 sps:$4 sm:$0xff]  }
  0x81   : > { %1585 = vmatprep.mubr.bf16.mxu0 %v2885_v2  ;;  %1754 = vmatprep.subr.bf16.mxu0 %v2822_v50  ;;  %v789_v50 = vpack.c.bf16 %v3428_v12, %v3395_v0 }
  0x82   : > { %892 = vmatprep.subr.bf16.mxu1 %v2825_v51  ;;  %v1649_v51 = vpack.c.bf16 %v1643_v46, %v1642_v45 }
  0x83   : > { %893 = vmatpush1.bf16.msra.mxu1 %v2823_v52  ;;  %v2876_v52 = vld [vmem:[%s3628_s1 + $0x474] ss:$8 sps:$4 sm:$0xff]  }
  0x84   : > { %1755 = vmatpush1.bf16.msra.mxu0 %v2820_v48  ;;  %894 = vmatprep.subr.bf16.mxu1 %v2828_v55  ;;  %v2871_v48 = vld [vmem:[%s3628_s1 + $0x460] ss:$8 sps:$4 sm:$0xff]   ;;  %v1644_v55 = vld [vmem:[%s3007_s21 + $0x55] sm:$0xff] }
  0x85   : > { %1756 = vmatprep.subr.bf16.mxu0 %v2831_v56  ;;  %v1645_v56 = vld [vmem:[%s3007_s21 + $0x5d] sm:$0x3f] }
  0x87   : > { %726 = vmatmul.mubr.bf16.gmra.mrb[8].mxu1 %v573_v57  ;;  %1586 = vmatmul.mubr.bf16.gmra.mrb[8].mxu0 %v1433_v58  ;;  %v2874_v57 = vld [vmem:[%s3628_s1 + $0x470] ss:$8 sps:$4 sm:$0xff]   ;;  %v790_v58 = vpack.c.bf16 %v785_v54, %v784_v53 }
  0x88   : > { %895 = vmatpush1.bf16.msra.mxu1 %v2826_v59  ;;  %1757 = vmatpush1.bf16.msra.mxu0 %v2829_v60  ;;  %v1650_v59 = vpack.c.bf16 %v1645_v56, %v1644_v55  ;;  %v1851_v60 = vld [vmem:[%s3007_s21 + $0x16] sm:$0xff] }
  0x89   : > { %735 = vmatprep.mubr.bf16.mxu1 %v2885_v2  ;;  %1595 = vmatprep.mubr.bf16.mxu0 %v2885_v2 }
  0x8a   : > { %896 = vmatprep.subr.bf16.mxu1 %v2834_v62  ;;  %1758 = vmatprep.subr.bf16.mxu0 %v2837_v61  ;;  %v1852_v62 = vld [vmem:[%s3007_s21 + $0x1e] sm:$0xff]  ;;  %v1857_v61 = vld [vmem:[%s3007_s21 + $0x46] sm:$0xff] }
  0x8b   : > { %v1861_v0 = vpack.c.bf16 %v1852_v62, %v1851_v60 }
  0x8c   : > { %897 = vmatpush1.bf16.msra.mxu1 %v2832_v1  ;;  %1759 = vmatpush1.bf16.msra.mxu0 %v2835_v3  ;;  %v1864_v1 = vpack.c.bf16 %v1858_v63, %v1857_v61  ;;  %v1853_v3 = vld [vmem:[%s3007_s21 + $0x26] sm:$0xff] }
  0x8d   : > { %898 = vmatprep.subr.bf16.mxu1 %v2840_v4  ;;  %1760 = vmatprep.subr.bf16.mxu0 %v2843_v5  ;;  %v1854_v4 = vld [vmem:[%s3007_s21 + $0x2e] sm:$0xff]  ;;  %v1859_v5 = vld [vmem:[%s3007_s21 + $0x56] sm:$0xff] }
  0x8f   : > { %736 = vmatmul.mubr.bf16.gmra.mrb[12].mxu1 %v574_v6  ;;  %1596 = vmatmul.mubr.bf16.gmra.mrb[12].mxu0 %v1434_v7  ;;  %v1860_v6 = vld [vmem:[%s3007_s21 + $0x5e] sm:$0x3f]  ;;  %v1862_v7 = vpack.c.bf16 %v1854_v4, %v1853_v3 }
  0x90   : > { %899 = vmatpush1.bf16.msra.mxu1 %v2838_v8  ;;  %745 = vmatprep.mubr.bf16.mxu1 %v2885_v2  ;;  %v1865_v8 = vpack.c.bf16 %v1860_v6, %v1859_v5 }
  0x91   : > { %1605 = vmatprep.mubr.bf16.mxu0 %v2885_v2  ;;  %1761 = vmatpush1.bf16.msra.mxu0 %v2841_v9  ;;  %v1855_v9 = vld [vmem:[%s3007_s21 + $0x36] sm:$0xff] }
  0x92   : > { %900 = vmatprep.subr.bf16.mxu1 %v2846_v10  ;;  %1762 = vmatprep.subr.bf16.mxu0 %v2849_v11  ;;  %v1856_v10 = vld [vmem:[%s3007_s21 + $0x3e] sm:$0xff] }
  0x93   : > { %v1863_v11 = vpack.c.bf16 %v1856_v10, %v1855_v9 }
  0x94   : > { %901 = vmatpush1.bf16.msra.mxu1 %v2844_v14 }
  0x95   : > { %902 = vmatprep.subr.bf16.mxu1 %v2852_v18  ;;  %1763 = vmatpush1.bf16.msra.mxu0 %v2847_v17 }
  0x96   : > { %1963 = vmatprep.subr.bf16.mxu0 %v2855_v19 }
  0x97   : > { %746 = vmatmul.mubr.bf16.gmra.mrb[16].mxu1 %v575_v20  ;;  %1606 = vmatmul.mubr.bf16.gmra.mrb[16].mxu0 %v1435_v21 }
  0x98   : > { %903 = vmatpush1.bf16.msra.mxu1 %v2850_v22  ;;  %920 = vmatprep.mubr.bf16.mxu1 %v2885_v2 }
  0x99   : > { %1780 = vmatprep.mubr.bf16.mxu0 %v2885_v2  ;;  %2474 = vmatprep.subr.bf16.mxu1 %v2855_v19 }
  0x9f   : > { %921 = vmatmul.mubr.bf16.vlgmr.msra.gmra.mrb[0].mxu1 %v786_v25  ;;  %1781 = vmatmul.mubr.bf16.vlgmr.msra.gmra.mrb[0].mxu0 %v1646_v26 }
  0xa0   : > { %1964 = vmatpush1.bf16.msra.mxu0 %v2853_v27  ;;  %930 = vmatprep.mubr.bf16.mxu1 %v2885_v2 }
  0xa1   : > { %1965 = vmatprep.subr.bf16.mxu0 %v2858_v28  ;;  %1790 = vmatprep.mubr.bf16.mxu0 %v2885_v2 }
  0xa2   : > { %2482 = vmatpush1.bf16.msra.mxu1 %v2853_v27 }
  0xa3   : > { %2475 = vmatprep.subr.bf16.mxu1 %v2858_v28 }
  0xa4   : > { %1966 = vmatpush1.bf16.msra.mxu0 %v2856_v29 }
  0xa5   : > { %1967 = vmatprep.subr.bf16.mxu0 %v2861_v32 }
  0xa6   : > { %2483 = vmatpush1.bf16.msra.mxu1 %v2856_v29 }
  0xa7   : > { %931 = vmatmul.mubr.bf16.gmra.mrb[4].mxu1 %v787_v33  ;;  %1791 = vmatmul.mubr.bf16.gmra.mrb[4].mxu0 %v1647_v34  ;;  %v2068_v34 = vlaneseq }
  0xa8   : > { %1968 = vmatpush1.bf16.msra.mxu0 %v2859_v35  ;;  %940 = vmatprep.mubr.bf16.mxu1 %v2885_v2 }
  0xa9   : > { %1800 = vmatprep.mubr.bf16.mxu0 %v2885_v2  ;;  %1969 = vmatprep.subr.bf16.mxu0 %v2864_v36 }
  0xaa   : > { %2476 = vmatprep.subr.bf16.mxu1 %v2861_v32 }
  0xab   : > { %2484 = vmatpush1.bf16.msra.mxu1 %v2859_v35 }
  0xac   : > { %1970 = vmatpush1.bf16.msra.mxu0 %v2862_v38  ;;  %2477 = vmatprep.subr.bf16.mxu1 %v2864_v36  ;;  %v2069_v36 = vshrl.u32 %v2068_v34, 7 }
  0xad   : > { %1971 = vmatprep.subr.bf16.mxu0 %v2867_v41 }
  0xaf   : > { %941 = vmatmul.mubr.bf16.gmra.mrb[8].mxu1 %v788_v42  ;;  %1801 = vmatmul.mubr.bf16.gmra.mrb[8].mxu0 %v1648_v37 }
  0xb0   : > { %2485 = vmatpush1.bf16.msra.mxu1 %v2862_v38  ;;  %1972 = vmatpush1.bf16.msra.mxu0 %v2865_v43 }
  0xb1   : > { %950 = vmatprep.mubr.bf16.mxu1 %v2885_v2  ;;  %1810 = vmatprep.mubr.bf16.mxu0 %v2885_v2 }
  0xb2   : > { %2478 = vmatprep.subr.bf16.mxu1 %v2867_v41  ;;  %1973 = vmatprep.subr.bf16.mxu0 %v2870_v44 }
  0xb4   : > { %2486 = vmatpush1.bf16.msra.mxu1 %v2865_v43  ;;  %1974 = vmatpush1.bf16.msra.mxu0 %v2868_v47 }
  0xb5   : > { %2479 = vmatprep.subr.bf16.mxu1 %v2870_v44  ;;  %1975 = vmatprep.subr.bf16.mxu0 %v2873_v49 }
  0xb7   : > { %951 = vmatmul.mubr.bf16.gmra.mrb[12].mxu1 %v789_v50  ;;  %1811 = vmatmul.mubr.bf16.gmra.mrb[12].mxu0 %v1649_v51  ;;  %v2066_v51 = vld [vmem:[%s3629_s2] sm:$0x3] }
  0xb8   : > { %2487 = vmatpush1.bf16.msra.mxu1 %v2868_v47  ;;  %960 = vmatprep.mubr.bf16.mxu1 %v2885_v2 }
  0xb9   : > { %1820 = vmatprep.mubr.bf16.mxu0 %v2885_v2  ;;  %1976 = vmatpush1.bf16.msra.mxu0 %v2871_v48 }
  0xba   : > { %2480 = vmatprep.subr.bf16.mxu1 %v2873_v49  ;;  %1977 = vmatprep.subr.bf16.mxu0 %v2876_v52  ;;  %v2070_v49 = vsub.s32 0, %v2069_v36 }
  0xbc   : > { %2488 = vmatpush1.bf16.msra.mxu1 %v2871_v48  ;;  %v2074_v48 = vsub.s32 1, %v2069_v36 }
  0xbd   : > { %2481 = vmatprep.subr.bf16.mxu1 %v2876_v52  ;;  %1978 = vmatpush1.bf16.msra.mxu0 %v2874_v57  ;;  %v3564_v52 = vrot.slane %v2066_v51, %v2070_v49 }
  0xbe   : > { %v3567_v55 = vrot.slane %v2066_v51, %v2074_v48 }
  0xbf   : > { %961 = vmatmul.mubr.bf16.gmra.mrb[16].mxu1 %v790_v58  ;;  %1821 = vmatmul.mubr.bf16.gmra.mrb[16].mxu0 %v1650_v59 }
  0xc0   : > { %2489 = vmatpush1.bf16.msra.mxu1 %v2874_v57  ;;  %1995 = vmatprep.mubr.bf16.mxu0 %v2885_v2 }
  0xc1   : > { %2025 = vmatprep.mubr.bf16.mxu1 %v2885_v2 }
  0xc7   : > { %1996 = vmatmul.mubr.bf16.vlgmr.msra.gmra.mrb[0].mxu0 %v1861_v0  ;;  %2026 = vmatmul.mubr.bf16.vlgmr.msra.gmra.mrb[20].mxu1 %v1864_v1 }
  0xc8   : > { %2005 = vmatprep.mubr.bf16.mxu0 %v2885_v2  ;;  %2035 = vmatprep.mubr.bf16.mxu1 %v2885_v2 }
  0xcf   : > { %2006 = vmatmul.mubr.bf16.gmra.mrb[4].mxu0 %v1862_v7  ;;  %2036 = vmatmul.mubr.bf16.gmra.mrb[24].mxu1 %v1865_v8 }
  0xd0   : > { %2015 = vmatprep.mubr.bf16.mxu0 %v2885_v2 }
  0xd7   : > { %2016 = vmatmul.mubr.bf16.gmra.mrb[8].mxu0 %v1863_v11 }
 0x172   : > { %v922_v12 = vpop.f32.mrb[0].mxu1 }
 0x173   : > { %v924_v13 = vpop.f32.mrb[1].mxu1 }
 0x174   : > { %v926_v14 = vpop.f32.mrb[2].mxu1 }
 0x175   : > { %v928_v15 = vpop.f32.mrb[3].mxu1 }
 0x17a   : > { %v3541_v16 = vpop.f32.mrb[4].mxu1 }
 0x17b   : > { %v3543_v17 = vpop.f32.mrb[5].mxu1 }
 0x17c   : > { %v3545_v18 = vpop.f32.mrb[6].mxu1 }
 0x17d   : > { %v3547_v19 = vpop.f32.mrb[7].mxu1 }
 0x182   : > { %v3549_v20 = vpop.f32.mrb[8].mxu1 }
 0x183   : > { %v3551_v21 = vpop.f32.mrb[9].mxu1 }
 0x184   : > { %v3553_v2 = vpop.f32.mrb[10].mxu1 }
 0x185   : > { %v3555_v22 = vpop.f32.mrb[11].mxu1 }
 0x18a   : > { %v952_v23 = vpop.f32.mrb[12].mxu1  ;;  %v1812_v24 = vpop.f32.mrb[12].mxu0 }
 0x18b   : > { %v2502_v25 = vadd.f32 %v1812_v24, %v952_v23  ;;  %v954_v26 = vpop.f32.mrb[13].mxu1  ;;  %v1814_v27 = vpop.f32.mrb[13].mxu0 }
 0x18c   : > { %v2504_v28 = vadd.f32 %v1814_v27, %v954_v26  ;;  %v956_v29 = vpop.f32.mrb[14].mxu1  ;;  %v1816_v30 = vpop.f32.mrb[14].mxu0 }
 0x18d   : > { %v2506_v31 = vadd.f32 %v1816_v30, %v956_v29  ;;  %v958_v32 = vpop.f32.mrb[15].mxu1  ;;  %v1818_v33 = vpop.f32.mrb[15].mxu0 }
 0x18e   : > { %v2508_v35 = vadd.f32 %v1818_v33, %v958_v32 }
 0x192   : > { %v962_v38 = vpop.f32.mrb[16].mxu1  ;;  %v1822_v39 = vpop.f32.mrb[16].mxu0 }
 0x193   : > { %v2510_v40 = vadd.f32 %v1822_v39, %v962_v38  ;;  %v964_v41 = vpop.f32.mrb[17].mxu1  ;;  %v1824_v42 = vpop.f32.mrb[17].mxu0 }
 0x194   : > { %v2512_v37 = vadd.f32 %v1824_v42, %v964_v41  ;;  %v966_v43 = vpop.f32.mrb[18].mxu1  ;;  %v1826_v44 = vpop.f32.mrb[18].mxu0 }
 0x195   : > { %v3557_v45 = vadd.f32 %v1826_v44, %v966_v43  ;;  %v968_v46 = vpop.f32.mrb[19].mxu1  ;;  %v1828_v47 = vpop.f32.mrb[19].mxu0 }
 0x196   : > { %v3559_v50 = vadd.f32 %v1828_v47, %v968_v46 }
 0x19a   : > { %v1997_v53 = vpop.f32.mrb[0].mxu0  ;;  %v2027_v54 = vpop.f32.mrb[20].mxu1 }
 0x19b   : > { %v2490_v56 = vadd.f32 %v1997_v53, %v922_v12  ;;  %v2503_v57 = vadd.f32 %v2502_v25, %v2027_v54  ;;  %v1999_v58 = vpop.f32.mrb[1].mxu0  ;;  %v2029_v59 = vpop.f32.mrb[21].mxu1 }
 0x19c   : > { %v2491_v60 = vadd.f32 %v1999_v58, %v924_v13  ;;  %v2505_v62 = vadd.f32 %v2504_v28, %v2029_v59  ;;  %v2001_v61 = vpop.f32.mrb[2].mxu0  ;;  %v2031_v63 = vpop.f32.mrb[22].mxu1 }
 0x19d   : > { %v2078_v0 = vadd.f32 %v2490_v56, %v3564_v52  ;;  %v2090_v1 = vadd.f32 %v2503_v57, %v3564_v52  ;;  %v2492_v3 = vadd.f32 %v2001_v61, %v926_v14  ;;  %v2507_v4 = vadd.f32 %v2506_v31, %v2031_v63  ;;  %v2003_v5 = vpop.f32.mrb[3].mxu0  ;;  %v2033_v6 = vpop.f32.mrb[23].mxu1 }
 0x19e   : > { %v2079_v7 = vadd.f32 %v2491_v60, %v3567_v55  ;;  %v2091_v8 = vadd.f32 %v2505_v62, %v3567_v55  ;;  %v2493_v9 = vadd.f32 %v2003_v5, %v928_v15  ;;  %v2509_v10 = vadd.f32 %v2508_v35, %v2033_v6 }
 0x19f   : > { %v2098_v11 = vmax.f32 %v2078_v0, 0.0  ;;  %v2110_v12 = vmax.f32 %v2090_v1, 0.0  ;;  %v2080_v13 = vadd.f32 %v2492_v3, %v3564_v52  ;;  %v2092_v14 = vadd.f32 %v2507_v4, %v3564_v52 }
 0x1a0   : > { %v2099_v23 = vmax.f32 %v2079_v7, 0.0  ;;  %v2111_v24 = vmax.f32 %v2091_v8, 0.0  ;;  %v2081_v25 = vadd.f32 %v2493_v9, %v3567_v55  ;;  %v2093_v26 = vadd.f32 %v2509_v10, %v3567_v55 }
 0x1a1   : > { %2118 = vst [vmem:[%s3574_s18] sm:$0xff] %v2098_v11  ;;  %2130 = vst [vmem:[%s3574_s18 + $0x60] sm:$0xff] %v2110_v12  ;;  %v2100_v15 = vmax.f32 %v2080_v13, 0.0  ;;  %v2112_v27 = vmax.f32 %v2092_v14, 0.0 }
 0x1a2   : > { %2119 = vst [vmem:[%s3574_s18 + $0x8] sm:$0xff] %v2099_v23  ;;  %2131 = vst [vmem:[%s3574_s18 + $0x68] sm:$0xff] %v2111_v24  ;;  %v2101_v28 = vmax.f32 %v2081_v25, 0.0  ;;  %v2113_v29 = vmax.f32 %v2093_v26, 0.0  ;;  %v2007_v30 = vpop.f32.mrb[4].mxu0  ;;  %v2037_v31 = vpop.f32.mrb[24].mxu1 }
 0x1a3   : > { %2120 = vst [vmem:[%s3574_s18 + $0x10] sm:$0xff] %v2100_v15  ;;  %2132 = vst [vmem:[%s3574_s18 + $0x70] sm:$0xff] %v2112_v27  ;;  %v2494_v32 = vadd.f32 %v2007_v30, %v3541_v16  ;;  %v2511_v33 = vadd.f32 %v2510_v40, %v2037_v31  ;;  %v2009_v34 = vpop.f32.mrb[5].mxu0  ;;  %v2039_v35 = vpop.f32.mrb[25].mxu1 }
 0x1a4   : > { %2121 = vst [vmem:[%s3574_s18 + $0x18] sm:$0xff] %v2101_v28  ;;  %2133 = vst [vmem:[%s3574_s18 + $0x78] sm:$0xff] %v2113_v29  ;;  %v2495_v36 = vadd.f32 %v2009_v34, %v3543_v17  ;;  %v2513_v38 = vadd.f32 %v2512_v37, %v2039_v35  ;;  %v2011_v39 = vpop.f32.mrb[6].mxu0  ;;  %v2041_v41 = vpop.f32.mrb[26].mxu1 }
 0x1a5   : > { %v2082_v42 = vadd.f32 %v2494_v32, %v3564_v52  ;;  %v2094_v43 = vadd.f32 %v2511_v33, %v3564_v52  ;;  %v2496_v44 = vadd.f32 %v2011_v39, %v3545_v18  ;;  %v2515_v46 = vadd.f32 %v3557_v45, %v2041_v41  ;;  %v2013_v16 = vpop.f32.mrb[7].mxu0  ;;  %v2043_v40 = vpop.f32.mrb[27].mxu1 }
 0x1a6   : > { %v2083_v47 = vadd.f32 %v2495_v36, %v3567_v55  ;;  %v2095_v17 = vadd.f32 %v2513_v38, %v3567_v55  ;;  %v2497_v37 = vadd.f32 %v2013_v16, %v3547_v19  ;;  %v2517_v49 = vadd.f32 %v3559_v50, %v2043_v40 }
 0x1a7   : > { %v2102_v51 = vmax.f32 %v2082_v42, 0.0  ;;  %v2114_v48 = vmax.f32 %v2094_v43, 0.0  ;;  %v2084_v18 = vadd.f32 %v2496_v44, %v3564_v52  ;;  %v2096_v45 = vadd.f32 %v2515_v46, %v3564_v52 }
 0x1a8   : > { %v2103_v53 = vmax.f32 %v2083_v47, 0.0  ;;  %v2115_v54 = vmax.f32 %v2095_v17, 0.0  ;;  %v2085_v56 = vadd.f32 %v2497_v37, %v3567_v55  ;;  %v2097_v57 = vadd.f32 %v2517_v49, %v3567_v55 }
 0x1a9   : > { %2122 = vst [vmem:[%s3574_s18 + $0x20] sm:$0xff] %v2102_v51  ;;  %2134 = vst [vmem:[%s3574_s18 + $0x80] sm:$0xff] %v2114_v48  ;;  %v2104_v19 = vmax.f32 %v2084_v18, 0.0  ;;  %v2116_v50 = vmax.f32 %v2096_v45, 0.0 }
 0x1aa   : > { %2123 = vst [vmem:[%s3574_s18 + $0x28] sm:$0xff] %v2103_v53  ;;  %2135 = vst [vmem:[%s3574_s18 + $0x88] sm:$0xff] %v2115_v54  ;;  %v2105_v58 = vmax.f32 %v2085_v56, 0.0  ;;  %v2117_v59 = vmax.f32 %v2097_v57, 0.0  ;;  %v2017_v60 = vpop.f32.mrb[8].mxu0 }
 0x1ab   : > { %2124 = vst [vmem:[%s3574_s18 + $0x30] sm:$0xff] %v2104_v19  ;;  %2136 = vst [vmem:[%s3574_s18 + $0x90] sm:$0x3f] %v2116_v50  ;;  %v2498_v62 = vadd.f32 %v2017_v60, %v3549_v20  ;;  %v2019_v61 = vpop.f32.mrb[9].mxu0 }
 0x1ac   : > { %2125 = vst [vmem:[%s3574_s18 + $0x38] sm:$0xff] %v2105_v58  ;;  %2137 = vst [vmem:[%s3574_s18 + $0x98] sm:$0x3f] %v2117_v59  ;;  %v2499_v63 = vadd.f32 %v2019_v61, %v3551_v21  ;;  %v2021_v0 = vpop.f32.mrb[10].mxu0 }
 0x1ad   : > { %v2086_v1 = vadd.f32 %v2498_v62, %v3564_v52  ;;  %v2500_v3 = vadd.f32 %v2021_v0, %v3553_v2  ;;  %v2023_v4 = vpop.f32.mrb[11].mxu0 }
 0x1ae   : > { %v2087_v5 = vadd.f32 %v2499_v63, %v3567_v55  ;;  %v2501_v6 = vadd.f32 %v2023_v4, %v3555_v22 }
 0x1af   : > { %v2106_v7 = vmax.f32 %v2086_v1, 0.0  ;;  %v2088_v20 = vadd.f32 %v2500_v3, %v3564_v52 }
 0x1b0   : > { %v2107_v8 = vmax.f32 %v2087_v5, 0.0  ;;  %v2089_v9 = vadd.f32 %v2501_v6, %v3567_v55 }
 0x1b1   : > { %2126 = vst [vmem:[%s3574_s18 + $0x40] sm:$0xff] %v2106_v7  ;;  %v2108_v10 = vmax.f32 %v2088_v20, 0.0 }
 0x1b2   : > { %2127 = vst [vmem:[%s3574_s18 + $0x48] sm:$0xff] %v2107_v8  ;;  %v2109_v21 = vmax.f32 %v2089_v9, 0.0 }
 0x1b3   : > { %2128 = vst [vmem:[%s3574_s18 + $0x50] sm:$0xff] %v2108_v10 }
 0x1b4   : > { %2129 = vst [vmem:[%s3574_s18 + $0x58] sm:$0xff] %v2109_v21 }
 0x1b5 PF: > { %s13_s12 = sadd.s32 1, %s2883_s12  }
 0x1b6   : > { %p10_p4 = scmp.ge.s32.totalorder %s13_s12, 4  }
 0x1b8   :  { %12 = sbr.rel (!%p10_p4) target bundleno = 1 (0x1), region = 70 }

// kernel: net_forward.9
= control target key start
LH: loop header
LB: loop body
LE: loop exit
PB: predicated region body
PF: predicated region fallthrough
CT: control target
= control target key end

     0   :  { %v553_v28 = vlaneseq  ;;  %v4025_v36 = vmov 1966171168   ;;  %s4927_s0 = inlined_call_operand.vmem [shape: bf16[2,4096], index: 0, kind: input, shape index: {}]   ;;  %s4928_s1 = inlined_call_operand.vmem [shape: bf16[4096,128], index: 1, kind: input, shape index: {}]   ;;  %s4929_s2 = inlined_call_operand.vmem [shape: f32[1,128], index: 2, kind: input, shape index: {}]   ;;  %s4930_s3 = inlined_call_operand.vmem [shape: bf16[128,10], index: 3, kind: input, shape index: {}]   ;;  %s4931_s4 = inlined_call_operand.vmem [shape: f32[1,10], index: 4, kind: input, shape index: {}]   ;;  %s4932_s5 = inlined_call_operand.hbm [shape: f32[2,10], index: 5, kind: output, shape index: {}]  }
   0x1   :  { %v3733_v0 = vld [vmem:[%s4928_s1 + $0x40] sm:$0xff]   ;;  %v3737_v4 = vld [vmem:[%s4928_s1 + $0x48] sm:$0xff]   ;;  %v3741_v8 = vld [vmem:[%s4928_s1 + $0x50] sm:$0xff]   ;;  %v551_v37 = vunpack.c.l.s4 %v4025_v36 }
   0x2   :  { %v3734_v1 = vld [vmem:[%s4928_s1 + $0xc0] sm:$0xff]   ;;  %3348 = vmatprep.subr.bf16.mxu0 %v3733_v0  ;;  %v3738_v5 = vld [vmem:[%s4928_s1 + $0xc8] sm:$0xff]   ;;  %v3742_v9 = vld [vmem:[%s4928_s1 + $0xd0] sm:$0xff]   ;;  %v554_v33 = vshrl.u32 %v553_v28, 7 }
   0x3   :  { %v3735_v2 = vld [vmem:[%s4928_s1] sm:$0xff]   ;;  %3370 = vmatprep.subr.bf16.mxu1 %v3734_v1  ;;  %v3739_v6 = vld [vmem:[%s4928_s1 + $0x8] sm:$0xff]   ;;  %v3743_v10 = vld [vmem:[%s4928_s1 + $0x10] sm:$0xff]   ;;  %v552_v40 = vunpack.c.0.s8 %v551_v37 }
   0x4   :  { %v3736_v3 = vld [vmem:[%s4928_s1 + $0x80] sm:$0xff]   ;;  %3349 = vmatpush3.bf16.msra.mxu0 %v3735_v2  ;;  %v3740_v7 = vld [vmem:[%s4928_s1 + $0x88] sm:$0xff]   ;;  %v3744_v11 = vld [vmem:[%s4928_s1 + $0x90] sm:$0xff]  }
   0x5   :  { %3371 = vmatpush3.bf16.msra.mxu1 %v3736_v3  ;;  %3350 = vmatprep.subr.bf16.mxu0 %v3737_v4  ;;  %v3745_v12 = vld [vmem:[%s4928_s1 + $0x58] sm:$0xff]   ;;  %v3749_v16 = vld [vmem:[%s4928_s1 + $0x60] sm:$0xff]   ;;  %v3753_v20 = vld [vmem:[%s4928_s1 + $0x68] sm:$0xff]   ;;  %v4164_v41 = vsub.s32 %v552_v40, %v554_v33 }
   0x6   :  { %3372 = vmatprep.subr.bf16.mxu1 %v3738_v5  ;;  %v3746_v13 = vld [vmem:[%s4928_s1 + $0xd8] sm:$0xff]   ;;  %v3750_v17 = vld [vmem:[%s4928_s1 + $0xe0] sm:$0xff]   ;;  %v3754_v21 = vld [vmem:[%s4928_s1 + $0xe8] sm:$0xff]  }
   0x7   :  { %v3747_v14 = vld [vmem:[%s4928_s1 + $0x18] sm:$0xff]   ;;  %v3751_v18 = vld [vmem:[%s4928_s1 + $0x20] sm:$0xff]   ;;  %v3755_v22 = vld [vmem:[%s4928_s1 + $0x28] sm:$0xff]  }
   0x8   :  { %3351 = vmatpush3.bf16.msra.mxu0 %v3739_v6  ;;  %v3748_v15 = vld [vmem:[%s4928_s1 + $0x98] sm:$0xff]   ;;  %v3752_v19 = vld [vmem:[%s4928_s1 + $0xa0] sm:$0xff]   ;;  %v3756_v23 = vld [vmem:[%s4928_s1 + $0xa8] sm:$0xff]  }
   0x9   :  { %3373 = vmatpush3.bf16.msra.mxu1 %v3740_v7  ;;  %3352 = vmatprep.subr.bf16.mxu0 %v3741_v8  ;;  %v3757_v24 = vld [vmem:[%s4928_s1 + $0x70] sm:$0xff]   ;;  %v3761_v29 = vld [vmem:[%s4928_s1 + $0x78] sm:$0xff]   ;;  %v22_v34 = vld [vmem:[%s4927_s0] sm:$0xff] }
   0xa   :  { %3374 = vmatprep.subr.bf16.mxu1 %v3742_v9  ;;  %v3758_v25 = vld [vmem:[%s4928_s1 + $0xf0] sm:$0xff]   ;;  %v3762_v30 = vld [vmem:[%s4928_s1 + $0xf8] sm:$0xff]   ;;  %v3766_v35 = vld [vmem:[%s4928_s1 + $0x140] sm:$0xff]   ;;  %v549_v39 = vcombine.high %v22_v34, %v22_v34  ;;  %v556_v42 = vrot.slane %v22_v34, %v4164_v41 }
   0xb   :  { %v3759_v26 = vld [vmem:[%s4928_s1 + $0x30] sm:$0xff]   ;;  %v3763_v31 = vld [vmem:[%s4928_s1 + $0x38] sm:$0xff]   ;;  %v3767_v38 = vld [vmem:[%s4928_s1 + $0x1c0] sm:$0xff]  }
   0xc   :  { %3353 = vmatpush3.bf16.msra.mxu0 %v3743_v10  ;;  %v3760_v27 = vld [vmem:[%s4928_s1 + $0xb0] sm:$0xff]   ;;  %v3764_v32 = vld [vmem:[%s4928_s1 + $0xb8] sm:$0xff]   ;;  %v4168_v43 = vrot.slane %v549_v39, %v4164_v41  ;;  %v564_v44 = vcombine.high %v556_v42, %v556_v42  ;;  %v572_v45 = vrot.slane %v556_v42, %v4164_v41  ;;  %v3768_v47 = vld [vmem:[%s4928_s1 + $0x100] sm:$0xff]  }
   0xd   :  { %3375 = vmatpush3.bf16.msra.mxu1 %v3744_v11  ;;  %3354 = vmatprep.subr.bf16.mxu0 %v3745_v12  ;;  %v3769_v49 = vld [vmem:[%s4928_s1 + $0x180] sm:$0xff]   ;;  %v3770_v52 = vld [vmem:[%s4928_s1 + $0x148] sm:$0xff]   ;;  %v3774_v58 = vld [vmem:[%s4928_s1 + $0x150] sm:$0xff]  }
   0xe   :  { %3376 = vmatprep.subr.bf16.mxu1 %v3746_v13  ;;  %v565_v46 = vcombine.high %v4168_v43, %v4168_v43  ;;  %v586_v48 = vrot.slane %v564_v44, %v4164_v41  ;;  %v594_v51 = vcombine.high %v572_v45, %v572_v45  ;;  %v3771_v54 = vld [vmem:[%s4928_s1 + $0x1c8] sm:$0xff]   ;;  %v3775_v59 = vld [vmem:[%s4928_s1 + $0x1d0] sm:$0xff]   ;;  %v3778_v62 = vld [vmem:[%s4928_s1 + $0x158] sm:$0xff]  }
   0xf   :  { %v3772_v55 = vld [vmem:[%s4928_s1 + $0x108] sm:$0xff]   ;;  %v3776_v60 = vld [vmem:[%s4928_s1 + $0x110] sm:$0xff]   ;;  %v3779_v63 = vld [vmem:[%s4928_s1 + $0x1d8] sm:$0xff]  }
  0x10   :  { %3355 = vmatpush3.bf16.msra.mxu0 %v3747_v14  ;;  %v593_v50 = vrot.slane %v565_v46, %v4164_v41  ;;  %2345 = vmatprep.mubr.bf16.mxu0 %v586_v48  ;;  %v596_v53 = vcombine.high %v586_v48, %v586_v48  ;;  %v3773_v57 = vld [vmem:[%s4928_s1 + $0x188] sm:$0xff]   ;;  %v3777_v61 = vld [vmem:[%s4928_s1 + $0x190] sm:$0xff]   ;;  %v3780_v0 = vld [vmem:[%s4928_s1 + $0x118] sm:$0xff]  }
  0x11   :  { %3377 = vmatpush3.bf16.msra.mxu1 %v3748_v15  ;;  %3356 = vmatprep.subr.bf16.mxu0 %v3749_v16  ;;  %v3781_v1 = vld [vmem:[%s4928_s1 + $0x198] sm:$0xff]   ;;  %v3782_v2 = vld [vmem:[%s4928_s1 + $0x160] sm:$0xff]   ;;  %v3786_v6 = vld [vmem:[%s4928_s1 + $0x168] sm:$0xff]  }
  0x12   :  { %3378 = vmatprep.subr.bf16.mxu1 %v3750_v17  ;;  %v597_v56 = vcombine.high %v593_v50, %v593_v50  ;;  %2385 = vmatprep.mubr.bf16.mxu1 %v596_v53  ;;  %v3783_v3 = vld [vmem:[%s4928_s1 + $0x1e0] sm:$0xff]   ;;  %v3787_v7 = vld [vmem:[%s4928_s1 + $0x1e8] sm:$0xff]   ;;  %v3790_v10 = vld [vmem:[%s4928_s1 + $0x170] sm:$0xff]  }
  0x13   :  { %v3784_v4 = vld [vmem:[%s4928_s1 + $0x120] sm:$0xff]   ;;  %v3788_v8 = vld [vmem:[%s4928_s1 + $0x128] sm:$0xff]   ;;  %v3791_v11 = vld [vmem:[%s4928_s1 + $0x1f0] sm:$0xff]  }
  0x14   :  { %3357 = vmatpush3.bf16.msra.mxu0 %v3751_v18  ;;  %v3785_v5 = vld [vmem:[%s4928_s1 + $0x1a0] sm:$0xff]   ;;  %v3789_v9 = vld [vmem:[%s4928_s1 + $0x1a8] sm:$0xff]   ;;  %v3792_v12 = vld [vmem:[%s4928_s1 + $0x130] sm:$0xff]   ;;  %v579_v18 = vrot.slane %v4168_v43, %v4164_v41 }
  0x15   :  { %3379 = vmatpush3.bf16.msra.mxu1 %v3752_v19  ;;  %3358 = vmatprep.subr.bf16.mxu0 %v3753_v20  ;;  %v3793_v13 = vld [vmem:[%s4928_s1 + $0x1b0] sm:$0xff]   ;;  %v3794_v14 = vld [vmem:[%s4928_s1 + $0x178] sm:$0xff]   ;;  %v3798_v19 = vld [vmem:[%s4928_s1 + $0x240] sm:$0xff]  }
  0x16   :  { %3380 = vmatprep.subr.bf16.mxu1 %v3754_v21  ;;  %v3795_v15 = vld [vmem:[%s4928_s1 + $0x1f8] sm:$0xff]   ;;  %v3799_v20 = vld [vmem:[%s4928_s1 + $0x2c0] sm:$0xff]   ;;  %v3806_v28 = vld [vmem:[%s4928_s1 + $0x250] sm:$0xff]  }
  0x17   :  { %v3796_v16 = vld [vmem:[%s4928_s1 + $0x138] sm:$0xff]   ;;  %v3800_v21 = vld [vmem:[%s4928_s1 + $0x200] sm:$0xff]   ;;  %v3818_v40 = vld [vmem:[%s4928_s1 + $0x268] sm:$0xff]  }
  0x18   :  { %3359 = vmatpush3.bf16.msra.mxu0 %v3755_v22  ;;  %v3797_v17 = vld [vmem:[%s4928_s1 + $0x1b8] sm:$0xff]   ;;  %v3801_v22 = vld [vmem:[%s4928_s1 + $0x280] sm:$0xff]   ;;  %v3819_v42 = vld [vmem:[%s4928_s1 + $0x2e8] sm:$0xff]  }
  0x19   :  { %3381 = vmatpush3.bf16.msra.mxu1 %v3756_v23  ;;  %3360 = vmatprep.subr.bf16.mxu0 %v3757_v24  ;;  %v595_v23 = vcombine.high %v579_v18, %v579_v18  ;;  %v3802_v24 = vld [vmem:[%s4928_s1 + $0x248] sm:$0xff]   ;;  %v3811_v33 = vld [vmem:[%s4928_s1 + $0x2d8] sm:$0xff]   ;;  %v3814_v36 = vld [vmem:[%s4928_s1 + $0x260] sm:$0xff]  }
  0x1a   :  { %3382 = vmatprep.subr.bf16.mxu1 %v3758_v25  ;;  %v3803_v25 = vld [vmem:[%s4928_s1 + $0x2c8] sm:$0xff]   ;;  %v3812_v34 = vld [vmem:[%s4928_s1 + $0x218] sm:$0xff]   ;;  %v3815_v37 = vld [vmem:[%s4928_s1 + $0x2e0] sm:$0xff]  }
  0x1b   :  { %v3817_v39 = vld [vmem:[%s4928_s1 + $0x2a0] sm:$0xff]   ;;  %v3820_v43 = vld [vmem:[%s4928_s1 + $0x228] sm:$0xff]  }
  0x1c   :  { %3361 = vmatpush3.bf16.msra.mxu0 %v3759_v26  ;;  %v3804_v26 = vld [vmem:[%s4928_s1 + $0x208] sm:$0xff]  }
  0x1d   :  { %3383 = vmatpush3.bf16.msra.mxu1 %v3760_v27  ;;  %3362 = vmatprep.subr.bf16.mxu0 %v3761_v29  ;;  %v3805_v27 = vld [vmem:[%s4928_s1 + $0x288] sm:$0xff]   ;;  %v3807_v29 = vld [vmem:[%s4928_s1 + $0x2d0] sm:$0xff]  }
  0x1e   :  { %3384 = vmatprep.subr.bf16.mxu1 %v3762_v30  ;;  %v3808_v30 = vld [vmem:[%s4928_s1 + $0x210] sm:$0xff]   ;;  %v3821_v44 = vld [vmem:[%s4928_s1 + $0x2a8] sm:$0xff]  }
  0x1f   :  { %v23_v46 = vld [vmem:[%s4927_s0 + $0x8] sm:$0xff] }
  0x20   :  { %3363 = vmatpush3.bf16.msra.mxu0 %v3763_v31  ;;  %v3809_v31 = vld [vmem:[%s4928_s1 + $0x290] sm:$0xff]   ;;  %v605_v48 = vrot.slane %v23_v46, %v4164_v41 }
  0x21   :  { %3385 = vmatpush3.bf16.msra.mxu1 %v3764_v32  ;;  %3392 = vmatprep.subr.bf16.mxu0 %v3766_v35  ;;  %v3810_v32 = vld [vmem:[%s4928_s1 + $0x258] sm:$0xff]  }
  0x22   :  { %3414 = vmatprep.subr.bf16.mxu1 %v3767_v38  ;;  %v3813_v35 = vld [vmem:[%s4928_s1 + $0x298] sm:$0xff]   ;;  %v3816_v38 = vld [vmem:[%s4928_s1 + $0x220] sm:$0xff]  }
  0x23   :  { %2346 = vmatmul.mubr.bf16.vlgmr.msra.gmra.mrb[0].mxu0 %v572_v45  ;;  %v3822_v45 = vld [vmem:[%s4928_s1 + $0x270] sm:$0xff]  }
  0x24   :  { %3393 = vmatpush3.bf16.msra.mxu0 %v3768_v47  ;;  %2386 = vmatmul.mubr.bf16.vlgmr.msra.gmra.mrb[0].mxu1 %v594_v51  ;;  %v3823_v47 = vld [vmem:[%s4928_s1 + $0x2f0] sm:$0xff]  }
  0x25   :  { %3394 = vmatprep.subr.bf16.mxu0 %v3770_v52  ;;  %3415 = vmatpush3.bf16.msra.mxu1 %v3769_v49  ;;  %v598_v49 = vcombine.high %v23_v46, %v23_v46  ;;  %v3825_v51 = vld [vmem:[%s4928_s1 + $0x2b0] sm:$0xff]   ;;  %v613_v52 = vcombine.high %v605_v48, %v605_v48 }
  0x26   :  { %2425 = vmatprep.mubr.bf16.mxu0 %v593_v50  ;;  %3416 = vmatprep.subr.bf16.mxu1 %v3771_v54  ;;  %v3824_v50 = vld [vmem:[%s4928_s1 + $0x230] sm:$0xff]   ;;  %v3826_v54 = vld [vmem:[%s4928_s1 + $0x278] sm:$0xff]  }
  0x27   :  { %2465 = vmatprep.mubr.bf16.mxu1 %v597_v56  ;;  %v4356_v53 = vrot.slane %v598_v49, %v4164_v41  ;;  %v635_v56 = vrot.slane %v613_v52, %v4164_v41  ;;  %v3873_v46 = vld [vmem:[%s4928_s1 + $0x410] sm:$0xff]   ;;  %v3876_v49 = vld [vmem:[%s4928_s1 + $0x4d8] sm:$0xff]   ;;  %v3879_v52 = vld [vmem:[%s4928_s1 + $0x460] sm:$0xff]  }
  0x28   :  { %3395 = vmatpush3.bf16.msra.mxu0 %v3772_v55  ;;  %v3827_v55 = vld [vmem:[%s4928_s1 + $0x2f8] sm:$0xff]  }
  0x29   :  { %3396 = vmatprep.subr.bf16.mxu0 %v3774_v58  ;;  %3417 = vmatpush3.bf16.msra.mxu1 %v3773_v57  ;;  %v614_v57 = vcombine.high %v4356_v53, %v4356_v53  ;;  %v3828_v58 = vld [vmem:[%s4928_s1 + $0x238] sm:$0xff]  }
  0x2a   :  { %3418 = vmatprep.subr.bf16.mxu1 %v3775_v59  ;;  %v3829_v59 = vld [vmem:[%s4928_s1 + $0x2b8] sm:$0xff]  }
  0x2c   :  { %3397 = vmatpush3.bf16.msra.mxu0 %v3776_v60  ;;  %v645_v60 = vcombine.high %v635_v56, %v635_v56 }
  0x2d   :  { %3398 = vmatprep.subr.bf16.mxu0 %v3778_v62  ;;  %3419 = vmatpush3.bf16.msra.mxu1 %v3777_v61  ;;  %v621_v61 = vrot.slane %v605_v48, %v4164_v41  ;;  %v3830_v62 = vld [vmem:[%s4928_s1 + $0x340] sm:$0xff]   ;;  %v3875_v48 = vld [vmem:[%s4928_s1 + $0x458] sm:$0xff]  }
  0x2e   :  { %3420 = vmatprep.subr.bf16.mxu1 %v3779_v63  ;;  %v3831_v63 = vld [vmem:[%s4928_s1 + $0x3c0] sm:$0xff]  }
  0x30   :  { %3399 = vmatpush3.bf16.msra.mxu0 %v3780_v0  ;;  %v642_v0 = vrot.slane %v614_v57, %v4164_v41  ;;  %v3884_v57 = vld [vmem:[%s4928_s1 + $0x4e8] sm:$0xff]  }
  0x31   :  { %3400 = vmatprep.subr.bf16.mxu0 %v3782_v2  ;;  %3421 = vmatpush3.bf16.msra.mxu1 %v3781_v1  ;;  %v3832_v1 = vld [vmem:[%s4928_s1 + $0x300] sm:$0xff]  }
  0x32   :  { %3422 = vmatprep.subr.bf16.mxu1 %v3783_v3  ;;  %v3833_v2 = vld [vmem:[%s4928_s1 + $0x380] sm:$0xff]   ;;  %v643_v3 = vcombine.high %v621_v61, %v621_v61 }
  0x34   :  { %3401 = vmatpush3.bf16.msra.mxu0 %v3784_v4  ;;  %v3834_v4 = vld [vmem:[%s4928_s1 + $0x348] sm:$0xff]  }
  0x35   :  { %3402 = vmatprep.subr.bf16.mxu0 %v3786_v6  ;;  %3423 = vmatpush3.bf16.msra.mxu1 %v3785_v5  ;;  %v3835_v5 = vld [vmem:[%s4928_s1 + $0x3c8] sm:$0xff]   ;;  %v646_v6 = vcombine.high %v642_v0, %v642_v0 }
  0x36   :  { %3424 = vmatprep.subr.bf16.mxu1 %v3787_v7  ;;  %v3836_v7 = vld [vmem:[%s4928_s1 + $0x308] sm:$0xff]  }
  0x38   :  { %3403 = vmatpush3.bf16.msra.mxu0 %v3788_v8  ;;  %v3837_v8 = vld [vmem:[%s4928_s1 + $0x388] sm:$0xff]  }
  0x39   :  { %3404 = vmatprep.subr.bf16.mxu0 %v3790_v10  ;;  %3425 = vmatpush3.bf16.msra.mxu1 %v3789_v9  ;;  %v3838_v9 = vld [vmem:[%s4928_s1 + $0x350] sm:$0xff]  }
  0x3a   :  { %3426 = vmatprep.subr.bf16.mxu1 %v3791_v11  ;;  %v3839_v10 = vld [vmem:[%s4928_s1 + $0x3d0] sm:$0xff]  }
  0x3b   :  { %v3840_v11 = vld [vmem:[%s4928_s1 + $0x310] sm:$0xff]  }
  0x3c   :  { %3405 = vmatpush3.bf16.msra.mxu0 %v3792_v12  ;;  %v3841_v12 = vld [vmem:[%s4928_s1 + $0x390] sm:$0xff]  }
  0x3d   :  { %3406 = vmatprep.subr.bf16.mxu0 %v3794_v14  ;;  %3427 = vmatpush3.bf16.msra.mxu1 %v3793_v13  ;;  %v3842_v13 = vld [vmem:[%s4928_s1 + $0x358] sm:$0xff]  }
  0x3e   :  { %3428 = vmatprep.subr.bf16.mxu1 %v3795_v15  ;;  %v3843_v14 = vld [vmem:[%s4928_s1 + $0x3d8] sm:$0xff]  }
  0x3f   :  { %v3844_v15 = vld [vmem:[%s4928_s1 + $0x318] sm:$0xff]  }
  0x40   :  { %3407 = vmatpush3.bf16.msra.mxu0 %v3796_v16  ;;  %v3845_v16 = vld [vmem:[%s4928_s1 + $0x398] sm:$0xff]  }
  0x41   :  { %3436 = vmatprep.subr.bf16.mxu0 %v3798_v19  ;;  %3429 = vmatpush3.bf16.msra.mxu1 %v3797_v17  ;;  %v3846_v17 = vld [vmem:[%s4928_s1 + $0x360] sm:$0xff]  }
  0x42   :  { %3458 = vmatprep.subr.bf16.mxu1 %v3799_v20  ;;  %v3848_v19 = vld [vmem:[%s4928_s1 + $0x320] sm:$0xff]  }
  0x43   :  { %2426 = vmatmul.mubr.bf16.vlgmr.msra.gmra.mrb[4].mxu0 %v579_v18  ;;  %v3847_v18 = vld [vmem:[%s4928_s1 + $0x3e0] sm:$0xff]  }
  0x44   :  { %3437 = vmatpush3.bf16.msra.mxu0 %v3800_v21  ;;  %2466 = vmatmul.mubr.bf16.vlgmr.msra.gmra.mrb[4].mxu1 %v595_v23  ;;  %v3849_v20 = vld [vmem:[%s4928_s1 + $0x3a0] sm:$0xff]   ;;  %v3850_v21 = vld [vmem:[%s4928_s1 + $0x368] sm:$0xff]  }
  0x45   :  { %3438 = vmatprep.subr.bf16.mxu0 %v3802_v24  ;;  %3459 = vmatpush3.bf16.msra.mxu1 %v3801_v22  ;;  %v3851_v22 = vld [vmem:[%s4928_s1 + $0x3e8] sm:$0xff]  }
  0x46   :  { %3460 = vmatprep.subr.bf16.mxu1 %v3803_v25  ;;  %2505 = vmatprep.mubr.bf16.mxu0 %v635_v56  ;;  %v3852_v23 = vld [vmem:[%s4928_s1 + $0x328] sm:$0xff]   ;;  %v3854_v25 = vld [vmem:[%s4928_s1 + $0x370] sm:$0xff]  }
  0x47   :  { %2545 = vmatprep.mubr.bf16.mxu1 %v645_v60  ;;  %v3853_v24 = vld [vmem:[%s4928_s1 + $0x3a8] sm:$0xff]   ;;  %v3887_v60 = vld [vmem:[%s4928_s1 + $0x470] sm:$0xff]  }
  0x48   :  { %3439 = vmatpush3.bf16.msra.mxu0 %v3804_v26  ;;  %v3855_v26 = vld [vmem:[%s4928_s1 + $0x3f0] sm:$0xff]   ;;  %v3883_v56 = vld [vmem:[%s4928_s1 + $0x468] sm:$0xff]  }
  0x49   :  { %3440 = vmatprep.subr.bf16.mxu0 %v3806_v28  ;;  %3461 = vmatpush3.bf16.msra.mxu1 %v3805_v27  ;;  %v3856_v27 = vld [vmem:[%s4928_s1 + $0x330] sm:$0xff]  }
  0x4a   :  { %3462 = vmatprep.subr.bf16.mxu1 %v3807_v29  ;;  %v3857_v28 = vld [vmem:[%s4928_s1 + $0x3b0] sm:$0xff]   ;;  %v3858_v29 = vld [vmem:[%s4928_s1 + $0x378] sm:$0xff]  }
  0x4c   :  { %3441 = vmatpush3.bf16.msra.mxu0 %v3808_v30  ;;  %v3859_v30 = vld [vmem:[%s4928_s1 + $0x3f8] sm:$0xff]  }
  0x4d   :  { %3442 = vmatprep.subr.bf16.mxu0 %v3810_v32  ;;  %3463 = vmatpush3.bf16.msra.mxu1 %v3809_v31  ;;  %v3860_v31 = vld [vmem:[%s4928_s1 + $0x338] sm:$0xff]  }
  0x4e   :  { %3464 = vmatprep.subr.bf16.mxu1 %v3811_v33  ;;  %v3861_v32 = vld [vmem:[%s4928_s1 + $0x3b8] sm:$0xff]   ;;  %v628_v33 = vrot.slane %v4356_v53, %v4164_v41  ;;  %v3880_v53 = vld [vmem:[%s4928_s1 + $0x4e0] sm:$0xff]  }
  0x50   :  { %3443 = vmatpush3.bf16.msra.mxu0 %v3812_v34  ;;  %v3863_v34 = vld [vmem:[%s4928_s1 + $0x440] sm:$0xff]  }
  0x51   :  { %3444 = vmatprep.subr.bf16.mxu0 %v3814_v36  ;;  %3465 = vmatpush3.bf16.msra.mxu1 %v3813_v35  ;;  %v3864_v35 = vld [vmem:[%s4928_s1 + $0x4c0] sm:$0xff]  }
  0x52   :  { %3466 = vmatprep.subr.bf16.mxu1 %v3815_v37  ;;  %v3865_v36 = vld [vmem:[%s4928_s1 + $0x400] sm:$0xff]  }
  0x53   :  { %v3866_v37 = vld [vmem:[%s4928_s1 + $0x480] sm:$0xff]  }
  0x54   :  { %3445 = vmatpush3.bf16.msra.mxu0 %v3816_v38  ;;  %v644_v38 = vcombine.high %v628_v33, %v628_v33 }
  0x55   :  { %3446 = vmatprep.subr.bf16.mxu0 %v3818_v40  ;;  %3467 = vmatpush3.bf16.msra.mxu1 %v3817_v39  ;;  %v3867_v39 = vld [vmem:[%s4928_s1 + $0x448] sm:$0xff]  }
  0x56   :  { %3468 = vmatprep.subr.bf16.mxu1 %v3819_v42  ;;  %v3868_v40 = vld [vmem:[%s4928_s1 + $0x4c8] sm:$0xff]  }
  0x57   :  { %v3869_v42 = vld [vmem:[%s4928_s1 + $0x408] sm:$0xff]  }
  0x58   :  { %3447 = vmatpush3.bf16.msra.mxu0 %v3820_v43  ;;  %v3870_v43 = vld [vmem:[%s4928_s1 + $0x488] sm:$0xff]  }
  0x59   :  { %3448 = vmatprep.subr.bf16.mxu0 %v3822_v45  ;;  %3469 = vmatpush3.bf16.msra.mxu1 %v3821_v44  ;;  %v3871_v44 = vld [vmem:[%s4928_s1 + $0x450] sm:$0xff]  }
  0x5a   :  { %3470 = vmatprep.subr.bf16.mxu1 %v3823_v47  ;;  %v3872_v45 = vld [vmem:[%s4928_s1 + $0x4d0] sm:$0xff]  }
  0x5b   :  { %v3874_v47 = vld [vmem:[%s4928_s1 + $0x490] sm:$0xff]  }
  0x5c   :  { %3449 = vmatpush3.bf16.msra.mxu0 %v3824_v50  ;;  %v3877_v50 = vld [vmem:[%s4928_s1 + $0x418] sm:$0xff]  }
  0x5d   :  { %3450 = vmatprep.subr.bf16.mxu0 %v3826_v54  ;;  %3471 = vmatpush3.bf16.msra.mxu1 %v3825_v51  ;;  %v3878_v51 = vld [vmem:[%s4928_s1 + $0x498] sm:$0xff]   ;;  %v3881_v54 = vld [vmem:[%s4928_s1 + $0x420] sm:$0xff]  }
  0x5e   :  { %3472 = vmatprep.subr.bf16.mxu1 %v3827_v55  ;;  %v3882_v55 = vld [vmem:[%s4928_s1 + $0x4a0] sm:$0xff]  }
  0x60   :  { %3451 = vmatpush3.bf16.msra.mxu0 %v3828_v58  ;;  %v3885_v58 = vld [vmem:[%s4928_s1 + $0x428] sm:$0xff]  }
  0x61   :  { %3480 = vmatprep.subr.bf16.mxu0 %v3830_v62  ;;  %3473 = vmatpush3.bf16.msra.mxu1 %v3829_v59  ;;  %v3886_v59 = vld [vmem:[%s4928_s1 + $0x4a8] sm:$0xff]   ;;  %v3888_v62 = vld [vmem:[%s4928_s1 + $0x4f0] sm:$0xff]  }
  0x62   :  { %3502 = vmatprep.subr.bf16.mxu1 %v3831_v63 }
  0x63   :  { %2506 = vmatmul.mubr.bf16.vlgmr.msra.gmra.mrb[8].mxu0 %v621_v61  ;;  %v24_v61 = vld [vmem:[%s4927_s0 + $0x10] sm:$0xff] }
  0x64   :  { %3481 = vmatpush3.bf16.msra.mxu0 %v3832_v1  ;;  %2585 = vmatprep.mubr.bf16.mxu0 %v642_v0  ;;  %v654_v63 = vrot.slane %v24_v61, %v4164_v41  ;;  %v647_v0 = vcombine.high %v24_v61, %v24_v61  ;;  %v3889_v1 = vld [vmem:[%s4928_s1 + $0x430] sm:$0xff]  }
  0x65   :  { %2546 = vmatmul.mubr.bf16.vlgmr.msra.gmra.mrb[8].mxu1 %v643_v3  ;;  %3482 = vmatprep.subr.bf16.mxu0 %v3834_v4  ;;  %v3938_v61 = vld [vmem:[%s4928_s1 + $0x610] sm:$0xff]  }
  0x66   :  { %3503 = vmatpush3.bf16.msra.mxu1 %v3833_v2  ;;  %2625 = vmatprep.mubr.bf16.mxu1 %v646_v6  ;;  %v3890_v2 = vld [vmem:[%s4928_s1 + $0x4b0] sm:$0xff]   ;;  %v662_v3 = vcombine.high %v654_v63, %v654_v63  ;;  %v4562_v4 = vrot.slane %v647_v0, %v4164_v41  ;;  %v3892_v6 = vld [vmem:[%s4928_s1 + $0x4f8] sm:$0xff]  }
  0x67   :  { %3504 = vmatprep.subr.bf16.mxu1 %v3835_v5  ;;  %v3891_v5 = vld [vmem:[%s4928_s1 + $0x478] sm:$0xff]  }
  0x68   :  { %3483 = vmatpush3.bf16.msra.mxu0 %v3836_v7  ;;  %v684_v7 = vrot.slane %v662_v3, %v4164_v41  ;;  %v3941_v0 = vld [vmem:[%s4928_s1 + $0x6d8] sm:$0xff]   ;;  %v3944_v3 = vld [vmem:[%s4928_s1 + $0x660] sm:$0xff]  }
  0x69   :  { %3484 = vmatprep.subr.bf16.mxu0 %v3838_v9  ;;  %v3893_v9 = vld [vmem:[%s4928_s1 + $0x438] sm:$0xff]  }
  0x6a   :  { %3505 = vmatpush3.bf16.msra.mxu1 %v3837_v8  ;;  %v663_v8 = vcombine.high %v4562_v4, %v4562_v4 }
  0x6b   :  { %3506 = vmatprep.subr.bf16.mxu1 %v3839_v10  ;;  %v3894_v10 = vld [vmem:[%s4928_s1 + $0x4b8] sm:$0xff]  }
  0x6c   :  { %3485 = vmatpush3.bf16.msra.mxu0 %v3840_v11  ;;  %v694_v11 = vcombine.high %v684_v7, %v684_v7 }
  0x6d   :  { %3486 = vmatprep.subr.bf16.mxu0 %v3842_v13  ;;  %v3895_v13 = vld [vmem:[%s4928_s1 + $0x540] sm:$0xff]  }
  0x6e   :  { %3507 = vmatpush3.bf16.msra.mxu1 %v3841_v12  ;;  %v670_v12 = vrot.slane %v654_v63, %v4164_v41  ;;  %v3940_v63 = vld [vmem:[%s4928_s1 + $0x658] sm:$0xff]  }
  0x6f   :  { %3508 = vmatprep.subr.bf16.mxu1 %v3843_v14  ;;  %v3896_v14 = vld [vmem:[%s4928_s1 + $0x5c0] sm:$0xff]  }
  0x70   :  { %3487 = vmatpush3.bf16.msra.mxu0 %v3844_v15  ;;  %v691_v15 = vrot.slane %v663_v8, %v4164_v41  ;;  %v3949_v8 = vld [vmem:[%s4928_s1 + $0x6e8] sm:$0xff]  }
  0x71   :  { %3488 = vmatprep.subr.bf16.mxu0 %v3846_v17  ;;  %v3898_v17 = vld [vmem:[%s4928_s1 + $0x580] sm:$0xff]  }
  0x72   :  { %3509 = vmatpush3.bf16.msra.mxu1 %v3845_v16  ;;  %v3897_v16 = vld [vmem:[%s4928_s1 + $0x500] sm:$0xff]  }
  0x73   :  { %3510 = vmatprep.subr.bf16.mxu1 %v3847_v18  ;;  %v692_v18 = vcombine.high %v670_v12, %v670_v12 }
  0x74   :  { %3489 = vmatpush3.bf16.msra.mxu0 %v3848_v19  ;;  %v3899_v19 = vld [vmem:[%s4928_s1 + $0x548] sm:$0xff]  }
  0x75   :  { %3490 = vmatprep.subr.bf16.mxu0 %v3850_v21  ;;  %v695_v21 = vcombine.high %v691_v15, %v691_v15 }
  0x76   :  { %3511 = vmatpush3.bf16.msra.mxu1 %v3849_v20  ;;  %v3900_v20 = vld [vmem:[%s4928_s1 + $0x5c8] sm:$0xff]  }
  0x77   :  { %3512 = vmatprep.subr.bf16.mxu1 %v3851_v22  ;;  %v3901_v22 = vld [vmem:[%s4928_s1 + $0x508] sm:$0xff]  }
  0x78   :  { %3491 = vmatpush3.bf16.msra.mxu0 %v3852_v23  ;;  %v3902_v23 = vld [vmem:[%s4928_s1 + $0x588] sm:$0xff]  }
  0x79   :  { %3492 = vmatprep.subr.bf16.mxu0 %v3854_v25  ;;  %v3904_v25 = vld [vmem:[%s4928_s1 + $0x5d0] sm:$0xff]  }
  0x7a   :  { %3513 = vmatpush3.bf16.msra.mxu1 %v3853_v24  ;;  %v3903_v24 = vld [vmem:[%s4928_s1 + $0x550] sm:$0xff]  }
  0x7b   :  { %3514 = vmatprep.subr.bf16.mxu1 %v3855_v26  ;;  %v3905_v26 = vld [vmem:[%s4928_s1 + $0x510] sm:$0xff]  }
  0x7c   :  { %3493 = vmatpush3.bf16.msra.mxu0 %v3856_v27  ;;  %v3906_v27 = vld [vmem:[%s4928_s1 + $0x590] sm:$0xff]  }
  0x7d   :  { %3494 = vmatprep.subr.bf16.mxu0 %v3858_v29  ;;  %v3908_v29 = vld [vmem:[%s4928_s1 + $0x5d8] sm:$0xff]  }
  0x7e   :  { %3515 = vmatpush3.bf16.msra.mxu1 %v3857_v28  ;;  %v3907_v28 = vld [vmem:[%s4928_s1 + $0x558] sm:$0xff]  }
  0x7f   :  { %3516 = vmatprep.subr.bf16.mxu1 %v3859_v30  ;;  %v3909_v30 = vld [vmem:[%s4928_s1 + $0x518] sm:$0xff]  }
  0x80   :  { %3495 = vmatpush3.bf16.msra.mxu0 %v3860_v31  ;;  %v3910_v31 = vld [vmem:[%s4928_s1 + $0x598] sm:$0xff]  }
  0x81   :  { %3524 = vmatprep.subr.bf16.mxu0 %v3863_v34  ;;  %v3913_v34 = vld [vmem:[%s4928_s1 + $0x520] sm:$0xff]  }
  0x82   :  { %3517 = vmatpush3.bf16.msra.mxu1 %v3861_v32  ;;  %v3911_v32 = vld [vmem:[%s4928_s1 + $0x560] sm:$0xff]  }
  0x83   :  { %2586 = vmatmul.mubr.bf16.vlgmr.msra.gmra.mrb[12].mxu0 %v628_v33  ;;  %3546 = vmatprep.subr.bf16.mxu1 %v3864_v35  ;;  %v3912_v33 = vld [vmem:[%s4928_s1 + $0x5e0] sm:$0xff]  }
  0x84   :  { %3525 = vmatpush3.bf16.msra.mxu0 %v3865_v36  ;;  %2665 = vmatprep.mubr.bf16.mxu0 %v684_v7  ;;  %v3914_v35 = vld [vmem:[%s4928_s1 + $0x5a0] sm:$0xff]   ;;  %v3915_v36 = vld [vmem:[%s4928_s1 + $0x568] sm:$0xff]  }
  0x85   :  { %2626 = vmatmul.mubr.bf16.vlgmr.msra.gmra.mrb[12].mxu1 %v644_v38  ;;  %3526 = vmatprep.subr.bf16.mxu0 %v3867_v39  ;;  %v3917_v38 = vld [vmem:[%s4928_s1 + $0x528] sm:$0xff]  }
  0x86   :  { %3547 = vmatpush3.bf16.msra.mxu1 %v3866_v37  ;;  %2705 = vmatprep.mubr.bf16.mxu1 %v694_v11  ;;  %v3916_v37 = vld [vmem:[%s4928_s1 + $0x5e8] sm:$0xff]   ;;  %v3952_v11 = vld [vmem:[%s4928_s1 + $0x670] sm:$0xff]  }
  0x87   :  { %3548 = vmatprep.subr.bf16.mxu1 %v3868_v40  ;;  %v3918_v39 = vld [vmem:[%s4928_s1 + $0x5a8] sm:$0xff]   ;;  %v3919_v40 = vld [vmem:[%s4928_s1 + $0x570] sm:$0xff]  }
  0x88   :  { %3527 = vmatpush3.bf16.msra.mxu0 %v3869_v42  ;;  %v3920_v42 = vld [vmem:[%s4928_s1 + $0x5f0] sm:$0xff]   ;;  %v3948_v7 = vld [vmem:[%s4928_s1 + $0x668] sm:$0xff]  }
  0x89   :  { %3528 = vmatprep.subr.bf16.mxu0 %v3871_v44  ;;  %v3922_v44 = vld [vmem:[%s4928_s1 + $0x5b0] sm:$0xff]  }
  0x8a   :  { %3549 = vmatpush3.bf16.msra.mxu1 %v3870_v43  ;;  %v3921_v43 = vld [vmem:[%s4928_s1 + $0x530] sm:$0xff]  }
  0x8b   :  { %3550 = vmatprep.subr.bf16.mxu1 %v3872_v45  ;;  %v3923_v45 = vld [vmem:[%s4928_s1 + $0x578] sm:$0xff]  }
  0x8c   :  { %3529 = vmatpush3.bf16.msra.mxu0 %v3873_v46  ;;  %v3924_v46 = vld [vmem:[%s4928_s1 + $0x5f8] sm:$0xff]  }
  0x8d   :  { %3530 = vmatprep.subr.bf16.mxu0 %v3875_v48  ;;  %v3926_v48 = vld [vmem:[%s4928_s1 + $0x5b8] sm:$0xff]  }
  0x8e   :  { %3551 = vmatpush3.bf16.msra.mxu1 %v3874_v47  ;;  %v3925_v47 = vld [vmem:[%s4928_s1 + $0x538] sm:$0xff]  }
  0x8f   :  { %3552 = vmatprep.subr.bf16.mxu1 %v3876_v49  ;;  %v677_v49 = vrot.slane %v4562_v4, %v4164_v41  ;;  %v3945_v4 = vld [vmem:[%s4928_s1 + $0x6e0] sm:$0xff]  }
  0x90   :  { %3531 = vmatpush3.bf16.msra.mxu0 %v3877_v50  ;;  %v3928_v50 = vld [vmem:[%s4928_s1 + $0x640] sm:$0xff]  }
  0x91   :  { %3532 = vmatprep.subr.bf16.mxu0 %v3879_v52  ;;  %v3930_v52 = vld [vmem:[%s4928_s1 + $0x600] sm:$0xff]  }
  0x92   :  { %3553 = vmatpush3.bf16.msra.mxu1 %v3878_v51  ;;  %v3929_v51 = vld [vmem:[%s4928_s1 + $0x6c0] sm:$0xff]  }
  0x93   :  { %3554 = vmatprep.subr.bf16.mxu1 %v3880_v53  ;;  %v3931_v53 = vld [vmem:[%s4928_s1 + $0x680] sm:$0xff]  }
  0x94   :  { %3533 = vmatpush3.bf16.msra.mxu0 %v3881_v54  ;;  %v693_v54 = vcombine.high %v677_v49, %v677_v49 }
  0x95   :  { %3534 = vmatprep.subr.bf16.mxu0 %v3883_v56  ;;  %v3933_v56 = vld [vmem:[%s4928_s1 + $0x6c8] sm:$0xff]  }
  0x96   :  { %3555 = vmatpush3.bf16.msra.mxu1 %v3882_v55  ;;  %v3932_v55 = vld [vmem:[%s4928_s1 + $0x648] sm:$0xff]  }
  0x97   :  { %3556 = vmatprep.subr.bf16.mxu1 %v3884_v57  ;;  %v3934_v57 = vld [vmem:[%s4928_s1 + $0x608] sm:$0xff]  }
  0x98   :  { %3535 = vmatpush3.bf16.msra.mxu0 %v3885_v58  ;;  %v3935_v58 = vld [vmem:[%s4928_s1 + $0x688] sm:$0xff]  }
  0x99   :  { %3536 = vmatprep.subr.bf16.mxu0 %v3887_v60  ;;  %v3937_v60 = vld [vmem:[%s4928_s1 + $0x6d0] sm:$0xff]  }
  0x9a   :  { %3557 = vmatpush3.bf16.msra.mxu1 %v3886_v59  ;;  %v3936_v59 = vld [vmem:[%s4928_s1 + $0x650] sm:$0xff]  }
  0x9b   :  { %3558 = vmatprep.subr.bf16.mxu1 %v3888_v62  ;;  %v3939_v62 = vld [vmem:[%s4928_s1 + $0x690] sm:$0xff]  }
  0x9c   :  { %3537 = vmatpush3.bf16.msra.mxu0 %v3889_v1  ;;  %v3942_v1 = vld [vmem:[%s4928_s1 + $0x618] sm:$0xff]  }
  0x9d   :  { %3538 = vmatprep.subr.bf16.mxu0 %v3891_v5  ;;  %v3946_v5 = vld [vmem:[%s4928_s1 + $0x620] sm:$0xff]  }
  0x9e   :  { %3559 = vmatpush3.bf16.msra.mxu1 %v3890_v2  ;;  %v3943_v2 = vld [vmem:[%s4928_s1 + $0x698] sm:$0xff]  }
  0x9f   :  { %3560 = vmatprep.subr.bf16.mxu1 %v3892_v6  ;;  %v3947_v6 = vld [vmem:[%s4928_s1 + $0x6a0] sm:$0xff]  }
  0xa0   :  { %3539 = vmatpush3.bf16.msra.mxu0 %v3893_v9  ;;  %v3950_v9 = vld [vmem:[%s4928_s1 + $0x628] sm:$0xff]  }
  0xa1   :  { %3568 = vmatprep.subr.bf16.mxu0 %v3895_v13  ;;  %v3953_v13 = vld [vmem:[%s4928_s1 + $0x6f0] sm:$0xff]  }
  0xa2   :  { %3561 = vmatpush3.bf16.msra.mxu1 %v3894_v10  ;;  %v3951_v10 = vld [vmem:[%s4928_s1 + $0x6a8] sm:$0xff]  }
  0xa3   :  { %2666 = vmatmul.mubr.bf16.vlgmr.msra.gmra.mrb[16].mxu0 %v670_v12  ;;  %3590 = vmatprep.subr.bf16.mxu1 %v3896_v14  ;;  %v25_v12 = vld [vmem:[%s4927_s0 + $0x18] sm:$0xff] }
  0xa4   :  { %3569 = vmatpush3.bf16.msra.mxu0 %v3897_v16  ;;  %2745 = vmatprep.mubr.bf16.mxu0 %v691_v15  ;;  %v703_v14 = vrot.slane %v25_v12, %v4164_v41  ;;  %v696_v15 = vcombine.high %v25_v12, %v25_v12  ;;  %v3954_v16 = vld [vmem:[%s4928_s1 + $0x630] sm:$0xff]  }
  0xa5   :  { %2706 = vmatmul.mubr.bf16.vlgmr.msra.gmra.mrb[16].mxu1 %v692_v18  ;;  %3570 = vmatprep.subr.bf16.mxu0 %v3899_v19 }
  0xa6   :  { %3591 = vmatpush3.bf16.msra.mxu1 %v3898_v17  ;;  %2785 = vmatprep.mubr.bf16.mxu1 %v695_v21  ;;  %v3956_v17 = vld [vmem:[%s4928_s1 + $0x678] sm:$0xff]   ;;  %v711_v18 = vcombine.high %v703_v14, %v703_v14  ;;  %v4768_v19 = vrot.slane %v696_v15, %v4164_v41 }
  0xa7   :  { %3592 = vmatprep.subr.bf16.mxu1 %v3900_v20  ;;  %v3955_v20 = vld [vmem:[%s4928_s1 + $0x6b0] sm:$0xff]   ;;  %v3957_v21 = vld [vmem:[%s4928_s1 + $0x6f8] sm:$0xff]  }
  0xa8   :  { %3571 = vmatpush3.bf16.msra.mxu0 %v3901_v22  ;;  %v733_v22 = vrot.slane %v711_v18, %v4164_v41  ;;  %v726_v12 = vrot.slane %v4768_v19, %v4164_v41 }
  0xa9   :  { %3572 = vmatprep.subr.bf16.mxu0 %v3903_v24  ;;  %v3958_v24 = vld [vmem:[%s4928_s1 + $0x638] sm:$0xff]  }
  0xaa   :  { %3593 = vmatpush3.bf16.msra.mxu1 %v3902_v23  ;;  %v712_v23 = vcombine.high %v4768_v19, %v4768_v19 }
  0xab   :  { %3594 = vmatprep.subr.bf16.mxu1 %v3904_v25  ;;  %v743_v25 = vcombine.high %v733_v22, %v733_v22 }
  0xac   :  { %3573 = vmatpush3.bf16.msra.mxu0 %v3905_v26  ;;  %v719_v26 = vrot.slane %v703_v14, %v4164_v41 }
  0xad   :  { %3574 = vmatprep.subr.bf16.mxu0 %v3907_v28  ;;  %v3959_v28 = vld [vmem:[%s4928_s1 + $0x6b8] sm:$0xff]  }
  0xae   :  { %3595 = vmatpush3.bf16.msra.mxu1 %v3906_v27  ;;  %v3960_v27 = vld [vmem:[%s4928_s1 + $0x740] sm:$0xff]  }
  0xaf   :  { %3596 = vmatprep.subr.bf16.mxu1 %v3908_v29  ;;  %v740_v29 = vrot.slane %v712_v23, %v4164_v41 }
  0xb0   :  { %3575 = vmatpush3.bf16.msra.mxu0 %v3909_v30  ;;  %v3961_v30 = vld [vmem:[%s4928_s1 + $0x7c0] sm:$0xff]  }
  0xb1   :  { %3576 = vmatprep.subr.bf16.mxu0 %v3911_v32  ;;  %v741_v32 = vcombine.high %v719_v26, %v719_v26 }
  0xb2   :  { %3597 = vmatpush3.bf16.msra.mxu1 %v3910_v31  ;;  %v3962_v31 = vld [vmem:[%s4928_s1 + $0x700] sm:$0xff]  }
  0xb3   :  { %3598 = vmatprep.subr.bf16.mxu1 %v3912_v33  ;;  %v3964_v33 = vld [vmem:[%s4928_s1 + $0x748] sm:$0xff]  }
  0xb4   :  { %3577 = vmatpush3.bf16.msra.mxu0 %v3913_v34  ;;  %v3963_v34 = vld [vmem:[%s4928_s1 + $0x780] sm:$0xff]  }
  0xb5   :  { %3578 = vmatprep.subr.bf16.mxu0 %v3915_v36  ;;  %v3965_v36 = vld [vmem:[%s4928_s1 + $0x7c8] sm:$0xff]  }
  0xb6   :  { %3599 = vmatpush3.bf16.msra.mxu1 %v3914_v35  ;;  %v744_v35 = vcombine.high %v740_v29, %v740_v29 }
  0xb7   :  { %3600 = vmatprep.subr.bf16.mxu1 %v3916_v37  ;;  %v3966_v37 = vld [vmem:[%s4928_s1 + $0x708] sm:$0xff]  }
  0xb8   :  { %3579 = vmatpush3.bf16.msra.mxu0 %v3917_v38  ;;  %v3968_v38 = vld [vmem:[%s4928_s1 + $0x750] sm:$0xff]  }
  0xb9   :  { %3580 = vmatprep.subr.bf16.mxu0 %v3919_v40  ;;  %v3969_v40 = vld [vmem:[%s4928_s1 + $0x7d0] sm:$0xff]  }
  0xba   :  { %3601 = vmatpush3.bf16.msra.mxu1 %v3918_v39  ;;  %v3967_v39 = vld [vmem:[%s4928_s1 + $0x788] sm:$0xff]  }
  0xbb   :  { %3602 = vmatprep.subr.bf16.mxu1 %v3920_v42  ;;  %v3970_v42 = vld [vmem:[%s4928_s1 + $0x710] sm:$0xff]  }
  0xbc   :  { %3581 = vmatpush3.bf16.msra.mxu0 %v3921_v43  ;;  %v3972_v43 = vld [vmem:[%s4928_s1 + $0x758] sm:$0xff]  }
  0xbd   :  { %3582 = vmatprep.subr.bf16.mxu0 %v3923_v45  ;;  %v3973_v45 = vld [vmem:[%s4928_s1 + $0x7d8] sm:$0xff]  }
  0xbe   :  { %3603 = vmatpush3.bf16.msra.mxu1 %v3922_v44  ;;  %v3971_v44 = vld [vmem:[%s4928_s1 + $0x790] sm:$0xff]  }
  0xbf   :  { %3604 = vmatprep.subr.bf16.mxu1 %v3924_v46  ;;  %v3974_v46 = vld [vmem:[%s4928_s1 + $0x718] sm:$0xff]  }
  0xc0   :  { %3583 = vmatpush3.bf16.msra.mxu0 %v3925_v47  ;;  %v3975_v47 = vld [vmem:[%s4928_s1 + $0x798] sm:$0xff]  }
  0xc1   :  { %3612 = vmatprep.subr.bf16.mxu0 %v3928_v50  ;;  %v3978_v50 = vld [vmem:[%s4928_s1 + $0x720] sm:$0xff]  }
  0xc2   :  { %3605 = vmatpush3.bf16.msra.mxu1 %v3926_v48  ;;  %v3976_v48 = vld [vmem:[%s4928_s1 + $0x760] sm:$0xff]  }
  0xc3   :  { %2746 = vmatmul.mubr.bf16.vlgmr.msra.gmra.mrb[20].mxu0 %v677_v49  ;;  %3634 = vmatprep.subr.bf16.mxu1 %v3929_v51  ;;  %v3977_v49 = vld [vmem:[%s4928_s1 + $0x7e0] sm:$0xff]  }
  0xc4   :  { %3613 = vmatpush3.bf16.msra.mxu0 %v3930_v52  ;;  %2825 = vmatprep.mubr.bf16.mxu0 %v733_v22  ;;  %v3979_v51 = vld [vmem:[%s4928_s1 + $0x7a0] sm:$0xff]   ;;  %v3980_v52 = vld [vmem:[%s4928_s1 + $0x768] sm:$0xff]  }
  0xc5   :  { %2786 = vmatmul.mubr.bf16.vlgmr.msra.gmra.mrb[20].mxu1 %v693_v54  ;;  %3614 = vmatprep.subr.bf16.mxu0 %v3932_v55  ;;  %v3982_v54 = vld [vmem:[%s4928_s1 + $0x728] sm:$0xff]  }
  0xc6   :  { %3635 = vmatpush3.bf16.msra.mxu1 %v3931_v53  ;;  %2865 = vmatprep.mubr.bf16.mxu1 %v743_v25  ;;  %v3981_v53 = vld [vmem:[%s4928_s1 + $0x7e8] sm:$0xff]  }
  0xc7   :  { %3636 = vmatprep.subr.bf16.mxu1 %v3933_v56  ;;  %v3983_v55 = vld [vmem:[%s4928_s1 + $0x7a8] sm:$0xff]   ;;  %v3984_v56 = vld [vmem:[%s4928_s1 + $0x770] sm:$0xff]  }
  0xc8   :  { %3615 = vmatpush3.bf16.msra.mxu0 %v3934_v57  ;;  %v3082_v57 = vld [vmem:[%s4929_s2] ss:$0 sm:$0xff] }
  0xc9   :  { %3616 = vmatprep.subr.bf16.mxu0 %v3936_v59 }
  0xca   :  { %3637 = vmatpush3.bf16.msra.mxu1 %v3935_v58  ;;  %v3985_v58 = vld [vmem:[%s4928_s1 + $0x7f0] sm:$0xff]  }
  0xcb   :  { %3638 = vmatprep.subr.bf16.mxu1 %v3937_v60  ;;  %v3986_v60 = vld [vmem:[%s4928_s1 + $0x730] sm:$0xff]  }
  0xcc   :  { %3617 = vmatpush3.bf16.msra.mxu0 %v3938_v61 }
  0xcd   :  { %3618 = vmatprep.subr.bf16.mxu0 %v3940_v63 }
  0xce   :  { %3639 = vmatpush3.bf16.msra.mxu1 %v3939_v62  ;;  %v3988_v62 = vld [vmem:[%s4928_s1 + $0x778] sm:$0xff]  }
  0xcf   :  { %3640 = vmatprep.subr.bf16.mxu1 %v3941_v0 }
  0xd0   :  { %3619 = vmatpush3.bf16.msra.mxu0 %v3942_v1 }
  0xd1   :  { %3620 = vmatprep.subr.bf16.mxu0 %v3944_v3 }
  0xd2   :  { %3641 = vmatpush3.bf16.msra.mxu1 %v3943_v2  ;;  %v3987_v2 = vld [vmem:[%s4928_s1 + $0x7b0] sm:$0xff]  }
  0xd3   :  { %3642 = vmatprep.subr.bf16.mxu1 %v3945_v4 }
  0xd4   :  { %3621 = vmatpush3.bf16.msra.mxu0 %v3946_v5 }
  0xd5   :  { %3622 = vmatprep.subr.bf16.mxu0 %v3948_v7 }
  0xd6   :  { %3643 = vmatpush3.bf16.msra.mxu1 %v3947_v6 }
  0xd7   :  { %3644 = vmatprep.subr.bf16.mxu1 %v3949_v8  ;;  %v3989_v8 = vld [vmem:[%s4928_s1 + $0x7f8] sm:$0xff]  }
  0xd8   :  { %3623 = vmatpush3.bf16.msra.mxu0 %v3950_v9 }
  0xd9   :  { %3624 = vmatprep.subr.bf16.mxu0 %v3952_v11 }
  0xda   :  { %3645 = vmatpush3.bf16.msra.mxu1 %v3951_v10  ;;  %v3990_v10 = vld [vmem:[%s4928_s1 + $0x738] sm:$0xff]  }
  0xdb   :  { %3646 = vmatprep.subr.bf16.mxu1 %v3953_v13 }
  0xdc   :  { %3625 = vmatpush3.bf16.msra.mxu0 %v3954_v16 }
  0xdd   :  { %3626 = vmatprep.subr.bf16.mxu0 %v3956_v17 }
  0xde   :  { %3647 = vmatpush3.bf16.msra.mxu1 %v3955_v20 }
  0xdf   :  { %3648 = vmatprep.subr.bf16.mxu1 %v3957_v21 }
  0xe0   :  { %3627 = vmatpush3.bf16.msra.mxu0 %v3958_v24 }
  0xe1   :  { %3656 = vmatprep.subr.bf16.mxu0 %v3960_v27 }
  0xe2   :  { %3649 = vmatpush3.bf16.msra.mxu1 %v3959_v28 }
  0xe3   :  { %2826 = vmatmul.mubr.bf16.vlgmr.msra.gmra.mrb[24].mxu0 %v719_v26  ;;  %3678 = vmatprep.subr.bf16.mxu1 %v3961_v30 }
  0xe4   :  { %3657 = vmatpush3.bf16.msra.mxu0 %v3962_v31  ;;  %2905 = vmatprep.mubr.bf16.mxu0 %v740_v29 }
  0xe5   :  { %2866 = vmatmul.mubr.bf16.vlgmr.msra.gmra.mrb[24].mxu1 %v741_v32  ;;  %3658 = vmatprep.subr.bf16.mxu0 %v3964_v33 }
  0xe6   :  { %3679 = vmatpush3.bf16.msra.mxu1 %v3963_v34  ;;  %2945 = vmatprep.mubr.bf16.mxu1 %v744_v35 }
  0xe7   :  { %3680 = vmatprep.subr.bf16.mxu1 %v3965_v36 }
  0xe8   :  { %3659 = vmatpush3.bf16.msra.mxu0 %v3966_v37 }
  0xe9   :  { %3660 = vmatprep.subr.bf16.mxu0 %v3968_v38 }
  0xea   :  { %3681 = vmatpush3.bf16.msra.mxu1 %v3967_v39 }
  0xeb   :  { %3682 = vmatprep.subr.bf16.mxu1 %v3969_v40 }
  0xec   :  { %3661 = vmatpush3.bf16.msra.mxu0 %v3970_v42 }
  0xed   :  { %3662 = vmatprep.subr.bf16.mxu0 %v3972_v43 }
  0xee   :  { %3683 = vmatpush3.bf16.msra.mxu1 %v3971_v44 }
  0xef   :  { %3684 = vmatprep.subr.bf16.mxu1 %v3973_v45 }
  0xf0   :  { %3663 = vmatpush3.bf16.msra.mxu0 %v3974_v46 }
  0xf1   :  { %3664 = vmatprep.subr.bf16.mxu0 %v3976_v48 }
  0xf2   :  { %3685 = vmatpush3.bf16.msra.mxu1 %v3975_v47 }
  0xf3   :  { %3686 = vmatprep.subr.bf16.mxu1 %v3977_v49 }
  0xf4   :  { %3665 = vmatpush3.bf16.msra.mxu0 %v3978_v50 }
  0xf5   :  { %3666 = vmatprep.subr.bf16.mxu0 %v3980_v52 }
  0xf6   :  { %3687 = vmatpush3.bf16.msra.mxu1 %v3979_v51  ;;  %v3364_v59 = vpop.f32.mrb[0].mxu0 }
  0xf7   :  { %v3365_v61 = vpop.f32.mrb[1].mxu0  ;;  %3688 = vmatprep.subr.bf16.mxu1 %v3981_v53  ;;  %v3386_v63 = vpop.f32.mrb[0].mxu1 }
  0xf8   :  { %v3366_v0 = vadd.f32 %v3365_v61, %v3364_v59  ;;  %v3367_v1 = vpop.f32.mrb[2].mxu0  ;;  %3667 = vmatpush3.bf16.msra.mxu0 %v3982_v54  ;;  %v3387_v3 = vpop.f32.mrb[1].mxu1 }
  0xf9   :  { %v3368_v4 = vpop.f32.mrb[3].mxu0  ;;  %3668 = vmatprep.subr.bf16.mxu0 %v3984_v56  ;;  %v3388_v6 = vadd.f32 %v3387_v3, %v3386_v63  ;;  %v3389_v7 = vpop.f32.mrb[2].mxu1 }
  0xfa   :  { %v2348_v5 = vadd.f32 %v3366_v0, %v3082_v57  ;;  %3689 = vmatpush3.bf16.msra.mxu1 %v3983_v55  ;;  %v3390_v9 = vpop.f32.mrb[3].mxu1 }
  0xfb   :  { %3690 = vmatprep.subr.bf16.mxu1 %v3985_v58 }
  0xfc   :  { %v2388_v11 = vadd.f32 %v3388_v6, %v2348_v5  ;;  %3669 = vmatpush3.bf16.msra.mxu0 %v3986_v60 }
  0xfd   :  { %3670 = vmatprep.subr.bf16.mxu0 %v3988_v62 }
  0xfe   :  { %10 = vsyncpa [#allocation3], 0  ;;  %3691 = vmatpush3.bf16.msra.mxu1 %v3987_v2  ;;  %v3991_v13 = vld [vmem:[%s4928_s1 + $0x7b8] sm:$0xff]   ;;  %v742_v14 = vcombine.high %v726_v12, %v726_v12  ;;  %v3993_v38 = vld [vmem:[%s4930_s3] sm:$0xff]   ;;  %v4026_v39 = vmov 0.0   ;;  %vm4027_vm0 = vmmov 0  }
  0xff   :  { %3692 = vmatprep.subr.bf16.mxu1 %v3989_v8  ;;  %v3994_v40 = vld [vmem:[%s4930_s3 + $0x8] sm:$0xff]   ;;  %v3995_v42 = vld [vmem:[%s4930_s3 + $0x10] sm:$0xff]   ;;  %v3996_v43 = vld [vmem:[%s4930_s3 + $0x18] sm:$0xff]   ;;  %s4028_s26 = smov [#allocation2]   ;;  %vm3066_vm1 = vcmask 74752  }
 0x100   :  { %3671 = vmatpush3.bf16.msra.mxu0 %v3990_v10  ;;  %v3997_v44 = vld [vmem:[%s4930_s3 + $0x20] sm:$0xff]   ;;  %v3998_v47 = vld [vmem:[%s4930_s3 + $0x28] sm:$0xff]   ;;  %v3999_v57 = vld [vmem:[%s4930_s3 + $0x30] sm:$0xff]   ;;  %s3074_s27 = sshll.u32 %s4028_s26, 4  ;;  %s3075_s27 = int_to_ptr.vmem [resolvable:$true] %s3074_s27 }
 0x101   :  { %3709 = vmatprep.subr.bf16.mxu0 %v4026_v39  ;;  %v4000_v59 = vld [vmem:[%s4930_s3 + $0x38] sm:$0xff]   ;;  %s4001_s28 = scalar_lea.vmem %s3075_s27, 32  ;;  %p4006_p1 = scmp.lt.s32.totalorder %s3075_s27, %s3075_s27 }
 0x102   :  { %3693 = vmatpush3.bf16.msra.mxu1 %v3991_v13  ;;  %p4002_p0 = scmp.ne.s32.totalorder %s3075_s27, %s4001_s28  ;;  %p4007_p2 = scmp.lt.s32.totalorder %s4001_s28, %s4001_s28 }
 0x103   :  { %2906 = vmatmul.mubr.bf16.vlgmr.msra.gmra.mrb[28].mxu0 %v726_v12 }
 0x104   :  { %3710 = vmatpush3.bf16.msra.mxu0 %v3993_v38  ;;  %3725 = vmatprep.mubr.msk.bf16.mxu0 %vm4027_vm0, %v4026_v39  ;;  %p4008_p3 = por %p4007_p2, %p4006_p1 }
 0x105   :  { %2946 = vmatmul.mubr.bf16.vlgmr.msra.gmra.mrb[28].mxu1 %v742_v14  ;;  %3711 = vmatprep.subr.bf16.mxu0 %v4026_v39 }
 0x106   :  { %p4009_p4 = pnand %p4008_p3, %p4002_p0 }
 0x108   :  { %3712 = vmatpush3.bf16.msra.mxu0 %v3994_v40 }
 0x109   :  { %3713 = vmatprep.subr.bf16.mxu0 %v4026_v39 }
 0x10c   :  { %3714 = vmatpush3.bf16.msra.mxu0 %v3995_v42 }
 0x10d   :  { %3715 = vmatprep.subr.bf16.mxu0 %v4026_v39 }
 0x110   :  { %3716 = vmatpush3.bf16.msra.mxu0 %v3996_v43 }
 0x111   :  { %3717 = vmatprep.subr.bf16.mxu0 %v4026_v39 }
 0x114   :  { %3718 = vmatpush3.bf16.msra.mxu0 %v3997_v44 }
 0x115   :  { %3719 = vmatprep.subr.bf16.mxu0 %v4026_v39 }
 0x116   :  { %v3408_v15 = vpop.f32.mrb[4].mxu0 }
 0x117   :  { %v3409_v16 = vpop.f32.mrb[5].mxu0  ;;  %v3430_v17 = vpop.f32.mrb[4].mxu1 }
 0x118   :  { %v3410_v18 = vadd.f32 %v3409_v16, %v3408_v15  ;;  %v3411_v20 = vpop.f32.mrb[6].mxu0  ;;  %v3431_v21 = vpop.f32.mrb[5].mxu1  ;;  %3720 = vmatpush3.bf16.msra.mxu0 %v3998_v47 }
 0x119   :  { %v3412_v22 = vpop.f32.mrb[7].mxu0  ;;  %v3432_v19 = vadd.f32 %v3431_v21, %v3430_v17  ;;  %v3433_v23 = vpop.f32.mrb[6].mxu1  ;;  %3721 = vmatprep.subr.bf16.mxu0 %v4026_v39 }
 0x11a   :  { %v2428_v41 = vadd.f32 %v3410_v18, %v2388_v11  ;;  %v3434_v24 = vpop.f32.mrb[7].mxu1 }
 0x11c   :  { %v2468_v25 = vadd.f32 %v3432_v19, %v2428_v41  ;;  %3722 = vmatpush3.bf16.msra.mxu0 %v3999_v57 }
 0x11d   :  { %3723 = vmatprep.subr.bf16.mxu0 %v4026_v39 }
 0x120   :  { %3724 = vmatpush3.bf16.msra.mxu0 %v4000_v59 }
 0x136   :  { %v3452_v26 = vpop.f32.mrb[8].mxu0 }
 0x137   :  { %v3453_v27 = vpop.f32.mrb[9].mxu0 }
 0x138   :  { %v3474_v28 = vpop.f32.mrb[8].mxu1  ;;  %v3454_v29 = vadd.f32 %v3453_v27, %v3452_v26  ;;  %v3455_v30 = vpop.f32.mrb[10].mxu0 }
 0x139   :  { %v3475_v31 = vpop.f32.mrb[9].mxu1  ;;  %v3456_v32 = vpop.f32.mrb[11].mxu0 }
 0x13a   :  { %v2508_v33 = vadd.f32 %v3454_v29, %v2468_v25  ;;  %v3476_v34 = vadd.f32 %v3475_v31, %v3474_v28  ;;  %v3477_v35 = vpop.f32.mrb[10].mxu1 }
 0x13b   :  { %v3478_v36 = vpop.f32.mrb[11].mxu1 }
 0x13c   :  { %v2548_v37 = vadd.f32 %v3476_v34, %v2508_v33 }
 0x156   :  { %v3496_v45 = vpop.f32.mrb[12].mxu0 }
 0x157   :  { %v3497_v46 = vpop.f32.mrb[13].mxu0 }
 0x158   :  { %v3518_v48 = vpop.f32.mrb[12].mxu1  ;;  %v3498_v49 = vadd.f32 %v3497_v46, %v3496_v45  ;;  %v3499_v50 = vpop.f32.mrb[14].mxu0  ;;  %v3339_v46 = vld [vmem:[%s4931_s4] ss:$0 sm:$0xff] }
 0x159   :  { %v3519_v51 = vpop.f32.mrb[13].mxu1  ;;  %v3500_v52 = vpop.f32.mrb[15].mxu0 }
 0x15a   :  { %v2588_v53 = vadd.f32 %v3498_v49, %v2548_v37  ;;  %v3520_v54 = vadd.f32 %v3519_v51, %v3518_v48  ;;  %v3521_v55 = vpop.f32.mrb[14].mxu1 }
 0x15b   :  { %v3522_v56 = vpop.f32.mrb[15].mxu1 }
 0x15c   :  { %v2628_v58 = vadd.f32 %v3520_v54, %v2588_v53 }
 0x176   :  { %v3540_v60 = vpop.f32.mrb[16].mxu0 }
 0x177   :  { %v3541_v61 = vpop.f32.mrb[17].mxu0 }
 0x178   :  { %v3562_v62 = vpop.f32.mrb[16].mxu1  ;;  %v3542_v63 = vadd.f32 %v3541_v61, %v3540_v60  ;;  %v3543_v0 = vpop.f32.mrb[18].mxu0 }
 0x179   :  { %v3563_v1 = vpop.f32.mrb[17].mxu1  ;;  %v3544_v2 = vpop.f32.mrb[19].mxu0 }
 0x17a   :  { %v2668_v3 = vadd.f32 %v3542_v63, %v2628_v58  ;;  %v3564_v4 = vadd.f32 %v3563_v1, %v3562_v62  ;;  %v3565_v5 = vpop.f32.mrb[18].mxu1 }
 0x17b   :  { %v3566_v6 = vpop.f32.mrb[19].mxu1 }
 0x17c   :  { %v2708_v7 = vadd.f32 %v3564_v4, %v2668_v3 }
 0x196   :  { %v3584_v8 = vpop.f32.mrb[20].mxu0 }
 0x197   :  { %v3585_v9 = vpop.f32.mrb[21].mxu0 }
 0x198   :  { %v3606_v10 = vpop.f32.mrb[20].mxu1  ;;  %v3586_v11 = vadd.f32 %v3585_v9, %v3584_v8  ;;  %v3587_v12 = vpop.f32.mrb[22].mxu0 }
 0x199   :  { %v3607_v13 = vpop.f32.mrb[21].mxu1  ;;  %v3588_v14 = vpop.f32.mrb[23].mxu0 }
 0x19a   :  { %v2748_v15 = vadd.f32 %v3586_v11, %v2708_v7  ;;  %v3608_v16 = vadd.f32 %v3607_v13, %v3606_v10  ;;  %v3609_v17 = vpop.f32.mrb[22].mxu1 }
 0x19b   :  { %v3610_v18 = vpop.f32.mrb[23].mxu1 }
 0x19c   :  { %v2788_v20 = vadd.f32 %v3608_v16, %v2748_v15 }
 0x1b6   :  { %v3628_v21 = vpop.f32.mrb[24].mxu0 }
 0x1b7   :  { %v3629_v22 = vpop.f32.mrb[25].mxu0 }
 0x1b8   :  { %v3650_v41 = vpop.f32.mrb[24].mxu1  ;;  %v3630_v19 = vadd.f32 %v3629_v22, %v3628_v21  ;;  %v3631_v23 = vpop.f32.mrb[26].mxu0 }
 0x1b9   :  { %v3651_v24 = vpop.f32.mrb[25].mxu1  ;;  %v3632_v25 = vpop.f32.mrb[27].mxu0 }
 0x1ba   :  { %v2828_v26 = vadd.f32 %v3630_v19, %v2788_v20  ;;  %v3652_v27 = vadd.f32 %v3651_v24, %v3650_v41  ;;  %v3653_v28 = vpop.f32.mrb[26].mxu1 }
 0x1bb   :  { %v3654_v29 = vpop.f32.mrb[27].mxu1 }
 0x1bc   :  { %v2868_v30 = vadd.f32 %v3652_v27, %v2828_v26 }
 0x1d6   :  { %v3672_v31 = vpop.f32.mrb[28].mxu0 }
 0x1d7   :  { %v3673_v32 = vpop.f32.mrb[29].mxu0 }
 0x1d8   :  { %v3694_v33 = vpop.f32.mrb[28].mxu1  ;;  %v3674_v34 = vadd.f32 %v3673_v32, %v3672_v31  ;;  %v3675_v35 = vpop.f32.mrb[30].mxu0 }
 0x1d9   :  { %v3695_v36 = vpop.f32.mrb[29].mxu1  ;;  %v3676_v37 = vpop.f32.mrb[31].mxu0 }
 0x1da   :  { %v2908_v38 = vadd.f32 %v3674_v34, %v2868_v30  ;;  %v3696_v39 = vadd.f32 %v3695_v36, %v3694_v33  ;;  %v3697_v40 = vpop.f32.mrb[30].mxu1 }
 0x1db   :  { %v3698_v42 = vpop.f32.mrb[31].mxu1 }
 0x1dc   :  { %v2948_v43 = vadd.f32 %v3696_v39, %v2908_v38 }
 0x1de   :  { %v2953_v44 = vmax.f32 %v2948_v43, 0.0 }
 0x1e0   :  { %v2954_v45 = vpack.c.bf16 %v2953_v44, %v2953_v44 }
 0x1e2   :  { %3726 = vmatmul.mubr.bf16.vlgmr.msra.gmra.mrb[32].mxu0 %v2954_v45 }
 0x2b5   :  { %v3060_v47 = vpop.f32.mrb[32].mxu0 }
 0x2b6   :  { %v3061_v48 = vadd.f32 %v3339_v46, %v3060_v47  ;;  %v3727_v49 = vpop.f32.mrb[33].mxu0 }
 0x2b7   :  { %v3063_v50 = vpop.f32.mrb[34].mxu0 }
 0x2b8   :  { %v3728_v51 = vpop.f32.mrb[35].mxu0  ;;  %3067 = vst.msk [vmem:[#allocation2] sm:$0x3] %vm3066_vm1, %v3061_v48 }
 0x2b9   :  { %4012 = shalt.err (!%p4009_p4)
}
 0x2ba   :  { %s4013_s4 = scalar_lea.hbm %s4932_s5, 32 }
 0x2bb   :  { %p4014_p5 = scmp.ne.s32.totalorder %s4932_s5, %s4013_s4  ;;  %p4017_p6 = scmp.lt.u32.totalorder %s4013_s4, %s4932_s5 }
 0x2bd   :  { %p4019_p7 = pnand %p4017_p6, %p4014_p5 }
 0x2bf   :  { %4022 = shalt.err (!%p4019_p7)
}
 0x2c0   :  { %3077 = dma.vmem_to_hbm [thread:$0]  %s3075_s27, 32, %s4932_s5, [#allocation3]  }
 0x2c1   :  { %4023 = dma.done.wait [#allocation3], 32  }
 0x2c2   :  { %4024 = vsyncadd [#allocation3], 4294967264 }
 0x2c3   :  { %3081 = vsyncpa [#allocation3], 1 }

</bundles_post_ra>
